<compile_context>
chip_gen: v6e
topology: v6e:2x2x1
jax: 0.10.0
libtpu: 0.0.40
codegen_flags: <defaults>
</compile_context>

<pallas_src>
import jax
import jax.numpy as jnp
from jax.experimental import pallas as pl
from jax.experimental.pallas import tpu as pltpu

EPS = 1e-5
OUT_PAD = 128                 # lane-dense padding for the final (robot_dim-wide) layer
VEC_PAD = 512                 # lane padding of the packed per-feature-vector operand
VMEM_LIMIT_BYTES = 32 * 1024 * 1024   # actual resident footprint is a few MB


def _bn_relu_train_f32(h, gamma, beta):
    """Training-mode BatchNorm1d folded to scale/shift, then ReLU (all f32).

    One-pass biased variance E[h^2]-E[h]^2 (clamped at 0); fine at the 2e-2
    tolerance used here.
    """
    mu = jnp.mean(h, axis=0, keepdims=True)
    ms = jnp.mean(h * h, axis=0, keepdims=True)
    var = jnp.maximum(ms - mu * mu, 0.0)
    scale = gamma * jax.lax.rsqrt(var + EPS)        # (1, F)
    shift = beta - mu * scale                       # (1, F)
    return jnp.maximum(h * scale + shift, 0.0)


def igl_large_kernel(x_ref, w1_ref, w2_ref, w3_ref, w4_ref, w5_ref, vec_ref, o_ref):
    f32 = jnp.float32
    bf16 = jnp.bfloat16

    # Packed per-feature vectors, statically sliced (lane-aligned, zero-cost views).
    b1  = vec_ref[0:1, :]               # (1, 512)
    g2  = vec_ref[1:2, :]               # (1, 512)
    be2 = vec_ref[2:3, :]               # (1, 512)
    g3  = vec_ref[3:4, :256]            # (1, 256)
    be3 = vec_ref[4:5, :256]            # (1, 256)
    g4  = vec_ref[5:6, :256]            # (1, 256)
    be4 = vec_ref[6:7, :256]            # (1, 256)
    b5  = vec_ref[7:8, :OUT_PAD]        # (1, OUT_PAD)

    # Linear(all_dim, 512) + bias + ReLU          (bf16 operands, f32 accumulate)
    h = jnp.dot(x_ref[...], w1_ref[...], preferred_element_type=f32)
    h = jnp.maximum(h + b1, 0.0)

    # Linear(512, 512) [bias cancelled by training-mode BN] + BN(512) + ReLU
    h = jnp.dot(h.astype(bf16), w2_ref[...], preferred_element_type=f32)
    h = _bn_relu_train_f32(h, g2, be2)

    # Linear(512, 256) [bias cancelled] + BN(256) + ReLU
    h = jnp.dot(h.astype(bf16), w3_ref[...], preferred_element_type=f32)
    h = _bn_relu_train_f32(h, g3, be3)

    # Linear(256, 256) [bias cancelled] + BN(256) + ReLU
    h = jnp.dot(h.astype(bf16), w4_ref[...], preferred_element_type=f32)
    h = _bn_relu_train_f32(h, g4, be4)

    # Linear(256, robot_dim) -- lane-padded to OUT_PAD columns, bf16 writeback.
    out = jnp.dot(h.astype(bf16), w5_ref[...], preferred_element_type=f32) + b5
    o_ref[...] = out.astype(o_ref.dtype)


def init_params(key, all_dim, robot_dim):
    """PyTorch-like uniform fan-in init.

    Returns:
      kernel_params: (w1, w2, w3, w4, w5_padded) bf16 weights + one packed (8,512)
                     f32 vector operand (b1, BN gammas/betas, padded b5).
      ref_params:    full PyTorch-faithful parameter set (with b2/b3/b4 and the
                     unpadded final layer) for the pure-JAX reference.
    """
    dims = [(all_dim, 512), (512, 512), (512, 256), (256, 256), (256, robot_dim)]
    ws, bs = [], []
    for fin, fout in dims:
        key, kw, kb = jax.random.split(key, 3)
        bound = float(fin) ** -0.5
        w = jax.random.uniform(kw, (fin, fout), jnp.float32, -bound, bound)
        b = jax.random.uniform(kb, (1, fout), jnp.float32, -bound, bound)
        ws.append(w.astype(jnp.bfloat16))      # weights stored / DMA'd as bf16
        bs.append(b)                           # biases stay f32
    gammas = [jnp.ones((1, d), jnp.float32) for d in (512, 256, 256)]
    betas = [jnp.zeros((1, d), jnp.float32) for d in (512, 256, 256)]

    # Lane-pad the final layer so the last matmul + output stores are lane-dense.
    w5p = jnp.zeros((dims[-1][0], OUT_PAD), jnp.bfloat16).at[:, :robot_dim].set(ws[4])
    b5p = jnp.zeros((1, OUT_PAD), jnp.float32).at[:, :robot_dim].set(bs[4])

    def pad_row(v):
        return jnp.zeros((1, VEC_PAD), jnp.float32).at[:, : v.shape[1]].set(v)

    # One packed (8, 512) f32 operand: b1, g2, be2, g3, be3, g4, be4, b5p.
    vecs = jnp.concatenate(
        [pad_row(bs[0]),
         pad_row(gammas[0]), pad_row(betas[0]),
         pad_row(gammas[1]), pad_row(betas[1]),
         pad_row(gammas[2]), pad_row(betas[2]),
         pad_row(b5p)],
        axis=0,
    )

    kernel_params = (ws[0], ws[1], ws[2], ws[3], w5p, vecs)
    ref_params = (
        ws[0], bs[0],
        ws[1], bs[1], gammas[0], betas[0],
        ws[2], bs[2], gammas[1], betas[1],
        ws[3], bs[3], gammas[2], betas[2],
        ws[4], bs[4],
    )
    return kernel_params, ref_params


def igl_large_forward(x_bf16, kernel_params, robot_dim, mb):
    """Runs the fused forward over N = num_minibatches * mb rows.

    Each grid step processes one `mb`-row minibatch (its own BN statistics);
    weights stay VMEM-resident across all grid steps (constant index_maps).
    """
    N, all_dim = x_bf16.shape
    assert N % mb == 0, "total rows must be a multiple of the minibatch size"
    num_mb = N // mb
    w1, w2, w3, w4, w5p, vecs = kernel_params

    const2 = lambda i: (0, 0)   # weight/param blocks: same block every step -> resident

    padded = pl.pallas_call(
        igl_large_kernel,
        out_shape=jax.ShapeDtypeStruct((N, OUT_PAD), jnp.bfloat16),
        grid=(num_mb,),
        in_specs=[
            pl.BlockSpec((mb, all_dim), lambda i: (i, 0)),   # x: per-minibatch block
            pl.BlockSpec(w1.shape, const2),
            pl.BlockSpec(w2.shape, const2),
            pl.BlockSpec(w3.shape, const2),
            pl.BlockSpec(w4.shape, const2),
            pl.BlockSpec(w5p.shape, const2),
            pl.BlockSpec(vecs.shape, const2),
        ],
        out_specs=pl.BlockSpec((mb, OUT_PAD), lambda i: (i, 0)),
        compiler_params=pltpu.CompilerParams(
            dimension_semantics=("parallel",),               # megacore on v7x
            vmem_limit_bytes=VMEM_LIMIT_BYTES,
        ),
    )(x_bf16, w1, w2, w3, w4, w5p, vecs)

    return padded[:, :robot_dim].astype(jnp.float32)


def igl_large_reference(x_bf16, ref_params, mb):
    """PyTorch-faithful forward (b2/b3/b4 included, two-pass BN variance), with BN
    statistics computed per `mb`-row minibatch, matching the kernel's grid."""
    (w1, b1,
     w2, b2, g2, be2,
     w3, b3, g3, be3,
     w4, b4, g4, be4,
     w5, b5) = ref_params

    def mm(a, w):
        return jnp.dot(a.astype(jnp.bfloat16), w, preferred_element_type=jnp.float32)

    def bn(h, g, be):
        mu = jnp.mean(h, axis=0, keepdims=True)
        var = jnp.mean((h - mu) * (h - mu), axis=0, keepdims=True)
        return (h - mu) * jax.lax.rsqrt(var + EPS) * g + be

    def one_minibatch(xb):
        h = jnp.maximum(mm(xb, w1) + b1, 0.0)
        h = jnp.maximum(bn(mm(h, w2) + b2, g2, be2), 0.0)
        h = jnp.maximum(bn(mm(h, w3) + b3, g3, be3), 0.0)
        h = jnp.maximum(bn(mm(h, w4) + b4, g4, be4), 0.0)
        return mm(h, w5) + b5

    N = x_bf16.shape[0]
    xs = x_bf16.reshape(N // mb, mb, -1)
    return jax.vmap(one_minibatch)(xs).reshape(N, -1)


if __name__ == "__main__":
    # MB=256 fills the 256-wide MXU on v6e/v7x; 2 minibatches exercise the grid and
    # weight residency.  all_dim/robot_dim kept small, consistent with the module.
    MB, NUM_MB = 256, 2
    all_dim, robot_dim = 32, 8

    key = jax.random.PRNGKey(0)
    key, kx = jax.random.split(key)
    x = jax.random.normal(kx, (NUM_MB * MB, all_dim), jnp.float32)
    x_bf16 = x.astype(jnp.bfloat16)   # cast once in the wrapper: halves x DMA

    kernel_params, ref_params = init_params(key, all_dim, robot_dim)

    out = igl_large_forward(x_bf16, kernel_params, robot_dim, MB)
    out = jax.block_until_ready(out)

    ref = igl_large_reference(x_bf16, ref_params, MB)
    assert out.shape == (NUM_MB * MB, robot_dim)
    # Tolerance covers: BN-cancelled biases kept in the reference, one-pass vs
    # two-pass variance, bf16 activation re-rounding, and bf16 output writeback.
    max_err = float(jnp.max(jnp.abs(out - ref)))
    assert jnp.allclose(out, ref, atol=2e-2, rtol=2e-2), f"max abs err {max_err}"

    print("KERNEL_OK")
</pallas_src>

<mosaic_0001>
module attributes {stable_mosaic.version = 11 : i64} {
  func.func @igl_large_kernel(%arg0: i32, %arg1: memref<256x32xbf16, #tpu.memory_space<vmem>>, %arg2: memref<32x512xbf16, #tpu.memory_space<vmem>>, %arg3: memref<512x512xbf16, #tpu.memory_space<vmem>>, %arg4: memref<512x256xbf16, #tpu.memory_space<vmem>>, %arg5: memref<256x256xbf16, #tpu.memory_space<vmem>>, %arg6: memref<256x128xbf16, #tpu.memory_space<vmem>>, %arg7: memref<8x512xf32, #tpu.memory_space<vmem>>, %arg8: memref<256x128xbf16, #tpu.memory_space<vmem>>) attributes {dimension_semantics = [#tpu.dimension_semantics<parallel>], iteration_bounds = array<i64: 2>, scalar_prefetch = 0 : i64, scratch_operands = 0 : i64, tpu.core_type = #tpu.core_type<tc>, window_params = [{transform_indices = @transform_0, window_bounds = array<i64: 256, 32>}, {pipeline_mode = #tpu.pipeline_mode<synchronous>, transform_indices = @transform_1, window_bounds = array<i64: 32, 512>}, {pipeline_mode = #tpu.pipeline_mode<synchronous>, transform_indices = @transform_2, window_bounds = array<i64: 512, 512>}, {pipeline_mode = #tpu.pipeline_mode<synchronous>, transform_indices = @transform_3, window_bounds = array<i64: 512, 256>}, {pipeline_mode = #tpu.pipeline_mode<synchronous>, transform_indices = @transform_4, window_bounds = array<i64: 256, 256>}, {pipeline_mode = #tpu.pipeline_mode<synchronous>, transform_indices = @transform_5, window_bounds = array<i64: 256, 128>}, {pipeline_mode = #tpu.pipeline_mode<synchronous>, transform_indices = @transform_6, window_bounds = array<i64: 8, 512>}, {transform_indices = @transform_7, window_bounds = array<i64: 256, 128>}]} {
    %c0 = arith.constant 0 : index
    %c0_0 = arith.constant 0 : index
    %0 = vector.load %arg7[%c0, %c0_0] : memref<8x512xf32, #tpu.memory_space<vmem>>, vector<1x512xf32>
    %c1 = arith.constant 1 : index
    %c0_1 = arith.constant 0 : index
    %1 = vector.load %arg7[%c1, %c0_1] : memref<8x512xf32, #tpu.memory_space<vmem>>, vector<1x512xf32>
    %c2 = arith.constant 2 : index
    %c0_2 = arith.constant 0 : index
    %2 = vector.load %arg7[%c2, %c0_2] : memref<8x512xf32, #tpu.memory_space<vmem>>, vector<1x512xf32>
    %c3 = arith.constant 3 : index
    %c0_3 = arith.constant 0 : index
    %3 = vector.load %arg7[%c3, %c0_3] : memref<8x512xf32, #tpu.memory_space<vmem>>, vector<1x256xf32>
    %c4 = arith.constant 4 : index
    %c0_4 = arith.constant 0 : index
    %4 = vector.load %arg7[%c4, %c0_4] : memref<8x512xf32, #tpu.memory_space<vmem>>, vector<1x256xf32>
    %c5 = arith.constant 5 : index
    %c0_5 = arith.constant 0 : index
    %5 = vector.load %arg7[%c5, %c0_5] : memref<8x512xf32, #tpu.memory_space<vmem>>, vector<1x256xf32>
    %c6 = arith.constant 6 : index
    %c0_6 = arith.constant 0 : index
    %6 = vector.load %arg7[%c6, %c0_6] : memref<8x512xf32, #tpu.memory_space<vmem>>, vector<1x256xf32>
    %c7 = arith.constant 7 : index
    %c0_7 = arith.constant 0 : index
    %7 = vector.load %arg7[%c7, %c0_7] : memref<8x512xf32, #tpu.memory_space<vmem>>, vector<1x128xf32>
    %c0_8 = arith.constant 0 : index
    %c0_9 = arith.constant 0 : index
    %8 = vector.load %arg1[%c0_8, %c0_9] : memref<256x32xbf16, #tpu.memory_space<vmem>>, vector<256x32xbf16>
    %c0_10 = arith.constant 0 : index
    %c0_11 = arith.constant 0 : index
    %9 = vector.load %arg2[%c0_10, %c0_11] : memref<32x512xbf16, #tpu.memory_space<vmem>>, vector<32x512xbf16>
    %cst = arith.constant dense<0.000000e+00> : vector<256x512xf32>
    %10 = tpu.matmul %8, %9, %cst {dimension_numbers = #tpu.dot_dimension_numbers<[1], [0], [0], [1], [0, 0, 1, 1], [], []>} : vector<256x32xbf16>, vector<32x512xbf16>, vector<256x512xf32> -> vector<256x512xf32>
    %11 = vector.broadcast %0 : vector<1x512xf32> to vector<256x512xf32>
    %12 = arith.addf %10, %11 : vector<256x512xf32>
    %cst_12 = arith.constant 0.000000e+00 : f32
    %13 = vector.broadcast %cst_12 : f32 to vector<256x512xf32>
    %14 = arith.maximumf %12, %13 : vector<256x512xf32>
    %15 = arith.truncf %14 : vector<256x512xf32> to vector<256x512xbf16>
    %c0_13 = arith.constant 0 : index
    %c0_14 = arith.constant 0 : index
    %16 = vector.load %arg3[%c0_13, %c0_14] : memref<512x512xbf16, #tpu.memory_space<vmem>>, vector<512x512xbf16>
    %cst_15 = arith.constant dense<0.000000e+00> : vector<256x512xf32>
    %17 = tpu.matmul %15, %16, %cst_15 {dimension_numbers = #tpu.dot_dimension_numbers<[1], [0], [0], [1], [0, 0, 1, 1], [], []>} : vector<256x512xbf16>, vector<512x512xbf16>, vector<256x512xf32> -> vector<256x512xf32>
    %cst_16 = arith.constant dense<0.000000e+00> : vector<512xf32>
    %18 = vector.multi_reduction <add>, %17, %cst_16 [0] : vector<256x512xf32> to vector<512xf32>
    %19 = vector.shape_cast %18 : vector<512xf32> to vector<1x512xf32>
    %cst_17 = arith.constant 2.560000e+02 : f32
    %20 = vector.broadcast %cst_17 : f32 to vector<1x512xf32>
    %21 = arith.divf %19, %20 : vector<1x512xf32>
    %22 = arith.mulf %17, %17 : vector<256x512xf32>
    %cst_18 = arith.constant dense<0.000000e+00> : vector<512xf32>
    %23 = vector.multi_reduction <add>, %22, %cst_18 [0] : vector<256x512xf32> to vector<512xf32>
    %24 = vector.shape_cast %23 : vector<512xf32> to vector<1x512xf32>
    %cst_19 = arith.constant 2.560000e+02 : f32
    %25 = vector.broadcast %cst_19 : f32 to vector<1x512xf32>
    %26 = arith.divf %24, %25 : vector<1x512xf32>
    %27 = arith.mulf %21, %21 : vector<1x512xf32>
    %28 = arith.subf %26, %27 : vector<1x512xf32>
    %cst_20 = arith.constant 0.000000e+00 : f32
    %29 = vector.broadcast %cst_20 : f32 to vector<1x512xf32>
    %30 = arith.maximumf %28, %29 : vector<1x512xf32>
    %cst_21 = arith.constant 9.99999974E-6 : f32
    %31 = vector.broadcast %cst_21 : f32 to vector<1x512xf32>
    %32 = arith.addf %30, %31 : vector<1x512xf32>
    %33 = math.rsqrt %32 : vector<1x512xf32>
    %34 = arith.mulf %1, %33 : vector<1x512xf32>
    %35 = arith.mulf %21, %34 : vector<1x512xf32>
    %36 = arith.subf %2, %35 : vector<1x512xf32>
    %37 = vector.broadcast %34 : vector<1x512xf32> to vector<256x512xf32>
    %38 = arith.mulf %17, %37 : vector<256x512xf32>
    %39 = vector.broadcast %36 : vector<1x512xf32> to vector<256x512xf32>
    %40 = arith.addf %38, %39 : vector<256x512xf32>
    %cst_22 = arith.constant 0.000000e+00 : f32
    %41 = vector.broadcast %cst_22 : f32 to vector<256x512xf32>
    %42 = arith.maximumf %40, %41 : vector<256x512xf32>
    %43 = arith.truncf %42 : vector<256x512xf32> to vector<256x512xbf16>
    %c0_23 = arith.constant 0 : index
    %c0_24 = arith.constant 0 : index
    %44 = vector.load %arg4[%c0_23, %c0_24] : memref<512x256xbf16, #tpu.memory_space<vmem>>, vector<512x256xbf16>
    %cst_25 = arith.constant dense<0.000000e+00> : vector<256x256xf32>
    %45 = tpu.matmul %43, %44, %cst_25 {dimension_numbers = #tpu.dot_dimension_numbers<[1], [0], [0], [1], [0, 0, 1, 1], [], []>} : vector<256x512xbf16>, vector<512x256xbf16>, vector<256x256xf32> -> vector<256x256xf32>
    %cst_26 = arith.constant dense<0.000000e+00> : vector<256xf32>
    %46 = vector.multi_reduction <add>, %45, %cst_26 [0] : vector<256x256xf32> to vector<256xf32>
    %47 = vector.shape_cast %46 : vector<256xf32> to vector<1x256xf32>
    %cst_27 = arith.constant 2.560000e+02 : f32
    %48 = vector.broadcast %cst_27 : f32 to vector<1x256xf32>
    %49 = arith.divf %47, %48 : vector<1x256xf32>
    %50 = arith.mulf %45, %45 : vector<256x256xf32>
    %cst_28 = arith.constant dense<0.000000e+00> : vector<256xf32>
    %51 = vector.multi_reduction <add>, %50, %cst_28 [0] : vector<256x256xf32> to vector<256xf32>
    %52 = vector.shape_cast %51 : vector<256xf32> to vector<1x256xf32>
    %cst_29 = arith.constant 2.560000e+02 : f32
    %53 = vector.broadcast %cst_29 : f32 to vector<1x256xf32>
    %54 = arith.divf %52, %53 : vector<1x256xf32>
    %55 = arith.mulf %49, %49 : vector<1x256xf32>
    %56 = arith.subf %54, %55 : vector<1x256xf32>
    %cst_30 = arith.constant 0.000000e+00 : f32
    %57 = vector.broadcast %cst_30 : f32 to vector<1x256xf32>
    %58 = arith.maximumf %56, %57 : vector<1x256xf32>
    %cst_31 = arith.constant 9.99999974E-6 : f32
    %59 = vector.broadcast %cst_31 : f32 to vector<1x256xf32>
    %60 = arith.addf %58, %59 : vector<1x256xf32>
    %61 = math.rsqrt %60 : vector<1x256xf32>
    %62 = arith.mulf %3, %61 : vector<1x256xf32>
    %63 = arith.mulf %49, %62 : vector<1x256xf32>
    %64 = arith.subf %4, %63 : vector<1x256xf32>
    %65 = vector.broadcast %62 : vector<1x256xf32> to vector<256x256xf32>
    %66 = arith.mulf %45, %65 : vector<256x256xf32>
    %67 = vector.broadcast %64 : vector<1x256xf32> to vector<256x256xf32>
    %68 = arith.addf %66, %67 : vector<256x256xf32>
    %cst_32 = arith.constant 0.000000e+00 : f32
    %69 = vector.broadcast %cst_32 : f32 to vector<256x256xf32>
    %70 = arith.maximumf %68, %69 : vector<256x256xf32>
    %71 = arith.truncf %70 : vector<256x256xf32> to vector<256x256xbf16>
    %c0_33 = arith.constant 0 : index
    %c0_34 = arith.constant 0 : index
    %72 = vector.load %arg5[%c0_33, %c0_34] : memref<256x256xbf16, #tpu.memory_space<vmem>>, vector<256x256xbf16>
    %cst_35 = arith.constant dense<0.000000e+00> : vector<256x256xf32>
    %73 = tpu.matmul %71, %72, %cst_35 {dimension_numbers = #tpu.dot_dimension_numbers<[1], [0], [0], [1], [0, 0, 1, 1], [], []>} : vector<256x256xbf16>, vector<256x256xbf16>, vector<256x256xf32> -> vector<256x256xf32>
    %cst_36 = arith.constant dense<0.000000e+00> : vector<256xf32>
    %74 = vector.multi_reduction <add>, %73, %cst_36 [0] : vector<256x256xf32> to vector<256xf32>
    %75 = vector.shape_cast %74 : vector<256xf32> to vector<1x256xf32>
    %cst_37 = arith.constant 2.560000e+02 : f32
    %76 = vector.broadcast %cst_37 : f32 to vector<1x256xf32>
    %77 = arith.divf %75, %76 : vector<1x256xf32>
    %78 = arith.mulf %73, %73 : vector<256x256xf32>
    %cst_38 = arith.constant dense<0.000000e+00> : vector<256xf32>
    %79 = vector.multi_reduction <add>, %78, %cst_38 [0] : vector<256x256xf32> to vector<256xf32>
    %80 = vector.shape_cast %79 : vector<256xf32> to vector<1x256xf32>
    %cst_39 = arith.constant 2.560000e+02 : f32
    %81 = vector.broadcast %cst_39 : f32 to vector<1x256xf32>
    %82 = arith.divf %80, %81 : vector<1x256xf32>
    %83 = arith.mulf %77, %77 : vector<1x256xf32>
    %84 = arith.subf %82, %83 : vector<1x256xf32>
    %cst_40 = arith.constant 0.000000e+00 : f32
    %85 = vector.broadcast %cst_40 : f32 to vector<1x256xf32>
    %86 = arith.maximumf %84, %85 : vector<1x256xf32>
    %cst_41 = arith.constant 9.99999974E-6 : f32
    %87 = vector.broadcast %cst_41 : f32 to vector<1x256xf32>
    %88 = arith.addf %86, %87 : vector<1x256xf32>
    %89 = math.rsqrt %88 : vector<1x256xf32>
    %90 = arith.mulf %5, %89 : vector<1x256xf32>
    %91 = arith.mulf %77, %90 : vector<1x256xf32>
    %92 = arith.subf %6, %91 : vector<1x256xf32>
    %93 = vector.broadcast %90 : vector<1x256xf32> to vector<256x256xf32>
    %94 = arith.mulf %73, %93 : vector<256x256xf32>
    %95 = vector.broadcast %92 : vector<1x256xf32> to vector<256x256xf32>
    %96 = arith.addf %94, %95 : vector<256x256xf32>
    %cst_42 = arith.constant 0.000000e+00 : f32
    %97 = vector.broadcast %cst_42 : f32 to vector<256x256xf32>
    %98 = arith.maximumf %96, %97 : vector<256x256xf32>
    %99 = arith.truncf %98 : vector<256x256xf32> to vector<256x256xbf16>
    %c0_43 = arith.constant 0 : index
    %c0_44 = arith.constant 0 : index
    %100 = vector.load %arg6[%c0_43, %c0_44] : memref<256x128xbf16, #tpu.memory_space<vmem>>, vector<256x128xbf16>
    %cst_45 = arith.constant dense<0.000000e+00> : vector<256x128xf32>
    %101 = tpu.matmul %99, %100, %cst_45 {dimension_numbers = #tpu.dot_dimension_numbers<[1], [0], [0], [1], [0, 0, 1, 1], [], []>} : vector<256x256xbf16>, vector<256x128xbf16>, vector<256x128xf32> -> vector<256x128xf32>
    %102 = vector.broadcast %7 : vector<1x128xf32> to vector<256x128xf32>
    %103 = arith.addf %101, %102 : vector<256x128xf32>
    %104 = arith.truncf %103 : vector<256x128xf32> to vector<256x128xbf16>
    %c0_46 = arith.constant 0 : index
    %c0_47 = arith.constant 0 : index
    %105 = vector.load %arg8[%c0_46, %c0_47] : memref<256x128xbf16, #tpu.memory_space<vmem>>, vector<256x128xbf16>
    tpu.vector_store %arg8[%c0_46, %c0_47], %104 {strides = array<i32>} : memref<256x128xbf16, #tpu.memory_space<vmem>>, vector<256x128xbf16>,
    return
  }
  func.func @transform_0(%arg0: i32) -> (i32, i32) {
    %c0_i32 = arith.constant 0 : i32
    %c0_i32_0 = arith.constant 0 : i32
    return %arg0, %c0_i32 : i32, i32
  }
  func.func @transform_1(%arg0: i32) -> (i32, i32) {
    %c0_i32 = arith.constant 0 : i32
    %c0_i32_0 = arith.constant 0 : i32
    %c0_i32_1 = arith.constant 0 : i32
    return %c0_i32, %c0_i32_0 : i32, i32
  }
  func.func @transform_2(%arg0: i32) -> (i32, i32) {
    %c0_i32 = arith.constant 0 : i32
    %c0_i32_0 = arith.constant 0 : i32
    %c0_i32_1 = arith.constant 0 : i32
    return %c0_i32, %c0_i32_0 : i32, i32
  }
  func.func @transform_3(%arg0: i32) -> (i32, i32) {
    %c0_i32 = arith.constant 0 : i32
    %c0_i32_0 = arith.constant 0 : i32
    %c0_i32_1 = arith.constant 0 : i32
    return %c0_i32, %c0_i32_0 : i32, i32
  }
  func.func @transform_4(%arg0: i32) -> (i32, i32) {
    %c0_i32 = arith.constant 0 : i32
    %c0_i32_0 = arith.constant 0 : i32
    %c0_i32_1 = arith.constant 0 : i32
    return %c0_i32, %c0_i32_0 : i32, i32
  }
  func.func @transform_5(%arg0: i32) -> (i32, i32) {
    %c0_i32 = arith.constant 0 : i32
    %c0_i32_0 = arith.constant 0 : i32
    %c0_i32_1 = arith.constant 0 : i32
    return %c0_i32, %c0_i32_0 : i32, i32
  }
  func.func @transform_6(%arg0: i32) -> (i32, i32) {
    %c0_i32 = arith.constant 0 : i32
    %c0_i32_0 = arith.constant 0 : i32
    %c0_i32_1 = arith.constant 0 : i32
    return %c0_i32, %c0_i32_0 : i32, i32
  }
  func.func @transform_7(%arg0: i32) -> (i32, i32) {
    %c0_i32 = arith.constant 0 : i32
    %c0_i32_0 = arith.constant 0 : i32
    return %arg0, %c0_i32 : i32, i32
  }
}

</mosaic_0001>

<bundles_post_ra>
// kernel: tpu_custom_call.1
= control target key start
LH: loop header
LB: loop body
LE: loop exit
PB: predicated region body
PF: predicated region fallthrough
CT: control target
= control target key end

     0   :  { %12 = vsyncpa [#allocation3], 0  ;;  %s12290_s0 = inlined_call_operand.vmem [shape: bf16[512,32], index: 0, kind: input, shape index: {}]   ;;  %s12291_s1 = inlined_call_operand.vmem [shape: bf16[32,512], index: 1, kind: input, shape index: {}]   ;;  %s12292_s2 = inlined_call_operand.hbm [shape: bf16[512,512], index: 2, kind: input, shape index: {}]   ;;  %s12293_s3 = inlined_call_operand.hbm [shape: bf16[512,256], index: 3, kind: input, shape index: {}]   ;;  %s12294_s4 = inlined_call_operand.vmem [shape: bf16[256,256], index: 4, kind: input, shape index: {}]   ;;  %s12295_s5 = inlined_call_operand.hbm [shape: bf16[256,128], index: 5, kind: input, shape index: {}]   ;;  %s12296_s6 = inlined_call_operand.hbm [shape: f32[8,512], index: 6, kind: input, shape index: {}]   ;;  %s12297_s7 = inlined_call_operand.hbm [shape: bf16[512,128], index: 7, kind: output, shape index: {}]  }
   0x1   :  { %13 = vsyncpa [#allocation6], 0 }
   0x2   :  { %14 = vsyncpa [#allocation9], 0 }
   0x3   :  { %15 = vsyncpa [#allocation4], 0 }
   0x4   :  { %17 = vsyncpa [#allocation4 + $0x1], 0  ;;  %s7759_s24 = smov 0   ;;  %s7761_s25 = smov 0  }
   0x5   :  { %s7763_s26 = smov 0   ;;  %s7765_s27 = smov 0  }
   0x6 LB: > { %s7780_s28 = sadd.s32 4294967295, %s7702_s27   ;;  %s6452_s29 = sadd.s32 4294967294, %s7702_s27   ;;  %s7702_s27 = sphi %s7765_s27, %s13231_s27   ;;  %s7698_s26 = sphi %s7763_s26, %s13230_s26   ;;  %s7694_s25 = sphi %s7761_s25, %s13229_s25   ;;  %s7690_s24 = sphi %s7759_s24, %s13228_s24  }
   0x7   : > { %s7784_s30 = sadd.s32 1, %s7702_s27   ;;  %s182_s8 = sadd.s32 1, %s7698_s26 }
   0x8   : > { %s179_s9 = ssub.s32 %s7702_s27, %s7784_s30  ;;  %p192_p0 = scmp.ne.s32.totalorder %s7698_s26, %s7694_s25 }
   0x9   : > { %p180_p1 = scmp.eq.s32.totalorder %s179_s9, 0  ;;  %p193_p2 = scmp.eq.s32.totalorder %s7780_s28, 1 }
   0xa   : > { %p198_p3 = scmp.ne.s32.totalorder %s7694_s25, %s7690_s24  ;;  %p199_p4 = scmp.eq.s32.totalorder %s6452_s29, 1 }
   0xb   : > { %s7795_s10 = scalar_select %p180_p1, %s7698_s26, %s182_s8  }
   0xc   : > { %p7797_p5 = por %p193_p2, %p192_p0  ;;  %p7801_p6 = por %p199_p4, %p198_p3 }
   0xd   : > { %p6453_p7 = scmp.ge.s32.totalorder %s7702_s27, 1  ;;  %p206_p8 = scmp.lt.s32.totalorder %s7702_s27, 3 }
   0xe   : > { %s12533_s12 = scalar_select %p7801_p6, 1, 0 }
   0xf   : > { %p12298_p9 = scmp.eq.s32.totalorder %s7780_s28, 0  ;;  %p7808_p10 = pnand %p6453_p7, %p206_p8 }
  0x10   : > { %s7704_s14 = smov [#allocation5]   ;;  %s7705_s17 = smov [#allocation2]  }
  0x11   : > { %s234_s15 = sshll.u32 %s7704_s14, 4  ;;  %p7058_p11 = pneg %p7808_p10  ;;  %s235_s15 = int_to_ptr.vmem [resolvable:$true] %s234_s15 }
  0x12   : > { %s221_s18 = sshll.u32 %s7705_s17, 4  ;;  %s7537_s19 = scalar_lea.vmem %s235_s15, 8192  ;;  %s222_s18 = int_to_ptr.vmem [resolvable:$true] %s221_s18 }
  0x13   : > { %p7816_p12 = pnand %p12298_p9, %p7058_p11  ;;  %p7538_p0 = scmp.ne.s32.totalorder %s235_s15, %s7537_s19 }
  0x14   : > { %p7545_p3 = scmp.lt.s32.totalorder %s235_s15, %s235_s15  ;;  %p7546_p4 = scmp.lt.s32.totalorder %s7537_s19, %s7537_s19 }
  0x15   : > { %p7528_p13 = pneg %p7816_p12 }
  0x16   : > { %p7547_p7 = por %p7546_p4, %p7545_p3 }
  0x17   : > { %p7540_p1 = pnand %p7538_p0, %p7528_p13 }
  0x19   : > { %p7541_p2 = pneg %p7540_p1 }
  0x1b   : > { %p7548_p8 = pnand %p7547_p7, %p7541_p2 }
  0x1d   : > { %7551 = shalt.err (!%p7548_p8)
}
  0x1e   : > { %s7706_s20 = smov 128   ;;  %s7707_s21 = smov 8  }
  0x1f   : > { %7064 = dma.hbm_to_vmem [thread:$0]  (!%p7816_p12), %s12293_s3, 8192, %s235_s15, [#allocation6], %s7706_s20, %s7706_s20, %s7707_s21  }
  0x20   : > { %s7563_s29 = scalar_lea.vmem %s222_s18, 16384  ;;  %p7571_p9 = scmp.lt.s32.totalorder %s222_s18, %s222_s18 }
  0x21   : > { %p7564_p11 = scmp.ne.s32.totalorder %s222_s18, %s7563_s29  ;;  %p7572_p6 = scmp.lt.s32.totalorder %s7563_s29, %s7563_s29 }
  0x23   : > { %p7566_p0 = pnand %p7564_p11, %p7528_p13  ;;  %p7573_p3 = por %p7572_p6, %p7571_p9 }
  0x25   : > { %p7567_p1 = pneg %p7566_p0 }
  0x27   : > { %p7574_p2 = pnand %p7573_p3, %p7567_p1 }
  0x29   : > { %7577 = shalt.err (!%p7574_p2)
}
  0x2a   : > { %s7708_s8 = smov 256   ;;  %s7709_s9 = smov 16  }
  0x2b   : > { %7061 = dma.hbm_to_vmem [thread:$0]  (!%p7816_p12), %s12292_s2, 16384, %s222_s18, [#allocation3], %s7708_s8, %s7708_s8, %s7709_s9  }
  0x2c   : > { %s7710_s15 = smov [#allocation7]  }
  0x2d   : > { %s250_s19 = sshll.u32 %s7710_s15, 4  ;;  %s251_s19 = int_to_ptr.vmem [resolvable:$true] %s250_s19 }
  0x2e   : > { %s7589_s20 = scalar_lea.vmem %s251_s19, 2048  ;;  %p7597_p9 = scmp.lt.s32.totalorder %s251_s19, %s251_s19 }
  0x2f   : > { %p7590_p4 = scmp.ne.s32.totalorder %s251_s19, %s7589_s20  ;;  %p7598_p8 = scmp.lt.s32.totalorder %s7589_s20, %s7589_s20 }
  0x31   : > { %p7592_p7 = pnand %p7590_p4, %p7528_p13  ;;  %p7599_p11 = por %p7598_p8, %p7597_p9 }
  0x33   : > { %p7593_p6 = pneg %p7592_p7 }
  0x35   : > { %p7600_p0 = pnand %p7599_p11, %p7593_p6 }
  0x37   : > { %7603 = shalt.err (!%p7600_p0)
}
  0x38   : > { %s7711_s21 = smov 64   ;;  %s7712_s22 = smov 4  }
  0x39   : > { %7067 = dma.hbm_to_vmem [thread:$0]  (!%p7816_p12), %s12295_s5, 2048, %s251_s19, [#allocation6], %s7711_s21, %s7711_s21, %s7712_s22  }
  0x3a   : > { %s7713_s29 = smov [#allocation8]  }
  0x3b   : > { %s264_s8 = sshll.u32 %s7713_s29, 4  ;;  %s265_s8 = int_to_ptr.vmem [resolvable:$true] %s264_s8 }
  0x3c   : > { %s7615_s9 = scalar_lea.vmem %s265_s8, 512  ;;  %p7623_p4 = scmp.lt.s32.totalorder %s265_s8, %s265_s8 }
  0x3d   : > { %p7616_p1 = scmp.ne.s32.totalorder %s265_s8, %s7615_s9  ;;  %p7624_p7 = scmp.lt.s32.totalorder %s7615_s9, %s7615_s9 }
  0x3f   : > { %p7618_p3 = pnand %p7616_p1, %p7528_p13  ;;  %p7625_p6 = por %p7624_p7, %p7623_p4 }
  0x41   : > { %p7619_p2 = pneg %p7618_p3 }
  0x43   : > { %p7626_p9 = pnand %p7625_p6, %p7619_p2 }
  0x45   : > { %7629 = shalt.err (!%p7626_p9)
}
  0x46   : > { %7070 = dma.hbm_to_vmem [thread:$0]  (!%p7816_p12), %s12296_s6, 512, %s265_s8, [#allocation9]  }
  0x47   : > { %286 = sbr.rel (%p7808_p10) target bundleno = 2015 (0x7df), region = 48 }
  0x4c   : > { %p12536_p8 = scmp.eq.s32.totalorder %s7780_s28, 0 }
  0x4e   : > { %7673 = dma.done.wait (%p12536_p8), [#allocation3], 16384   ;;  %p12537_p13 = pmov %p12536_p8 }
  0x4f   : > { %p12538_p11 = pmov %p12536_p8 }
  0x50   : > { %7675 = vsyncadd (%p12537_p13), [#allocation3], 4294950912 }
  0x51   : > { %7677 = dma.done.wait (%p12538_p11), [#allocation6], 10240   ;;  %p12539_p0 = pmov %p12536_p8 }
  0x53   : > { %7679 = vsyncadd (%p12539_p0), [#allocation6], 4294957056  ;;  %p12540_p1 = pmov %p12539_p0 }
  0x54   : > { %p12541_p12 = pmov %p12539_p0 }
  0x55   : > { %7681 = dma.done.wait (%p12540_p1), [#allocation9], 512  }
  0x56   : > { %7683 = vsyncadd (%p12541_p12), [#allocation9], 4294966784  ;;  %s6465_s13 = sshll.u32 %s7780_s28, 5  ;;  %v7714_v0 = vmov 0   ;;  %v7130_v1 = vld [vmem:[%s12291_s1 + $0x24] ss:$16 sps:$4 sm:$0xff]  }
  0x57   : > { %614 = vmatprep.mubr.bf16.mxu0 %v7714_v0  ;;  %807 = vmatprep.mubr.bf16.mxu1 %v7714_v0  ;;  %p331_p10 = scmp.lt.s32.totalorder %s6465_s13, 63  ;;  %v7132_v2 = vld [vmem:[%s12291_s1 + $0x2c] ss:$16 sps:$4 sm:$0xff]   ;;  %v7134_v3 = vld [vmem:[%s12291_s1 + $0x20] ss:$16 sps:$4 sm:$0xff]   ;;  %vm533_vm0 = vcmask 261120  }
  0x58   : > { %594 = vmatprep.subr.bf16.mxu0 %v7130_v1  ;;  %v7135_v4 = vld [vmem:[%s12291_s1 + $0x28] ss:$16 sps:$4 sm:$0xff]   ;;  %787 = vmatprep.subr.bf16.mxu1 %v7132_v2  ;;  %v7136_v5 = vld [vmem:[%s12291_s1 + $0x4] ss:$16 sps:$4 sm:$0xff]   ;;  %v7138_v6 = vld [vmem:[%s12291_s1 + $0xc] ss:$16 sps:$4 sm:$0xff]  }
  0x59   : > { %s13233_s13 = smov (!%p331_p10, %s6465_s13), 63  ;;  %595 = vmatpush1.bf16.msra.mxu0 %v7134_v3  ;;  %788 = vmatpush1.bf16.msra.mxu1 %v7135_v4  ;;  %v7140_v7 = vld [vmem:[%s12291_s1] ss:$16 sps:$4 sm:$0xff]   ;;  %v7141_v8 = vld [vmem:[%s12291_s1 + $0x8] ss:$16 sps:$4 sm:$0xff]   ;;  %s327_s16 = sand.u32 1, %s7694_s25  }
  0x5a   : > { %s6466_s21 = sshll.u32 %s13233_s13, 2  ;;  %596 = vmatprep.subr.bf16.mxu0 %v7136_v5  ;;  %789 = vmatprep.subr.bf16.mxu1 %v7138_v6  ;;  %v7154_v11 = vld [vmem:[#allocation2 + $0xe4] ss:$16 sps:$4 sm:$0xff]   ;;  %v7152_v12 = vld [vmem:[#allocation2 + $0xe0] ss:$16 sps:$4 sm:$0xff]   ;;  %s6464_s15 = sshll.u32 %s327_s16, 7 }
  0x5b   : > { %s7895_s20 = scalar_lea.vmem %s12290_s0, %s6466_s21  ;;  %v7157_v13 = vld [vmem:[#allocation2 + $0x2e4] ss:$16 sps:$4 sm:$0xff]   ;;  %v7155_v14 = vld [vmem:[#allocation2 + $0x2e0] ss:$16 sps:$4 sm:$0xff]   ;;  %s12191_s19 = scalar_lea.vmem [#allocation10], %s6464_s15 }
  0x5c   : > { %v7142_v9 = vld [vmem:[%s7895_s20] sm:$0xff]   ;;  %v7143_v10 = vld [vmem:[%s7895_s20 + $0x8] sm:$0xff]   ;;  %v7144_v19 = vld [vmem:[%s7895_s20 + $0x10] sm:$0xff]   ;;  %s6349_s22 = sshll.u32 %s12191_s19, 4  ;;  %s12250_s29 = scalar_lea.sflag [#allocation4], %s327_s16  ;;  %s12245_s22 = int_to_ptr.vmem [resolvable:$true] %s6349_s22 }
  0x5d   : > { %597 = vmatpush1.bf16.msra.mxu0 %v7140_v7  ;;  %790 = vmatpush1.bf16.msra.mxu1 %v7141_v8  ;;  %v7161_v15 = vld [vmem:[#allocation2 + $0xc4] ss:$16 sps:$4 sm:$0xff]   ;;  %v7159_v16 = vld [vmem:[#allocation2 + $0xc0] ss:$16 sps:$4 sm:$0xff]   ;;  %v7145_v26 = vld [vmem:[%s7895_s20 + $0x18] sm:$0xff]   ;;  %s7716_s8 = smov [#allocation10]  }
  0x5e   : > { %1928 = vmatprep.subr.bf16.mxu0 %v7154_v11  ;;  %2121 = vmatprep.subr.bf16.mxu1 %v7157_v13  ;;  %v7164_v17 = vld [vmem:[#allocation2 + $0x2c4] ss:$16 sps:$4 sm:$0xff]   ;;  %v7162_v18 = vld [vmem:[#allocation2 + $0x2c0] ss:$16 sps:$4 sm:$0xff]   ;;  %v7147_v47 = vld [vmem:[%s7895_s20 + $0x28] sm:$0xff]   ;;  %s7634_s9 = sshll.u32 %s7716_s8, 4  ;;  %s7635_s9 = int_to_ptr.vmem [resolvable:$false] %s7634_s9 }
  0x5f   : > { %v7168_v20 = vld [vmem:[#allocation2 + $0xa4] ss:$16 sps:$4 sm:$0xff]   ;;  %v7166_v21 = vld [vmem:[#allocation2 + $0xa0] ss:$16 sps:$4 sm:$0xff]   ;;  %v7149_v63 = vld [vmem:[%s7895_s20 + $0x38] sm:$0xff]   ;;  %s7636_s14 = scalar_lea.vmem %s7635_s9, 4096  ;;  %p7637_p7 = scmp.lt.s32.totalorder %s12245_s22, %s7635_s9 }
  0x60   : > { %6491 = vmatmul.mubr.msk.bf16.vlgmr.msra.gmra.mxu0 %vm533_vm0, %v7142_v9  ;;  %6507 = vmatmul.mubr.msk.bf16.vlgmr.msra.gmra.mxu1 %vm533_vm0, %v7142_v9  ;;  %v7171_v22 = vld [vmem:[#allocation2 + $0x2a4] ss:$16 sps:$4 sm:$0xff]   ;;  %v7169_v23 = vld [vmem:[#allocation2 + $0x2a0] ss:$16 sps:$4 sm:$0xff]  }
  0x61   : > { %624 = vmatprep.mubr.bf16.mxu0 %v7714_v0  ;;  %817 = vmatprep.mubr.bf16.mxu1 %v7714_v0  ;;  %v7175_v24 = vld [vmem:[#allocation2 + $0x84] ss:$16 sps:$4 sm:$0xff]   ;;  %v7173_v27 = vld [vmem:[#allocation2 + $0x80] ss:$16 sps:$4 sm:$0xff]  }
  0x62   : > { %1929 = vmatpush1.bf16.msra.mxu0 %v7152_v12  ;;  %2122 = vmatpush1.bf16.msra.mxu1 %v7155_v14  ;;  %v7178_v25 = vld [vmem:[#allocation2 + $0x284] ss:$16 sps:$4 sm:$0xff]   ;;  %v7176_v28 = vld [vmem:[#allocation2 + $0x280] ss:$16 sps:$4 sm:$0xff]  }
  0x63   : > { %1930 = vmatprep.subr.bf16.mxu0 %v7161_v15  ;;  %2123 = vmatprep.subr.bf16.mxu1 %v7164_v17  ;;  %v7182_v29 = vld [vmem:[#allocation2 + $0x64] ss:$16 sps:$4 sm:$0xff]   ;;  %v7180_v30 = vld [vmem:[#allocation2 + $0x60] ss:$16 sps:$4 sm:$0xff]   ;;  %v7151_v15 = vld [vmem:[%s7895_s20 + $0x48] sm:$0xff]  }
  0x64   : > { %v7185_v31 = vld [vmem:[#allocation2 + $0x264] ss:$16 sps:$4 sm:$0xff]   ;;  %v7183_v32 = vld [vmem:[#allocation2 + $0x260] ss:$16 sps:$4 sm:$0xff]  }
  0x65   : > { %v7189_v33 = vld [vmem:[#allocation2 + $0x44] ss:$16 sps:$4 sm:$0xff]   ;;  %v7187_v35 = vld [vmem:[#allocation2 + $0x40] ss:$16 sps:$4 sm:$0xff]  }
  0x66   : > { %1931 = vmatpush1.bf16.msra.mxu0 %v7159_v16  ;;  %2124 = vmatpush1.bf16.msra.mxu1 %v7162_v18  ;;  %v7192_v34 = vld [vmem:[#allocation2 + $0x244] ss:$16 sps:$4 sm:$0xff]   ;;  %v7190_v36 = vld [vmem:[#allocation2 + $0x240] ss:$16 sps:$4 sm:$0xff]  }
  0x67   : > { %1932 = vmatprep.subr.bf16.mxu0 %v7168_v20  ;;  %2125 = vmatprep.subr.bf16.mxu1 %v7171_v22  ;;  %v7196_v37 = vld [vmem:[#allocation2 + $0x24] ss:$16 sps:$4 sm:$0xff]   ;;  %v7194_v39 = vld [vmem:[#allocation2 + $0x20] ss:$16 sps:$4 sm:$0xff]   ;;  %v7165_v22 = vld [vmem:[%s7895_s20 + $0x58] sm:$0xff]  }
  0x68   : > { %6492 = vmatmul.mubr.msk.bf16.gmra.mxu0 %vm533_vm0, %v7143_v10  ;;  %6508 = vmatmul.mubr.msk.bf16.gmra.mxu1 %vm533_vm0, %v7143_v10  ;;  %v7146_v38 = vld [vmem:[%s7895_s20 + $0x20] sm:$0xff]   ;;  %v7148_v56 = vld [vmem:[%s7895_s20 + $0x30] sm:$0xff]  }
  0x69   : > { %634 = vmatprep.mubr.bf16.mxu0 %v7714_v0  ;;  %827 = vmatprep.mubr.bf16.mxu1 %v7714_v0  ;;  %v7199_v40 = vld [vmem:[#allocation2 + $0x224] ss:$16 sps:$4 sm:$0xff]   ;;  %v7197_v41 = vld [vmem:[#allocation2 + $0x220] ss:$16 sps:$4 sm:$0xff]  }
  0x6a   : > { %1933 = vmatpush1.bf16.msra.mxu0 %v7166_v21  ;;  %2126 = vmatpush1.bf16.msra.mxu1 %v7169_v23  ;;  %v7202_v42 = vld [vmem:[#allocation2 + $0x4] ss:$16 sps:$4 sm:$0xff]   ;;  %v7200_v44 = vld [vmem:[#allocation2] ss:$16 sps:$4 sm:$0xff]   ;;  %v7256_v21 = vld [vmem:[#allocation2 + $0xec] ss:$16 sps:$4 sm:$0xff]  }
  0x6b   : > { %1934 = vmatprep.subr.bf16.mxu0 %v7175_v24  ;;  %2127 = vmatprep.subr.bf16.mxu1 %v7178_v25  ;;  %v7205_v43 = vld [vmem:[#allocation2 + $0x204] ss:$16 sps:$4 sm:$0xff]   ;;  %v7203_v45 = vld [vmem:[#allocation2 + $0x200] ss:$16 sps:$4 sm:$0xff]   ;;  %v7259_v23 = vld [vmem:[#allocation2 + $0x2ec] ss:$16 sps:$4 sm:$0xff]  }
  0x6c   : > { %v7208_v46 = vld [vmem:[#allocation2 + $0x1e4] ss:$16 sps:$4 sm:$0xff]   ;;  %v7206_v48 = vld [vmem:[#allocation2 + $0x1e0] ss:$16 sps:$4 sm:$0xff]   ;;  %v7179_v25 = vld [vmem:[%s7895_s20 + $0x68] sm:$0xff]  }
  0x6d   : > { %v7211_v49 = vld [vmem:[#allocation2 + $0x3e4] ss:$16 sps:$4 sm:$0xff]   ;;  %v7209_v50 = vld [vmem:[#allocation2 + $0x3e0] ss:$16 sps:$4 sm:$0xff]  }
  0x6e   : > { %1935 = vmatpush1.bf16.msra.mxu0 %v7173_v27  ;;  %2128 = vmatpush1.bf16.msra.mxu1 %v7176_v28  ;;  %v7214_v51 = vld [vmem:[#allocation2 + $0x1c4] ss:$16 sps:$4 sm:$0xff]   ;;  %v7212_v53 = vld [vmem:[#allocation2 + $0x1c0] ss:$16 sps:$4 sm:$0xff]   ;;  %v7193_v27 = vld [vmem:[%s7895_s20 + $0x78] sm:$0xff]   ;;  %v393_v28 = vlaneseq }
  0x6f   : > { %1936 = vmatprep.subr.bf16.mxu0 %v7182_v29  ;;  %2129 = vmatprep.subr.bf16.mxu1 %v7185_v31  ;;  %v7217_v52 = vld [vmem:[#allocation2 + $0x3c4] ss:$16 sps:$4 sm:$0xff]   ;;  %v7215_v54 = vld [vmem:[#allocation2 + $0x3c0] ss:$16 sps:$4 sm:$0xff]  }
  0x70   : > { %6493 = vmatmul.mubr.msk.bf16.gmra.mxu0 %vm533_vm0, %v7144_v19  ;;  %6509 = vmatmul.mubr.msk.bf16.gmra.mxu1 %vm533_vm0, %v7144_v19  ;;  %v7220_v55 = vld [vmem:[#allocation2 + $0x1a4] ss:$16 sps:$4 sm:$0xff]   ;;  %v7218_v57 = vld [vmem:[#allocation2 + $0x1a0] ss:$16 sps:$4 sm:$0xff]   ;;  %v7978_v29 = vshrl.u32 %v393_v28, 7 }
  0x71   : > { %644 = vmatprep.mubr.bf16.mxu0 %v7714_v0  ;;  %837 = vmatprep.mubr.bf16.mxu1 %v7714_v0  ;;  %v7223_v58 = vld [vmem:[#allocation2 + $0x3a4] ss:$16 sps:$4 sm:$0xff]   ;;  %v7221_v59 = vld [vmem:[#allocation2 + $0x3a0] ss:$16 sps:$4 sm:$0xff]   ;;  %v7263_v28 = vld [vmem:[#allocation2 + $0x2c8] ss:$16 sps:$4 sm:$0xff]  }
  0x72   : > { %1937 = vmatpush1.bf16.msra.mxu0 %v7180_v30  ;;  %2130 = vmatpush1.bf16.msra.mxu1 %v7183_v32  ;;  %v7226_v60 = vld [vmem:[#allocation2 + $0x184] ss:$16 sps:$4 sm:$0xff]   ;;  %v7224_v62 = vld [vmem:[#allocation2 + $0x180] ss:$16 sps:$4 sm:$0xff]   ;;  %12542 = vst [vmem:[#allocation15_spill] sm:$0xff] %v7978_v29  ;;  %v7981_v30 = vsub.s32 1, %v7978_v29 }
  0x73   : > { %1938 = vmatprep.subr.bf16.mxu0 %v7189_v33  ;;  %2131 = vmatprep.subr.bf16.mxu1 %v7192_v34  ;;  %v7229_v61 = vld [vmem:[#allocation2 + $0x384] ss:$16 sps:$4 sm:$0xff]   ;;  %v7227_v1 = vld [vmem:[#allocation2 + $0x380] ss:$16 sps:$4 sm:$0xff]   ;;  %v7984_v31 = vsub.s32 3, %v7978_v29  ;;  %v7987_v32 = vsub.s32 0, %v7978_v29 }
  0x74   : > { %v7232_v2 = vld [vmem:[#allocation2 + $0x164] ss:$16 sps:$4 sm:$0xff]   ;;  %v7230_v3 = vld [vmem:[#allocation2 + $0x160] ss:$16 sps:$4 sm:$0xff]   ;;  %12543 = vst [vmem:[#allocation16_spill] sm:$0xff] %v7981_v30  ;;  %v7990_v33 = vsub.s32 2, %v7978_v29 }
  0x75   : > { %v7235_v4 = vld [vmem:[#allocation2 + $0x364] ss:$16 sps:$4 sm:$0xff]   ;;  %v7233_v5 = vld [vmem:[#allocation2 + $0x360] ss:$16 sps:$4 sm:$0xff]   ;;  %12544 = vst [vmem:[#allocation17_spill] sm:$0xff] %v7984_v31  ;;  %12545 = vst [vmem:[#allocation18_spill] sm:$0xff] %v7987_v32 }
  0x76   : > { %1939 = vmatpush1.bf16.msra.mxu0 %v7187_v35  ;;  %2132 = vmatpush1.bf16.msra.mxu1 %v7190_v36  ;;  %v7238_v6 = vld [vmem:[#allocation2 + $0x144] ss:$16 sps:$4 sm:$0xff]   ;;  %v7236_v8 = vld [vmem:[#allocation2 + $0x140] ss:$16 sps:$4 sm:$0xff]   ;;  %12546 = vst [vmem:[#allocation19_spill] sm:$0xff] %v7990_v33 }
  0x77   : > { %1940 = vmatprep.subr.bf16.mxu0 %v7196_v37  ;;  %2133 = vmatprep.subr.bf16.mxu1 %v7199_v40  ;;  %v7241_v7 = vld [vmem:[#allocation2 + $0x344] ss:$16 sps:$4 sm:$0xff]   ;;  %v7239_v9 = vld [vmem:[#allocation2 + $0x340] ss:$16 sps:$4 sm:$0xff]  }
  0x78   : > { %6494 = vmatmul.mubr.msk.bf16.gmra.mxu0 %vm533_vm0, %v7145_v26  ;;  %6510 = vmatmul.mubr.msk.bf16.gmra.mxu1 %vm533_vm0, %v7145_v26  ;;  %v7244_v10 = vld [vmem:[#allocation2 + $0x124] ss:$16 sps:$4 sm:$0xff]   ;;  %v7242_v12 = vld [vmem:[#allocation2 + $0x120] ss:$16 sps:$4 sm:$0xff]  }
  0x79   : > { %654 = vmatprep.mubr.bf16.mxu0 %v7714_v0  ;;  %847 = vmatprep.mubr.bf16.mxu1 %v7714_v0  ;;  %v7150_v11 = vld [vmem:[%s7895_s20 + $0x40] sm:$0xff]   ;;  %v7158_v20 = vld [vmem:[%s7895_s20 + $0x50] sm:$0xff]  }
  0x7a   : > { %1941 = vmatpush1.bf16.msra.mxu0 %v7194_v39  ;;  %2134 = vmatpush1.bf16.msra.mxu1 %v7197_v41  ;;  %v7247_v13 = vld [vmem:[#allocation2 + $0x324] ss:$16 sps:$4 sm:$0xff]   ;;  %v7245_v14 = vld [vmem:[#allocation2 + $0x320] ss:$16 sps:$4 sm:$0xff]  }
  0x7b   : > { %1942 = vmatprep.subr.bf16.mxu0 %v7202_v42  ;;  %2135 = vmatprep.subr.bf16.mxu1 %v7205_v43  ;;  %v7250_v16 = vld [vmem:[#allocation2 + $0x104] ss:$16 sps:$4 sm:$0xff]   ;;  %v7248_v18 = vld [vmem:[#allocation2 + $0x100] ss:$16 sps:$4 sm:$0xff]  }
  0x7c   : > { %v7253_v17 = vld [vmem:[#allocation2 + $0x304] ss:$16 sps:$4 sm:$0xff]   ;;  %v7251_v19 = vld [vmem:[#allocation2 + $0x300] ss:$16 sps:$4 sm:$0xff]  }
  0x7d   : > { %v7172_v24 = vld [vmem:[%s7895_s20 + $0x60] sm:$0xff]   ;;  %v7186_v26 = vld [vmem:[%s7895_s20 + $0x70] sm:$0xff]   ;;  %s6832_s20 = sshll.u32 %s7780_s28, 11  ;;  %s7630_s28 = scalar_lea.vmem %s12245_s22, 2048 }
  0x7e   : > { %1943 = vmatpush1.bf16.msra.mxu0 %v7200_v44  ;;  %2136 = vmatpush1.bf16.msra.mxu1 %v7203_v45  ;;  %s12243_s23 = scalar_lea.hbm %s12297_s7, %s6832_s20  ;;  %p7631_p3 = scmp.ne.s32.totalorder %s12245_s22, %s7630_s28 }
  0x7f   : > { %1944 = vmatprep.subr.bf16.mxu0 %v7208_v46  ;;  %2137 = vmatprep.subr.bf16.mxu1 %v7211_v49  ;;  %p7638_p6 = scmp.lt.s32.totalorder %s7636_s14, %s7630_s28 }
  0x80   : > { %6495 = vmatmul.mubr.msk.bf16.gmra.mxu0 %vm533_vm0, %v7146_v38  ;;  %6511 = vmatmul.mubr.msk.bf16.gmra.mxu1 %vm533_vm0, %v7146_v38  ;;  %p7632_p2 = pnand %p7631_p3, %p7797_p5 }
  0x81   : > { %664 = vmatprep.mubr.bf16.mxu0 %v7714_v0  ;;  %857 = vmatprep.mubr.bf16.mxu1 %v7714_v0  ;;  %p7639_p9 = por %p7638_p6, %p7637_p7 }
  0x82   : > { %1945 = vmatpush2.bf16.msra.mxu0 %v7206_v48  ;;  %2138 = vmatpush2.bf16.msra.mxu1 %v7209_v50  ;;  %p7633_p4 = pneg %p7632_p2 }
  0x83   : > { %1946 = vmatprep.subr.bf16.mxu0 %v7214_v51  ;;  %2139 = vmatprep.subr.bf16.mxu1 %v7217_v52 }
  0x84   : > { %p7640_p8 = pnand %p7639_p9, %p7633_p4 }
  0x86   : > { %1947 = vmatpush2.bf16.msra.mxu0 %v7212_v53  ;;  %2140 = vmatpush2.bf16.msra.mxu1 %v7215_v54 }
  0x87   : > { %1948 = vmatprep.subr.bf16.mxu0 %v7220_v55  ;;  %2141 = vmatprep.subr.bf16.mxu1 %v7223_v58 }
  0x88   : > { %6496 = vmatmul.mubr.msk.bf16.gmra.mxu0 %vm533_vm0, %v7147_v47  ;;  %6512 = vmatmul.mubr.msk.bf16.gmra.mxu1 %vm533_vm0, %v7147_v47 }
  0x89   : > { %674 = vmatprep.mubr.bf16.mxu0 %v7714_v0  ;;  %867 = vmatprep.mubr.bf16.mxu1 %v7714_v0 }
  0x8a   : > { %1949 = vmatpush2.bf16.msra.mxu0 %v7218_v57  ;;  %2142 = vmatpush2.bf16.msra.mxu1 %v7221_v59 }
  0x8b   : > { %1950 = vmatprep.subr.bf16.mxu0 %v7226_v60  ;;  %2143 = vmatprep.subr.bf16.mxu1 %v7229_v61 }
  0x8e   : > { %1951 = vmatpush2.bf16.msra.mxu0 %v7224_v62  ;;  %2144 = vmatpush2.bf16.msra.mxu1 %v7227_v1 }
  0x8f   : > { %1952 = vmatprep.subr.bf16.mxu0 %v7232_v2  ;;  %2145 = vmatprep.subr.bf16.mxu1 %v7235_v4 }
  0x90   : > { %6497 = vmatmul.mubr.msk.bf16.gmra.mxu0 %vm533_vm0, %v7148_v56  ;;  %6513 = vmatmul.mubr.msk.bf16.gmra.mxu1 %vm533_vm0, %v7148_v56 }
  0x91   : > { %684 = vmatprep.mubr.bf16.mxu0 %v7714_v0  ;;  %877 = vmatprep.mubr.bf16.mxu1 %v7714_v0 }
  0x92   : > { %1953 = vmatpush2.bf16.msra.mxu0 %v7230_v3  ;;  %2146 = vmatpush2.bf16.msra.mxu1 %v7233_v5  ;;  %v7254_v5 = vld [vmem:[#allocation2 + $0xe8] ss:$16 sps:$4 sm:$0xff]  }
  0x93   : > { %1954 = vmatprep.subr.bf16.mxu0 %v7238_v6  ;;  %2147 = vmatprep.subr.bf16.mxu1 %v7241_v7  ;;  %v7257_v6 = vld [vmem:[#allocation2 + $0x2e8] ss:$16 sps:$4 sm:$0xff]  }
  0x96   : > { %1955 = vmatpush2.bf16.msra.mxu0 %v7236_v8  ;;  %2148 = vmatpush2.bf16.msra.mxu1 %v7239_v9 }
  0x97   : > { %1956 = vmatprep.subr.bf16.mxu0 %v7244_v10  ;;  %2149 = vmatprep.subr.bf16.mxu1 %v7247_v13  ;;  %v7265_v13 = vld [vmem:[#allocation2 + $0x2cc] ss:$16 sps:$4 sm:$0xff]  }
  0x98   : > { %6498 = vmatmul.mubr.msk.bf16.gmra.mxu0 %vm533_vm0, %v7149_v63  ;;  %6514 = vmatmul.mubr.msk.bf16.gmra.mxu1 %vm533_vm0, %v7149_v63 }
  0x99   : > { %694 = vmatprep.mubr.bf16.mxu0 %v7714_v0  ;;  %887 = vmatprep.mubr.bf16.mxu1 %v7714_v0 }
  0x9a   : > { %1957 = vmatpush2.bf16.msra.mxu0 %v7242_v12  ;;  %2150 = vmatpush2.bf16.msra.mxu1 %v7245_v14  ;;  %v7262_v12 = vld [vmem:[#allocation2 + $0xcc] ss:$16 sps:$4 sm:$0xff]  }
  0x9b   : > { %1958 = vmatprep.subr.bf16.mxu0 %v7250_v16  ;;  %2151 = vmatprep.subr.bf16.mxu1 %v7253_v17 }
  0x9e   : > { %1959 = vmatpush2.bf16.msra.mxu0 %v7248_v18  ;;  %2152 = vmatpush2.bf16.msra.mxu1 %v7251_v19 }
  0x9f   : > { %2314 = vmatprep.subr.bf16.mxu0 %v7256_v21  ;;  %2507 = vmatprep.subr.bf16.mxu1 %v7259_v23  ;;  %v7260_v23 = vld [vmem:[#allocation2 + $0xc8] ss:$16 sps:$4 sm:$0xff]  }
  0xa0   : > { %6499 = vmatmul.mubr.msk.bf16.gmra.mxu0 %vm533_vm0, %v7150_v11  ;;  %6515 = vmatmul.mubr.msk.bf16.gmra.mxu1 %vm533_vm0, %v7150_v11 }
  0xa1   : > { %704 = vmatprep.mubr.bf16.mxu0 %v7714_v0  ;;  %897 = vmatprep.mubr.bf16.mxu1 %v7714_v0 }
  0xa8   : > { %6500 = vmatmul.mubr.msk.bf16.gmra.mxu0 %vm533_vm0, %v7151_v15  ;;  %6516 = vmatmul.mubr.msk.bf16.gmra.mxu1 %vm533_vm0, %v7151_v15 }
  0xa9   : > { %714 = vmatprep.mubr.bf16.mxu0 %v7714_v0  ;;  %907 = vmatprep.mubr.bf16.mxu1 %v7714_v0 }
  0xb0   : > { %6501 = vmatmul.mubr.msk.bf16.gmra.mxu0 %vm533_vm0, %v7158_v20  ;;  %6517 = vmatmul.mubr.msk.bf16.gmra.mxu1 %vm533_vm0, %v7158_v20 }
  0xb1   : > { %724 = vmatprep.mubr.bf16.mxu0 %v7714_v0  ;;  %917 = vmatprep.mubr.bf16.mxu1 %v7714_v0 }
  0xb8   : > { %6502 = vmatmul.mubr.msk.bf16.gmra.mxu0 %vm533_vm0, %v7165_v22  ;;  %6518 = vmatmul.mubr.msk.bf16.gmra.mxu1 %vm533_vm0, %v7165_v22 }
  0xb9   : > { %734 = vmatprep.mubr.bf16.mxu0 %v7714_v0  ;;  %927 = vmatprep.mubr.bf16.mxu1 %v7714_v0 }
  0xc0   : > { %6503 = vmatmul.mubr.msk.bf16.gmra.mxu0 %vm533_vm0, %v7172_v24  ;;  %6519 = vmatmul.mubr.msk.bf16.gmra.mxu1 %vm533_vm0, %v7172_v24 }
  0xc1   : > { %744 = vmatprep.mubr.bf16.mxu0 %v7714_v0  ;;  %937 = vmatprep.mubr.bf16.mxu1 %v7714_v0 }
  0xc8   : > { %6504 = vmatmul.mubr.msk.bf16.gmra.mxu0 %vm533_vm0, %v7179_v25  ;;  %6520 = vmatmul.mubr.msk.bf16.gmra.mxu1 %vm533_vm0, %v7179_v25 }
  0xc9   : > { %754 = vmatprep.mubr.bf16.mxu0 %v7714_v0  ;;  %947 = vmatprep.mubr.bf16.mxu1 %v7714_v0 }
  0xd0   : > { %6505 = vmatmul.mubr.msk.bf16.gmra.mxu0 %vm533_vm0, %v7186_v26  ;;  %6521 = vmatmul.mubr.msk.bf16.gmra.mxu1 %vm533_vm0, %v7186_v26 }
  0xd1   : > { %764 = vmatprep.mubr.bf16.mxu0 %v7714_v0  ;;  %957 = vmatprep.mubr.bf16.mxu1 %v7714_v0  ;;  %v338_v0 = vld [vmem:[#allocation8] ss:$8 sm:$0xf] }
  0xd2   : > { %v7993_v36 = vrot.slane %v338_v0, %v7981_v30  ;;  %v7996_v37 = vrot.slane %v338_v0, %v7984_v31  ;;  %v7999_v38 = vrot.slane %v338_v0, %v7987_v32  ;;  %v8002_v39 = vrot.slane %v338_v0, %v7990_v33  ;;  %v7268_v0 = vld [vmem:[#allocation2 + $0xac] ss:$16 sps:$4 sm:$0xff]  }
  0xd8   : > { %6506 = vmatmul.mubr.msk.bf16.gmra.mxu0 %vm533_vm0, %v7193_v27  ;;  %6522 = vmatmul.mubr.msk.bf16.gmra.mxu1 %vm533_vm0, %v7193_v27 }
 0x120   : > { %v616_v34 = vpop.f32.mrf.mxu0  ;;  %v809_v35 = vpop.f32.mrf.mxu1 }
 0x121   : > { %v617_v48 = vadd.f32 %v616_v34, %v7999_v38  ;;  %v810_v49 = vadd.f32 %v809_v35, %v8002_v39 }
 0x122   : > { %v618_v40 = vpop.f32.mrf.mxu0  ;;  %v811_v41 = vpop.f32.mrf.mxu1 }
 0x123   : > { %v619_v44 = vadd.f32 %v618_v40, %v7993_v36  ;;  %v812_v45 = vadd.f32 %v811_v41, %v7996_v37  ;;  %v968_v62 = vmax.f32 %v617_v48, 0.0  ;;  %v970_v63 = vmax.f32 %v810_v49, 0.0  ;;  %v7266_v48 = vld [vmem:[#allocation2 + $0xa8] ss:$16 sps:$4 sm:$0xff]   ;;  %v7271_v49 = vld [vmem:[#allocation2 + $0x2ac] ss:$16 sps:$4 sm:$0xff]  }
 0x124   : > { %v620_v42 = vpop.f32.mrf.mxu0  ;;  %v813_v43 = vpop.f32.mrf.mxu1 }
 0x125   : > { %v621_v46 = vadd.f32 %v620_v42, %v7999_v38  ;;  %v814_v47 = vadd.f32 %v813_v43, %v8002_v39  ;;  %v969_v58 = vmax.f32 %v619_v44, 0.0  ;;  %v971_v59 = vmax.f32 %v812_v45, 0.0 }
 0x126   : > { %v622_v50 = vpop.f32.mrf.mxu0  ;;  %v815_v51 = vpop.f32.mrf.mxu1 }
 0x127   : > { %v623_v52 = vadd.f32 %v622_v50, %v7993_v36  ;;  %v816_v53 = vadd.f32 %v815_v51, %v7996_v37  ;;  %v972_v54 = vmax.f32 %v621_v46, 0.0  ;;  %v974_v55 = vmax.f32 %v814_v47, 0.0 }
 0x128   : > { %v626_v56 = vpop.f32.mrf.mxu0  ;;  %v819_v57 = vpop.f32.mrf.mxu1 }
 0x129   : > { %v973_v60 = vmax.f32 %v623_v52, 0.0  ;;  %v975_v61 = vmax.f32 %v816_v53, 0.0  ;;  %v8016_v7 = vpack.c.bf16 %v972_v54, %v968_v62  ;;  %v8018_v8 = vpack.c.bf16 %v974_v55, %v970_v63  ;;  %v7269_v55 = vld [vmem:[#allocation2 + $0x2a8] ss:$16 sps:$4 sm:$0xff]  }
 0x12a   : > { %v628_v1 = vpop.f32.mrf.mxu0  ;;  %v821_v2 = vpop.f32.mrf.mxu1  ;;  %v627_v17 = vadd.f32 %v626_v56, %v7999_v38  ;;  %v820_v18 = vadd.f32 %v819_v57, %v8002_v39  ;;  %v7274_v56 = vld [vmem:[#allocation2 + $0x8c] ss:$16 sps:$4 sm:$0xff]  }
 0x12b   : > { %v8012_v3 = vpack.c.bf16 %v973_v60, %v969_v58  ;;  %v8014_v4 = vpack.c.bf16 %v975_v61, %v971_v59  ;;  %v629_v9 = vadd.f32 %v628_v1, %v7993_v36  ;;  %v822_v14 = vadd.f32 %v821_v2, %v7996_v37  ;;  %v7277_v60 = vld [vmem:[#allocation2 + $0x28c] ss:$16 sps:$4 sm:$0xff]  }
 0x12c   : > { %v630_v10 = vpop.f32.mrf.mxu0  ;;  %v823_v11 = vpop.f32.mrf.mxu1  ;;  %v976_v42 = vmax.f32 %v627_v17, 0.0  ;;  %v978_v43 = vmax.f32 %v820_v18, 0.0 }
 0x12d   : > { %v631_v15 = vadd.f32 %v630_v10, %v7999_v38  ;;  %v824_v16 = vadd.f32 %v823_v11, %v8002_v39  ;;  %1960 = vmatprep.mubr.bf16.mxu0 %v8012_v3  ;;  %2153 = vmatprep.mubr.bf16.mxu1 %v8014_v4  ;;  %v977_v34 = vmax.f32 %v629_v9, 0.0  ;;  %v979_v35 = vmax.f32 %v822_v14, 0.0  ;;  %v7280_v14 = vld [vmem:[#allocation2 + $0x6c] ss:$16 sps:$4 sm:$0xff]  }
 0x12e   : > { %v632_v19 = vpop.f32.mrf.mxu0  ;;  %v825_v20 = vpop.f32.mrf.mxu1  ;;  %1961 = vmatmul.mubr.bf16.vlgmr.msra.gmra.mxu0 %v8016_v7  ;;  %2154 = vmatmul.mubr.bf16.vlgmr.msra.gmra.mxu1 %v8018_v8 }
 0x12f   : > { %v633_v21 = vadd.f32 %v632_v19, %v7993_v36  ;;  %v826_v22 = vadd.f32 %v825_v20, %v7996_v37  ;;  %2315 = vmatpush1.bf16.msra.mxu0 %v7254_v5  ;;  %2508 = vmatpush1.bf16.msra.mxu1 %v7257_v6  ;;  %v980_v24 = vmax.f32 %v631_v15, 0.0  ;;  %v982_v25 = vmax.f32 %v824_v16, 0.0  ;;  %v7272_v6 = vld [vmem:[#allocation2 + $0x88] ss:$16 sps:$4 sm:$0xff]  }
 0x130   : > { %v636_v26 = vpop.f32.mrf.mxu0  ;;  %v829_v27 = vpop.f32.mrf.mxu1  ;;  %2316 = vmatprep.subr.bf16.mxu0 %v7262_v12  ;;  %2509 = vmatprep.subr.bf16.mxu1 %v7265_v13  ;;  %v7275_v13 = vld [vmem:[#allocation2 + $0x288] ss:$16 sps:$4 sm:$0xff]  }
 0x131   : > { %v981_v40 = vmax.f32 %v633_v21, 0.0  ;;  %v983_v41 = vmax.f32 %v826_v22, 0.0  ;;  %v8036_v50 = vpack.c.bf16 %v980_v24, %v976_v42  ;;  %v8038_v51 = vpack.c.bf16 %v982_v25, %v978_v43  ;;  %v7278_v25 = vld [vmem:[#allocation2 + $0x68] ss:$16 sps:$4 sm:$0xff]  }
 0x132   : > { %v638_v44 = vpop.f32.mrf.mxu0  ;;  %v831_v45 = vpop.f32.mrf.mxu1  ;;  %v637_v61 = vadd.f32 %v636_v26, %v7999_v38  ;;  %v830_v62 = vadd.f32 %v829_v27, %v8002_v39  ;;  %v7283_v26 = vld [vmem:[#allocation2 + $0x26c] ss:$16 sps:$4 sm:$0xff]  }
 0x133   : > { %v8032_v46 = vpack.c.bf16 %v981_v40, %v977_v34  ;;  %v8034_v47 = vpack.c.bf16 %v983_v41, %v979_v35  ;;  %2317 = vmatpush1.bf16.msra.mxu0 %v7260_v23  ;;  %v639_v52 = vadd.f32 %v638_v44, %v7993_v36  ;;  %2510 = vmatpush1.bf16.msra.mxu1 %v7263_v28  ;;  %v7281_v40 = vld [vmem:[#allocation2 + $0x268] ss:$16 sps:$4 sm:$0xff]   ;;  %v7286_v41 = vld [vmem:[#allocation2 + $0x4c] ss:$16 sps:$4 sm:$0xff]  }
 0x134   : > { %v640_v53 = vpop.f32.mrf.mxu0  ;;  %v833_v54 = vpop.f32.mrf.mxu1  ;;  %2318 = vmatprep.subr.bf16.mxu0 %v7268_v0  ;;  %v832_v57 = vadd.f32 %v831_v45, %v7996_v37  ;;  %2511 = vmatprep.subr.bf16.mxu1 %v7271_v49  ;;  %v984_v19 = vmax.f32 %v637_v61, 0.0  ;;  %v986_v20 = vmax.f32 %v830_v62, 0.0  ;;  %v7289_v45 = vld [vmem:[#allocation2 + $0x24c] ss:$16 sps:$4 sm:$0xff]   ;;  %v7287_v61 = vld [vmem:[#allocation2 + $0x248] ss:$16 sps:$4 sm:$0xff]  }
 0x135   : > { %v641_v58 = vadd.f32 %v640_v53, %v7999_v38  ;;  %v834_v59 = vadd.f32 %v833_v54, %v8002_v39  ;;  %1970 = vmatprep.mubr.bf16.mxu0 %v8032_v46  ;;  %2163 = vmatprep.mubr.bf16.mxu1 %v8034_v47  ;;  %v985_v15 = vmax.f32 %v639_v52, 0.0  ;;  %v7292_v62 = vld [vmem:[#allocation2 + $0x2c] ss:$16 sps:$4 sm:$0xff]  }
 0x136   : > { %v642_v63 = vpop.f32.mrf.mxu0  ;;  %v835_v1 = vpop.f32.mrf.mxu1  ;;  %1971 = vmatmul.mubr.bf16.gmra.mxu0 %v8036_v50  ;;  %2164 = vmatmul.mubr.bf16.gmra.mxu1 %v8038_v51  ;;  %v987_v16 = vmax.f32 %v832_v57, 0.0 }
 0x137   : > { %v643_v2 = vadd.f32 %v642_v63, %v7993_v36  ;;  %v836_v5 = vadd.f32 %v835_v1, %v7996_v37  ;;  %2319 = vmatpush1.bf16.msra.mxu0 %v7266_v48  ;;  %v988_v9 = vmax.f32 %v641_v58, 0.0  ;;  %v990_v10 = vmax.f32 %v834_v59, 0.0  ;;  %2512 = vmatpush1.bf16.msra.mxu1 %v7269_v55 }
 0x138   : > { %v646_v11 = vpop.f32.mrf.mxu0  ;;  %v839_v12 = vpop.f32.mrf.mxu1  ;;  %2320 = vmatprep.subr.bf16.mxu0 %v7274_v56  ;;  %2513 = vmatprep.subr.bf16.mxu1 %v7277_v60  ;;  %v7284_v56 = vld [vmem:[#allocation2 + $0x48] ss:$16 sps:$4 sm:$0xff]  }
 0x139   : > { %v989_v17 = vmax.f32 %v643_v2, 0.0  ;;  %v991_v18 = vmax.f32 %v836_v5, 0.0  ;;  %v8056_v27 = vpack.c.bf16 %v988_v9, %v984_v19  ;;  %v8058_v28 = vpack.c.bf16 %v990_v10, %v986_v20 }
 0x13a   : > { %v648_v21 = vpop.f32.mrf.mxu0  ;;  %v841_v22 = vpop.f32.mrf.mxu1  ;;  %v647_v48 = vadd.f32 %v646_v11, %v7999_v38  ;;  %v840_v49 = vadd.f32 %v839_v12, %v8002_v39 }
 0x13b   : > { %v8052_v23 = vpack.c.bf16 %v989_v17, %v985_v15  ;;  %v8054_v24 = vpack.c.bf16 %v991_v18, %v987_v16  ;;  %2321 = vmatpush1.bf16.msra.mxu0 %v7272_v6  ;;  %v649_v0 = vadd.f32 %v648_v21, %v7993_v36  ;;  %2514 = vmatpush1.bf16.msra.mxu1 %v7275_v13  ;;  %v7295_v15 = vld [vmem:[#allocation2 + $0x22c] ss:$16 sps:$4 sm:$0xff]   ;;  %v7293_v21 = vld [vmem:[#allocation2 + $0x228] ss:$16 sps:$4 sm:$0xff]  }
 0x13c   : > { %v650_v34 = vpop.f32.mrf.mxu0  ;;  %v843_v35 = vpop.f32.mrf.mxu1  ;;  %2322 = vmatprep.subr.bf16.mxu0 %v7280_v14  ;;  %v842_v42 = vadd.f32 %v841_v22, %v7996_v37  ;;  %2515 = vmatprep.subr.bf16.mxu1 %v7283_v26  ;;  %v992_v6 = vmax.f32 %v647_v48, 0.0  ;;  %v994_v9 = vmax.f32 %v840_v49, 0.0  ;;  %v7290_v14 = vld [vmem:[#allocation2 + $0x28] ss:$16 sps:$4 sm:$0xff]   ;;  %v7298_v22 = vld [vmem:[#allocation2 + $0xc] ss:$16 sps:$4 sm:$0xff]  }
 0x13d   : > { %v651_v43 = vadd.f32 %v650_v34, %v7999_v38  ;;  %v844_v44 = vadd.f32 %v843_v35, %v8002_v39  ;;  %1980 = vmatprep.mubr.bf16.mxu0 %v8052_v23  ;;  %2173 = vmatprep.mubr.bf16.mxu1 %v8054_v24  ;;  %v993_v63 = vmax.f32 %v649_v0, 0.0  ;;  %v7301_v34 = vld [vmem:[#allocation2 + $0x20c] ss:$16 sps:$4 sm:$0xff]  }
 0x13e   : > { %v652_v52 = vpop.f32.mrf.mxu0  ;;  %v845_v53 = vpop.f32.mrf.mxu1  ;;  %1981 = vmatmul.mubr.bf16.gmra.mxu0 %v8056_v27  ;;  %2174 = vmatmul.mubr.bf16.gmra.mxu1 %v8058_v28  ;;  %v995_v1 = vmax.f32 %v842_v42, 0.0 }
 0x13f   : > { %v653_v54 = vadd.f32 %v652_v52, %v7993_v36  ;;  %v846_v55 = vadd.f32 %v845_v53, %v7996_v37  ;;  %2323 = vmatpush1.bf16.msra.mxu0 %v7278_v25  ;;  %v996_v57 = vmax.f32 %v651_v43, 0.0  ;;  %v998_v58 = vmax.f32 %v844_v44, 0.0  ;;  %2516 = vmatpush1.bf16.msra.mxu1 %v7281_v40 }
 0x140   : > { %v656_v59 = vpop.f32.mrf.mxu0  ;;  %v849_v60 = vpop.f32.mrf.mxu1  ;;  %2324 = vmatprep.subr.bf16.mxu0 %v7286_v41  ;;  %2517 = vmatprep.subr.bf16.mxu1 %v7289_v45  ;;  %v7296_v45 = vld [vmem:[#allocation2 + $0x8] ss:$16 sps:$4 sm:$0xff]  }
 0x141   : > { %v997_v2 = vmax.f32 %v653_v54, 0.0  ;;  %v999_v5 = vmax.f32 %v846_v55, 0.0  ;;  %v8076_v16 = vpack.c.bf16 %v996_v57, %v992_v6  ;;  %v8078_v17 = vpack.c.bf16 %v998_v58, %v994_v9  ;;  %v7299_v54 = vld [vmem:[#allocation2 + $0x208] ss:$16 sps:$4 sm:$0xff]   ;;  %v7304_v55 = vld [vmem:[#allocation2 + $0x1ec] ss:$16 sps:$4 sm:$0xff]  }
 0x142   : > { %v658_v10 = vpop.f32.mrf.mxu0  ;;  %v851_v11 = vpop.f32.mrf.mxu1  ;;  %v657_v35 = vadd.f32 %v656_v59, %v7999_v38  ;;  %v850_v40 = vadd.f32 %v849_v60, %v8002_v39  ;;  %v7307_v6 = vld [vmem:[#allocation2 + $0x3ec] ss:$16 sps:$4 sm:$0xff]  }
 0x143   : > { %v8072_v12 = vpack.c.bf16 %v997_v2, %v993_v63  ;;  %v8074_v13 = vpack.c.bf16 %v999_v5, %v995_v1  ;;  %2325 = vmatpush1.bf16.msra.mxu0 %v7284_v56  ;;  %v659_v18 = vadd.f32 %v658_v10, %v7993_v36  ;;  %2518 = vmatpush1.bf16.msra.mxu1 %v7287_v61  ;;  %v7302_v5 = vld [vmem:[#allocation2 + $0x1e8] ss:$16 sps:$4 sm:$0xff]  }
 0x144   : > { %v660_v19 = vpop.f32.mrf.mxu0  ;;  %v853_v20 = vpop.f32.mrf.mxu1  ;;  %2326 = vmatprep.subr.bf16.mxu0 %v7292_v62  ;;  %v852_v25 = vadd.f32 %v851_v11, %v7996_v37  ;;  %2519 = vmatprep.subr.bf16.mxu1 %v7295_v15  ;;  %v1000_v60 = vmax.f32 %v657_v35, 0.0  ;;  %v1002_v61 = vmax.f32 %v850_v40, 0.0 }
 0x145   : > { %v661_v26 = vadd.f32 %v660_v19, %v7999_v38  ;;  %v854_v0 = vadd.f32 %v853_v20, %v8002_v39  ;;  %1990 = vmatprep.mubr.bf16.mxu0 %v8072_v12  ;;  %2183 = vmatprep.mubr.bf16.mxu1 %v8074_v13  ;;  %v1001_v56 = vmax.f32 %v659_v18, 0.0  ;;  %v7305_v18 = vld [vmem:[#allocation2 + $0x3e8] ss:$16 sps:$4 sm:$0xff]   ;;  %v7310_v19 = vld [vmem:[#allocation2 + $0x1cc] ss:$16 sps:$4 sm:$0xff]  }
 0x146   : > { %v662_v41 = vpop.f32.mrf.mxu0  ;;  %v855_v42 = vpop.f32.mrf.mxu1  ;;  %1991 = vmatmul.mubr.bf16.gmra.mxu0 %v8076_v16  ;;  %2184 = vmatmul.mubr.bf16.gmra.mxu1 %v8078_v17  ;;  %v1003_v57 = vmax.f32 %v852_v25, 0.0  ;;  %v7313_v25 = vld [vmem:[#allocation2 + $0x3cc] ss:$16 sps:$4 sm:$0xff]  }
 0x147   : > { %v663_v43 = vadd.f32 %v662_v41, %v7993_v36  ;;  %v856_v44 = vadd.f32 %v855_v42, %v7996_v37  ;;  %2327 = vmatpush1.bf16.msra.mxu0 %v7290_v14  ;;  %v1004_v48 = vmax.f32 %v661_v26, 0.0  ;;  %v1006_v49 = vmax.f32 %v854_v0, 0.0  ;;  %2520 = vmatpush1.bf16.msra.mxu1 %v7293_v21  ;;  %v7308_v42 = vld [vmem:[#allocation2 + $0x1c8] ss:$16 sps:$4 sm:$0xff]  }
 0x148   : > { %v666_v52 = vpop.f32.mrf.mxu0  ;;  %v859_v53 = vpop.f32.mrf.mxu1  ;;  %2328 = vmatprep.subr.bf16.mxu0 %v7298_v22  ;;  %2521 = vmatprep.subr.bf16.mxu1 %v7301_v34 }
 0x149   : > { %v1005_v58 = vmax.f32 %v663_v43, 0.0  ;;  %v1007_v59 = vmax.f32 %v856_v44, 0.0  ;;  %v8096_v9 = vpack.c.bf16 %v1004_v48, %v1000_v60  ;;  %v8098_v10 = vpack.c.bf16 %v1006_v49, %v1002_v61  ;;  %v7311_v49 = vld [vmem:[#allocation2 + $0x3c8] ss:$16 sps:$4 sm:$0xff]  }
 0x14a   : > { %v668_v62 = vpop.f32.mrf.mxu0  ;;  %v861_v63 = vpop.f32.mrf.mxu1  ;;  %v667_v26 = vadd.f32 %v666_v52, %v7999_v38  ;;  %v860_v0 = vadd.f32 %v859_v53, %v8002_v39  ;;  %v7316_v52 = vld [vmem:[#allocation2 + $0x1ac] ss:$16 sps:$4 sm:$0xff]  }
 0x14b   : > { %v8092_v1 = vpack.c.bf16 %v1005_v58, %v1001_v56  ;;  %v8094_v2 = vpack.c.bf16 %v1007_v59, %v1003_v57  ;;  %2329 = vmatpush1.bf16.msra.mxu0 %v7296_v45  ;;  %v669_v11 = vadd.f32 %v668_v62, %v7993_v36  ;;  %2522 = vmatpush1.bf16.msra.mxu1 %v7299_v54 }
 0x14c   : > { %v670_v14 = vpop.f32.mrf.mxu0  ;;  %v863_v15 = vpop.f32.mrf.mxu1  ;;  %2330 = vmatprep.subr.bf16.mxu0 %v7304_v55  ;;  %v862_v20 = vadd.f32 %v861_v63, %v7996_v37  ;;  %2523 = vmatprep.subr.bf16.mxu1 %v7307_v6  ;;  %v1008_v57 = vmax.f32 %v667_v26, 0.0  ;;  %v1010_v58 = vmax.f32 %v860_v0, 0.0  ;;  %v7314_v63 = vld [vmem:[#allocation2 + $0x1a8] ss:$16 sps:$4 sm:$0xff]   ;;  %v7325_v26 = vld [vmem:[#allocation2 + $0x38c] ss:$16 sps:$4 sm:$0xff]  }
 0x14d   : > { %v671_v21 = vadd.f32 %v670_v14, %v7999_v38  ;;  %v864_v22 = vadd.f32 %v863_v15, %v8002_v39  ;;  %2000 = vmatprep.mubr.bf16.mxu0 %v8092_v1  ;;  %2193 = vmatprep.mubr.bf16.mxu1 %v8094_v2  ;;  %v1009_v53 = vmax.f32 %v669_v11, 0.0 }
 0x14e   : > { %v672_v34 = vpop.f32.mrf.mxu0  ;;  %v865_v35 = vpop.f32.mrf.mxu1  ;;  %2001 = vmatmul.mubr.bf16.gmra.mxu0 %v8096_v9  ;;  %2194 = vmatmul.mubr.bf16.gmra.mxu1 %v8098_v10  ;;  %v1011_v54 = vmax.f32 %v862_v20, 0.0  ;;  %v7322_v20 = vld [vmem:[#allocation2 + $0x18c] ss:$16 sps:$4 sm:$0xff]  }
 0x14f   : > { %v673_v40 = vadd.f32 %v672_v34, %v7993_v36  ;;  %v866_v41 = vadd.f32 %v865_v35, %v7996_v37  ;;  %2331 = vmatpush2.bf16.msra.mxu0 %v7302_v5  ;;  %v1012_v43 = vmax.f32 %v671_v21, 0.0  ;;  %v1014_v44 = vmax.f32 %v864_v22, 0.0  ;;  %2524 = vmatpush2.bf16.msra.mxu1 %v7305_v18  ;;  %v7319_v5 = vld [vmem:[#allocation2 + $0x3ac] ss:$16 sps:$4 sm:$0xff]  }
 0x150   : > { %v676_v45 = vpop.f32.mrf.mxu0  ;;  %v869_v48 = vpop.f32.mrf.mxu1  ;;  %2332 = vmatprep.subr.bf16.mxu0 %v7310_v19  ;;  %2525 = vmatprep.subr.bf16.mxu1 %v7313_v25  ;;  %v7317_v19 = vld [vmem:[#allocation2 + $0x3a8] ss:$16 sps:$4 sm:$0xff]  }
 0x151   : > { %v1013_v55 = vmax.f32 %v673_v40, 0.0  ;;  %v1015_v56 = vmax.f32 %v866_v41, 0.0  ;;  %v8116_v6 = vpack.c.bf16 %v1012_v43, %v1008_v57  ;;  %v8118_v14 = vpack.c.bf16 %v1014_v44, %v1010_v58  ;;  %v7320_v43 = vld [vmem:[#allocation2 + $0x188] ss:$16 sps:$4 sm:$0xff]  }
 0x152   : > { %v678_v59 = vpop.f32.mrf.mxu0  ;;  %v871_v60 = vpop.f32.mrf.mxu1  ;;  %v677_v0 = vadd.f32 %v676_v45, %v7999_v38  ;;  %v870_v34 = vadd.f32 %v869_v48, %v8002_v39  ;;  %v7323_v45 = vld [vmem:[#allocation2 + $0x388] ss:$16 sps:$4 sm:$0xff]   ;;  %v7328_v48 = vld [vmem:[#allocation2 + $0x16c] ss:$16 sps:$4 sm:$0xff]  }
 0x153   : > { %v8112_v61 = vpack.c.bf16 %v1013_v55, %v1009_v53  ;;  %v8114_v62 = vpack.c.bf16 %v1015_v56, %v1011_v54  ;;  %2333 = vmatpush2.bf16.msra.mxu0 %v7308_v42  ;;  %v679_v11 = vadd.f32 %v678_v59, %v7993_v36  ;;  %2526 = vmatpush2.bf16.msra.mxu1 %v7311_v49 }
 0x154   : > { %v680_v15 = vpop.f32.mrf.mxu0  ;;  %v873_v18 = vpop.f32.mrf.mxu1  ;;  %2334 = vmatprep.subr.bf16.mxu0 %v7316_v52  ;;  %v872_v21 = vadd.f32 %v871_v60, %v7996_v37  ;;  %2527 = vmatprep.subr.bf16.mxu1 %v7319_v5  ;;  %v1016_v58 = vmax.f32 %v677_v0, 0.0  ;;  %v1018_v59 = vmax.f32 %v870_v34, 0.0  ;;  %v7334_v0 = vld [vmem:[#allocation2 + $0x14c] ss:$16 sps:$4 sm:$0xff]  }
 0x155   : > { %v681_v22 = vadd.f32 %v680_v15, %v7999_v38  ;;  %v874_v25 = vadd.f32 %v873_v18, %v8002_v39  ;;  %2010 = vmatprep.mubr.bf16.mxu0 %v8112_v61  ;;  %2203 = vmatprep.mubr.bf16.mxu1 %v8114_v62  ;;  %v1017_v54 = vmax.f32 %v679_v11, 0.0  ;;  %v7326_v18 = vld [vmem:[#allocation2 + $0x168] ss:$16 sps:$4 sm:$0xff]  }
 0x156   : > { %v682_v35 = vpop.f32.mrf.mxu0  ;;  %v875_v40 = vpop.f32.mrf.mxu1  ;;  %2011 = vmatmul.mubr.bf16.gmra.mxu0 %v8116_v6  ;;  %2204 = vmatmul.mubr.bf16.gmra.mxu1 %v8118_v14  ;;  %v1019_v55 = vmax.f32 %v872_v21, 0.0 }
 0x157   : > { %v683_v41 = vadd.f32 %v682_v35, %v7993_v36  ;;  %v876_v42 = vadd.f32 %v875_v40, %v7996_v37  ;;  %2335 = vmatpush2.bf16.msra.mxu0 %v7314_v63  ;;  %v1020_v44 = vmax.f32 %v681_v22, 0.0  ;;  %v1022_v49 = vmax.f32 %v874_v25, 0.0  ;;  %2528 = vmatpush2.bf16.msra.mxu1 %v7317_v19  ;;  %v7331_v22 = vld [vmem:[#allocation2 + $0x36c] ss:$16 sps:$4 sm:$0xff]  }
 0x158   : > { %v686_v52 = vpop.f32.mrf.mxu0  ;;  %v879_v53 = vpop.f32.mrf.mxu1  ;;  %2336 = vmatprep.subr.bf16.mxu0 %v7322_v20  ;;  %2529 = vmatprep.subr.bf16.mxu1 %v7325_v26  ;;  %v7329_v26 = vld [vmem:[#allocation2 + $0x368] ss:$16 sps:$4 sm:$0xff]  }
 0x159   : > { %v1021_v56 = vmax.f32 %v683_v41, 0.0  ;;  %v1023_v57 = vmax.f32 %v876_v42, 0.0  ;;  %v8136_v19 = vpack.c.bf16 %v1020_v44, %v1016_v58  ;;  %v8138_v20 = vpack.c.bf16 %v1022_v49, %v1018_v59  ;;  %v7337_v41 = vld [vmem:[#allocation2 + $0x34c] ss:$16 sps:$4 sm:$0xff]  }
 0x15a   : > { %v688_v60 = vpop.f32.mrf.mxu0  ;;  %v881_v15 = vpop.f32.mrf.mxu1  ;;  %v687_v42 = vadd.f32 %v686_v52, %v7999_v38  ;;  %v7335_v52 = vld [vmem:[#allocation2 + $0x348] ss:$16 sps:$4 sm:$0xff]  }
 0x15b   : > { %v8132_v5 = vpack.c.bf16 %v1021_v56, %v1017_v54  ;;  %v8134_v63 = vpack.c.bf16 %v1023_v57, %v1019_v55  ;;  %2337 = vmatpush2.bf16.msra.mxu0 %v7320_v43  ;;  %v689_v11 = vadd.f32 %v688_v60, %v7993_v36  ;;  %2530 = vmatpush2.bf16.msra.mxu1 %v7323_v45  ;;  %v7332_v54 = vld [vmem:[#allocation2 + $0x148] ss:$16 sps:$4 sm:$0xff]  }
 0x15c   : > { %v690_v21 = vpop.f32.mrf.mxu0  ;;  %v883_v25 = vpop.f32.mrf.mxu1  ;;  %2338 = vmatprep.subr.bf16.mxu0 %v7328_v48  ;;  %v882_v34 = vadd.f32 %v881_v15, %v7996_v37  ;;  %v880_v43 = vadd.f32 %v879_v53, %v8002_v39  ;;  %2531 = vmatprep.subr.bf16.mxu1 %v7331_v22  ;;  %v7340_v53 = vld [vmem:[#allocation2 + $0x12c] ss:$16 sps:$4 sm:$0xff]  }
 0x15d   : > { %v691_v35 = vadd.f32 %v690_v21, %v7999_v38  ;;  %v884_v40 = vadd.f32 %v883_v25, %v8002_v39  ;;  %2020 = vmatprep.mubr.bf16.mxu0 %v8132_v5  ;;  %2213 = vmatprep.mubr.bf16.mxu1 %v8134_v63  ;;  %v1025_v59 = vmax.f32 %v689_v11, 0.0  ;;  %v1024_v25 = vmax.f32 %v687_v42, 0.0  ;;  %v7346_v42 = vld [vmem:[#allocation2 + $0x10c] ss:$16 sps:$4 sm:$0xff]  }
 0x15e   : > { %v692_v44 = vpop.f32.mrf.mxu0  ;;  %v885_v49 = vpop.f32.mrf.mxu1  ;;  %2021 = vmatmul.mubr.bf16.gmra.mxu0 %v8136_v19  ;;  %2214 = vmatmul.mubr.bf16.gmra.mxu1 %v8138_v20  ;;  %v1027_v60 = vmax.f32 %v882_v34, 0.0 }
 0x15f   : > { %v693_v45 = vadd.f32 %v692_v44, %v7993_v36  ;;  %v886_v48 = vadd.f32 %v885_v49, %v7996_v37  ;;  %2339 = vmatpush2.bf16.msra.mxu0 %v7326_v18  ;;  %v1028_v55 = vmax.f32 %v691_v35, 0.0  ;;  %v1030_v56 = vmax.f32 %v884_v40, 0.0  ;;  %2532 = vmatpush2.bf16.msra.mxu1 %v7329_v26  ;;  %v7338_v35 = vld [vmem:[#allocation2 + $0x128] ss:$16 sps:$4 sm:$0xff]   ;;  %v7343_v40 = vld [vmem:[#allocation2 + $0x32c] ss:$16 sps:$4 sm:$0xff]  }
 0x160   : > { %v696_v57 = vpop.f32.mrf.mxu0  ;;  %v889_v58 = vpop.f32.mrf.mxu1  ;;  %2340 = vmatprep.subr.bf16.mxu0 %v7334_v0  ;;  %2533 = vmatprep.subr.bf16.mxu1 %v7337_v41  ;;  %v1026_v44 = vmax.f32 %v880_v43, 0.0  ;;  %v7341_v41 = vld [vmem:[#allocation2 + $0x328] ss:$16 sps:$4 sm:$0xff]  }
 0x161   : > { %v1029_v15 = vmax.f32 %v693_v45, 0.0  ;;  %v1031_v21 = vmax.f32 %v886_v48, 0.0  ;;  %v8156_v26 = vpack.c.bf16 %v1028_v55, %v1024_v25  ;;  %v7349_v55 = vld [vmem:[#allocation2 + $0x30c] ss:$16 sps:$4 sm:$0xff]  }
 0x162   : > { %v698_v31 = vpop.f32.mrf.mxu0  ;;  %v891_v49 = vpop.f32.mrf.mxu1  ;;  %v8158_v0 = vpack.c.bf16 %v1030_v56, %v1026_v44  ;;  %v697_v56 = vadd.f32 %v696_v57, %v7999_v38  ;;  %v7347_v57 = vld [vmem:[#allocation2 + $0x308] ss:$16 sps:$4 sm:$0xff]  }
 0x163   : > { %v8152_v22 = vpack.c.bf16 %v1029_v15, %v1025_v59  ;;  %v8154_v18 = vpack.c.bf16 %v1031_v21, %v1027_v60  ;;  %2341 = vmatpush2.bf16.msra.mxu0 %v7332_v54  ;;  %v699_v11 = vadd.f32 %v698_v31, %v7993_v36  ;;  %2534 = vmatpush2.bf16.msra.mxu1 %v7335_v52  ;;  %v7344_v15 = vld [vmem:[#allocation2 + $0x108] ss:$16 sps:$4 sm:$0xff]  }
 0x164   : > { %v700_v34 = vpop.f32.mrf.mxu0  ;;  %v893_v45 = vpop.f32.mrf.mxu1  ;;  %2342 = vmatprep.subr.bf16.mxu0 %v7340_v53  ;;  %v892_v43 = vadd.f32 %v891_v49, %v7996_v37  ;;  %v890_v31 = vadd.f32 %v889_v58, %v8002_v39  ;;  %2535 = vmatprep.subr.bf16.mxu1 %v7343_v40  ;;  %v1032_v30 = vmax.f32 %v697_v56, 0.0 }
 0x165   : > { %v701_v48 = vadd.f32 %v700_v34, %v7999_v38  ;;  %v894_v54 = vadd.f32 %v893_v45, %v8002_v39  ;;  %2030 = vmatprep.mubr.bf16.mxu0 %v8152_v22  ;;  %2223 = vmatprep.mubr.bf16.mxu1 %v8154_v18  ;;  %v1033_v58 = vmax.f32 %v699_v11, 0.0 }
 0x166   : > { %v702_v59 = vpop.f32.mrf.mxu0  ;;  %v895_v52 = vpop.f32.mrf.mxu1  ;;  %2031 = vmatmul.mubr.bf16.gmra.mxu0 %v8156_v26  ;;  %2224 = vmatmul.mubr.bf16.gmra.mxu1 %v8158_v0  ;;  %v1035_v34 = vmax.f32 %v892_v43, 0.0  ;;  %v1034_v32 = vmax.f32 %v890_v31, 0.0 }
 0x167   : > { %v703_v53 = vadd.f32 %v702_v59, %v7993_v36  ;;  %v896_v60 = vadd.f32 %v895_v52, %v7996_v37  ;;  %2343 = vmatpush2.bf16.msra.mxu0 %v7338_v35  ;;  %v1036_v21 = vmax.f32 %v701_v48, 0.0  ;;  %v1038_v25 = vmax.f32 %v894_v54, 0.0  ;;  %2536 = vmatpush2.bf16.msra.mxu1 %v7341_v41 }
 0x168   : > { %v706_v44 = vpop.f32.mrf.mxu0  ;;  %v899_v49 = vpop.f32.mrf.mxu1  ;;  %2344 = vmatprep.subr.bf16.mxu0 %v7346_v42  ;;  %2537 = vmatprep.subr.bf16.mxu1 %v7349_v55 }
 0x169   : > { %v1037_v45 = vmax.f32 %v703_v53, 0.0  ;;  %v1039_v33 = vmax.f32 %v896_v60, 0.0  ;;  %v8176_v40 = vpack.c.bf16 %v1036_v21, %v1032_v30  ;;  %v8178_v48 = vpack.c.bf16 %v1038_v25, %v1034_v32 }
 0x16a   : > { %v708_v59 = vpop.f32.mrf.mxu0  ;;  %v901_v29 = vpop.f32.mrf.mxu1  ;;  %v707_v30 = vadd.f32 %v706_v44, %v7999_v38  ;;  %v900_v32 = vadd.f32 %v899_v49, %v8002_v39 }
 0x16b   : > { %v8172_v52 = vpack.c.bf16 %v1037_v45, %v1033_v58  ;;  %v8174_v35 = vpack.c.bf16 %v1039_v33, %v1035_v34  ;;  %2345 = vmatpush2.bf16.msra.mxu0 %v7344_v15  ;;  %12547 = vst [vmem:[#allocation20_spill] sm:$0xff] %v8178_v48  ;;  %v709_v41 = vadd.f32 %v708_v59, %v7993_v36 }
 0x16c   : > { %v710_v11 = vpop.f32.mrf.mxu0  ;;  %v903_v42 = vpop.f32.mrf.mxu1  ;;  %2538 = vmatpush2.bf16.msra.mxu1 %v7347_v57  ;;  %v902_v43 = vadd.f32 %v901_v29, %v7996_v37  ;;  %v1040_v34 = vmax.f32 %v707_v30, 0.0  ;;  %v1042_v49 = vmax.f32 %v900_v32, 0.0 }
 0x16d   : > { %v711_v54 = vadd.f32 %v710_v11, %v7999_v38  ;;  %v904_v55 = vadd.f32 %v903_v42, %v8002_v39  ;;  %2040 = vmatprep.mubr.bf16.mxu0 %v8172_v52  ;;  %2233 = vmatprep.mubr.bf16.mxu1 %v8174_v35  ;;  %v1041_v25 = vmax.f32 %v709_v41, 0.0 }
 0x16e   : > { %v712_v33 = vpop.f32.mrf.mxu0  ;;  %v905_v56 = vpop.f32.mrf.mxu1  ;;  %2041 = vmatmul.mubr.bf16.gmra.mxu0 %v8176_v40  ;;  %2234 = vmatmul.mubr.bf16.gmra.mxu1 %v8178_v48  ;;  %v1043_v57 = vmax.f32 %v902_v43, 0.0 }
 0x16f   : > { %v713_v29 = vadd.f32 %v712_v33, %v7993_v36  ;;  %v906_v31 = vadd.f32 %v905_v56, %v7996_v37  ;;  %v1044_v53 = vmax.f32 %v711_v54, 0.0  ;;  %v1046_v60 = vmax.f32 %v904_v55, 0.0 }
 0x170   : > { %v716_v15 = vpop.f32.mrf.mxu0  ;;  %v909_v21 = vpop.f32.mrf.mxu1 }
 0x171   : > { %v1045_v58 = vmax.f32 %v713_v29, 0.0  ;;  %v1047_v44 = vmax.f32 %v906_v31, 0.0  ;;  %v8196_v48 = vpack.c.bf16 %v1044_v53, %v1040_v34  ;;  %v8198_v33 = vpack.c.bf16 %v1046_v60, %v1042_v49 }
 0x172   : > { %v718_v45 = vpop.f32.mrf.mxu0  ;;  %v911_v59 = vpop.f32.mrf.mxu1  ;;  %v717_v32 = vadd.f32 %v716_v15, %v7999_v38  ;;  %v910_v29 = vadd.f32 %v909_v21, %v8002_v39 }
 0x173   : > { %v8192_v11 = vpack.c.bf16 %v1045_v58, %v1041_v25  ;;  %v8194_v42 = vpack.c.bf16 %v1047_v44, %v1043_v57  ;;  %12550 = vst [vmem:[#allocation23_spill] sm:$0xff] %v8196_v48  ;;  %12551 = vst [vmem:[#allocation24_spill] sm:$0xff] %v8198_v33  ;;  %v719_v54 = vadd.f32 %v718_v45, %v7993_v36 }
 0x174   : > { %v720_v55 = vpop.f32.mrf.mxu0  ;;  %v913_v56 = vpop.f32.mrf.mxu1  ;;  %v912_v41 = vadd.f32 %v911_v59, %v7996_v37  ;;  %v1050_v21 = vmax.f32 %v910_v29, 0.0 }
 0x175   : > { %12548 = vst [vmem:[#allocation21_spill] sm:$0xff] %v8192_v11  ;;  %12549 = vst [vmem:[#allocation22_spill] sm:$0xff] %v8194_v42  ;;  %v721_v43 = vadd.f32 %v720_v55, %v7999_v38  ;;  %v914_v30 = vadd.f32 %v913_v56, %v8002_v39  ;;  %2050 = vmatprep.mubr.bf16.mxu0 %v8192_v11  ;;  %2243 = vmatprep.mubr.bf16.mxu1 %v8194_v42  ;;  %v1049_v49 = vmax.f32 %v719_v54, 0.0 }
 0x176   : > { %v722_v31 = vpop.f32.mrf.mxu0  ;;  %v915_v53 = vpop.f32.mrf.mxu1  ;;  %2051 = vmatmul.mubr.bf16.gmra.mxu0 %v8196_v48  ;;  %2244 = vmatmul.mubr.bf16.gmra.mxu1 %v8198_v33  ;;  %v1051_v45 = vmax.f32 %v912_v41, 0.0  ;;  %v1048_v55 = vmax.f32 %v717_v32, 0.0 }
 0x177   : > { %v723_v60 = vadd.f32 %v722_v31, %v7993_v36  ;;  %v916_v25 = vadd.f32 %v915_v53, %v7996_v37  ;;  %v1052_v57 = vmax.f32 %v721_v43, 0.0  ;;  %v1054_v58 = vmax.f32 %v914_v30, 0.0 }
 0x178   : > { %v726_v44 = vpop.f32.mrf.mxu0  ;;  %v919_v34 = vpop.f32.mrf.mxu1 }
 0x179   : > { %v1053_v59 = vmax.f32 %v723_v60, 0.0  ;;  %v1055_v15 = vmax.f32 %v916_v25, 0.0  ;;  %v8216_v33 = vpack.c.bf16 %v1052_v57, %v1048_v55  ;;  %v8218_v31 = vpack.c.bf16 %v1054_v58, %v1050_v21 }
 0x17a   : > { %v728_v56 = vpop.f32.mrf.mxu0  ;;  %v921_v42 = vpop.f32.mrf.mxu1  ;;  %v727_v29 = vadd.f32 %v726_v44, %v7999_v38  ;;  %v920_v60 = vadd.f32 %v919_v34, %v8002_v39 }
 0x17b   : > { %v8212_v11 = vpack.c.bf16 %v1053_v59, %v1049_v49  ;;  %v8214_v48 = vpack.c.bf16 %v1055_v15, %v1051_v45  ;;  %12554 = vst [vmem:[#allocation27_spill] sm:$0xff] %v8216_v33  ;;  %12555 = vst [vmem:[#allocation28_spill] sm:$0xff] %v8218_v31  ;;  %v729_v43 = vadd.f32 %v728_v56, %v7993_v36 }
 0x17c   : > { %v730_v30 = vpop.f32.mrf.mxu0  ;;  %v923_v53 = vpop.f32.mrf.mxu1  ;;  %v922_v54 = vadd.f32 %v921_v42, %v7996_v37  ;;  %v1058_v34 = vmax.f32 %v920_v60, 0.0 }
 0x17d   : > { %12552 = vst [vmem:[#allocation25_spill] sm:$0xff] %v8212_v11  ;;  %12553 = vst [vmem:[#allocation26_spill] sm:$0xff] %v8214_v48  ;;  %v731_v41 = vadd.f32 %v730_v30, %v7999_v38  ;;  %v924_v32 = vadd.f32 %v923_v53, %v8002_v39  ;;  %2060 = vmatprep.mubr.bf16.mxu0 %v8212_v11  ;;  %2253 = vmatprep.mubr.bf16.mxu1 %v8214_v48  ;;  %v1057_v55 = vmax.f32 %v729_v43, 0.0 }
 0x17e   : > { %v732_v25 = vpop.f32.mrf.mxu0  ;;  %v925_v57 = vpop.f32.mrf.mxu1  ;;  %2061 = vmatmul.mubr.bf16.gmra.mxu0 %v8216_v33  ;;  %2254 = vmatmul.mubr.bf16.gmra.mxu1 %v8218_v31  ;;  %v1059_v21 = vmax.f32 %v922_v54, 0.0  ;;  %v1056_v30 = vmax.f32 %v727_v29, 0.0 }
 0x17f   : > { %v733_v42 = vadd.f32 %v732_v25, %v7993_v36  ;;  %v926_v58 = vadd.f32 %v925_v57, %v7996_v37  ;;  %v1060_v49 = vmax.f32 %v731_v41, 0.0  ;;  %v1062_v45 = vmax.f32 %v924_v32, 0.0 }
 0x180   : > { %v736_v59 = vpop.f32.mrf.mxu0  ;;  %v929_v15 = vpop.f32.mrf.mxu1 }
 0x181   : > { %v1061_v56 = vmax.f32 %v733_v42, 0.0  ;;  %v1063_v44 = vmax.f32 %v926_v58, 0.0  ;;  %v8236_v31 = vpack.c.bf16 %v1060_v49, %v1056_v30  ;;  %v8238_v25 = vpack.c.bf16 %v1062_v45, %v1058_v34 }
 0x182   : > { %v738_v53 = vpop.f32.mrf.mxu0  ;;  %v931_v48 = vpop.f32.mrf.mxu1  ;;  %v737_v60 = vadd.f32 %v736_v59, %v7999_v38  ;;  %v930_v42 = vadd.f32 %v929_v15, %v8002_v39 }
 0x183   : > { %v8232_v11 = vpack.c.bf16 %v1061_v56, %v1057_v55  ;;  %v8234_v33 = vpack.c.bf16 %v1063_v44, %v1059_v21  ;;  %12558 = vst [vmem:[#allocation31_spill] sm:$0xff] %v8236_v31  ;;  %12559 = vst [vmem:[#allocation32_spill] sm:$0xff] %v8238_v25  ;;  %v739_v41 = vadd.f32 %v738_v53, %v7993_v36 }
 0x184   : > { %v740_v32 = vpop.f32.mrf.mxu0  ;;  %v933_v57 = vpop.f32.mrf.mxu1  ;;  %v932_v43 = vadd.f32 %v931_v48, %v7996_v37  ;;  %v1066_v15 = vmax.f32 %v930_v42, 0.0 }
 0x185   : > { %12556 = vst [vmem:[#allocation29_spill] sm:$0xff] %v8232_v11  ;;  %12557 = vst [vmem:[#allocation30_spill] sm:$0xff] %v8234_v33  ;;  %v741_v54 = vadd.f32 %v740_v32, %v7999_v38  ;;  %v934_v29 = vadd.f32 %v933_v57, %v8002_v39  ;;  %2070 = vmatprep.mubr.bf16.mxu0 %v8232_v11  ;;  %2263 = vmatprep.mubr.bf16.mxu1 %v8234_v33  ;;  %v1065_v30 = vmax.f32 %v739_v41, 0.0 }
 0x186   : > { %v742_v58 = vpop.f32.mrf.mxu0  ;;  %v935_v49 = vpop.f32.mrf.mxu1  ;;  %2071 = vmatmul.mubr.bf16.gmra.mxu0 %v8236_v31  ;;  %2264 = vmatmul.mubr.bf16.gmra.mxu1 %v8238_v25  ;;  %v1067_v34 = vmax.f32 %v932_v43, 0.0  ;;  %v1064_v32 = vmax.f32 %v737_v60, 0.0 }
 0x187   : > { %v743_v48 = vadd.f32 %v742_v58, %v7993_v36  ;;  %v936_v45 = vadd.f32 %v935_v49, %v7996_v37  ;;  %v1068_v55 = vmax.f32 %v741_v54, 0.0  ;;  %v1070_v21 = vmax.f32 %v934_v29, 0.0 }
 0x188   : > { %v746_v56 = vpop.f32.mrf.mxu0  ;;  %v939_v44 = vpop.f32.mrf.mxu1 }
 0x189   : > { %v1069_v53 = vmax.f32 %v743_v48, 0.0  ;;  %v1071_v59 = vmax.f32 %v936_v45, 0.0  ;;  %v8256_v25 = vpack.c.bf16 %v1068_v55, %v1064_v32  ;;  %v8258_v58 = vpack.c.bf16 %v1070_v21, %v1066_v15 }
 0x18a   : > { %v748_v57 = vpop.f32.mrf.mxu0  ;;  %v941_v33 = vpop.f32.mrf.mxu1  ;;  %v747_v42 = vadd.f32 %v746_v56, %v7999_v38  ;;  %v940_v48 = vadd.f32 %v939_v44, %v8002_v39 }
 0x18b   : > { %v8252_v11 = vpack.c.bf16 %v1069_v53, %v1065_v30  ;;  %v8254_v31 = vpack.c.bf16 %v1071_v59, %v1067_v34  ;;  %12562 = vst [vmem:[#allocation35_spill] sm:$0xff] %v8256_v25  ;;  %12563 = vst [vmem:[#allocation36_spill] sm:$0xff] %v8258_v58  ;;  %v749_v54 = vadd.f32 %v748_v57, %v7993_v36 }
 0x18c   : > { %v750_v29 = vpop.f32.mrf.mxu0  ;;  %v943_v49 = vpop.f32.mrf.mxu1  ;;  %v942_v41 = vadd.f32 %v941_v33, %v7996_v37  ;;  %v1074_v44 = vmax.f32 %v940_v48, 0.0 }
 0x18d   : > { %12560 = vst [vmem:[#allocation33_spill] sm:$0xff] %v8252_v11  ;;  %12561 = vst [vmem:[#allocation34_spill] sm:$0xff] %v8254_v31  ;;  %v751_v43 = vadd.f32 %v750_v29, %v7999_v38  ;;  %v944_v60 = vadd.f32 %v943_v49, %v8002_v39  ;;  %2080 = vmatprep.mubr.bf16.mxu0 %v8252_v11  ;;  %2273 = vmatprep.mubr.bf16.mxu1 %v8254_v31  ;;  %v1073_v32 = vmax.f32 %v749_v54, 0.0 }
 0x18e   : > { %v752_v45 = vpop.f32.mrf.mxu0  ;;  %v945_v55 = vpop.f32.mrf.mxu1  ;;  %2081 = vmatmul.mubr.bf16.gmra.mxu0 %v8256_v25  ;;  %2274 = vmatmul.mubr.bf16.gmra.mxu1 %v8258_v58  ;;  %v1075_v15 = vmax.f32 %v942_v41, 0.0  ;;  %v1072_v29 = vmax.f32 %v747_v42, 0.0 }
 0x18f   : > { %v753_v33 = vadd.f32 %v752_v45, %v7993_v36  ;;  %v946_v21 = vadd.f32 %v945_v55, %v7996_v37  ;;  %v1076_v30 = vmax.f32 %v751_v43, 0.0  ;;  %v1078_v34 = vmax.f32 %v944_v60, 0.0 }
 0x190   : > { %v756_v53 = vpop.f32.mrf.mxu0  ;;  %v949_v59 = vpop.f32.mrf.mxu1 }
 0x191   : > { %v1077_v57 = vmax.f32 %v753_v33, 0.0  ;;  %v1079_v56 = vmax.f32 %v946_v21, 0.0  ;;  %v8276_v58 = vpack.c.bf16 %v1076_v30, %v1072_v29  ;;  %v8278_v45 = vpack.c.bf16 %v1078_v34, %v1074_v44 }
 0x192   : > { %v758_v49 = vpop.f32.mrf.mxu0  ;;  %v951_v31 = vpop.f32.mrf.mxu1  ;;  %v757_v48 = vadd.f32 %v756_v53, %v7999_v38  ;;  %v950_v33 = vadd.f32 %v949_v59, %v8002_v39 }
 0x193   : > { %v8272_v11 = vpack.c.bf16 %v1077_v57, %v1073_v32  ;;  %v8274_v25 = vpack.c.bf16 %v1079_v56, %v1075_v15  ;;  %12566 = vst [vmem:[#allocation39_spill] sm:$0xff] %v8276_v58  ;;  %12567 = vst [vmem:[#allocation40_spill] sm:$0xff] %v8278_v45  ;;  %v759_v43 = vadd.f32 %v758_v49, %v7993_v36 }
 0x194   : > { %v760_v60 = vpop.f32.mrf.mxu0  ;;  %v953_v55 = vpop.f32.mrf.mxu1  ;;  %v952_v54 = vadd.f32 %v951_v31, %v7996_v37  ;;  %v1082_v59 = vmax.f32 %v950_v33, 0.0 }
 0x195   : > { %12564 = vst [vmem:[#allocation37_spill] sm:$0xff] %v8272_v11  ;;  %12565 = vst [vmem:[#allocation38_spill] sm:$0xff] %v8274_v25  ;;  %v761_v41 = vadd.f32 %v760_v60, %v7999_v38  ;;  %v954_v42 = vadd.f32 %v953_v55, %v8002_v39  ;;  %2090 = vmatprep.mubr.bf16.mxu0 %v8272_v11  ;;  %2283 = vmatprep.mubr.bf16.mxu1 %v8274_v25  ;;  %v1081_v29 = vmax.f32 %v759_v43, 0.0 }
 0x196   : > { %v762_v21 = vpop.f32.mrf.mxu0  ;;  %v955_v30 = vpop.f32.mrf.mxu1  ;;  %2091 = vmatmul.mubr.bf16.gmra.mxu0 %v8276_v58  ;;  %2284 = vmatmul.mubr.bf16.gmra.mxu1 %v8278_v45  ;;  %v1083_v44 = vmax.f32 %v952_v54, 0.0  ;;  %v1080_v60 = vmax.f32 %v757_v48, 0.0 }
 0x197   : > { %v763_v31 = vadd.f32 %v762_v21, %v7993_v36  ;;  %v956_v34 = vadd.f32 %v955_v30, %v7996_v37  ;;  %v1084_v32 = vmax.f32 %v761_v41, 0.0  ;;  %v1086_v15 = vmax.f32 %v954_v42, 0.0 }
 0x198   : > { %v766_v57 = vpop.f32.mrf.mxu0  ;;  %v959_v56 = vpop.f32.mrf.mxu1 }
 0x199   : > { %v1085_v49 = vmax.f32 %v763_v31, 0.0  ;;  %v1087_v53 = vmax.f32 %v956_v34, 0.0  ;;  %v8296_v45 = vpack.c.bf16 %v1084_v32, %v1080_v60  ;;  %v8298_v21 = vpack.c.bf16 %v1086_v15, %v1082_v59 }
 0x19a   : > { %v768_v55 = vpop.f32.mrf.mxu0  ;;  %v961_v25 = vpop.f32.mrf.mxu1  ;;  %v767_v33 = vadd.f32 %v766_v57, %v7999_v38  ;;  %v960_v31 = vadd.f32 %v959_v56, %v8002_v39 }
 0x19b   : > { %v8292_v11 = vpack.c.bf16 %v1085_v49, %v1081_v29  ;;  %v8294_v58 = vpack.c.bf16 %v1087_v53, %v1083_v44  ;;  %v769_v41 = vadd.f32 %v768_v55, %v7993_v36  ;;  %v962_v43 = vadd.f32 %v961_v25, %v7996_v37 }
 0x19c   : > { %v770_v42 = vpop.f32.mrf.mxu0  ;;  %v963_v30 = vpop.f32.mrf.mxu1  ;;  %v1088_v55 = vmax.f32 %v767_v33, 0.0 }
 0x19d   : > { %v771_v54 = vadd.f32 %v770_v42, %v7999_v38  ;;  %v964_v48 = vadd.f32 %v963_v30, %v8002_v39  ;;  %2100 = vmatprep.mubr.bf16.mxu0 %v8292_v11  ;;  %2293 = vmatprep.mubr.bf16.mxu1 %v8294_v58  ;;  %v1089_v49 = vmax.f32 %v769_v41, 0.0  ;;  %v1091_v53 = vmax.f32 %v962_v43, 0.0  ;;  %v12587_v41 = vld [vmem:[#allocation30_spill] sm:$0xff] }
 0x19e   : > { %v772_v34 = vpop.f32.mrf.mxu0  ;;  %v965_v32 = vpop.f32.mrf.mxu1  ;;  %2101 = vmatmul.mubr.bf16.gmra.mxu0 %v8296_v45  ;;  %2294 = vmatmul.mubr.bf16.gmra.mxu1 %v8298_v21  ;;  %v1090_v38 = vmax.f32 %v960_v31, 0.0 }
 0x19f   : > { %v773_v25 = vadd.f32 %v772_v34, %v7993_v36  ;;  %v966_v15 = vadd.f32 %v965_v32, %v7996_v37  ;;  %v1092_v29 = vmax.f32 %v771_v54, 0.0  ;;  %v1094_v44 = vmax.f32 %v964_v48, 0.0 }
 0x1a1   : > { %v1093_v60 = vmax.f32 %v773_v25, 0.0  ;;  %v1095_v59 = vmax.f32 %v966_v15, 0.0  ;;  %v8316_v56 = vpack.c.bf16 %v1092_v29, %v1088_v55  ;;  %v8318_v42 = vpack.c.bf16 %v1094_v44, %v1090_v38  ;;  %v12591_v44 = vld [vmem:[#allocation31_spill] sm:$0xff] }
 0x1a3   : > { %v8312_v57 = vpack.c.bf16 %v1093_v60, %v1089_v49  ;;  %v8314_v39 = vpack.c.bf16 %v1095_v59, %v1091_v53  ;;  %v12592_v49 = vld [vmem:[#allocation32_spill] sm:$0xff]  ;;  %v12594_v60 = vld [vmem:[#allocation33_spill] sm:$0xff]  ;;  %v12595_v59 = vld [vmem:[#allocation34_spill] sm:$0xff] }
 0x1a5   : > { %2110 = vmatprep.mubr.bf16.mxu0 %v8312_v57  ;;  %2303 = vmatprep.mubr.bf16.mxu1 %v8314_v39 }
 0x1a6   : > { %2111 = vmatmul.mubr.bf16.gmra.mxu0 %v8316_v56  ;;  %2304 = vmatmul.mubr.bf16.gmra.mxu1 %v8318_v42 }
 0x1a7   : > { %2346 = vmatprep.mubr.bf16.mxu0 %v8012_v3  ;;  %2539 = vmatprep.mubr.bf16.mxu1 %v8014_v4  ;;  %v12568_v3 = vld [vmem:[#allocation20_spill] sm:$0xff] }
 0x1ae   : > { %2347 = vmatmul.mubr.bf16.vlgmr.msra.gmra.mxu0 %v8016_v7  ;;  %2540 = vmatmul.mubr.bf16.vlgmr.msra.gmra.mxu1 %v8018_v8  ;;  %v12570_v7 = vld [vmem:[#allocation21_spill] sm:$0xff]  ;;  %v12571_v8 = vld [vmem:[#allocation22_spill] sm:$0xff] }
 0x1af   : > { %2356 = vmatprep.mubr.bf16.mxu0 %v8032_v46  ;;  %2549 = vmatprep.mubr.bf16.mxu1 %v8034_v47 }
 0x1b6   : > { %2357 = vmatmul.mubr.bf16.gmra.mxu0 %v8036_v50  ;;  %2550 = vmatmul.mubr.bf16.gmra.mxu1 %v8038_v51 }
 0x1b7   : > { %2366 = vmatprep.mubr.bf16.mxu0 %v8052_v23  ;;  %2559 = vmatprep.mubr.bf16.mxu1 %v8054_v24 }
 0x1be   : > { %2367 = vmatmul.mubr.bf16.gmra.mxu0 %v8056_v27  ;;  %2560 = vmatmul.mubr.bf16.gmra.mxu1 %v8058_v28 }
 0x1bf   : > { %2376 = vmatprep.mubr.bf16.mxu0 %v8072_v12  ;;  %2569 = vmatprep.mubr.bf16.mxu1 %v8074_v13 }
 0x1c6   : > { %2377 = vmatmul.mubr.bf16.gmra.mxu0 %v8076_v16  ;;  %2570 = vmatmul.mubr.bf16.gmra.mxu1 %v8078_v17  ;;  %v12575_v17 = vld [vmem:[#allocation23_spill] sm:$0xff] }
 0x1c7   : > { %2386 = vmatprep.mubr.bf16.mxu0 %v8092_v1  ;;  %2579 = vmatprep.mubr.bf16.mxu1 %v8094_v2  ;;  %v12576_v1 = vld [vmem:[#allocation24_spill] sm:$0xff] }
 0x1ce   : > { %2387 = vmatmul.mubr.bf16.gmra.mxu0 %v8096_v9  ;;  %2580 = vmatmul.mubr.bf16.gmra.mxu1 %v8098_v10  ;;  %v12578_v9 = vld [vmem:[#allocation25_spill] sm:$0xff]  ;;  %v12579_v10 = vld [vmem:[#allocation26_spill] sm:$0xff] }
 0x1cf   : > { %2396 = vmatprep.mubr.bf16.mxu0 %v8112_v61  ;;  %2589 = vmatprep.mubr.bf16.mxu1 %v8114_v62 }
 0x1d6   : > { %2397 = vmatmul.mubr.bf16.gmra.mxu0 %v8116_v6  ;;  %2590 = vmatmul.mubr.bf16.gmra.mxu1 %v8118_v14 }
 0x1d7   : > { %2406 = vmatprep.mubr.bf16.mxu0 %v8132_v5  ;;  %2599 = vmatprep.mubr.bf16.mxu1 %v8134_v63 }
 0x1de   : > { %2407 = vmatmul.mubr.bf16.gmra.mxu0 %v8136_v19  ;;  %2600 = vmatmul.mubr.bf16.gmra.mxu1 %v8138_v20 }
 0x1df   : > { %2416 = vmatprep.mubr.bf16.mxu0 %v8152_v22  ;;  %2609 = vmatprep.mubr.bf16.mxu1 %v8154_v18 }
 0x1e6   : > { %2417 = vmatmul.mubr.bf16.gmra.mxu0 %v8156_v26  ;;  %2610 = vmatmul.mubr.bf16.gmra.mxu1 %v8158_v0  ;;  %v12583_v0 = vld [vmem:[#allocation27_spill] sm:$0xff] }
 0x1e7   : > { %2426 = vmatprep.mubr.bf16.mxu0 %v8172_v52  ;;  %2619 = vmatprep.mubr.bf16.mxu1 %v8174_v35  ;;  %v12584_v52 = vld [vmem:[#allocation28_spill] sm:$0xff] }
 0x1ee   : > { %v1962_v36 = vpop.f32.mrf.mxu0  ;;  %v2155_v37 = vpop.f32.mrf.mxu1  ;;  %2427 = vmatmul.mubr.bf16.gmra.mxu0 %v8176_v40  ;;  %2620 = vmatmul.mubr.bf16.gmra.mxu1 %v12568_v3  ;;  %v12586_v40 = vld [vmem:[#allocation29_spill] sm:$0xff] }
 0x1ef   : > { %v8360_v4 = vadd.f32 %v2155_v37, %v1962_v36  ;;  %2436 = vmatprep.mubr.bf16.mxu0 %v12570_v7  ;;  %2629 = vmatprep.mubr.bf16.mxu1 %v12571_v8 }
 0x1f0   : > { %v1964_v46 = vpop.f32.mrf.mxu0  ;;  %v2157_v47 = vpop.f32.mrf.mxu1 }
 0x1f1   : > { %12569 = vst [vmem:[#allocation20_spill] sm:$0xff] %v8360_v4  ;;  %v8364_v50 = vadd.f32 %v2157_v47, %v1964_v46 }
 0x1f2   : > { %v1966_v51 = vpop.f32.mrf.mxu0  ;;  %v2159_v23 = vpop.f32.mrf.mxu1 }
 0x1f3   : > { %12572 = vst [vmem:[#allocation21_spill] sm:$0xff] %v8364_v50  ;;  %v8366_v24 = vadd.f32 %v2159_v23, %v1966_v51 }
 0x1f4   : > { %v1968_v27 = vpop.f32.mrf.mxu0  ;;  %v2161_v28 = vpop.f32.mrf.mxu1 }
 0x1f5   : > { %12573 = vst [vmem:[#allocation22_spill] sm:$0xff] %v8366_v24  ;;  %v8368_v12 = vadd.f32 %v2161_v28, %v1968_v27  ;;  %v12599_v27 = vld [vmem:[#allocation35_spill] sm:$0xff]  ;;  %v12600_v28 = vld [vmem:[#allocation36_spill] sm:$0xff] }
 0x1f6   : > { %v1972_v13 = vpop.f32.mrf.mxu0  ;;  %v2165_v16 = vpop.f32.mrf.mxu1  ;;  %2437 = vmatmul.mubr.bf16.gmra.mxu0 %v12575_v17  ;;  %2630 = vmatmul.mubr.bf16.gmra.mxu1 %v12576_v1  ;;  %v12603_v17 = vld [vmem:[#allocation38_spill] sm:$0xff] }
 0x1f7   : > { %12574 = vst [vmem:[#allocation41_spill] sm:$0xff] %v8368_v12  ;;  %v8372_v2 = vadd.f32 %v2165_v16, %v1972_v13  ;;  %2446 = vmatprep.mubr.bf16.mxu0 %v12578_v9  ;;  %2639 = vmatprep.mubr.bf16.mxu1 %v12579_v10  ;;  %v12602_v16 = vld [vmem:[#allocation37_spill] sm:$0xff] }
 0x1f8   : > { %v1974_v61 = vpop.f32.mrf.mxu0  ;;  %v2167_v62 = vpop.f32.mrf.mxu1 }
 0x1f9   : > { %12577 = vst [vmem:[#allocation23_spill] sm:$0xff] %v8372_v2  ;;  %v8376_v6 = vadd.f32 %v2167_v62, %v1974_v61 }
 0x1fa   : > { %v1976_v14 = vpop.f32.mrf.mxu0  ;;  %v2169_v5 = vpop.f32.mrf.mxu1 }
 0x1fb   : > { %12580 = vst [vmem:[#allocation24_spill] sm:$0xff] %v8376_v6  ;;  %v8378_v63 = vadd.f32 %v2169_v5, %v1976_v14 }
 0x1fc   : > { %v1978_v19 = vpop.f32.mrf.mxu0  ;;  %v2171_v20 = vpop.f32.mrf.mxu1 }
 0x1fd   : > { %12581 = vst [vmem:[#allocation25_spill] sm:$0xff] %v8378_v63  ;;  %v8380_v22 = vadd.f32 %v2171_v20, %v1978_v19 }
 0x1fe   : > { %v1982_v18 = vpop.f32.mrf.mxu0  ;;  %v2175_v26 = vpop.f32.mrf.mxu1  ;;  %2447 = vmatmul.mubr.bf16.gmra.mxu0 %v12583_v0  ;;  %2640 = vmatmul.mubr.bf16.gmra.mxu1 %v12584_v52  ;;  %v12607_v0 = vld [vmem:[#allocation40_spill] sm:$0xff] }
 0x1ff   : > { %12582 = vst [vmem:[#allocation26_spill] sm:$0xff] %v8380_v22  ;;  %v8384_v35 = vadd.f32 %v2175_v26, %v1982_v18  ;;  %2456 = vmatprep.mubr.bf16.mxu0 %v12586_v40  ;;  %2649 = vmatprep.mubr.bf16.mxu1 %v12587_v41  ;;  %v12606_v26 = vld [vmem:[#allocation39_spill] sm:$0xff] }
 0x200   : > { %v1984_v30 = vpop.f32.mrf.mxu0  ;;  %v2177_v43 = vpop.f32.mrf.mxu1 }
 0x201   : > { %12585 = vst [vmem:[#allocation27_spill] sm:$0xff] %v8384_v35  ;;  %v8388_v54 = vadd.f32 %v2177_v43, %v1984_v30 }
 0x202   : > { %v1986_v48 = vpop.f32.mrf.mxu0  ;;  %v2179_v33 = vpop.f32.mrf.mxu1 }
 0x203   : > { %12588 = vst [vmem:[#allocation28_spill] sm:$0xff] %v8388_v54  ;;  %v8390_v31 = vadd.f32 %v2179_v33, %v1986_v48 }
 0x204   : > { %v1988_v34 = vpop.f32.mrf.mxu0  ;;  %v2181_v32 = vpop.f32.mrf.mxu1 }
 0x205   : > { %12589 = vst [vmem:[#allocation29_spill] sm:$0xff] %v8390_v31  ;;  %v8392_v25 = vadd.f32 %v2181_v32, %v1988_v34 }
 0x206   : > { %v1992_v15 = vpop.f32.mrf.mxu0  ;;  %v2185_v29 = vpop.f32.mrf.mxu1  ;;  %2457 = vmatmul.mubr.bf16.gmra.mxu0 %v12591_v44  ;;  %2650 = vmatmul.mubr.bf16.gmra.mxu1 %v12592_v49 }
 0x207   : > { %12590 = vst [vmem:[#allocation30_spill] sm:$0xff] %v8392_v25  ;;  %v8396_v53 = vadd.f32 %v2185_v29, %v1992_v15  ;;  %2466 = vmatprep.mubr.bf16.mxu0 %v12594_v60  ;;  %2659 = vmatprep.mubr.bf16.mxu1 %v12595_v59 }
 0x208   : > { %v1994_v55 = vpop.f32.mrf.mxu0  ;;  %v2187_v38 = vpop.f32.mrf.mxu1 }
 0x209   : > { %12593 = vst [vmem:[#allocation31_spill] sm:$0xff] %v8396_v53  ;;  %v8400_v36 = vadd.f32 %v2187_v38, %v1994_v55 }
 0x20a   : > { %v1996_v37 = vpop.f32.mrf.mxu0  ;;  %v2189_v3 = vpop.f32.mrf.mxu1 }
 0x20b   : > { %12596 = vst [vmem:[#allocation32_spill] sm:$0xff] %v8400_v36  ;;  %v8402_v7 = vadd.f32 %v2189_v3, %v1996_v37 }
 0x20c   : > { %v1998_v8 = vpop.f32.mrf.mxu0  ;;  %v2191_v46 = vpop.f32.mrf.mxu1 }
 0x20d   : > { %12597 = vst [vmem:[#allocation33_spill] sm:$0xff] %v8402_v7  ;;  %v8404_v47 = vadd.f32 %v2191_v46, %v1998_v8 }
 0x20e   : > { %v2002_v51 = vpop.f32.mrf.mxu0  ;;  %v2195_v23 = vpop.f32.mrf.mxu1  ;;  %2467 = vmatmul.mubr.bf16.gmra.mxu0 %v12599_v27  ;;  %2660 = vmatmul.mubr.bf16.gmra.mxu1 %v12600_v28 }
 0x20f   : > { %12598 = vst [vmem:[#allocation34_spill] sm:$0xff] %v8404_v47  ;;  %v8408_v13 = vadd.f32 %v2195_v23, %v2002_v51  ;;  %2476 = vmatprep.mubr.bf16.mxu0 %v12602_v16  ;;  %2669 = vmatprep.mubr.bf16.mxu1 %v12603_v17 }
 0x210   : > { %v2004_v1 = vpop.f32.mrf.mxu0  ;;  %v2197_v9 = vpop.f32.mrf.mxu1 }
 0x211   : > { %12601 = vst [vmem:[#allocation35_spill] sm:$0xff] %v8408_v13  ;;  %v8412_v10 = vadd.f32 %v2197_v9, %v2004_v1 }
 0x212   : > { %v2006_v61 = vpop.f32.mrf.mxu0  ;;  %v2199_v62 = vpop.f32.mrf.mxu1 }
 0x213   : > { %12604 = vst [vmem:[#allocation36_spill] sm:$0xff] %v8412_v10  ;;  %v8414_v14 = vadd.f32 %v2199_v62, %v2006_v61 }
 0x214   : > { %v8416_v5 = vpop.f32.mrf.mxu0  ;;  %v8418_v19 = vpop.f32.mrf.mxu1 }
 0x215   : > { %12605 = vst [vmem:[#allocation37_spill] sm:$0xff] %v8414_v14 }
 0x216   : > { %v2012_v20 = vpop.f32.mrf.mxu0  ;;  %v2205_v18 = vpop.f32.mrf.mxu1  ;;  %2477 = vmatmul.mubr.bf16.gmra.mxu0 %v12606_v26  ;;  %2670 = vmatmul.mubr.bf16.gmra.mxu1 %v12607_v0 }
 0x217   : > { %v8422_v52 = vadd.f32 %v2205_v18, %v2012_v20  ;;  %2486 = vmatprep.mubr.bf16.mxu0 %v8292_v11  ;;  %2679 = vmatprep.mubr.bf16.mxu1 %v8294_v58 }
 0x218   : > { %v2014_v40 = vpop.f32.mrf.mxu0  ;;  %v2207_v41 = vpop.f32.mrf.mxu1 }
 0x219   : > { %12608 = vst [vmem:[#allocation38_spill] sm:$0xff] %v8422_v52  ;;  %v8426_v30 = vadd.f32 %v2207_v41, %v2014_v40 }
 0x21a   : > { %v2016_v43 = vpop.f32.mrf.mxu0  ;;  %v2209_v48 = vpop.f32.mrf.mxu1 }
 0x21b   : > { %12609 = vst [vmem:[#allocation39_spill] sm:$0xff] %v8426_v30  ;;  %v8428_v33 = vadd.f32 %v2209_v48, %v2016_v43 }
 0x21c   : > { %v8430_v34 = vpop.f32.mrf.mxu0  ;;  %v8432_v32 = vpop.f32.mrf.mxu1 }
 0x21d   : > { %12610 = vst [vmem:[#allocation40_spill] sm:$0xff] %v8428_v33 }
 0x21e   : > { %v2022_v15 = vpop.f32.mrf.mxu0  ;;  %v2215_v29 = vpop.f32.mrf.mxu1  ;;  %2487 = vmatmul.mubr.bf16.gmra.mxu0 %v8296_v45  ;;  %2680 = vmatmul.mubr.bf16.gmra.mxu1 %v8298_v21 }
 0x21f   : > { %v8436_v11 = vadd.f32 %v2215_v29, %v2022_v15  ;;  %2496 = vmatprep.mubr.bf16.mxu0 %v8312_v57  ;;  %2689 = vmatprep.mubr.bf16.mxu1 %v8314_v39  ;;  %v7350_v29 = vld [vmem:[#allocation5 + $0x70] ss:$8 sps:$4 sm:$0xff]  }
 0x220   : > { %v2024_v58 = vpop.f32.mrf.mxu0  ;;  %v2217_v44 = vpop.f32.mrf.mxu1 }
 0x221   : > { %12611 = vst [vmem:[#allocation42_spill] sm:$0xff] %v8436_v11  ;;  %v8440_v49 = vadd.f32 %v2217_v44, %v2024_v58  ;;  %v7352_v58 = vld [vmem:[#allocation5 + $0x74] ss:$8 sps:$4 sm:$0xff]   ;;  %v7353_v44 = vld [vmem:[#allocation5 + $0x170] ss:$8 sps:$4 sm:$0xff]  }
 0x222   : > { %v2026_v60 = vpop.f32.mrf.mxu0  ;;  %v2219_v59 = vpop.f32.mrf.mxu1  ;;  %4091 = vmatprep.subr.bf16.mxu0 %v7352_v58 }
 0x223   : > { %12612 = vst [vmem:[#allocation43_spill] sm:$0xff] %v8440_v49  ;;  %v8442_v55 = vadd.f32 %v2219_v59, %v2026_v60  ;;  %4092 = vmatpush1.bf16.msra.mxu0 %v7350_v29 }
 0x224   : > { %v8444_v38 = vpop.f32.mrf.mxu0  ;;  %v8446_v37 = vpop.f32.mrf.mxu1 }
 0x225   : > { %12613 = vst [vmem:[#allocation44_spill] sm:$0xff] %v8442_v55 }
 0x226   : > { %v2032_v45 = vpop.f32.mrf.mxu0  ;;  %v2225_v21 = vpop.f32.mrf.mxu1  ;;  %2497 = vmatmul.mubr.bf16.gmra.mxu0 %v8316_v56  ;;  %2690 = vmatmul.mubr.bf16.gmra.mxu1 %v8318_v42 }
 0x227   : > { %v8450_v57 = vadd.f32 %v2225_v21, %v2032_v45  ;;  %v7355_v45 = vld [vmem:[#allocation5 + $0x174] ss:$8 sps:$4 sm:$0xff]  }
 0x228   : > { %v2034_v39 = vpop.f32.mrf.mxu0  ;;  %v2227_v3 = vpop.f32.mrf.mxu1  ;;  %4284 = vmatprep.subr.bf16.mxu1 %v7355_v45 }
 0x229   : > { %12614 = vst [vmem:[#allocation45_spill] sm:$0xff] %v8450_v57  ;;  %v8452_v8 = vadd.f32 %v2227_v3, %v2034_v39  ;;  %4285 = vmatpush1.bf16.msra.mxu1 %v7353_v44 }
 0x22a   : > { %v2036_v46 = vpop.f32.mrf.mxu0  ;;  %v2229_v51 = vpop.f32.mrf.mxu1 }
 0x22b   : > { %12615 = vst [vmem:[#allocation46_spill] sm:$0xff] %v8452_v8  ;;  %v8454_v23 = vadd.f32 %v2229_v51, %v2036_v46 }
 0x22c   : > { %v8456_v27 = vpop.f32.mrf.mxu0  ;;  %v8458_v28 = vpop.f32.mrf.mxu1 }
 0x22d   : > { %12616 = vst [vmem:[#allocation47_spill] sm:$0xff] %v8454_v23 }
 0x22e   : > { %v2042_v16 = vpop.f32.mrf.mxu0  ;;  %v2235_v17 = vpop.f32.mrf.mxu1 }
 0x22f   : > { %v8460_v1 = vadd.f32 %v2235_v17, %v2042_v16 }
 0x230   : > { %v2044_v56 = vpop.f32.mrf.mxu0  ;;  %v2237_v42 = vpop.f32.mrf.mxu1 }
 0x231   : > { %12617 = vst [vmem:[#allocation48_spill] sm:$0xff] %v8460_v1  ;;  %v8462_v9 = vadd.f32 %v2237_v42, %v2044_v56 }
 0x232   : > { %v2046_v61 = vpop.f32.mrf.mxu0  ;;  %v2239_v62 = vpop.f32.mrf.mxu1 }
 0x233   : > { %12618 = vst [vmem:[#allocation49_spill] sm:$0xff] %v8462_v9  ;;  %v8464_v20 = vadd.f32 %v2239_v62, %v2046_v61  ;;  %v7356_v61 = vld [vmem:[#allocation5 + $0x60] ss:$8 sps:$4 sm:$0xff]   ;;  %v7358_v62 = vld [vmem:[#allocation5 + $0x64] ss:$8 sps:$4 sm:$0xff]  }
 0x234   : > { %v8466_v18 = vpop.f32.mrf.mxu0  ;;  %v8468_v26 = vpop.f32.mrf.mxu1  ;;  %4093 = vmatprep.subr.bf16.mxu0 %v7358_v62 }
 0x235   : > { %12619 = vst [vmem:[#allocation50_spill] sm:$0xff] %v8464_v20  ;;  %4094 = vmatpush1.bf16.msra.mxu0 %v7356_v61 }
 0x236   : > { %v2052_v0 = vpop.f32.mrf.mxu0  ;;  %v2245_v40 = vpop.f32.mrf.mxu1 }
 0x237   : > { %v8470_v41 = vadd.f32 %v2245_v40, %v2052_v0  ;;  %v7359_v0 = vld [vmem:[#allocation5 + $0x160] ss:$8 sps:$4 sm:$0xff]  }
 0x238   : > { %v2054_v43 = vpop.f32.mrf.mxu0  ;;  %v2247_v48 = vpop.f32.mrf.mxu1 }
 0x239   : > { %12620 = vst [vmem:[#allocation51_spill] sm:$0xff] %v8470_v41  ;;  %v8472_v15 = vadd.f32 %v2247_v48, %v2054_v43  ;;  %v7361_v48 = vld [vmem:[#allocation5 + $0x164] ss:$8 sps:$4 sm:$0xff]  }
 0x23a   : > { %v2056_v60 = vpop.f32.mrf.mxu0  ;;  %v2249_v59 = vpop.f32.mrf.mxu1  ;;  %4286 = vmatprep.subr.bf16.mxu1 %v7361_v48 }
 0x23b   : > { %12621 = vst [vmem:[#allocation52_spill] sm:$0xff] %v8472_v15  ;;  %v8474_v21 = vadd.f32 %v2249_v59, %v2056_v60  ;;  %4287 = vmatpush1.bf16.msra.mxu1 %v7359_v0 }
 0x23c   : > { %v8476_v39 = vpop.f32.mrf.mxu0  ;;  %v8478_v3 = vpop.f32.mrf.mxu1 }
 0x23d   : > { %12622 = vst [vmem:[#allocation53_spill] sm:$0xff] %v8474_v21 }
 0x23e   : > { %v2062_v46 = vpop.f32.mrf.mxu0  ;;  %v2255_v51 = vpop.f32.mrf.mxu1 }
 0x23f   : > { %v8480_v16 = vadd.f32 %v2255_v51, %v2062_v46 }
 0x240   : > { %v2064_v17 = vpop.f32.mrf.mxu0  ;;  %v2257_v56 = vpop.f32.mrf.mxu1 }
 0x241   : > { %12623 = vst [vmem:[#allocation54_spill] sm:$0xff] %v8480_v16  ;;  %v8482_v42 = vadd.f32 %v2257_v56, %v2064_v17  ;;  %v7362_v56 = vld [vmem:[#allocation5 + $0x50] ss:$8 sps:$4 sm:$0xff]  }
 0x242   : > { %v2066_v40 = vpop.f32.mrf.mxu0  ;;  %v2259_v43 = vpop.f32.mrf.mxu1 }
 0x243   : > { %12624 = vst [vmem:[#allocation55_spill] sm:$0xff] %v8482_v42  ;;  %v8484_v58 = vadd.f32 %v2259_v43, %v2066_v40  ;;  %v7364_v42 = vld [vmem:[#allocation5 + $0x54] ss:$8 sps:$4 sm:$0xff]   ;;  %v7365_v40 = vld [vmem:[#allocation5 + $0x150] ss:$8 sps:$4 sm:$0xff]  }
 0x244   : > { %v8486_v60 = vpop.f32.mrf.mxu0  ;;  %v8488_v29 = vpop.f32.mrf.mxu1  ;;  %4095 = vmatprep.subr.bf16.mxu0 %v7364_v42 }
 0x245   : > { %12625 = vst [vmem:[#allocation56_spill] sm:$0xff] %v8484_v58  ;;  %12626 = vst [vmem:[#allocation57_spill] sm:$0xff] %v8486_v60  ;;  %v7367_v58 = vld [vmem:[#allocation5 + $0x154] ss:$8 sps:$4 sm:$0xff]   ;;  %4096 = vmatpush1.bf16.msra.mxu0 %v7362_v56 }
 0x246   : > { %12627 = vst [vmem:[#allocation58_spill] sm:$0xff] %v8488_v29  ;;  %v2072_v44 = vpop.f32.mrf.mxu0  ;;  %v2265_v59 = vpop.f32.mrf.mxu1  ;;  %4288 = vmatprep.subr.bf16.mxu1 %v7367_v58  ;;  %v7370_v29 = vld [vmem:[#allocation5 + $0x44] ss:$8 sps:$4 sm:$0xff]  }
 0x247   : > { %v8490_v45 = vadd.f32 %v2265_v59, %v2072_v44  ;;  %4289 = vmatpush1.bf16.msra.mxu1 %v7365_v40  ;;  %4097 = vmatprep.subr.bf16.mxu0 %v7370_v29 }
 0x248   : > { %v2074_v46 = vpop.f32.mrf.mxu0  ;;  %v2267_v51 = vpop.f32.mrf.mxu1 }
 0x249   : > { %12628 = vst [vmem:[#allocation59_spill] sm:$0xff] %v8490_v45  ;;  %v8492_v17 = vadd.f32 %v2267_v51, %v2074_v46  ;;  %v7368_v45 = vld [vmem:[#allocation5 + $0x40] ss:$8 sps:$4 sm:$0xff]  }
 0x24a   : > { %v2076_v43 = vpop.f32.mrf.mxu0  ;;  %v2269_v62 = vpop.f32.mrf.mxu1  ;;  %4098 = vmatpush1.bf16.msra.mxu0 %v7368_v45 }
 0x24b   : > { %12629 = vst [vmem:[#allocation60_spill] sm:$0xff] %v8492_v17  ;;  %v8494_v60 = vadd.f32 %v2269_v62, %v2076_v43  ;;  %v7371_v43 = vld [vmem:[#allocation5 + $0x140] ss:$8 sps:$4 sm:$0xff]  }
 0x24c   : > { %v8496_v48 = vpop.f32.mrf.mxu0  ;;  %v8498_v61 = vpop.f32.mrf.mxu1 }
 0x24d   : > { %12630 = vst [vmem:[#allocation61_spill] sm:$0xff] %v8494_v60  ;;  %12631 = vst [vmem:[#allocation62_spill] sm:$0xff] %v8496_v48  ;;  %v7373_v60 = vld [vmem:[#allocation5 + $0x144] ss:$8 sps:$4 sm:$0xff]  }
 0x24e   : > { %12632 = vst [vmem:[#allocation63_spill] sm:$0xff] %v8498_v61  ;;  %v2082_v0 = vpop.f32.mrf.mxu0  ;;  %v2275_v44 = vpop.f32.mrf.mxu1  ;;  %4290 = vmatprep.subr.bf16.mxu1 %v7373_v60  ;;  %v7376_v61 = vld [vmem:[#allocation5 + $0x34] ss:$8 sps:$4 sm:$0xff]  }
 0x24f   : > { %v8500_v59 = vadd.f32 %v2275_v44, %v2082_v0  ;;  %4291 = vmatpush1.bf16.msra.mxu1 %v7371_v43  ;;  %4099 = vmatprep.subr.bf16.mxu0 %v7376_v61  ;;  %v2700_v61 = vadd.f32 %v8366_v24, %v8360_v4 }
 0x250   : > { %v2084_v46 = vpop.f32.mrf.mxu0  ;;  %v2277_v51 = vpop.f32.mrf.mxu1 }
 0x251   : > { %12633 = vst [vmem:[#allocation64_spill] sm:$0xff] %v8500_v59  ;;  %v8502_v17 = vadd.f32 %v2277_v51, %v2084_v46  ;;  %v7374_v59 = vld [vmem:[#allocation5 + $0x30] ss:$8 sps:$4 sm:$0xff]  }
 0x252   : > { %v2086_v62 = vpop.f32.mrf.mxu0  ;;  %v2279_v42 = vpop.f32.mrf.mxu1  ;;  %4100 = vmatpush1.bf16.msra.mxu0 %v7374_v59  ;;  %v2857_v59 = vmul.f32 %v8366_v24, %v8366_v24  ;;  %v2854_v24 = vmul.f32 %v8364_v50, %v8364_v50 }
 0x253   : > { %12634 = vst [vmem:[#allocation65_spill] sm:$0xff] %v8502_v17  ;;  %v8504_v48 = vadd.f32 %v2279_v42, %v2086_v62  ;;  %v7377_v62 = vld [vmem:[#allocation5 + $0x130] ss:$8 sps:$4 sm:$0xff]  }
 0x254   : > { %v8506_v58 = vpop.f32.mrf.mxu0  ;;  %v8508_v56 = vpop.f32.mrf.mxu1 }
 0x255   : > { %12635 = vst [vmem:[#allocation66_spill] sm:$0xff] %v8504_v48  ;;  %12636 = vst [vmem:[#allocation67_spill] sm:$0xff] %v8506_v58  ;;  %v7379_v48 = vld [vmem:[#allocation5 + $0x134] ss:$8 sps:$4 sm:$0xff]  }
 0x256   : > { %12637 = vst [vmem:[#allocation68_spill] sm:$0xff] %v8508_v56  ;;  %v2092_v40 = vpop.f32.mrf.mxu0  ;;  %v2285_v0 = vpop.f32.mrf.mxu1  ;;  %4292 = vmatprep.subr.bf16.mxu1 %v7379_v48  ;;  %v7382_v56 = vld [vmem:[#allocation5 + $0x24] ss:$8 sps:$4 sm:$0xff]  }
 0x257   : > { %v8510_v44 = vadd.f32 %v2285_v0, %v2092_v40  ;;  %4293 = vmatpush1.bf16.msra.mxu1 %v7377_v62  ;;  %4101 = vmatprep.subr.bf16.mxu0 %v7382_v56  ;;  %v2701_v62 = vadd.f32 %v2700_v61, %v8372_v2  ;;  %v2861_v56 = vmul.f32 %v8372_v2, %v8372_v2 }
 0x258   : > { %v2094_v46 = vpop.f32.mrf.mxu0  ;;  %v2287_v51 = vpop.f32.mrf.mxu1 }
 0x259   : > { %12638 = vst [vmem:[#allocation69_spill] sm:$0xff] %v8510_v44  ;;  %v8512_v17 = vadd.f32 %v2287_v51, %v2094_v46  ;;  %v7380_v44 = vld [vmem:[#allocation5 + $0x20] ss:$8 sps:$4 sm:$0xff]  }
 0x25a   : > { %v2096_v42 = vpop.f32.mrf.mxu0  ;;  %v2289_v29 = vpop.f32.mrf.mxu1  ;;  %4102 = vmatpush1.bf16.msra.mxu0 %v7380_v44  ;;  %v2737_v44 = vadd.f32 %v8368_v12, %v8364_v50  ;;  %v7386_v50 = vld [vmem:[#allocation5 + $0x10] ss:$8 sps:$4 sm:$0xff]  }
 0x25b   : > { %12639 = vst [vmem:[#allocation70_spill] sm:$0xff] %v8512_v17  ;;  %v8514_v58 = vadd.f32 %v2289_v29, %v2096_v42  ;;  %v7383_v42 = vld [vmem:[#allocation5 + $0x120] ss:$8 sps:$4 sm:$0xff]  }
 0x25c   : > { %v8516_v60 = vpop.f32.mrf.mxu0  ;;  %v8518_v45 = vpop.f32.mrf.mxu1 }
 0x25d   : > { %12640 = vst [vmem:[#allocation71_spill] sm:$0xff] %v8514_v58  ;;  %12641 = vst [vmem:[#allocation72_spill] sm:$0xff] %v8516_v60  ;;  %v7388_v58 = vld [vmem:[#allocation5 + $0x14] ss:$8 sps:$4 sm:$0xff]  }
 0x25e   : > { %12642 = vst [vmem:[#allocation73_spill] sm:$0xff] %v8518_v45  ;;  %v2102_v43 = vpop.f32.mrf.mxu0  ;;  %v2295_v40 = vpop.f32.mrf.mxu1  ;;  %v7385_v45 = vld [vmem:[#allocation5 + $0x124] ss:$8 sps:$4 sm:$0xff]   ;;  %4103 = vmatprep.subr.bf16.mxu0 %v7388_v58 }
 0x25f   : > { %v8520_v0 = vadd.f32 %v2295_v40, %v2102_v43  ;;  %4294 = vmatprep.subr.bf16.mxu1 %v7385_v45  ;;  %v2862_v45 = vmul.f32 %v8376_v6, %v8376_v6  ;;  %4104 = vmatpush1.bf16.msra.mxu0 %v7386_v50  ;;  %v2878_v50 = vmul.f32 %v8400_v36, %v8400_v36 }
 0x260   : > { %v2104_v46 = vpop.f32.mrf.mxu0  ;;  %v2297_v51 = vpop.f32.mrf.mxu1  ;;  %4295 = vmatpush1.bf16.msra.mxu1 %v7383_v42 }
 0x261   : > { %12643 = vst [vmem:[#allocation74_spill] sm:$0xff] %v8520_v0  ;;  %v8522_v17 = vadd.f32 %v2297_v51, %v2104_v46  ;;  %v2858_v46 = vmul.f32 %v8368_v12, %v8368_v12  ;;  %v2702_v51 = vadd.f32 %v2701_v62, %v8378_v63  ;;  %v2866_v0 = vmul.f32 %v8380_v22, %v8380_v22 }
 0x262   : > { %v2106_v29 = vpop.f32.mrf.mxu0  ;;  %v2299_v60 = vpop.f32.mrf.mxu1 }
 0x263   : > { %12644 = vst [vmem:[#allocation75_spill] sm:$0xff] %v8522_v17  ;;  %v8526_v48 = vadd.f32 %v2299_v60, %v2106_v29  ;;  %v2853_v60 = vmul.f32 %v8360_v4, %v8360_v4  ;;  %v2865_v4 = vmul.f32 %v8378_v63, %v8378_v63  ;;  %v2703_v2 = vadd.f32 %v2702_v51, %v8384_v35 }
 0x264   : > { %v8531_v43 = vpop.f32.mrf.mxu0  ;;  %v8533_v40 = vpop.f32.mrf.mxu1 }
 0x265   : > { %12645 = vst [vmem:[#allocation76_spill] sm:$0xff] %v8526_v48  ;;  %12646 = vst [vmem:[#allocation77_spill] sm:$0xff] %v8531_v43  ;;  %v2981_v17 = vadd.f32 %v2857_v59, %v2853_v60  ;;  %v3018_v43 = vadd.f32 %v2858_v46, %v2854_v24  ;;  %v2738_v48 = vadd.f32 %v2737_v44, %v8376_v6 }
 0x266   : > { %12647 = vst [vmem:[#allocation78_spill] sm:$0xff] %v8533_v40  ;;  %v2112_v29 = vpop.f32.mrf.mxu0  ;;  %v2305_v61 = vpop.f32.mrf.mxu1  ;;  %v2869_v59 = vmul.f32 %v8384_v35, %v8384_v35  ;;  %v2704_v60 = vadd.f32 %v2703_v2, %v8390_v31  ;;  %v2870_v44 = vmul.f32 %v8388_v54, %v8388_v54 }
 0x267   : > { %v8548_v42 = vadd.f32 %v2305_v61, %v2112_v29  ;;  %v7389_v29 = vld [vmem:[#allocation5 + $0x110] ss:$8 sps:$4 sm:$0xff]   ;;  %v2982_v61 = vadd.f32 %v2981_v17, %v2861_v56  ;;  %v3019_v24 = vadd.f32 %v3018_v43, %v2862_v45  ;;  %v2739_v46 = vadd.f32 %v2738_v48, %v8380_v22 }
 0x268   : > { %v2114_v62 = vpop.f32.mrf.mxu0  ;;  %v2307_v40 = vpop.f32.mrf.mxu1  ;;  %v2873_v17 = vmul.f32 %v8390_v31, %v8390_v31  ;;  %v2705_v56 = vadd.f32 %v2704_v60, %v8396_v53 }
 0x269   : > { %12648 = vst [vmem:[#allocation79_spill] sm:$0xff] %v8548_v42  ;;  %v8556_v12 = vadd.f32 %v2307_v40, %v2114_v62  ;;  %v7391_v42 = vld [vmem:[#allocation5 + $0x114] ss:$8 sps:$4 sm:$0xff]   ;;  %v2983_v62 = vadd.f32 %v2982_v61, %v2865_v4  ;;  %v3020_v43 = vadd.f32 %v3019_v24, %v2866_v0  ;;  %v2740_v48 = vadd.f32 %v2739_v46, %v8388_v54 }
 0x26a   : > { %v2116_v51 = vpop.f32.mrf.mxu0  ;;  %v2309_v63 = vpop.f32.mrf.mxu1  ;;  %4296 = vmatprep.subr.bf16.mxu1 %v7391_v42  ;;  %v2877_v4 = vmul.f32 %v8396_v53, %v8396_v53  ;;  %v2706_v45 = vadd.f32 %v2705_v56, %v8402_v7  ;;  %v2881_v42 = vmul.f32 %v8402_v7, %v8402_v7 }
 0x26b   : > { %12649 = vst [vmem:[#allocation80_spill] sm:$0xff] %v8556_v12  ;;  %v8564_v40 = vadd.f32 %v2309_v63, %v2116_v51  ;;  %v2874_v63 = vmul.f32 %v8392_v25, %v8392_v25  ;;  %4297 = vmatpush1.bf16.msra.mxu1 %v7389_v29  ;;  %v2984_v58 = vadd.f32 %v2983_v62, %v2869_v59 }
 0x26c   : > { %v8569_v35 = vpop.f32.mrf.mxu0  ;;  %v8571_v2 = vpop.f32.mrf.mxu1  ;;  %v3021_v51 = vadd.f32 %v3020_v43, %v2870_v44  ;;  %v2741_v31 = vadd.f32 %v2740_v48, %v8392_v25  ;;  %v2707_v29 = vadd.f32 %v2706_v45, %v8408_v13  ;;  %v2882_v44 = vmul.f32 %v8404_v47, %v8404_v47 }
 0x26d   : > { %12650 = vst [vmem:[#allocation81_spill] sm:$0xff] %v8564_v40  ;;  %v2985_v0 = vadd.f32 %v2984_v58, %v2873_v17  ;;  %v8592_v43 = vadd.f32 %v8418_v19, %v8416_v5  ;;  %v2885_v48 = vmul.f32 %v8408_v13, %v8408_v13  ;;  %v2889_v19 = vmul.f32 %v8414_v14, %v8414_v14 }
 0x26e   : > { %v2348_v61 = vpop.f32.mrf.mxu0  ;;  %v2541_v60 = vpop.f32.mrf.mxu1  ;;  %v3022_v62 = vadd.f32 %v3021_v51, %v2874_v63  ;;  %v2742_v56 = vadd.f32 %v2741_v31, %v8400_v36  ;;  %v2708_v58 = vadd.f32 %v2707_v29, %v8414_v14  ;;  %v2886_v51 = vmul.f32 %v8412_v10, %v8412_v10 }
 0x26f   : > { %v8585_v59 = vadd.f32 %v2541_v60, %v2348_v61  ;;  %12652 = vst [vmem:[#allocation83_spill] sm:$0xff] %v8592_v43  ;;  %v2986_v17 = vadd.f32 %v2985_v0, %v2877_v4 }
 0x270   : > { %v2350_v24 = vpop.f32.mrf.mxu0  ;;  %v2543_v46 = vpop.f32.mrf.mxu1  ;;  %v3023_v31 = vadd.f32 %v3022_v62, %v2878_v50  ;;  %v2743_v60 = vadd.f32 %v2742_v56, %v8404_v47  ;;  %v2709_v4 = vadd.f32 %v2708_v58, %v8422_v52  ;;  %v2890_v50 = vmul.f32 %v8592_v43, %v8592_v43 }
 0x271   : > { %12651 = vst [vmem:[#allocation82_spill] sm:$0xff] %v8585_v59  ;;  %v8597_v45 = vadd.f32 %v2543_v46, %v2350_v24  ;;  %v2987_v5 = vadd.f32 %v2986_v17, %v2881_v42  ;;  %v8618_v62 = vadd.f32 %v8432_v32, %v8430_v34  ;;  %v2893_v56 = vmul.f32 %v8422_v52, %v8422_v52 }
 0x272   : > { %v8599_v61 = vpop.f32.mrf.mxu0  ;;  %v8601_v63 = vpop.f32.mrf.mxu1  ;;  %v3024_v24 = vadd.f32 %v3023_v31, %v2882_v44  ;;  %v2744_v46 = vadd.f32 %v2743_v60, %v8412_v10  ;;  %v2710_v17 = vadd.f32 %v2709_v4, %v8428_v33  ;;  %v2894_v60 = vmul.f32 %v8426_v30, %v8426_v30 }
 0x273   : > { %12653 = vst [vmem:[#allocation84_spill] sm:$0xff] %v8618_v62  ;;  %v2988_v42 = vadd.f32 %v2987_v5, %v2885_v48  ;;  %v2897_v34 = vmul.f32 %v8428_v33, %v8428_v33 }
 0x274   : > { %v8609_v0 = vpop.f32.mrf.mxu0  ;;  %v8611_v29 = vpop.f32.mrf.mxu1  ;;  %v3025_v44 = vadd.f32 %v3024_v24, %v2886_v51  ;;  %v2745_v31 = vadd.f32 %v2744_v46, %v8592_v43  ;;  %v2711_v32 = vadd.f32 %v2710_v17, %v8436_v11  ;;  %v2898_v51 = vmul.f32 %v8618_v62, %v8618_v62 }
 0x275   : > { %v2989_v10 = vadd.f32 %v2988_v42, %v2889_v19  ;;  %v8642_v24 = vadd.f32 %v8446_v37, %v8444_v38  ;;  %v2901_v46 = vmul.f32 %v8436_v11, %v8436_v11  ;;  %v2905_v38 = vmul.f32 %v8442_v55, %v8442_v55 }
 0x276   : > { %v8623_v58 = vpop.f32.mrf.mxu0  ;;  %v8625_v14 = vpop.f32.mrf.mxu1  ;;  %v3026_v4 = vadd.f32 %v3025_v44, %v2890_v50  ;;  %v2746_v52 = vadd.f32 %v2745_v31, %v8426_v30  ;;  %v2712_v42 = vadd.f32 %v2711_v32, %v8442_v55  ;;  %v2902_v31 = vmul.f32 %v8440_v49, %v8440_v49 }
 0x277   : > { %12654 = vst [vmem:[#allocation85_spill] sm:$0xff] %v8642_v24  ;;  %v2990_v19 = vadd.f32 %v2989_v10, %v2893_v56 }
 0x278   : > { %v8633_v48 = vpop.f32.mrf.mxu0  ;;  %v8635_v5 = vpop.f32.mrf.mxu1  ;;  %v3027_v50 = vadd.f32 %v3026_v4, %v2894_v60  ;;  %v2747_v44 = vadd.f32 %v2746_v52, %v8618_v62  ;;  %v2713_v10 = vadd.f32 %v2712_v42, %v8450_v57  ;;  %v2906_v60 = vmul.f32 %v8642_v24, %v8642_v24 }
 0x279   : > { %v2991_v30 = vadd.f32 %v2990_v19, %v2897_v34  ;;  %v8666_v52 = vadd.f32 %v8458_v28, %v8456_v27  ;;  %v2909_v4 = vmul.f32 %v8450_v57, %v8450_v57  ;;  %v2913_v27 = vmul.f32 %v8454_v23, %v8454_v23 }
 0x27a   : > { %v8647_v17 = vpop.f32.mrf.mxu0  ;;  %v8649_v33 = vpop.f32.mrf.mxu1  ;;  %v3028_v32 = vadd.f32 %v3027_v50, %v2898_v51  ;;  %v2748_v11 = vadd.f32 %v2747_v44, %v8440_v49  ;;  %v2714_v19 = vadd.f32 %v2713_v10, %v8454_v23  ;;  %v2910_v44 = vmul.f32 %v8452_v8, %v8452_v8 }
 0x27b   : > { %12655 = vst [vmem:[#allocation86_spill] sm:$0xff] %v8666_v52  ;;  %v2992_v34 = vadd.f32 %v2991_v30, %v2901_v46 }
 0x27c   : > { %v8657_v37 = vpop.f32.mrf.mxu0  ;;  %v8659_v56 = vpop.f32.mrf.mxu1  ;;  %v3029_v51 = vadd.f32 %v3028_v32, %v2902_v31  ;;  %v2749_v50 = vadd.f32 %v2748_v11, %v8642_v24  ;;  %v2715_v30 = vadd.f32 %v2714_v19, %v8460_v1  ;;  %v2914_v31 = vmul.f32 %v8666_v52, %v8666_v52 }
 0x27d   : > { %v2993_v49 = vadd.f32 %v2992_v34, %v2905_v38  ;;  %v8690_v11 = vadd.f32 %v8468_v26, %v8466_v18  ;;  %v2917_v32 = vmul.f32 %v8460_v1, %v8460_v1  ;;  %v2921_v18 = vmul.f32 %v8464_v20, %v8464_v20 }
 0x27e   : > { %v8671_v42 = vpop.f32.mrf.mxu0  ;;  %v8673_v55 = vpop.f32.mrf.mxu1  ;;  %v3030_v10 = vadd.f32 %v3029_v51, %v2906_v60  ;;  %v2750_v57 = vadd.f32 %v2749_v50, %v8452_v8  ;;  %v2716_v34 = vadd.f32 %v2715_v30, %v8464_v20  ;;  %v2918_v50 = vmul.f32 %v8462_v9, %v8462_v9 }
 0x27f   : > { %12656 = vst [vmem:[#allocation87_spill] sm:$0xff] %v8690_v11  ;;  %v2994_v38 = vadd.f32 %v2993_v49, %v2909_v4 }
 0x280   : > { %v8681_v28 = vpop.f32.mrf.mxu0  ;;  %v8683_v46 = vpop.f32.mrf.mxu1  ;;  %v3031_v60 = vadd.f32 %v3030_v10, %v2910_v44  ;;  %v2751_v51 = vadd.f32 %v2750_v57, %v8666_v52  ;;  %v2717_v49 = vadd.f32 %v2716_v34, %v8470_v41  ;;  %v2922_v44 = vmul.f32 %v8690_v11, %v8690_v11 }
 0x281   : > { %v2995_v8 = vadd.f32 %v2994_v38, %v2913_v27  ;;  %v8714_v57 = vadd.f32 %v8478_v3, %v8476_v39  ;;  %v2925_v10 = vmul.f32 %v8470_v41, %v8470_v41  ;;  %v2929_v39 = vmul.f32 %v8474_v21, %v8474_v21 }
 0x282   : > { %v8695_v19 = vpop.f32.mrf.mxu0  ;;  %v8697_v23 = vpop.f32.mrf.mxu1  ;;  %v3032_v30 = vadd.f32 %v3031_v60, %v2914_v31  ;;  %v2752_v1 = vadd.f32 %v2751_v51, %v8462_v9  ;;  %v2718_v38 = vadd.f32 %v2717_v49, %v8474_v21  ;;  %v2926_v51 = vmul.f32 %v8472_v15, %v8472_v15  ;;  %v12661_v21 = vld [vmem:[#allocation56_spill] sm:$0xff] }
 0x283   : > { %12657 = vst [vmem:[#allocation88_spill] sm:$0xff] %v8714_v57  ;;  %v2996_v27 = vadd.f32 %v2995_v8, %v2917_v32 }
 0x284   : > { %v8705_v26 = vpop.f32.mrf.mxu0  ;;  %v8707_v4 = vpop.f32.mrf.mxu1  ;;  %v3033_v31 = vadd.f32 %v3032_v30, %v2918_v50  ;;  %v2753_v60 = vadd.f32 %v2752_v1, %v8690_v11  ;;  %v2719_v8 = vadd.f32 %v2718_v38, %v8480_v16  ;;  %v2930_v50 = vmul.f32 %v8714_v57, %v8714_v57  ;;  %v12658_v1 = vld [vmem:[#allocation57_spill] sm:$0xff]  ;;  %v12659_v30 = vld [vmem:[#allocation58_spill] sm:$0xff] }
 0x285   : > { %v2997_v9 = vadd.f32 %v2996_v27, %v2921_v18  ;;  %v8738_v11 = vadd.f32 %v12659_v30, %v12658_v1  ;;  %v2933_v27 = vmul.f32 %v8480_v16, %v8480_v16  ;;  %v2937_v1 = vmul.f32 %v12661_v21, %v12661_v21 }
 0x286   : > { %v8719_v34 = vpop.f32.mrf.mxu0  ;;  %v8721_v20 = vpop.f32.mrf.mxu1  ;;  %v3034_v49 = vadd.f32 %v3033_v31, %v2922_v44  ;;  %v2754_v41 = vadd.f32 %v2753_v60, %v8472_v15  ;;  %v2720_v38 = vadd.f32 %v2719_v8, %v12661_v21  ;;  %v12662_v60 = vld [vmem:[#allocation55_spill] sm:$0xff]  ;;  %v12667_v21 = vld [vmem:[#allocation61_spill] sm:$0xff] }
 0x287   : > { %12660 = vst [vmem:[#allocation57_spill] sm:$0xff] %v8738_v11  ;;  %v2998_v18 = vadd.f32 %v2997_v9, %v2925_v10  ;;  %v2934_v15 = vmul.f32 %v12662_v60, %v12662_v60  ;;  %v12663_v9 = vld [vmem:[#allocation59_spill] sm:$0xff] }
 0x288   : > { %v8729_v3 = vpop.f32.mrf.mxu0  ;;  %v8731_v32 = vpop.f32.mrf.mxu1  ;;  %v3035_v44 = vadd.f32 %v3034_v49, %v2926_v51  ;;  %v2755_v31 = vadd.f32 %v2754_v41, %v8714_v57  ;;  %v2721_v10 = vadd.f32 %v2720_v38, %v12663_v9  ;;  %v2938_v51 = vmul.f32 %v8738_v11, %v8738_v11  ;;  %v12664_v41 = vld [vmem:[#allocation62_spill] sm:$0xff]  ;;  %v12665_v49 = vld [vmem:[#allocation63_spill] sm:$0xff] }
 0x289   : > { %v2999_v62 = vadd.f32 %v2998_v18, %v2929_v39  ;;  %v8762_v57 = vadd.f32 %v12665_v49, %v12664_v41  ;;  %v2941_v18 = vmul.f32 %v12663_v9, %v12663_v9  ;;  %v2945_v41 = vmul.f32 %v12667_v21, %v12667_v21 }
 0x28a   : > { %v8743_v52 = vpop.f32.mrf.mxu0  ;;  %v8745_v24 = vpop.f32.mrf.mxu1  ;;  %v3036_v8 = vadd.f32 %v3035_v44, %v2930_v50  ;;  %v2756_v43 = vadd.f32 %v2755_v31, %v12662_v60  ;;  %v2722_v38 = vadd.f32 %v2721_v10, %v12667_v21  ;;  %v12668_v31 = vld [vmem:[#allocation60_spill] sm:$0xff]  ;;  %v12673_v21 = vld [vmem:[#allocation66_spill] sm:$0xff] }
 0x28b   : > { %12666 = vst [vmem:[#allocation58_spill] sm:$0xff] %v8762_v57  ;;  %v3000_v39 = vadd.f32 %v2999_v62, %v2933_v27  ;;  %v2942_v60 = vmul.f32 %v12668_v31, %v12668_v31  ;;  %v12669_v62 = vld [vmem:[#allocation64_spill] sm:$0xff] }
 0x28c   : > { %v8753_v30 = vpop.f32.mrf.mxu0  ;;  %v8755_v16 = vpop.f32.mrf.mxu1  ;;  %v3037_v50 = vadd.f32 %v3036_v8, %v2934_v15  ;;  %v2757_v44 = vadd.f32 %v2756_v43, %v8738_v11  ;;  %v2723_v27 = vadd.f32 %v2722_v38, %v12669_v62  ;;  %v2946_v15 = vmul.f32 %v8762_v57, %v8762_v57  ;;  %v12670_v43 = vld [vmem:[#allocation67_spill] sm:$0xff]  ;;  %v12671_v8 = vld [vmem:[#allocation68_spill] sm:$0xff] }
 0x28d   : > { %v3001_v7 = vadd.f32 %v3000_v39, %v2937_v1  ;;  %v8786_v11 = vadd.f32 %v12671_v8, %v12670_v43  ;;  %v2949_v39 = vmul.f32 %v12669_v62, %v12669_v62  ;;  %v2953_v43 = vmul.f32 %v12673_v21, %v12673_v21 }
 0x28e   : > { %v8767_v13 = vpop.f32.mrf.mxu0  ;;  %v8769_v47 = vpop.f32.mrf.mxu1  ;;  %v3038_v10 = vadd.f32 %v3037_v50, %v2938_v51  ;;  %v2758_v36 = vadd.f32 %v2757_v44, %v12668_v31  ;;  %v2724_v38 = vadd.f32 %v2723_v27, %v12673_v21  ;;  %v12674_v44 = vld [vmem:[#allocation65_spill] sm:$0xff] }
 0x28f   : > { %12672 = vst [vmem:[#allocation62_spill] sm:$0xff] %v8786_v11  ;;  %v3002_v1 = vadd.f32 %v3001_v7, %v2941_v18  ;;  %v2950_v31 = vmul.f32 %v12674_v44, %v12674_v44  ;;  %v12675_v7 = vld [vmem:[#allocation69_spill] sm:$0xff] }
 0x290   : > { %v8777_v49 = vpop.f32.mrf.mxu0  ;;  %v8779_v9 = vpop.f32.mrf.mxu1  ;;  %v3039_v51 = vadd.f32 %v3038_v10, %v2942_v60  ;;  %v2759_v50 = vadd.f32 %v2758_v36, %v8762_v57  ;;  %v2725_v18 = vadd.f32 %v2724_v38, %v12675_v7  ;;  %v2954_v60 = vmul.f32 %v8786_v11, %v8786_v11  ;;  %v12679_v57 = vld [vmem:[#allocation72_spill] sm:$0xff]  ;;  %v12680_v21 = vld [vmem:[#allocation73_spill] sm:$0xff] }
 0x291   : > { %v3003_v54 = vadd.f32 %v3002_v1, %v2945_v41  ;;  %v2957_v10 = vmul.f32 %v12675_v7, %v12675_v7  ;;  %v12678_v41 = vld [vmem:[#allocation71_spill] sm:$0xff]  ;;  %v8813_v6 = vadd.f32 %v12680_v21, %v12679_v57  ;;  %v12685_v7 = vld [vmem:[#allocation74_spill] sm:$0xff] }
 0x292   : > { %v8791_v53 = vpop.f32.mrf.mxu0  ;;  %v8793_v25 = vpop.f32.mrf.mxu1  ;;  %v3040_v27 = vadd.f32 %v3039_v51, %v2946_v15  ;;  %v2760_v22 = vadd.f32 %v2759_v50, %v12674_v44  ;;  %v2726_v1 = vadd.f32 %v2725_v18, %v12678_v41  ;;  %v12684_v44 = vld [vmem:[#allocation70_spill] sm:$0xff] }
 0x293   : > { %v3004_v36 = vadd.f32 %v3003_v54, %v2949_v39  ;;  %12681 = vst [vmem:[#allocation68_spill] sm:$0xff] %v8813_v6  ;;  %v2958_v54 = vmul.f32 %v12684_v44, %v12684_v44  ;;  %v2961_v39 = vmul.f32 %v12678_v41, %v12678_v41 }
 0x294   : > { %v8801_v8 = vpop.f32.mrf.mxu0  ;;  %v8803_v62 = vpop.f32.mrf.mxu1  ;;  %v3041_v15 = vadd.f32 %v3040_v27, %v2950_v31  ;;  %v2761_v51 = vadd.f32 %v2760_v22, %v8786_v11  ;;  %v2727_v18 = vadd.f32 %v2726_v1, %v12685_v7  ;;  %v2962_v22 = vmul.f32 %v8813_v6, %v8813_v6  ;;  %v12691_v11 = vld [vmem:[#allocation77_spill] sm:$0xff] }
 0x295   : > { %12676 = vst [vmem:[#allocation63_spill] sm:$0xff] %v8801_v8  ;;  %12677 = vst [vmem:[#allocation67_spill] sm:$0xff] %v8803_v62  ;;  %v3005_v50 = vadd.f32 %v3004_v36, %v2953_v43  ;;  %v2965_v31 = vmul.f32 %v12685_v7, %v12685_v7  ;;  %v12688_v43 = vld [vmem:[#allocation76_spill] sm:$0xff] }
 0x296   : > { %v8815_v38 = vpop.f32.mrf.mxu0  ;;  %v8817_v8 = vpop.f32.mrf.mxu1  ;;  %v3042_v57 = vadd.f32 %v3041_v15, %v2954_v60  ;;  %v2728_v27 = vadd.f32 %v2727_v18, %v12688_v43 }
 0x297   : > { %12682 = vst [vmem:[#allocation72_spill] sm:$0xff] %v8815_v38  ;;  %12683 = vst [vmem:[#allocation73_spill] sm:$0xff] %v8817_v8  ;;  %v2762_v38 = vadd.f32 %v2761_v51, %v12684_v44  ;;  %v3006_v8 = vadd.f32 %v3005_v50, %v2957_v10  ;;  %v12694_v51 = vld [vmem:[#allocation75_spill] sm:$0xff] }
 0x298   : > { %v8825_v62 = vpop.f32.mrf.mxu0  ;;  %v8827_v21 = vpop.f32.mrf.mxu1  ;;  %v3043_v15 = vadd.f32 %v3042_v57, %v2958_v54  ;;  %v2966_v50 = vmul.f32 %v12694_v51, %v12694_v51  ;;  %v12695_v44 = vld [vmem:[#allocation79_spill] sm:$0xff] }
 0x299   : > { %12686 = vst [vmem:[#allocation89_spill] sm:$0xff] %v8825_v62  ;;  %12687 = vst [vmem:[#allocation90_spill] sm:$0xff] %v8827_v21  ;;  %v2763_v1 = vadd.f32 %v2762_v38, %v8813_v6  ;;  %v12692_v21 = vld [vmem:[#allocation78_spill] sm:$0xff]  ;;  %v3007_v10 = vadd.f32 %v3006_v8, %v2961_v39  ;;  %v2729_v62 = vadd.f32 %v2728_v27, %v12695_v44 }
 0x29a   : > { %v8835_v36 = vpop.f32.mrf.mxu0  ;;  %v8837_v41 = vpop.f32.mrf.mxu1  ;;  %v8842_v60 = vadd.f32 %v12692_v21, %v12691_v11  ;;  %v2969_v38 = vmul.f32 %v12688_v43, %v12688_v43  ;;  %v3044_v6 = vadd.f32 %v3043_v15, %v2962_v22  ;;  %v2973_v57 = vmul.f32 %v12695_v44, %v12695_v44 }
 0x29b   : > { %12689 = vst [vmem:[#allocation91_spill] sm:$0xff] %v8835_v36  ;;  %12690 = vst [vmem:[#allocation92_spill] sm:$0xff] %v8837_v41  ;;  %v2764_v36 = vadd.f32 %v2763_v1, %v12694_v51  ;;  %v3008_v41 = vadd.f32 %v3007_v10, %v2965_v31  ;;  %v2730_v11 = vadd.f32 %v2729_v62, %v8564_v40 }
 0x29c   : > { %12693 = vst [vmem:[#allocation77_spill] sm:$0xff] %v8842_v60  ;;  %v8847_v7 = vpop.f32.mrf.mxu0  ;;  %v8849_v18 = vpop.f32.mrf.mxu1  ;;  %v2970_v21 = vmul.f32 %v8842_v60, %v8842_v60  ;;  %v8866_v27 = vadd.f32 %v8571_v2, %v8569_v35  ;;  %v3045_v22 = vadd.f32 %v3044_v6, %v2966_v50  ;;  %v2977_v10 = vmul.f32 %v8564_v40, %v8564_v40 }
 0x29d   : > { %v2765_v39 = vadd.f32 %v2764_v36, %v8842_v60  ;;  %v3009_v1 = vadd.f32 %v3008_v41, %v2969_v38  ;;  %v2974_v36 = vmul.f32 %v8556_v12, %v8556_v12  ;;  %v2731_v60 = vrot.slane %v2730_v11, 4 }
 0x29e   : > { %v8855_v54 = vpop.f32.mrf.mxu0  ;;  %v8857_v8 = vpop.f32.mrf.mxu1  ;;  %12696 = vst [vmem:[#allocation78_spill] sm:$0xff] %v8866_v27  ;;  %v3046_v35 = vadd.f32 %v3045_v22, %v2970_v21  ;;  %v2978_v41 = vmul.f32 %v8866_v27, %v8866_v27  ;;  %v8894_v21 = vadd.f32 %v8601_v63, %v8599_v61 }
 0x29f   : > { %v2766_v15 = vadd.f32 %v2765_v39, %v8556_v12  ;;  %v3010_v6 = vadd.f32 %v3009_v1, %v2973_v57  ;;  %v2732_v51 = vadd.f32 %v2731_v60, %v2730_v11  ;;  %v8906_v11 = vadd.f32 %v8625_v14, %v8623_v58 }
 0x2a0   : > { %v8868_v31 = vpop.f32.mrf.mxu0  ;;  %v8870_v62 = vpop.f32.mrf.mxu1  ;;  %v3047_v39 = vadd.f32 %v3046_v35, %v2974_v36  ;;  %12700 = vst [vmem:[#allocation96_spill] sm:$0xff] %v8894_v21  ;;  %v8916_v35 = vadd.f32 %v8635_v5, %v8633_v48  ;;  %v8936_v5 = vadd.f32 %v8659_v56, %v8657_v37 }
 0x2a1   : > { %12697 = vst [vmem:[#allocation93_spill] sm:$0xff] %v8870_v62  ;;  %v2767_v2 = vadd.f32 %v2766_v15, %v8866_v27  ;;  %v3011_v12 = vadd.f32 %v3010_v6, %v2977_v10  ;;  %v8902_v15 = vadd.f32 %v8611_v29, %v8609_v0  ;;  %v2733_v60 = vrot.slane %v2732_v51, 2 }
 0x2a2   : > { %v8877_v44 = vpop.f32.mrf.mxu0  ;;  %v8879_v43 = vpop.f32.mrf.mxu1  ;;  %12702 = vst [vmem:[#allocation98_spill] sm:$0xff] %v8916_v35  ;;  %v2859_v0 = vmul.f32 %v8894_v21, %v8894_v21  ;;  %v8922_v29 = vadd.f32 %v8649_v33, %v8647_v17  ;;  %12704 = vst [vmem:[#allocation100_spill] sm:$0xff] %v8936_v5  ;;  %v2856_v33 = vmul.f32 %v8597_v45, %v8597_v45 }
 0x2a3   : > { %12698 = vst [vmem:[#allocation94_spill] sm:$0xff] %v8877_v44  ;;  %12699 = vst [vmem:[#allocation95_spill] sm:$0xff] %v8879_v43  ;;  %v2768_v44 = vrot.slane %v2767_v2, 4  ;;  %v3048_v43 = vadd.f32 %v3047_v39, %v2978_v41  ;;  %v3012_v1 = vrot.slane %v3011_v12, 4  ;;  %v2860_v48 = vmul.f32 %v8902_v15, %v8902_v15 }
 0x2a4   : > { %v8884_v50 = vpop.f32.mrf.mxu0  ;;  %v8886_v38 = vpop.f32.mrf.mxu1  ;;  %12701 = vst [vmem:[#allocation97_spill] sm:$0xff] %v8902_v15  ;;  %12703 = vst [vmem:[#allocation99_spill] sm:$0xff] %v8922_v29  ;;  %v2863_v17 = vmul.f32 %v8906_v11, %v8906_v11  ;;  %v2864_v56 = vmul.f32 %v8916_v35, %v8916_v35  ;;  %v8967_v27 = vadd.f32 %v8697_v23, %v8695_v19 }
 0x2a5   : > { %v8912_v61 = vadd.f32 %v2768_v44, %v2767_v2  ;;  %v3049_v63 = vrot.slane %v3048_v43, 4  ;;  %v8928_v6 = vadd.f32 %v3012_v1, %v3011_v12  ;;  %v2855_v44 = vmul.f32 %v8585_v59, %v8585_v59 }
 0x2a6   : > { %v8888_v40 = vpop.f32.mrf.mxu0  ;;  %v8890_v62 = vpop.f32.mrf.mxu1  ;;  %v8938_v2 = vadd.f32 %v2733_v60, %v2732_v51  ;;  %v8946_v12 = vadd.f32 %v8673_v55, %v8671_v42  ;;  %v8959_v51 = vadd.f32 %v8683_v46, %v8681_v28  ;;  %v2774_v60 = vadd.f32 %v8894_v21, %v8585_v59  ;;  %12707 = vst [vmem:[#allocation103_spill] sm:$0xff] %v8967_v27 }
 0x2a7   : > { %v8953_v37 = vadd.f32 %v3049_v63, %v3048_v43  ;;  %v3055_v55 = vadd.f32 %v2859_v0, %v2855_v44  ;;  %v2867_v42 = vmul.f32 %v8922_v29, %v8922_v29  ;;  %v2811_v1 = vadd.f32 %v8902_v15, %v8597_v45 }
 0x2a8   : > { %v8896_v57 = vpop.f32.mrf.mxu0  ;;  %v8898_v22 = vpop.f32.mrf.mxu1  ;;  %12705 = vst [vmem:[#allocation101_spill] sm:$0xff] %v8946_v12  ;;  %12706 = vst [vmem:[#allocation102_spill] sm:$0xff] %v8959_v51  ;;  %v3092_v28 = vadd.f32 %v2860_v48, %v2856_v33  ;;  %v2868_v46 = vmul.f32 %v8936_v5, %v8936_v5  ;;  %v8979_v0 = vadd.f32 %v8707_v4, %v8705_v26 }
 0x2a9   : > { %v2775_v44 = vadd.f32 %v2774_v60, %v8906_v11  ;;  %v3056_v21 = vadd.f32 %v3055_v55, %v2863_v17  ;;  %v2871_v23 = vmul.f32 %v8946_v12, %v8946_v12  ;;  %v8986_v19 = vadd.f32 %v8721_v20, %v8719_v34 }
 0x2aa   : > { %v8908_v36 = vpop.f32.mrf.mxu0  ;;  %v8910_v10 = vpop.f32.mrf.mxu1  ;;  %12708 = vst [vmem:[#allocation104_spill] sm:$0xff] %v8979_v0  ;;  %v2812_v33 = vadd.f32 %v2811_v1, %v8916_v35  ;;  %v3093_v15 = vadd.f32 %v3092_v28, %v2864_v56  ;;  %v2872_v26 = vmul.f32 %v8959_v51, %v8959_v51  ;;  %v8997_v4 = vadd.f32 %v8731_v32, %v8729_v3 }
 0x2ab   : > { %12709 = vst [vmem:[#allocation105_spill] sm:$0xff] %v8986_v19  ;;  %v2776_v17 = vadd.f32 %v2775_v44, %v8922_v29  ;;  %v3057_v60 = vadd.f32 %v3056_v21, %v2867_v42  ;;  %v2875_v20 = vmul.f32 %v8967_v27, %v8967_v27  ;;  %v9004_v34 = vadd.f32 %v8745_v24, %v8743_v52 }
 0x2ac   : > { %v8924_v14 = vpop.f32.mrf.mxu0  ;;  %v8926_v58 = vpop.f32.mrf.mxu1  ;;  %v2813_v56 = vadd.f32 %v2812_v33, %v8936_v5  ;;  %v3094_v28 = vadd.f32 %v3093_v15, %v2868_v46  ;;  %v2876_v3 = vmul.f32 %v8979_v0, %v8979_v0  ;;  %v9015_v32 = vadd.f32 %v8755_v16, %v8753_v30 }
 0x2ad   : > { %12710 = vst [vmem:[#allocation106_spill] sm:$0xff] %v9004_v34  ;;  %v2777_v21 = vadd.f32 %v2776_v17, %v8946_v12  ;;  %v3058_v42 = vadd.f32 %v3057_v60, %v2871_v23  ;;  %v2879_v24 = vmul.f32 %v8986_v19, %v8986_v19  ;;  %v9022_v52 = vadd.f32 %v8769_v47, %v8767_v13 }
 0x2ae   : > { %v8948_v41 = vpop.f32.mrf.mxu0  ;;  %v8950_v39 = vpop.f32.mrf.mxu1  ;;  %12711 = vst [vmem:[#allocation107_spill] sm:$0xff] %v9015_v32  ;;  %v2814_v46 = vadd.f32 %v2813_v56, %v8959_v51  ;;  %v3095_v33 = vadd.f32 %v3094_v28, %v2872_v26  ;;  %v2880_v16 = vmul.f32 %v8997_v4, %v8997_v4  ;;  %v9033_v30 = vadd.f32 %v8779_v9, %v8777_v49  ;;  %v12714_v49 = vld [vmem:[#allocation63_spill] sm:$0xff]  ;;  %v12718_v51 = vld [vmem:[#allocation73_spill] sm:$0xff] }
 0x2af   : > { %12712 = vst [vmem:[#allocation108_spill] sm:$0xff] %v9022_v52  ;;  %v2778_v23 = vadd.f32 %v2777_v21, %v8967_v27  ;;  %v3059_v17 = vadd.f32 %v3058_v42, %v2875_v20  ;;  %v2883_v47 = vmul.f32 %v9004_v34, %v9004_v34  ;;  %v9040_v13 = vadd.f32 %v8793_v25, %v8791_v53  ;;  %v12715_v21 = vld [vmem:[#allocation67_spill] sm:$0xff]  ;;  %v12717_v53 = vld [vmem:[#allocation72_spill] sm:$0xff] }
 0x2b0   : > { %v8969_v43 = vpop.f32.mrf.mxu0  ;;  %v8971_v63 = vpop.f32.mrf.mxu1  ;;  %v2815_v56 = vadd.f32 %v2814_v46, %v8979_v0  ;;  %v3096_v28 = vadd.f32 %v3095_v33, %v2876_v3  ;;  %v2884_v9 = vmul.f32 %v9015_v32, %v9015_v32  ;;  %v9051_v20 = vadd.f32 %v12715_v21, %v12714_v49  ;;  %v12720_v21 = vld [vmem:[#allocation89_spill] sm:$0xff]  ;;  %v12724_v0 = vld [vmem:[#allocation92_spill] sm:$0xff] }
 0x2b1   : > { %12713 = vst [vmem:[#allocation109_spill] sm:$0xff] %v9040_v13  ;;  %v2779_v42 = vadd.f32 %v2778_v23, %v8986_v19  ;;  %v3060_v27 = vadd.f32 %v3059_v17, %v2879_v24  ;;  %v2887_v25 = vmul.f32 %v9022_v52, %v9022_v52  ;;  %v9058_v12 = vadd.f32 %v12718_v51, %v12717_v53  ;;  %v12721_v23 = vld [vmem:[#allocation90_spill] sm:$0xff]  ;;  %v12723_v53 = vld [vmem:[#allocation91_spill] sm:$0xff] }
 0x2b2   : > { %v8988_v59 = vpop.f32.mrf.mxu0  ;;  %v8990_v48 = vpop.f32.mrf.mxu1  ;;  %12716 = vst [vmem:[#allocation63_spill] sm:$0xff] %v9051_v20  ;;  %v2816_v46 = vadd.f32 %v2815_v56, %v8997_v4  ;;  %v3097_v33 = vadd.f32 %v3096_v28, %v2880_v16  ;;  %v2888_v49 = vmul.f32 %v9033_v30, %v9033_v30  ;;  %v9069_v24 = vadd.f32 %v12721_v23, %v12720_v21 }
 0x2b3   : > { %12719 = vst [vmem:[#allocation67_spill] sm:$0xff] %v9058_v12  ;;  %v2780_v17 = vadd.f32 %v2779_v42, %v9004_v34  ;;  %v3061_v19 = vadd.f32 %v3060_v27, %v2883_v47  ;;  %v2891_v51 = vmul.f32 %v9040_v13, %v9040_v13  ;;  %v9076_v29 = vadd.f32 %v12724_v0, %v12723_v53 }
 0x2b4   : > { %v9006_v55 = vpop.f32.mrf.mxu0  ;;  %v9008_v1 = vpop.f32.mrf.mxu1  ;;  %12722 = vst [vmem:[#allocation72_spill] sm:$0xff] %v9069_v24  ;;  %v2817_v56 = vadd.f32 %v2816_v46, %v9015_v32  ;;  %v3098_v28 = vadd.f32 %v3097_v33, %v2884_v9  ;;  %v2892_v21 = vmul.f32 %v9051_v20, %v9051_v20  ;;  %v9087_v27 = vadd.f32 %v8849_v18, %v8847_v7  ;;  %v12726_v18 = vld [vmem:[#allocation93_spill] sm:$0xff] }
 0x2b5   : > { %12725 = vst [vmem:[#allocation73_spill] sm:$0xff] %v9076_v29  ;;  %v2781_v47 = vadd.f32 %v2780_v17, %v9022_v52  ;;  %v3062_v42 = vadd.f32 %v3061_v19, %v2887_v25  ;;  %v2895_v0 = vmul.f32 %v9058_v12, %v9058_v12  ;;  %v9094_v23 = vadd.f32 %v8857_v8, %v8855_v54  ;;  %v12727_v8 = vld [vmem:[#allocation94_spill] sm:$0xff]  ;;  %v12728_v52 = vld [vmem:[#allocation95_spill] sm:$0xff] }
 0x2b6   : > { %v9024_v44 = vpop.f32.mrf.mxu0  ;;  %v9026_v15 = vpop.f32.mrf.mxu1  ;;  %v2818_v46 = vadd.f32 %v2817_v56, %v9033_v30  ;;  %v3099_v33 = vadd.f32 %v3098_v28, %v2888_v49  ;;  %v2896_v7 = vmul.f32 %v9069_v24, %v9069_v24  ;;  %v9105_v19 = vadd.f32 %v12726_v18, %v8868_v31 }
 0x2b7   : > { %v2782_v25 = vadd.f32 %v2781_v47, %v9040_v13  ;;  %v3063_v17 = vadd.f32 %v3062_v42, %v2891_v51  ;;  %v2899_v54 = vmul.f32 %v9076_v29, %v9076_v29  ;;  %v9112_v32 = vadd.f32 %v12728_v52, %v12727_v8 }
 0x2b8   : > { %v9042_v60 = vpop.f32.mrf.mxu0  ;;  %v9044_v26 = vpop.f32.mrf.mxu1  ;;  %v2819_v56 = vadd.f32 %v2818_v46, %v9051_v20  ;;  %v3100_v28 = vadd.f32 %v3099_v33, %v2892_v21  ;;  %v2900_v31 = vmul.f32 %v9087_v27, %v9087_v27  ;;  %v9123_v51 = vadd.f32 %v8886_v38, %v8884_v50 }
 0x2b9   : > { %v12729_v47 = vrot.slane %v8912_v61, 2  ;;  %v2783_v52 = vadd.f32 %v2782_v25, %v9058_v12  ;;  %v3064_v18 = vadd.f32 %v3063_v17, %v2895_v0  ;;  %v2903_v8 = vmul.f32 %v9094_v23, %v9094_v23  ;;  %v7397_v25 = vld [vmem:[#allocation5 + $0x104] ss:$8 sps:$4 sm:$0xff]  }
 0x2ba   : > { %v9060_v5 = vpop.f32.mrf.mxu0  ;;  %v9062_v3 = vpop.f32.mrf.mxu1  ;;  %v2820_v33 = vadd.f32 %v2819_v56, %v9069_v24  ;;  %v3101_v20 = vadd.f32 %v3100_v28, %v2896_v7  ;;  %v2904_v50 = vmul.f32 %v9105_v19, %v9105_v19  ;;  %v9142_v38 = vadd.f32 %v8890_v62, %v8888_v40  ;;  %v7392_v28 = vld [vmem:[#allocation5] ss:$8 sps:$4 sm:$0xff]   ;;  %4298 = vmatprep.subr.bf16.mxu1 %v7397_v25 }
 0x2bb   : > { %v9128_v42 = vadd.f32 %v12729_v47, %v8912_v61  ;;  %v7394_v61 = vld [vmem:[#allocation5 + $0x4] ss:$8 sps:$4 sm:$0xff]   ;;  %v2784_v0 = vadd.f32 %v2783_v52, %v9076_v29  ;;  %v3065_v17 = vadd.f32 %v3064_v18, %v2899_v54  ;;  %v2907_v47 = vmul.f32 %v9112_v32, %v9112_v32  ;;  %v7395_v24 = vld [vmem:[#allocation5 + $0x100] ss:$8 sps:$4 sm:$0xff]  }
 0x2bc   : > { %v9078_v35 = vpop.f32.mrf.mxu0  ;;  %v9080_v16 = vpop.f32.mrf.mxu1  ;;  %12730 = vst [vmem:[#allocation89_spill] sm:$0xff] %v9142_v38  ;;  %v9149_v12 = vadd.f32 %v8898_v22, %v8896_v57  ;;  %v2821_v40 = vadd.f32 %v2820_v33, %v9087_v27  ;;  %v3102_v62 = vadd.f32 %v3101_v20, %v2900_v31  ;;  %v2908_v52 = vmul.f32 %v9123_v51, %v9123_v51 }
 0x2bd   : > { %v9160_v54 = vadd.f32 %v8910_v10, %v8908_v36  ;;  %4105 = vmatprep.subr.bf16.mxu0 %v7394_v61  ;;  %v2785_v57 = vadd.f32 %v2784_v0, %v9094_v23  ;;  %v3066_v22 = vadd.f32 %v3065_v17, %v2903_v8  ;;  %v9165_v18 = vadd.f32 %v8926_v58, %v8924_v14  ;;  %v7400_v8 = vld [vmem:[#allocation5 + $0xf4] ss:$8 sps:$4 sm:$0xff]   ;;  %v7398_v17 = vld [vmem:[#allocation5 + $0xf0] ss:$8 sps:$4 sm:$0xff]  }
 0x2be   : > { %v9096_v53 = vpop.f32.mrf.mxu0  ;;  %v9098_v9 = vpop.f32.mrf.mxu1  ;;  %4106 = vmatpush1.bf16.msra.mxu0 %v7392_v28  ;;  %v2822_v20 = vadd.f32 %v2821_v40, %v9105_v19  ;;  %v3103_v31 = vadd.f32 %v3102_v62, %v2904_v50  ;;  %v2911_v36 = vmul.f32 %v9142_v38, %v9142_v38  ;;  %v9176_v10 = vadd.f32 %v8950_v39, %v8948_v41  ;;  %v7403_v14 = vld [vmem:[#allocation5 + $0x1f4] ss:$8 sps:$4 sm:$0xff]   ;;  %v7401_v41 = vld [vmem:[#allocation5 + $0x1f0] ss:$8 sps:$4 sm:$0xff]  }
 0x2bf   : > { %12731 = vst [vmem:[#allocation90_spill] sm:$0xff] %v9160_v54  ;;  %4299 = vmatpush1.bf16.msra.mxu1 %v7395_v24  ;;  %v2786_v58 = vadd.f32 %v2785_v57, %v9112_v32  ;;  %v3067_v33 = vadd.f32 %v3066_v22, %v2907_v47  ;;  %v2912_v61 = vmul.f32 %v9149_v12, %v9149_v12 }
 0x2c0   : > { %v9114_v34 = vpop.f32.mrf.mxu0  ;;  %v9116_v49 = vpop.f32.mrf.mxu1  ;;  %v9183_v25 = vadd.f32 %v8971_v63, %v8969_v43  ;;  %v2823_v39 = vadd.f32 %v2822_v20, %v9123_v51  ;;  %v3104_v24 = vadd.f32 %v3103_v31, %v2908_v52  ;;  %v2915_v28 = vmul.f32 %v9160_v54, %v9160_v54  ;;  %4107 = vmatprep.subr.bf16.mxu0 %v7400_v8  ;;  %v7406_v20 = vld [vmem:[#allocation5 + $0xe4] ss:$8 sps:$4 sm:$0xff]  }
 0x2c1   : > { %v9194_v47 = vadd.f32 %v8990_v48, %v8988_v59  ;;  %v2787_v43 = vadd.f32 %v2786_v58, %v9142_v38  ;;  %v2916_v63 = vmul.f32 %v9165_v18, %v9165_v18  ;;  %v9201_v40 = vadd.f32 %v9008_v1, %v9006_v55  ;;  %4300 = vmatprep.subr.bf16.mxu1 %v7403_v14  ;;  %v7409_v55 = vld [vmem:[#allocation5 + $0x1e4] ss:$8 sps:$4 sm:$0xff]  }
 0x2c2   : > { %v9133_v46 = vpop.f32.mrf.mxu0  ;;  %v9135_v21 = vpop.f32.mrf.mxu1  ;;  %12732 = vst [vmem:[#allocation91_spill] sm:$0xff] %v9183_v25  ;;  %4108 = vmatpush2.bf16.msra.mxu0 %v7398_v17  ;;  %v3068_v57 = vadd.f32 %v3067_v33, %v2911_v36  ;;  %v2824_v59 = vadd.f32 %v2823_v39, %v9149_v12  ;;  %v2919_v48 = vmul.f32 %v9176_v10, %v9176_v10  ;;  %v7404_v33 = vld [vmem:[#allocation5 + $0xe0] ss:$8 sps:$4 sm:$0xff]   ;;  %v7445_v38 = vld [vmem:[#allocation5 + $0x184] ss:$8 sps:$4 sm:$0xff]  }
 0x2c3   : > { %12733 = vst [vmem:[#allocation92_spill] sm:$0xff] %v9201_v40  ;;  %v9212_v22 = vadd.f32 %v9026_v15, %v9024_v44  ;;  %4301 = vmatpush2.bf16.msra.mxu1 %v7401_v41  ;;  %v3105_v1 = vadd.f32 %v3104_v24, %v2912_v61  ;;  %v2788_v31 = vadd.f32 %v2787_v43, %v9160_v54  ;;  %v7407_v44 = vld [vmem:[#allocation5 + $0x1e0] ss:$8 sps:$4 sm:$0xff]  }
 0x2c4   : > { %v9151_v7 = vpop.f32.mrf.mxu0  ;;  %v9153_v56 = vpop.f32.mrf.mxu1  ;;  %v2920_v8 = vmul.f32 %v9183_v25, %v9183_v25  ;;  %v9219_v36 = vadd.f32 %v9044_v26, %v9042_v60  ;;  %v3069_v15 = vadd.f32 %v3068_v57, %v2915_v28  ;;  %v2825_v17 = vadd.f32 %v2824_v59, %v9165_v18  ;;  %4109 = vmatprep.subr.bf16.mxu0 %v7406_v20 }
 0x2c5   : > { %v2923_v61 = vmul.f32 %v9194_v47, %v9194_v47  ;;  %v9230_v41 = vadd.f32 %v9062_v3, %v9060_v5  ;;  %v3106_v39 = vadd.f32 %v3105_v1, %v2916_v63  ;;  %v2924_v60 = vmul.f32 %v9201_v40, %v9201_v40  ;;  %4302 = vmatprep.subr.bf16.mxu1 %v7409_v55  ;;  %v7412_v63 = vld [vmem:[#allocation5 + $0xd4] ss:$8 sps:$4 sm:$0xff]  }
 0x2c6   : > { %v9167_v29 = vpop.f32.mrf.mxu0  ;;  %v9169_v13 = vpop.f32.mrf.mxu1  ;;  %v9236_v26 = vadd.f32 %v9080_v16, %v9078_v35  ;;  %4110 = vmatpush2.bf16.msra.mxu0 %v7404_v33  ;;  %v2789_v43 = vadd.f32 %v2788_v31, %v9176_v10  ;;  %v3070_v57 = vadd.f32 %v3069_v15, %v2919_v48  ;;  %v2927_v5 = vmul.f32 %v9212_v22, %v9212_v22  ;;  %v7415_v35 = vld [vmem:[#allocation5 + $0x1d4] ss:$8 sps:$4 sm:$0xff]   ;;  %v7410_v31 = vld [vmem:[#allocation5 + $0xd0] ss:$8 sps:$4 sm:$0xff]  }
 0x2c7   : > { %v9247_v3 = vadd.f32 %v9098_v9, %v9096_v53  ;;  %4303 = vmatpush2.bf16.msra.mxu1 %v7407_v44  ;;  %v2826_v16 = vadd.f32 %v2825_v17, %v9183_v25  ;;  %v3107_v59 = vadd.f32 %v3106_v39, %v2920_v8  ;;  %v2928_v20 = vmul.f32 %v9219_v36, %v9219_v36  ;;  %v7413_v33 = vld [vmem:[#allocation5 + $0x1d0] ss:$8 sps:$4 sm:$0xff]  }
 0x2c8   : > { %v9185_v50 = vpop.f32.mrf.mxu0  ;;  %v9187_v0 = vpop.f32.mrf.mxu1  ;;  %v9254_v55 = vadd.f32 %v9116_v49, %v9114_v34  ;;  %v2790_v53 = vadd.f32 %v2789_v43, %v9194_v47  ;;  %v3071_v9 = vadd.f32 %v3070_v57, %v2923_v61  ;;  %v2931_v44 = vmul.f32 %v9230_v41, %v9230_v41  ;;  %4111 = vmatprep.subr.bf16.mxu0 %v7412_v63 }
 0x2c9   : > { %v9261_v8 = vadd.f32 %v9135_v21, %v9133_v46  ;;  %v2827_v15 = vadd.f32 %v2826_v16, %v9201_v40  ;;  %v3108_v17 = vadd.f32 %v3107_v59, %v2924_v60  ;;  %v2932_v34 = vmul.f32 %v9236_v26, %v9236_v26  ;;  %4304 = vmatprep.subr.bf16.mxu1 %v7415_v35  ;;  %v7418_v21 = vld [vmem:[#allocation5 + $0xc4] ss:$8 sps:$4 sm:$0xff]  }
 0x2ca   : > { %v9203_v62 = vpop.f32.mrf.mxu0  ;;  %v9205_v52 = vpop.f32.mrf.mxu1  ;;  %4112 = vmatpush2.bf16.msra.mxu0 %v7410_v31  ;;  %v2791_v61 = vadd.f32 %v2790_v53, %v9212_v22  ;;  %v3072_v43 = vadd.f32 %v3071_v9, %v2927_v5  ;;  %v2935_v57 = vmul.f32 %v9247_v3, %v9247_v3  ;;  %v9271_v46 = vadd.f32 %v9153_v56, %v9151_v7  ;;  %v7421_v60 = vld [vmem:[#allocation5 + $0x1c4] ss:$8 sps:$4 sm:$0xff]   ;;  %v7416_v53 = vld [vmem:[#allocation5 + $0xc0] ss:$8 sps:$4 sm:$0xff]  }
 0x2cb   : > { %4305 = vmatpush2.bf16.msra.mxu1 %v7413_v33  ;;  %v2828_v63 = vadd.f32 %v2827_v15, %v9219_v36  ;;  %v3109_v16 = vadd.f32 %v3108_v17, %v2928_v20  ;;  %v2936_v35 = vmul.f32 %v9254_v55, %v9254_v55  ;;  %v9278_v59 = vadd.f32 %v9169_v13, %v9167_v29  ;;  %v7419_v9 = vld [vmem:[#allocation5 + $0x1c0] ss:$8 sps:$4 sm:$0xff]  }
 0x2cc   : > { %v9221_v14 = vpop.f32.mrf.mxu0  ;;  %v9223_v58 = vpop.f32.mrf.mxu1  ;;  %v2792_v7 = vadd.f32 %v2791_v61, %v9230_v41  ;;  %v3073_v56 = vadd.f32 %v3072_v43, %v2931_v44  ;;  %v2939_v33 = vmul.f32 %v9261_v8, %v9261_v8  ;;  %v9285_v20 = vadd.f32 %v9187_v0, %v9185_v50  ;;  %4113 = vmatprep.subr.bf16.mxu0 %v7418_v21  ;;  %v7424_v0 = vld [vmem:[#allocation5 + $0xb4] ss:$8 sps:$4 sm:$0xff]  }
 0x2cd   : > { %v2829_v15 = vadd.f32 %v2828_v63, %v9236_v26  ;;  %v3110_v17 = vadd.f32 %v3109_v16, %v2932_v34  ;;  %v9290_v29 = vadd.f32 %v9205_v52, %v9203_v62  ;;  %4306 = vmatprep.subr.bf16.mxu1 %v7421_v60  ;;  %v2940_v43 = vmul.f32 %v9271_v46, %v9271_v46  ;;  %v7427_v34 = vld [vmem:[#allocation5 + $0x1b4] ss:$8 sps:$4 sm:$0xff]   ;;  %v7422_v16 = vld [vmem:[#allocation5 + $0xb0] ss:$8 sps:$4 sm:$0xff]  }
 0x2ce   : > { %v9238_v24 = vpop.f32.mrf.mxu0  ;;  %v9240_v28 = vpop.f32.mrf.mxu1  ;;  %4114 = vmatpush2.bf16.msra.mxu0 %v7416_v53  ;;  %v2793_v44 = vadd.f32 %v2792_v7, %v9247_v3  ;;  %v3074_v61 = vadd.f32 %v3073_v56, %v2935_v57  ;;  %v9297_v50 = vadd.f32 %v9223_v58, %v9221_v14  ;;  %v2943_v21 = vmul.f32 %v9278_v59, %v9278_v59  ;;  %v7425_v53 = vld [vmem:[#allocation5 + $0x1b0] ss:$8 sps:$4 sm:$0xff]  }
 0x2cf   : > { %4307 = vmatpush2.bf16.msra.mxu1 %v7419_v9  ;;  %v2830_v62 = vadd.f32 %v2829_v15, %v9254_v55  ;;  %v3111_v52 = vadd.f32 %v3110_v17, %v2936_v35  ;;  %v9304_v60 = vadd.f32 %v9240_v28, %v9238_v24  ;;  %v2944_v9 = vmul.f32 %v9285_v20, %v9285_v20 }
 0x2d0   : > { %v2470_v48 = vpop.f32.mrf.mxu0  ;;  %v2663_v1 = vpop.f32.mrf.mxu1  ;;  %v2794_v14 = vadd.f32 %v2793_v44, %v9261_v8  ;;  %v3075_v58 = vadd.f32 %v3074_v61, %v2939_v33  ;;  %4115 = vmatprep.subr.bf16.mxu0 %v7424_v0  ;;  %v2947_v56 = vmul.f32 %v9290_v29, %v9290_v29  ;;  %4308 = vmatprep.subr.bf16.mxu1 %v7427_v34  ;;  %v7433_v61 = vld [vmem:[#allocation5 + $0x1a4] ss:$8 sps:$4 sm:$0xff]  }
 0x2d1   : > { %v9309_v7 = vadd.f32 %v2663_v1, %v2470_v48  ;;  %v2831_v35 = vadd.f32 %v2830_v62, %v9271_v46  ;;  %v3112_v17 = vadd.f32 %v3111_v52, %v2940_v43  ;;  %v2948_v44 = vmul.f32 %v9297_v50, %v9297_v50  ;;  %v7430_v1 = vld [vmem:[#allocation5 + $0xa4] ss:$8 sps:$4 sm:$0xff]   ;;  %v7428_v52 = vld [vmem:[#allocation5 + $0xa0] ss:$8 sps:$4 sm:$0xff]  }
 0x2d2   : > { %v2472_v49 = vpop.f32.mrf.mxu0  ;;  %v2665_v39 = vpop.f32.mrf.mxu1  ;;  %4116 = vmatpush2.bf16.msra.mxu0 %v7422_v16  ;;  %v2795_v33 = vadd.f32 %v2794_v14, %v9278_v59  ;;  %v3076_v0 = vadd.f32 %v3075_v58, %v2943_v21  ;;  %v7431_v16 = vld [vmem:[#allocation5 + $0x1a0] ss:$8 sps:$4 sm:$0xff]   ;;  %v3051_v21 = vrot.slane %v8953_v37, 2 }
 0x2d3   : > { %v9314_v24 = vadd.f32 %v2665_v39, %v2472_v49  ;;  %4309 = vmatpush2.bf16.msra.mxu1 %v7425_v53  ;;  %v2832_v62 = vadd.f32 %v2831_v35, %v9285_v20  ;;  %v2951_v49 = vmul.f32 %v9304_v60, %v9304_v60  ;;  %v3113_v14 = vadd.f32 %v3112_v17, %v2944_v9 }
 0x2d4   : > { %v2474_v5 = vpop.f32.mrf.mxu0  ;;  %v2667_v31 = vpop.f32.mrf.mxu1  ;;  %v2796_v25 = vadd.f32 %v2795_v33, %v9290_v29  ;;  %4117 = vmatprep.subr.bf16.mxu0 %v7430_v1  ;;  %v3077_v53 = vadd.f32 %v3076_v0, %v2947_v56  ;;  %4310 = vmatprep.subr.bf16.mxu1 %v7433_v61  ;;  %v7439_v56 = vld [vmem:[#allocation5 + $0x194] ss:$8 sps:$4 sm:$0xff]  }
 0x2d5   : > { %v9319_v48 = vadd.f32 %v2667_v31, %v2474_v5  ;;  %v2952_v5 = vmul.f32 %v9309_v7, %v9309_v7  ;;  %v2833_v9 = vadd.f32 %v2832_v62, %v9297_v50  ;;  %v3114_v17 = vadd.f32 %v3113_v14, %v2948_v44  ;;  %v7434_v62 = vld [vmem:[#allocation5 + $0x90] ss:$8 sps:$4 sm:$0xff]  }
 0x2d6   : > { %v2478_v13 = vpop.f32.mrf.mxu0  ;;  %v2671_v40 = vpop.f32.mrf.mxu1  ;;  %4118 = vmatpush2.bf16.msra.mxu0 %v7428_v52  ;;  %v2797_v33 = vadd.f32 %v2796_v25, %v9304_v60  ;;  %v3078_v1 = vadd.f32 %v3077_v53, %v2951_v49  ;;  %v7437_v44 = vld [vmem:[#allocation5 + $0x190] ss:$8 sps:$4 sm:$0xff]   ;;  %v3014_v49 = vrot.slane %v8928_v6, 2 }
 0x2d7   : > { %v9324_v39 = vadd.f32 %v2671_v40, %v2478_v13  ;;  %v2955_v40 = vmul.f32 %v9314_v24, %v9314_v24  ;;  %4311 = vmatpush2.bf16.msra.mxu1 %v7431_v16  ;;  %v2834_v25 = vadd.f32 %v2833_v9, %v9309_v7  ;;  %v3115_v14 = vadd.f32 %v3114_v17, %v2952_v5 }
 0x2d8   : > { %v2480_v57 = vpop.f32.mrf.mxu0  ;;  %v2673_v63 = vpop.f32.mrf.mxu1  ;;  %v2798_v54 = vadd.f32 %v2797_v33, %v9314_v24  ;;  %4312 = vmatprep.subr.bf16.mxu1 %v7439_v56 }
 0x2d9   : > { %12734 = vst [vmem:[#allocation93_spill] sm:$0xff] %v9324_v39  ;;  %v9329_v31 = vadd.f32 %v2673_v63, %v2480_v57  ;;  %v2956_v57 = vmul.f32 %v9319_v48, %v9319_v48  ;;  %v7436_v63 = vld [vmem:[#allocation5 + $0x94] ss:$8 sps:$4 sm:$0xff]   ;;  %v3079_v53 = vadd.f32 %v3078_v1, %v2955_v40  ;;  %v2835_v5 = vadd.f32 %v2834_v25, %v9319_v48  ;;  %v7440_v25 = vld [vmem:[#allocation5 + $0x80] ss:$8 sps:$4 sm:$0xff]  }
 0x2da   : > { %v2482_v28 = vpop.f32.mrf.mxu0  ;;  %v2675_v15 = vpop.f32.mrf.mxu1  ;;  %4119 = vmatprep.subr.bf16.mxu0 %v7436_v63  ;;  %v2799_v17 = vadd.f32 %v2798_v54, %v9324_v39  ;;  %v7442_v63 = vld [vmem:[#allocation5 + $0x84] ss:$8 sps:$4 sm:$0xff]   ;;  %v3052_v40 = vadd.f32 %v3051_v21, %v8953_v37  ;;  %v2772_v37 = vrot.slane %v9128_v42, 1 }
 0x2db   : > { %v9334_v13 = vadd.f32 %v2675_v15, %v2482_v28  ;;  %v2959_v28 = vmul.f32 %v9324_v39, %v9324_v39  ;;  %v2960_v16 = vmul.f32 %v9329_v31, %v9329_v31  ;;  %4120 = vmatpush2.bf16.msra.mxu0 %v7434_v62  ;;  %v3116_v9 = vadd.f32 %v3115_v14, %v2956_v57  ;;  %v7443_v57 = vld [vmem:[#allocation5 + $0x180] ss:$8 sps:$4 sm:$0xff]  }
 0x2dc   : > { %v2484_v34 = vpop.f32.mrf.mxu0  ;;  %v2677_v43 = vpop.f32.mrf.mxu1  ;;  %4313 = vmatpush2.bf16.msra.mxu1 %v7437_v44  ;;  %v2836_v54 = vadd.f32 %v2835_v5, %v9329_v31  ;;  %4121 = vmatprep.subr.bf16.mxu0 %v7442_v63 }
 0x2dd   : > { %12735 = vst [vmem:[#allocation94_spill] sm:$0xff] %v9334_v13  ;;  %v9342_v15 = vadd.f32 %v2677_v43, %v2484_v34  ;;  %v2963_v34 = vmul.f32 %v9334_v13, %v9334_v13  ;;  %v3080_v1 = vadd.f32 %v3079_v53, %v2959_v28  ;;  %v3117_v14 = vadd.f32 %v3116_v9, %v2960_v16 }
 0x2de   : > { %v2488_v58 = vpop.f32.mrf.mxu0  ;;  %v2681_v35 = vpop.f32.mrf.mxu1  ;;  %v2800_v44 = vadd.f32 %v2799_v17, %v9334_v13  ;;  %4314 = vmatprep.subr.bf16.mxu1 %v7445_v38  ;;  %v2735_v16 = vrot.slane %v8938_v2, 1 }
 0x2df   : > { %12736 = vst [vmem:[#allocation95_spill] sm:$0xff] %v9342_v15  ;;  %v9344_v0 = vadd.f32 %v2681_v35, %v2488_v58  ;;  %v3081_v21 = vadd.f32 %v3080_v1, %v2963_v34  ;;  %4122 = vmatpush2.bf16.msra.mxu0 %v7440_v25  ;;  %v2837_v5 = vadd.f32 %v2836_v54, %v9342_v15 }
 0x2e0   : > { %v2490_v61 = vpop.f32.mrf.mxu0  ;;  %v2683_v52 = vpop.f32.mrf.mxu1  ;;  %4315 = vmatpush2.bf16.msra.mxu1 %v7443_v57  ;;  %v3015_v34 = vadd.f32 %v3014_v49, %v8928_v6  ;;  %v3053_v57 = vrot.slane %v3052_v40, 1 }
 0x2e1   : > { %12737 = vst [vmem:[#allocation110_spill] sm:$0xff] %v9344_v0  ;;  %v9353_v43 = vadd.f32 %v2683_v52, %v2490_v61  ;;  %v2964_v61 = vmul.f32 %v9342_v15, %v9342_v15  ;;  %v2967_v56 = vmul.f32 %v9344_v0, %v9344_v0  ;;  %v2801_v9 = vadd.f32 %v2800_v44, %v9344_v0 }
 0x2e2   : > { %v2492_v58 = vpop.f32.mrf.mxu0  ;;  %v2685_v35 = vpop.f32.mrf.mxu1 }
 0x2e3   : > { %12738 = vst [vmem:[#allocation111_spill] sm:$0xff] %v9353_v43  ;;  %v9357_v33 = vadd.f32 %v2685_v35, %v2492_v58  ;;  %v2968_v28 = vmul.f32 %v9353_v43, %v9353_v43  ;;  %v3118_v63 = vadd.f32 %v3117_v14, %v2964_v61  ;;  %v3082_v1 = vadd.f32 %v3081_v21, %v2967_v56 }
 0x2e4   : > { %v2494_v52 = vpop.f32.mrf.mxu0  ;;  %v2687_v62 = vpop.f32.mrf.mxu1  ;;  %v2838_v38 = vadd.f32 %v2837_v5, %v9353_v43 }
 0x2e5   : > { %12739 = vst [vmem:[#allocation112_spill] sm:$0xff] %v9357_v33  ;;  %v9366_v58 = vadd.f32 %v2687_v62, %v2494_v52  ;;  %v2971_v53 = vmul.f32 %v9357_v33, %v9357_v33  ;;  %v2802_v25 = vadd.f32 %v2801_v9, %v9357_v33  ;;  %v3119_v6 = vadd.f32 %v3118_v63, %v2968_v28 }
 0x2e6   : > { %v2498_v35 = vpop.f32.mrf.mxu0  ;;  %v2691_v39 = vpop.f32.mrf.mxu1  ;;  %v2736_v9 = vadd.f32 %v2735_v16, %v8938_v2 }
 0x2e7   : > { %12740 = vst [vmem:[#allocation113_spill] sm:$0xff] %v9366_v58  ;;  %v9376_v17 = vadd.f32 %v2691_v39, %v2498_v35  ;;  %v2972_v52 = vmul.f32 %v9366_v58, %v9366_v58  ;;  %v2773_v39 = vadd.f32 %v2772_v37, %v9128_v42  ;;  %v3083_v49 = vadd.f32 %v3082_v1, %v2971_v53 }
 0x2e8   : > { %v2500_v62 = vpop.f32.mrf.mxu0  ;;  %v2693_v13 = vpop.f32.mrf.mxu1  ;;  %v2839_v14 = vadd.f32 %v2838_v38, %v9366_v58 }
 0x2e9   : > { %12741 = vst [vmem:[#allocation114_spill] sm:$0xff] %v9376_v17  ;;  %v2975_v54 = vmul.f32 %v9376_v17, %v9376_v17  ;;  %v9385_v44 = vadd.f32 %v2693_v13, %v2500_v62  ;;  %v2803_v21 = vadd.f32 %v2802_v25, %v9376_v17  ;;  %v3016_v13 = vrot.slane %v3015_v34, 1 }
 0x2ea   : > { %v2502_v61 = vpop.f32.mrf.mxu0  ;;  %v2695_v56 = vpop.f32.mrf.mxu1  ;;  %v3120_v62 = vadd.f32 %v3119_v6, %v2972_v52  ;;  %v9401_v38 = vmul.f32 0.00390625, %v2773_v39  ;;  %v3054_v25 = vadd.f32 %v3053_v57, %v3052_v40 }
 0x2eb   : > { %12742 = vst [vmem:[#allocation115_spill] sm:$0xff] %v9385_v44  ;;  %v2976_v35 = vmul.f32 %v9385_v44, %v9385_v44  ;;  %v9392_v5 = vadd.f32 %v2695_v56, %v2502_v61  ;;  %v3084_v33 = vadd.f32 %v3083_v49, %v2975_v54  ;;  %v2840_v28 = vadd.f32 %v2839_v14, %v9385_v44 }
 0x2ec   : > { %v2504_v42 = vpop.f32.mrf.mxu0  ;;  %v2697_v37 = vpop.f32.mrf.mxu1  ;;  %v9406_v54 = vmul.f32 0.00390625, %v2736_v9  ;;  %v3017_v6 = vadd.f32 %v3016_v13, %v3015_v34  ;;  %v3134_v39 = vmul.f32 %v9401_v38, %v9401_v38 }
 0x2ed   : > { %12743 = vst [vmem:[#allocation116_spill] sm:$0xff] %v9392_v5  ;;  %v2804_v53 = vadd.f32 %v2803_v21, %v9392_v5  ;;  %v2979_v63 = vmul.f32 %v9392_v5, %v9392_v5  ;;  %v9399_v1 = vadd.f32 %v2697_v37, %v2504_v42  ;;  %v3121_v61 = vadd.f32 %v3120_v62, %v2976_v35 }
 0x2ee   : > { %v3130_v42 = vmul.f32 0.00390625, %v3054_v25  ;;  %v3129_v62 = vmul.f32 0.00390625, %v3017_v6  ;;  %v3133_v37 = vmul.f32 %v9406_v54, %v9406_v54 }
 0x2ef   : > { %v2805_v56 = vrot.slane %v2804_v53, 4  ;;  %v3085_v2 = vadd.f32 %v3084_v33, %v2979_v63  ;;  %v2841_v16 = vadd.f32 %v2840_v28, %v9399_v1  ;;  %v2980_v52 = vmul.f32 %v9399_v1, %v9399_v1 }
 0x2f0   : > { %v3138_v13 = vsub.f32 %v3130_v42, %v3134_v39 }
 0x2f1   : > { %v2806_v49 = vadd.f32 %v2805_v56, %v2804_v53  ;;  %v3086_v14 = vrot.slane %v3085_v2, 4  ;;  %v2842_v21 = vrot.slane %v2841_v16, 4  ;;  %v3122_v44 = vadd.f32 %v3121_v61, %v2980_v52 }
 0x2f2   : > { %v3137_v52 = vsub.f32 %v3129_v62, %v3133_v37 }
 0x2f3   : > { %v2807_v40 = vrot.slane %v2806_v49, 2  ;;  %v3087_v57 = vadd.f32 %v3086_v14, %v3085_v2  ;;  %v2843_v35 = vadd.f32 %v2842_v21, %v2841_v16  ;;  %v3123_v33 = vrot.slane %v3122_v44, 4 }
 0x2f4   : > { %v3142_v16 = vmax.f32 %v3138_v13, 0.0  ;;  %v3141_v0 = vmax.f32 %v3137_v52, 0.0 }
 0x2f5   : > { %v2808_v28 = vadd.f32 %v2807_v40, %v2806_v49  ;;  %v3088_v9 = vrot.slane %v3087_v57, 2  ;;  %v2844_v63 = vrot.slane %v2843_v35, 2  ;;  %v3124_v34 = vadd.f32 %v3123_v33, %v3122_v44 }
 0x2f6   : > { %v3146_v42 = vadd.f32 1e-05, %v3142_v16  ;;  %v3145_v33 = vadd.f32 1e-05, %v3141_v0 }
 0x2f7   : > { %v2809_v53 = vrot.slane %v2808_v28, 1  ;;  %v3089_v56 = vadd.f32 %v3088_v9, %v3087_v57  ;;  %v2845_v61 = vadd.f32 %v2844_v63, %v2843_v35  ;;  %v3125_v25 = vrot.slane %v3124_v34, 2 }
 0x2f8   : > { %7510 = vrsqrt.f32 %v3146_v42  ;;  %v12748_v42 = vld [vmem:[#allocation16_spill] sm:$0xff] }
 0x2f9   : > { %v2810_v5 = vadd.f32 %v2809_v53, %v2808_v28  ;;  %v3090_v17 = vrot.slane %v3089_v56, 1  ;;  %v2846_v58 = vrot.slane %v2845_v61, 1  ;;  %v3126_v2 = vadd.f32 %v3125_v25, %v3124_v34 }
 0x2fa   : > { %7512 = vrsqrt.f32 %v3145_v33  ;;  %v12752_v33 = vld [vmem:[#allocation17_spill] sm:$0xff] }
 0x2fb   : > { %v2851_v14 = vmul.f32 0.00390625, %v2810_v5  ;;  %v3091_v6 = vadd.f32 %v3090_v17, %v3089_v56  ;;  %v2847_v21 = vadd.f32 %v2846_v58, %v2845_v61  ;;  %v3127_v43 = vrot.slane %v3126_v2, 1  ;;  %v12744_v56 = vld [vmem:[#allocation15_spill] sm:$0xff] }
 0x2fc   : > { %v7715_v58 = vmov 1966171168  }
 0x2fd   : > { %v3131_v49 = vmul.f32 0.00390625, %v3091_v6  ;;  %v3135_v40 = vmul.f32 %v2851_v14, %v2851_v14  ;;  %v2852_v15 = vmul.f32 0.00390625, %v2847_v21  ;;  %v3128_v44 = vadd.f32 %v3127_v43, %v3126_v2  ;;  %v340_v6 = vld [vmem:[#allocation8 + $0x1] ss:$8 sm:$0xf] }
 0x2fe   : > { %v3160_v17 = vunpack.c.l.s4 %v7715_v58 }
 0x2ff   : > { %v3139_v39 = vsub.f32 %v3131_v49, %v3135_v40  ;;  %v3132_v57 = vmul.f32 0.00390625, %v3128_v44  ;;  %v3136_v35 = vmul.f32 %v2852_v15, %v2852_v15  ;;  %v12746_v40 = vld [vmem:[#allocation18_spill] sm:$0xff] }
 0x300   : > { %v3161_v63 = vunpack.c.0.s8 %v3160_v17 }
 0x301   : > { %v3143_v62 = vmax.f32 %v3139_v39, 0.0  ;;  %v3140_v37 = vsub.f32 %v3132_v57, %v3136_v35  ;;  %v12750_v57 = vld [vmem:[#allocation19_spill] sm:$0xff] }
 0x302   : > { %v9413_v61 = vsub.s32 %v3161_v63, %v12744_v56 }
 0x303   : > { %v3147_v28 = vadd.f32 1e-05, %v3143_v62  ;;  %v3144_v9 = vmax.f32 %v3140_v37, 0.0 }
 0x304   : > { %12745 = vst [vmem:[#allocation15_spill] sm:$0xff] %v9413_v61 }
 0x305   : > { %v3148_v5 = vadd.f32 1e-05, %v3144_v9  ;;  %7514 = vrsqrt.f32 %v3147_v28  ;;  %v7511_v34 = vpop.eup %7510 }
 0x307   : > { %7516 = vrsqrt.f32 %v3148_v5  ;;  %v7513_v13 = vpop.eup %7512 }
 0x308   : > { %v3157_v53 = vcombine.low %v7513_v13, %v7511_v34 }
 0x30a   : > { %v3165_v52 = vrot.slane %v3157_v53, %v9413_v61  ;;  %v12755_v53 = vld [vmem:[#allocation20_spill] sm:$0xff] }
 0x312   : > { %v7515_v43 = vpop.eup %7514 }
 0x314   : > { %v7517_v0 = vpop.eup %7516 }
 0x315   : > { %v3158_v25 = vcombine.low %v7515_v43, %v7517_v0 }
 0x317   : > { %v3172_v2 = vrot.slane %v3158_v25, %v9413_v61  ;;  %v12760_v25 = vld [vmem:[#allocation22_spill] sm:$0xff] }
 0x319   : > { %v3173_v16 = vcombine.low %v3165_v52, %v3172_v2  ;;  %v12761_v2 = vld [vmem:[#allocation41_spill] sm:$0xff] }
 0x31b   : > { %v3180_v21 = vrot.slane %v3173_v16, %v9413_v61 }
 0x31d   : > { %v3182_v49 = vmul.f32 %v3180_v21, %v340_v6  ;;  %v342_v6 = vld [vmem:[#allocation8 + $0x2] ss:$8 sm:$0xf] }
 0x31e   : > { %v12763_v21 = vld [vmem:[#allocation96_spill] sm:$0xff] }
 0x31f   : > { %v9419_v44 = vrot.slane %v3182_v49, %v12746_v40  ;;  %v9422_v39 = vrot.slane %v3182_v49, %v12748_v42  ;;  %v9425_v35 = vrot.slane %v3182_v49, %v12750_v57  ;;  %v9428_v62 = vrot.slane %v3182_v49, %v12752_v33 }
 0x321   : > { %12747 = vst [vmem:[#allocation117_spill] sm:$0xff] %v9419_v44  ;;  %12749 = vst [vmem:[#allocation118_spill] sm:$0xff] %v9422_v39  ;;  %v3204_v37 = vmul.f32 %v9419_v44, %v9406_v54  ;;  %v3205_v28 = vmul.f32 %v9422_v39, %v9401_v38  ;;  %v3206_v9 = vmul.f32 %v9425_v35, %v2851_v14  ;;  %v12756_v38 = vld [vmem:[#allocation21_spill] sm:$0xff] }
 0x322   : > { %12751 = vst [vmem:[#allocation19_spill] sm:$0xff] %v9425_v35  ;;  %12753 = vst [vmem:[#allocation17_spill] sm:$0xff] %v9428_v62  ;;  %v3207_v5 = vmul.f32 %v9428_v62, %v2852_v15  ;;  %v9438_v58 = vmul.f32 %v9428_v62, %v9399_v1  ;;  %v9444_v54 = vmul.f32 %v9419_v44, %v12755_v53  ;;  %v12758_v15 = vld [vmem:[#allocation82_spill] sm:$0xff] }
 0x323   : > { %v3212_v17 = vcombine.low %v3204_v37, %v3205_v28  ;;  %v9448_v14 = vmul.f32 %v9422_v39, %v12756_v38  ;;  %v9452_v56 = vmul.f32 %v9425_v35, %v12758_v15  ;;  %v9457_v0 = vmul.f32 %v9428_v62, %v8597_v45  ;;  %v12764_v37 = vld [vmem:[#allocation97_spill] sm:$0xff]  ;;  %v12772_v38 = vld [vmem:[#allocation26_spill] sm:$0xff] }
 0x324   : > { %12754 = vst [vmem:[#allocation119_spill] sm:$0xff] %v9438_v58  ;;  %v3213_v63 = vcombine.low %v3206_v9, %v3207_v5  ;;  %v9461_v52 = vmul.f32 %v9419_v44, %v12760_v25  ;;  %v9465_v16 = vmul.f32 %v9422_v39, %v12761_v2  ;;  %v9469_v49 = vmul.f32 %v9425_v35, %v12763_v21  ;;  %v12766_v9 = vld [vmem:[#allocation23_spill] sm:$0xff]  ;;  %v12767_v5 = vld [vmem:[#allocation24_spill] sm:$0xff]  ;;  %v12781_v58 = vld [vmem:[#allocation102_spill] sm:$0xff] }
 0x325   : > { %v3220_v34 = vrot.slane %v3212_v17, %v9413_v61  ;;  %12757 = vst [vmem:[#allocation20_spill] sm:$0xff] %v9448_v14  ;;  %12759 = vst [vmem:[#allocation21_spill] sm:$0xff] %v9457_v0  ;;  %v9473_v28 = vmul.f32 %v9428_v62, %v12764_v37  ;;  %v9477_v45 = vmul.f32 %v9419_v44, %v12766_v9  ;;  %v12774_v25 = vld [vmem:[#allocation99_spill] sm:$0xff]  ;;  %v12775_v21 = vld [vmem:[#allocation100_spill] sm:$0xff] }
 0x326   : > { %v3227_v13 = vrot.slane %v3213_v63, %v9413_v61  ;;  %12762 = vst [vmem:[#allocation82_spill] sm:$0xff] %v9465_v16  ;;  %v9481_v17 = vmul.f32 %v9422_v39, %v12767_v5  ;;  %v9485_v63 = vmul.f32 %v9425_v35, %v8906_v11  ;;  %v9497_v15 = vmul.f32 %v9422_v39, %v12772_v38  ;;  %v12777_v37 = vld [vmem:[#allocation27_spill] sm:$0xff]  ;;  %v12778_v5 = vld [vmem:[#allocation28_spill] sm:$0xff]  ;;  %v12813_v16 = vld [vmem:[#allocation109_spill] sm:$0xff] }
 0x327   : > { %12765 = vst [vmem:[#allocation22_spill] sm:$0xff] %v9473_v28  ;;  %v9501_v2 = vmul.f32 %v9425_v35, %v12774_v25  ;;  %v9505_v11 = vmul.f32 %v9428_v62, %v12775_v21  ;;  %v9509_v9 = vmul.f32 %v9419_v44, %v12777_v37  ;;  %v9521_v25 = vmul.f32 %v9428_v62, %v12781_v58  ;;  %v12800_v28 = vld [vmem:[#allocation35_spill] sm:$0xff]  ;;  %v12829_v14 = vld [vmem:[#allocation73_spill] sm:$0xff] }
 0x328   : > { %v3228_v43 = vcombine.low %v3220_v34, %v3227_v13  ;;  %12768 = vst [vmem:[#allocation41_spill] sm:$0xff] %v9481_v17  ;;  %v12769_v34 = vld [vmem:[#allocation98_spill] sm:$0xff]  ;;  %12773 = vst [vmem:[#allocation97_spill] sm:$0xff] %v9497_v15  ;;  %v12786_v15 = vld [vmem:[#allocation103_spill] sm:$0xff] }
 0x329   : > { %v9489_v13 = vmul.f32 %v9428_v62, %v12769_v34  ;;  %12776 = vst [vmem:[#allocation23_spill] sm:$0xff] %v9505_v11  ;;  %v9513_v34 = vmul.f32 %v9422_v39, %v12778_v5  ;;  %12782 = vst [vmem:[#allocation98_spill] sm:$0xff] %v9521_v25  ;;  %v12784_v11 = vld [vmem:[#allocation30_spill] sm:$0xff]  ;;  %v9533_v5 = vmul.f32 %v9425_v35, %v12786_v15  ;;  %v12790_v25 = vld [vmem:[#allocation32_spill] sm:$0xff] }
 0x32a   : > { %v3235_v1 = vrot.slane %v3228_v43, %v9413_v61  ;;  %v12771_v43 = vld [vmem:[#allocation25_spill] sm:$0xff]  ;;  %v9529_v37 = vmul.f32 %v9422_v39, %v12784_v11  ;;  %v9553_v15 = vmul.f32 %v9428_v62, %v8997_v4  ;;  %v12797_v17 = vld [vmem:[#allocation106_spill] sm:$0xff]  ;;  %v9573_v4 = vmul.f32 %v9419_v44, %v12800_v28 }
 0x32b   : > { %12770 = vst [vmem:[#allocation96_spill] sm:$0xff] %v9489_v13  ;;  %v9493_v53 = vmul.f32 %v9419_v44, %v12771_v43  ;;  %12779 = vst [vmem:[#allocation24_spill] sm:$0xff] %v9513_v34  ;;  %v12780_v61 = vld [vmem:[#allocation101_spill] sm:$0xff] }
 0x32c   : > { %v3237_v43 = vsub.f32 %v342_v6, %v3235_v1  ;;  %v9517_v38 = vmul.f32 %v9425_v35, %v12780_v61  ;;  %v12783_v13 = vld [vmem:[#allocation29_spill] sm:$0xff]  ;;  %12785 = vst [vmem:[#allocation25_spill] sm:$0xff] %v9529_v37  ;;  %v12787_v1 = vld [vmem:[#allocation104_spill] sm:$0xff]  ;;  %v12789_v6 = vld [vmem:[#allocation31_spill] sm:$0xff] }
 0x32d   : > { %v9525_v21 = vmul.f32 %v9419_v44, %v12783_v13  ;;  %v9537_v61 = vmul.f32 %v9428_v62, %v12787_v1  ;;  %v9541_v58 = vmul.f32 %v9419_v44, %v12789_v6  ;;  %v9545_v13 = vmul.f32 %v9422_v39, %v12790_v25  ;;  %v12792_v34 = vld [vmem:[#allocation105_spill] sm:$0xff]  ;;  %12793 = vst [vmem:[#allocation100_spill] sm:$0xff] %v9553_v15 }
 0x32e   : > { %v9549_v11 = vmul.f32 %v9425_v35, %v12792_v34  ;;  %v12794_v37 = vld [vmem:[#allocation33_spill] sm:$0xff]  ;;  %v9565_v25 = vmul.f32 %v9425_v35, %v12797_v17  ;;  %v9576_v15 = vrot.slane %v3237_v43, %v12746_v40  ;;  %v9588_v17 = vmul.f32 %v9428_v62, %v9033_v30 }
 0x32f   : > { %12788 = vst [vmem:[#allocation26_spill] sm:$0xff] %v9537_v61  ;;  %12791 = vst [vmem:[#allocation99_spill] sm:$0xff] %v9545_v13  ;;  %v9557_v1 = vmul.f32 %v9419_v44, %v12794_v37  ;;  %v12795_v61 = vld [vmem:[#allocation34_spill] sm:$0xff]  ;;  %v12798_v13 = vld [vmem:[#allocation107_spill] sm:$0xff]  ;;  %v9594_v28 = vrot.slane %v3237_v43, %v12750_v57  ;;  %v9597_v40 = vrot.slane %v3237_v43, %v12752_v33 }
 0x330   : > { %v9561_v6 = vmul.f32 %v9422_v39, %v12795_v61  ;;  %v9569_v34 = vmul.f32 %v9428_v62, %v12798_v13  ;;  %12801 = vst [vmem:[#allocation101_spill] sm:$0xff] %v9576_v15  ;;  %v12802_v37 = vld [vmem:[#allocation36_spill] sm:$0xff]  ;;  %12805 = vst [vmem:[#allocation29_spill] sm:$0xff] %v9588_v17  ;;  %v9591_v13 = vrot.slane %v3237_v43, %v12748_v42  ;;  %v12815_v42 = vld [vmem:[#allocation63_spill] sm:$0xff] }
 0x331   : > { %v9580_v0 = vmul.f32 %v9422_v39, %v12802_v37  ;;  %v12804_v61 = vld [vmem:[#allocation108_spill] sm:$0xff]  ;;  %12807 = vst [vmem:[#allocation103_spill] sm:$0xff] %v9594_v28  ;;  %12808 = vst [vmem:[#allocation104_spill] sm:$0xff] %v9597_v40  ;;  %v9609_v30 = vmul.f32 %v9425_v35, %v12813_v16  ;;  %v9613_v17 = vmul.f32 %v9428_v62, %v12815_v42  ;;  %v12817_v57 = vld [vmem:[#allocation38_spill] sm:$0xff] }
 0x332   : > { %12796 = vst [vmem:[#allocation27_spill] sm:$0xff] %v9561_v6  ;;  %12799 = vst [vmem:[#allocation28_spill] sm:$0xff] %v9569_v34  ;;  %v9584_v6 = vmul.f32 %v9425_v35, %v12804_v61  ;;  %v12809_v34 = vld [vmem:[#allocation37_spill] sm:$0xff]  ;;  %v9617_v33 = vmul.f32 %v9419_v44, %v12817_v57  ;;  %v12819_v43 = vld [vmem:[#allocation39_spill] sm:$0xff] }
 0x333   : > { %12803 = vst [vmem:[#allocation102_spill] sm:$0xff] %v9580_v0  ;;  %12806 = vst [vmem:[#allocation30_spill] sm:$0xff] %v9591_v13  ;;  %v9601_v37 = vmul.f32 %v9419_v44, %v12809_v34  ;;  %v12811_v0 = vld [vmem:[#allocation83_spill] sm:$0xff]  ;;  %v9621_v34 = vmul.f32 %v9422_v39, %v12819_v43  ;;  %v12825_v13 = vld [vmem:[#allocation40_spill] sm:$0xff]  ;;  %v9641_v43 = vmul.f32 %v9425_v35, %v12829_v14 }
 0x334   : > { %v9605_v61 = vmul.f32 %v9422_v39, %v12811_v0  ;;  %12814 = vst [vmem:[#allocation105_spill] sm:$0xff] %v9609_v30  ;;  %12816 = vst [vmem:[#allocation33_spill] sm:$0xff] %v9613_v17  ;;  %v12821_v40 = vld [vmem:[#allocation67_spill] sm:$0xff]  ;;  %v9633_v42 = vmul.f32 %v9419_v44, %v12825_v13  ;;  %v12827_v17 = vld [vmem:[#allocation84_spill] sm:$0xff]  ;;  %v9661_v14 = vmul.f32 %v9428_v62, %v9105_v19 }
 0x335   : > { %12810 = vst [vmem:[#allocation31_spill] sm:$0xff] %v9601_v37  ;;  %12818 = vst [vmem:[#allocation34_spill] sm:$0xff] %v9617_v33  ;;  %v9625_v0 = vmul.f32 %v9425_v35, %v12821_v40  ;;  %v9637_v57 = vmul.f32 %v9422_v39, %v12827_v17  ;;  %v9645_v40 = vmul.f32 %v9428_v62, %v9087_v27  ;;  %v12905_v33 = vld [vmem:[#allocation113_spill] sm:$0xff]  ;;  %v12908_v30 = vld [vmem:[#allocation114_spill] sm:$0xff] }
 0x336   : > { %12812 = vst [vmem:[#allocation32_spill] sm:$0xff] %v9605_v61  ;;  %12820 = vst [vmem:[#allocation106_spill] sm:$0xff] %v9621_v34  ;;  %v12823_v61 = vld [vmem:[#allocation72_spill] sm:$0xff]  ;;  %v12832_v34 = vld [vmem:[#allocation42_spill] sm:$0xff]  ;;  %v9657_v17 = vmul.f32 %v9425_v35, %v9094_v23  ;;  %v9677_v23 = vmul.f32 %v9428_v62, %v9123_v51 }
 0x337   : > { %12822 = vst [vmem:[#allocation107_spill] sm:$0xff] %v9625_v0  ;;  %v9629_v16 = vmul.f32 %v9428_v62, %v12823_v61  ;;  %12826 = vst [vmem:[#allocation36_spill] sm:$0xff] %v9633_v42  ;;  %v9649_v61 = vmul.f32 %v9419_v44, %v12832_v34  ;;  %v12899_v42 = vld [vmem:[#allocation111_spill] sm:$0xff]  ;;  %v12902_v0 = vld [vmem:[#allocation77_spill] sm:$0xff] }
 0x338   : > { %12828 = vst [vmem:[#allocation108_spill] sm:$0xff] %v9637_v57  ;;  %12830 = vst [vmem:[#allocation37_spill] sm:$0xff] %v9641_v43  ;;  %v12838_v57 = vld [vmem:[#allocation44_spill] sm:$0xff]  ;;  %v12896_v43 = vld [vmem:[#allocation75_spill] sm:$0xff] }
 0x339   : > { %12824 = vst [vmem:[#allocation35_spill] sm:$0xff] %v9629_v16  ;;  %12831 = vst [vmem:[#allocation83_spill] sm:$0xff] %v9645_v40  ;;  %v12834_v16 = vld [vmem:[#allocation43_spill] sm:$0xff]  ;;  %v9665_v27 = vmul.f32 %v9419_v44, %v12838_v57  ;;  %v12840_v40 = vld [vmem:[#allocation85_spill] sm:$0xff]  ;;  %v9685_v57 = vmul.f32 %v9428_v62, %v9149_v12  ;;  %v3308_v12 = vmul.f32 %v9425_v35, %v9194_v47 }
 0x33a   : > { %12833 = vst [vmem:[#allocation109_spill] sm:$0xff] %v9649_v61  ;;  %v9653_v13 = vmul.f32 %v9422_v39, %v12834_v16  ;;  %12836 = vst [vmem:[#allocation38_spill] sm:$0xff] %v9657_v17  ;;  %v9669_v34 = vmul.f32 %v9422_v39, %v12840_v40  ;;  %v9673_v16 = vmul.f32 %v9425_v35, %v9112_v32  ;;  %v12890_v17 = vld [vmem:[#allocation68_spill] sm:$0xff]  ;;  %v12893_v61 = vld [vmem:[#allocation95_spill] sm:$0xff] }
 0x33b   : > { %12837 = vst [vmem:[#allocation39_spill] sm:$0xff] %v9661_v14  ;;  %12839 = vst [vmem:[#allocation67_spill] sm:$0xff] %v9665_v27  ;;  %v12847_v14 = vld [vmem:[#allocation86_spill] sm:$0xff]  ;;  %v9693_v32 = vmul.f32 %v9428_v62, %v9165_v18  ;;  %v3312_v18 = vmul.f32 %v9425_v35, %v9212_v22  ;;  %v12861_v27 = vld [vmem:[#allocation55_spill] sm:$0xff] }
 0x33c   : > { %12835 = vst [vmem:[#allocation63_spill] sm:$0xff] %v9653_v13  ;;  %12841 = vst [vmem:[#allocation72_spill] sm:$0xff] %v9669_v34  ;;  %v12844_v13 = vld [vmem:[#allocation46_spill] sm:$0xff]  ;;  %v9689_v40 = vmul.f32 %v9422_v39, %v12847_v14  ;;  %v12850_v34 = vld [vmem:[#allocation48_spill] sm:$0xff] }
 0x33d   : > { %12842 = vst [vmem:[#allocation40_spill] sm:$0xff] %v9673_v16  ;;  %12843 = vst [vmem:[#allocation84_spill] sm:$0xff] %v9677_v23  ;;  %v9681_v19 = vmul.f32 %v9422_v39, %v12844_v13  ;;  %v3302_v51 = vmul.f32 %v9419_v44, %v12850_v34  ;;  %v3304_v23 = vmul.f32 %v9425_v35, %v9176_v10  ;;  %v12851_v13 = vld [vmem:[#allocation50_spill] sm:$0xff]  ;;  %v12856_v10 = vld [vmem:[#allocation53_spill] sm:$0xff] }
 0x33e   : > { %12846 = vst [vmem:[#allocation42_spill] sm:$0xff] %v9685_v57  ;;  %12848 = vst [vmem:[#allocation43_spill] sm:$0xff] %v9689_v40  ;;  %v12852_v57 = vld [vmem:[#allocation51_spill] sm:$0xff]  ;;  %v12853_v40 = vld [vmem:[#allocation52_spill] sm:$0xff]  ;;  %v9713_v34 = vmul.f32 %v9428_v62, %v9219_v36  ;;  %v9731_v36 = vmul.f32 %v9422_v39, %v12861_v27  ;;  %v9749_v27 = vmul.f32 %v9428_v62, %v9271_v46 }
 0x33f   : > { %12845 = vst [vmem:[#allocation73_spill] sm:$0xff] %v9681_v19  ;;  %12849 = vst [vmem:[#allocation44_spill] sm:$0xff] %v9693_v32  ;;  %v3306_v19 = vmul.f32 %v9419_v44, %v12851_v13  ;;  %v3310_v14 = vmul.f32 %v9419_v44, %v12852_v57  ;;  %v9707_v16 = vmul.f32 %v9422_v39, %v12853_v40  ;;  %v12857_v32 = vld [vmem:[#allocation88_spill] sm:$0xff] }
 0x340   : > { %12855 = vst [vmem:[#allocation46_spill] sm:$0xff] %v9713_v34  ;;  %v3314_v13 = vmul.f32 %v9419_v44, %v12856_v10  ;;  %v9719_v47 = vmul.f32 %v9422_v39, %v12857_v32  ;;  %v3316_v57 = vmul.f32 %v9425_v35, %v9230_v41  ;;  %v9725_v40 = vmul.f32 %v9428_v62, %v9236_v26  ;;  %v12864_v34 = vld [vmem:[#allocation56_spill] sm:$0xff] }
 0x341   : > { %12854 = vst [vmem:[#allocation85_spill] sm:$0xff] %v9707_v16  ;;  %v12860_v16 = vld [vmem:[#allocation54_spill] sm:$0xff]  ;;  %12862 = vst [vmem:[#allocation50_spill] sm:$0xff] %v9731_v36  ;;  %v3320_v10 = vmul.f32 %v9425_v35, %v9247_v3  ;;  %v9737_v32 = vmul.f32 %v9428_v62, %v9254_v55  ;;  %v3322_v41 = vmul.f32 %v9419_v44, %v12864_v34  ;;  %v12868_v36 = vld [vmem:[#allocation59_spill] sm:$0xff] }
 0x342   : > { %12858 = vst [vmem:[#allocation86_spill] sm:$0xff] %v9719_v47  ;;  %12859 = vst [vmem:[#allocation48_spill] sm:$0xff] %v9725_v40  ;;  %v3318_v22 = vmul.f32 %v9419_v44, %v12860_v16  ;;  %v12865_v47 = vld [vmem:[#allocation57_spill] sm:$0xff]  ;;  %v3324_v16 = vmul.f32 %v9425_v35, %v9261_v8  ;;  %v3326_v3 = vmul.f32 %v9419_v44, %v12868_v36  ;;  %v12869_v40 = vld [vmem:[#allocation60_spill] sm:$0xff] }
 0x343   : > { %12863 = vst [vmem:[#allocation51_spill] sm:$0xff] %v9737_v32  ;;  %v9743_v26 = vmul.f32 %v9422_v39, %v12865_v47  ;;  %12867 = vst [vmem:[#allocation53_spill] sm:$0xff] %v9749_v27  ;;  %v9755_v55 = vmul.f32 %v9422_v39, %v12869_v40  ;;  %v3328_v34 = vmul.f32 %v9425_v35, %v9278_v59  ;;  %v12872_v32 = vld [vmem:[#allocation61_spill] sm:$0xff]  ;;  %v12910_v37 = vld [vmem:[#allocation116_spill] sm:$0xff] }
 0x344   : > { %v9761_v47 = vmul.f32 %v9428_v62, %v9285_v20  ;;  %v3330_v8 = vmul.f32 %v9419_v44, %v12872_v32  ;;  %v3332_v36 = vmul.f32 %v9425_v35, %v9290_v29  ;;  %v9773_v40 = vmul.f32 %v9428_v62, %v9297_v50  ;;  %v12877_v27 = vld [vmem:[#allocation65_spill] sm:$0xff] }
 0x345   : > { %12866 = vst [vmem:[#allocation52_spill] sm:$0xff] %v9743_v26  ;;  %12870 = vst [vmem:[#allocation88_spill] sm:$0xff] %v9755_v55  ;;  %v12873_v26 = vld [vmem:[#allocation58_spill] sm:$0xff]  ;;  %v12876_v55 = vld [vmem:[#allocation64_spill] sm:$0xff]  ;;  %v9779_v20 = vmul.f32 %v9422_v39, %v12877_v27  ;;  %v3336_v32 = vmul.f32 %v9425_v35, %v9304_v60  ;;  %v9797_v27 = vmul.f32 %v9428_v62, %v9319_v48 }
 0x346   : > { %12871 = vst [vmem:[#allocation54_spill] sm:$0xff] %v9761_v47  ;;  %v9767_v46 = vmul.f32 %v9422_v39, %v12873_v26  ;;  %12875 = vst [vmem:[#allocation56_spill] sm:$0xff] %v9773_v40  ;;  %v3334_v59 = vmul.f32 %v9419_v44, %v12876_v55  ;;  %v9785_v26 = vmul.f32 %v9428_v62, %v9309_v7  ;;  %v12880_v47 = vld [vmem:[#allocation66_spill] sm:$0xff] }
 0x347   : > { %12878 = vst [vmem:[#allocation57_spill] sm:$0xff] %v9779_v20  ;;  %v3338_v29 = vmul.f32 %v9419_v44, %v12880_v47  ;;  %v3340_v55 = vmul.f32 %v9425_v35, %v9314_v24  ;;  %12883 = vst [vmem:[#allocation61_spill] sm:$0xff] %v9797_v27  ;;  %v12884_v20 = vld [vmem:[#allocation69_spill] sm:$0xff]  ;;  %v12885_v40 = vld [vmem:[#allocation70_spill] sm:$0xff]  ;;  %v9815_v48 = vmul.f32 %v9422_v39, %v12890_v17 }
 0x348   : > { %12874 = vst [vmem:[#allocation55_spill] sm:$0xff] %v9767_v46  ;;  %12879 = vst [vmem:[#allocation59_spill] sm:$0xff] %v9785_v26  ;;  %v12881_v46 = vld [vmem:[#allocation62_spill] sm:$0xff]  ;;  %v3342_v60 = vmul.f32 %v9419_v44, %v12884_v20  ;;  %v9803_v7 = vmul.f32 %v9422_v39, %v12885_v40  ;;  %v12887_v26 = vld [vmem:[#allocation93_spill] sm:$0xff]  ;;  %v9821_v40 = vmul.f32 %v9428_v62, %v12893_v61 }
 0x349   : > { %v9791_v50 = vmul.f32 %v9422_v39, %v12881_v46  ;;  %v3344_v47 = vmul.f32 %v9425_v35, %v12887_v26  ;;  %v9809_v46 = vmul.f32 %v9428_v62, %v9329_v31  ;;  %12891 = vst [vmem:[#allocation65_spill] sm:$0xff] %v9815_v48  ;;  %v12892_v27 = vld [vmem:[#allocation94_spill] sm:$0xff]  ;;  %v9827_v31 = vmul.f32 %v9422_v39, %v12896_v43  ;;  %v12901_v48 = vld [vmem:[#allocation76_spill] sm:$0xff] }
 0x34a   : > { %12886 = vst [vmem:[#allocation58_spill] sm:$0xff] %v9803_v7  ;;  %v3348_v20 = vmul.f32 %v9425_v35, %v12892_v27  ;;  %12894 = vst [vmem:[#allocation66_spill] sm:$0xff] %v9821_v40  ;;  %v12895_v7 = vld [vmem:[#allocation74_spill] sm:$0xff]  ;;  %v9833_v17 = vmul.f32 %v9428_v62, %v12899_v42  ;;  %v3354_v27 = vmul.f32 %v9419_v44, %v12901_v48  ;;  %v12904_v40 = vld [vmem:[#allocation112_spill] sm:$0xff] }
 0x34b   : > { %12882 = vst [vmem:[#allocation60_spill] sm:$0xff] %v9791_v50  ;;  %12888 = vst [vmem:[#allocation64_spill] sm:$0xff] %v9809_v46  ;;  %v12889_v50 = vld [vmem:[#allocation71_spill] sm:$0xff]  ;;  %v3350_v26 = vmul.f32 %v9419_v44, %v12895_v7  ;;  %v12898_v46 = vld [vmem:[#allocation110_spill] sm:$0xff]  ;;  %v9839_v61 = vmul.f32 %v9422_v39, %v12902_v0  ;;  %v3356_v7 = vmul.f32 %v9425_v35, %v12904_v40 }
 0x34c   : > { %v3346_v24 = vmul.f32 %v9419_v44, %v12889_v50  ;;  %12897 = vst [vmem:[#allocation62_spill] sm:$0xff] %v9827_v31  ;;  %v3352_v50 = vmul.f32 %v9425_v35, %v12898_v46  ;;  %12900 = vst [vmem:[#allocation69_spill] sm:$0xff] %v9833_v17  ;;  %v9845_v43 = vmul.f32 %v9428_v62, %v12905_v33  ;;  %v12907_v31 = vld [vmem:[#allocation79_spill] sm:$0xff]  ;;  %v12909_v17 = vld [vmem:[#allocation81_spill] sm:$0xff] }
 0x34d   : > { %12903 = vst [vmem:[#allocation70_spill] sm:$0xff] %v9839_v61  ;;  %v3358_v46 = vmul.f32 %v9419_v44, %v12907_v31  ;;  %v3360_v42 = vmul.f32 %v9425_v35, %v12908_v30  ;;  %v3362_v48 = vmul.f32 %v9419_v44, %v12909_v17  ;;  %v3364_v0 = vmul.f32 %v9425_v35, %v12910_v37  ;;  %v12930_v44 = vld [vmem:[#allocation78_spill] sm:$0xff] }
 0x34e   : > { %12906 = vst [vmem:[#allocation93_spill] sm:$0xff] %v9845_v43  ;;  %v9856_v61 = vadd.f32 %v9576_v15, %v3302_v51  ;;  %v9859_v40 = vadd.f32 %v9594_v28, %v3304_v23  ;;  %v9862_v33 = vadd.f32 %v9576_v15, %v3306_v19  ;;  %v9865_v31 = vadd.f32 %v9594_v28, %v3308_v12  ;;  %v12939_v43 = vld [vmem:[#allocation109_spill] sm:$0xff] }
 0x34f   : > { %v9868_v30 = vadd.f32 %v9576_v15, %v3310_v14  ;;  %v9871_v17 = vadd.f32 %v9594_v28, %v3312_v18  ;;  %v9874_v37 = vadd.f32 %v9576_v15, %v3314_v13  ;;  %v9877_v51 = vadd.f32 %v9594_v28, %v3316_v57 }
 0x350   : > { %12911 = vst [vmem:[#allocation71_spill] sm:$0xff] %v9856_v61  ;;  %12912 = vst [vmem:[#allocation68_spill] sm:$0xff] %v9859_v40  ;;  %v9880_v23 = vadd.f32 %v9576_v15, %v3318_v22  ;;  %v9883_v19 = vadd.f32 %v9594_v28, %v3320_v10  ;;  %v9886_v12 = vadd.f32 %v9576_v15, %v3322_v41 }
 0x351   : > { %12913 = vst [vmem:[#allocation94_spill] sm:$0xff] %v9862_v33  ;;  %12914 = vst [vmem:[#allocation95_spill] sm:$0xff] %v9865_v31  ;;  %v9889_v14 = vadd.f32 %v9594_v28, %v3324_v16  ;;  %v9892_v18 = vadd.f32 %v9576_v15, %v3326_v3  ;;  %v9895_v13 = vadd.f32 %v9594_v28, %v3328_v34  ;;  %v12951_v31 = vld [vmem:[#allocation104_spill] sm:$0xff] }
 0x352   : > { %12915 = vst [vmem:[#allocation74_spill] sm:$0xff] %v9868_v30  ;;  %12916 = vst [vmem:[#allocation75_spill] sm:$0xff] %v9871_v17  ;;  %v9898_v57 = vadd.f32 %v9576_v15, %v3330_v8  ;;  %v9901_v22 = vadd.f32 %v9594_v28, %v3332_v36  ;;  %v9904_v10 = vadd.f32 %v9576_v15, %v3334_v59  ;;  %v12952_v30 = vld [vmem:[#allocation22_spill] sm:$0xff] }
 0x353   : > { %12917 = vst [vmem:[#allocation110_spill] sm:$0xff] %v9874_v37  ;;  %12918 = vst [vmem:[#allocation111_spill] sm:$0xff] %v9877_v51  ;;  %v9907_v41 = vadd.f32 %v9594_v28, %v3336_v32  ;;  %v9910_v16 = vadd.f32 %v9576_v15, %v3338_v29  ;;  %v9913_v3 = vadd.f32 %v9594_v28, %v3340_v55  ;;  %v12954_v51 = vld [vmem:[#allocation97_spill] sm:$0xff] }
 0x354   : > { %12919 = vst [vmem:[#allocation76_spill] sm:$0xff] %v9880_v23  ;;  %12920 = vst [vmem:[#allocation77_spill] sm:$0xff] %v9883_v19  ;;  %v9916_v34 = vadd.f32 %v9576_v15, %v3342_v60  ;;  %v9919_v8 = vadd.f32 %v9594_v28, %v3344_v47  ;;  %v9922_v36 = vadd.f32 %v9576_v15, %v3346_v24  ;;  %v12923_v24 = vld [vmem:[#allocation80_spill] sm:$0xff]  ;;  %v12956_v23 = vld [vmem:[#allocation23_spill] sm:$0xff] }
 0x355   : > { %v9925_v59 = vadd.f32 %v9594_v28, %v3348_v20  ;;  %v9928_v32 = vadd.f32 %v9576_v15, %v3350_v26  ;;  %v9931_v29 = vadd.f32 %v9594_v28, %v3352_v50  ;;  %v9934_v55 = vadd.f32 %v9576_v15, %v3354_v27  ;;  %v12928_v27 = vld [vmem:[#allocation115_spill] sm:$0xff] }
 0x356   : > { %v9937_v60 = vadd.f32 %v9594_v28, %v3356_v7  ;;  %v9940_v47 = vadd.f32 %v9576_v15, %v3358_v46  ;;  %v9944_v35 = vmul.f32 %v9422_v39, %v12923_v24  ;;  %v9947_v20 = vadd.f32 %v9594_v28, %v3360_v42 }
 0x357   : > { %v9950_v26 = vadd.f32 %v9576_v15, %v3362_v48  ;;  %v9953_v50 = vadd.f32 %v9594_v28, %v3364_v0  ;;  %v9957_v7 = vmul.f32 %v9428_v62, %v12928_v27  ;;  %v9961_v46 = vmul.f32 %v9422_v39, %v12930_v44  ;;  %v12933_v62 = vld [vmem:[#allocation105_spill] sm:$0xff]  ;;  %v12934_v39 = vld [vmem:[#allocation34_spill] sm:$0xff] }
 0x358   : > { %12921 = vst [vmem:[#allocation112_spill] sm:$0xff] %v9937_v60  ;;  %12922 = vst [vmem:[#allocation113_spill] sm:$0xff] %v9940_v47  ;;  %v9965_v24 = vadd.f32 %v9576_v15, %v9444_v54  ;;  %v9969_v42 = vadd.f32 %v9594_v28, %v9452_v56  ;;  %v3391_v48 = vadd.f32 %v9576_v15, %v9461_v52 }
 0x359   : > { %12924 = vst [vmem:[#allocation79_spill] sm:$0xff] %v9944_v35  ;;  %12925 = vst [vmem:[#allocation114_spill] sm:$0xff] %v9947_v20  ;;  %v9975_v0 = vadd.f32 %v9594_v28, %v9469_v49  ;;  %v9979_v27 = vadd.f32 %v9576_v15, %v9477_v45  ;;  %v9983_v44 = vadd.f32 %v9594_v28, %v9485_v63  ;;  %v12937_v35 = vld [vmem:[#allocation37_spill] sm:$0xff]  ;;  %v12945_v20 = vld [vmem:[#allocation40_spill] sm:$0xff] }
 0x35a   : > { %12926 = vst [vmem:[#allocation81_spill] sm:$0xff] %v9950_v26  ;;  %12927 = vst [vmem:[#allocation116_spill] sm:$0xff] %v9953_v50  ;;  %v9987_v54 = vadd.f32 %v9576_v15, %v9493_v53  ;;  %v9991_v56 = vadd.f32 %v9594_v28, %v9501_v2  ;;  %v9995_v52 = vadd.f32 %v9576_v15, %v9509_v9  ;;  %v12941_v50 = vld [vmem:[#allocation38_spill] sm:$0xff]  ;;  %v12943_v26 = vld [vmem:[#allocation67_spill] sm:$0xff]  ;;  %v3515_v47 = vmax.f32 %v9965_v24, 0.0 }
 0x35b   : > { %12929 = vst [vmem:[#allocation80_spill] sm:$0xff] %v9957_v7  ;;  %12931 = vst [vmem:[#allocation115_spill] sm:$0xff] %v9961_v46  ;;  %v9999_v49 = vadd.f32 %v9594_v28, %v9517_v38  ;;  %v10003_v45 = vadd.f32 %v9576_v15, %v9525_v21  ;;  %v10007_v63 = vadd.f32 %v9594_v28, %v9533_v5  ;;  %v12935_v7 = vld [vmem:[#allocation107_spill] sm:$0xff]  ;;  %v12936_v46 = vld [vmem:[#allocation36_spill] sm:$0xff]  ;;  %v3519_v60 = vmax.f32 %v3391_v48, 0.0 }
 0x35c   : > { %v10011_v53 = vadd.f32 %v9576_v15, %v9541_v58  ;;  %v10015_v2 = vadd.f32 %v9594_v28, %v9549_v11  ;;  %v10019_v9 = vadd.f32 %v9576_v15, %v9557_v1  ;;  %v10023_v38 = vadd.f32 %v9594_v28, %v9565_v25  ;;  %v12932_v58 = vld [vmem:[#allocation31_spill] sm:$0xff]  ;;  %v12955_v48 = vld [vmem:[#allocation96_spill] sm:$0xff] }
 0x35d   : > { %v10027_v21 = vadd.f32 %v9576_v15, %v9573_v4  ;;  %v10031_v5 = vadd.f32 %v9594_v28, %v9584_v6  ;;  %v10035_v11 = vadd.f32 %v9576_v15, %v12932_v58  ;;  %v10039_v1 = vadd.f32 %v9594_v28, %v12933_v62 }
 0x35e   : > { %v10043_v25 = vadd.f32 %v9576_v15, %v12934_v39  ;;  %v10047_v4 = vadd.f32 %v9594_v28, %v12935_v7  ;;  %v10051_v6 = vadd.f32 %v9576_v15, %v12936_v46  ;;  %v10055_v58 = vadd.f32 %v9594_v28, %v12937_v35 }
 0x35f   : > { %v10059_v62 = vadd.f32 %v9576_v15, %v12939_v43  ;;  %v10063_v39 = vadd.f32 %v9594_v28, %v12941_v50  ;;  %v10067_v7 = vadd.f32 %v9576_v15, %v12943_v26  ;;  %v10071_v46 = vadd.f32 %v9594_v28, %v12945_v20  ;;  %v12950_v26 = vld [vmem:[#allocation21_spill] sm:$0xff] }
 0x360   : > { %12938 = vst [vmem:[#allocation78_spill] sm:$0xff] %v10055_v58  ;;  %v3517_v35 = vmax.f32 %v9969_v42, 0.0  ;;  %v3521_v43 = vmax.f32 %v9975_v0, 0.0  ;;  %v12947_v0 = vld [vmem:[#allocation20_spill] sm:$0xff]  ;;  %v3390_v15 = vadd.f32 %v12951_v31, %v12950_v26  ;;  %v3394_v20 = vadd.f32 %v12951_v31, %v12952_v30  ;;  %v12953_v28 = vld [vmem:[#allocation41_spill] sm:$0xff] }
 0x361   : > { %12940 = vst [vmem:[#allocation31_spill] sm:$0xff] %v10059_v62  ;;  %12942 = vst [vmem:[#allocation105_spill] sm:$0xff] %v10063_v39  ;;  %v3643_v62 = vpack.c.bf16 %v3519_v60, %v3515_v47  ;;  %v3398_v60 = vadd.f32 %v12951_v31, %v12955_v48  ;;  %v12991_v30 = vld [vmem:[#allocation72_spill] sm:$0xff] }
 0x362   : > { %12944 = vst [vmem:[#allocation34_spill] sm:$0xff] %v10067_v7  ;;  %12946 = vst [vmem:[#allocation107_spill] sm:$0xff] %v10071_v46  ;;  %v12948_v46 = vld [vmem:[#allocation30_spill] sm:$0xff]  ;;  %v3518_v19 = vmax.f32 %v3390_v15, 0.0  ;;  %v3522_v17 = vmax.f32 %v3394_v20, 0.0  ;;  %v3645_v33 = vpack.c.bf16 %v3521_v43, %v3517_v35  ;;  %v12957_v15 = vld [vmem:[#allocation24_spill] sm:$0xff] }
 0x363   : > { %v3388_v50 = vadd.f32 %v12948_v46, %v12947_v0  ;;  %v12949_v7 = vld [vmem:[#allocation82_spill] sm:$0xff]  ;;  %v3396_v24 = vadd.f32 %v12948_v46, %v12953_v28  ;;  %v3400_v42 = vadd.f32 %v12948_v46, %v12954_v51  ;;  %v3526_v40 = vmax.f32 %v3398_v60, 0.0 }
 0x364   : > { %v3392_v39 = vadd.f32 %v12948_v46, %v12949_v7  ;;  %v3402_v7 = vadd.f32 %v12951_v31, %v12956_v23  ;;  %v3646_v48 = vpack.c.bf16 %v3522_v17, %v3518_v19  ;;  %v12958_v23 = vld [vmem:[#allocation25_spill] sm:$0xff]  ;;  %v12960_v60 = vld [vmem:[#allocation26_spill] sm:$0xff] }
 0x365   : > { %v3516_v47 = vmax.f32 %v3388_v50, 0.0  ;;  %v3524_v26 = vmax.f32 %v3396_v24, 0.0  ;;  %v3528_v37 = vmax.f32 %v3400_v42, 0.0  ;;  %v3408_v20 = vadd.f32 %v12948_v46, %v12958_v23  ;;  %v12959_v24 = vld [vmem:[#allocation98_spill] sm:$0xff]  ;;  %v12964_v23 = vld [vmem:[#allocation81_spill] sm:$0xff] }
 0x366   : > { %v3520_v0 = vmax.f32 %v3392_v39, 0.0  ;;  %v3530_v61 = vmax.f32 %v3402_v7, 0.0  ;;  %v3404_v39 = vadd.f32 %v12948_v46, %v12957_v15  ;;  %v3406_v42 = vadd.f32 %v12951_v31, %v12959_v24  ;;  %4316 = vmatprep.mubr.bf16.mxu1 %v3646_v48  ;;  %v12963_v15 = vld [vmem:[#allocation114_spill] sm:$0xff]  ;;  %v12971_v7 = vld [vmem:[#allocation99_spill] sm:$0xff] }
 0x367   : > { %v3648_v50 = vpack.c.bf16 %v3528_v37, %v3524_v26  ;;  %v3410_v35 = vadd.f32 %v12951_v31, %v12960_v60  ;;  %4317 = vmatmul.mubr.bf16.vlgmr.msra.gmra.mxu1 %v3645_v33  ;;  %v12969_v33 = vmax.f32 %v9995_v52, 0.0  ;;  %v12970_v26 = vmax.f32 %v10003_v45, 0.0  ;;  %v12972_v48 = vld [vmem:[#allocation27_spill] sm:$0xff]  ;;  %v12976_v45 = vld [vmem:[#allocation32_spill] sm:$0xff] }
 0x368   : > { %v3644_v28 = vpack.c.bf16 %v3520_v0, %v3516_v47  ;;  %v3650_v37 = vpack.c.bf16 %v3530_v61, %v3526_v40  ;;  %v3532_v61 = vmax.f32 %v3404_v39, 0.0  ;;  %v3536_v40 = vmax.f32 %v3408_v20, 0.0 }
 0x369   : > { %v3538_v24 = vmax.f32 %v3410_v35, 0.0  ;;  %v12966_v39 = vmax.f32 %v9987_v54, 0.0  ;;  %v12968_v35 = vmax.f32 %v9991_v56, 0.0  ;;  %v3651_v60 = vpack.c.bf16 %v12970_v26, %v12969_v33  ;;  %v12973_v54 = vld [vmem:[#allocation100_spill] sm:$0xff]  ;;  %v12977_v33 = vld [vmem:[#allocation29_spill] sm:$0xff] }
 0x36a   : > { %4123 = vmatprep.mubr.bf16.mxu0 %v3644_v28  ;;  %4326 = vmatprep.mubr.bf16.mxu1 %v3650_v37  ;;  %v12962_v28 = vld [vmem:[#allocation113_spill] sm:$0xff]  ;;  %v12965_v37 = vmax.f32 %v9979_v27, 0.0  ;;  %v3412_v19 = vadd.f32 %v12948_v46, %v12971_v7  ;;  %v3416_v17 = vadd.f32 %v12948_v46, %v12972_v48  ;;  %v3652_v27 = vpack.c.bf16 %v3536_v40, %v3532_v61  ;;  %v12979_v61 = vld [vmem:[#allocation116_spill] sm:$0xff] }
 0x36b   : > { %4124 = vmatmul.mubr.bf16.vlgmr.msra.gmra.mxu0 %v3643_v62  ;;  %v3534_v62 = vmax.f32 %v3406_v42, 0.0  ;;  %v12967_v42 = vmax.f32 %v9983_v44, 0.0  ;;  %v12974_v44 = vld [vmem:[#allocation28_spill] sm:$0xff]  ;;  %v3424_v26 = vadd.f32 %v12948_v46, %v12976_v45  ;;  %v3422_v7 = vadd.f32 %v12951_v31, %v12977_v33 }
 0x36c   : > { %4133 = vmatprep.mubr.bf16.mxu0 %v3648_v50  ;;  %v12961_v50 = vld [vmem:[#allocation112_spill] sm:$0xff]  ;;  %v3647_v20 = vpack.c.bf16 %v12966_v39, %v12965_v37  ;;  %v3414_v37 = vadd.f32 %v12951_v31, %v12973_v54  ;;  %v3418_v56 = vadd.f32 %v12951_v31, %v12974_v44  ;;  %v12975_v39 = vld [vmem:[#allocation102_spill] sm:$0xff]  ;;  %v3540_v45 = vmax.f32 %v3412_v19, 0.0 }
 0x36d   : > { %v3649_v0 = vpack.c.bf16 %v12968_v35, %v12967_v42  ;;  %v3654_v43 = vpack.c.bf16 %v3538_v24, %v3534_v62  ;;  %v3420_v52 = vadd.f32 %v12948_v46, %v12975_v39  ;;  %v12978_v42 = vld [vmem:[#allocation33_spill] sm:$0xff]  ;;  %v12980_v62 = vmax.f32 %v9999_v49, 0.0  ;;  %v12982_v35 = vld [vmem:[#allocation106_spill] sm:$0xff]  ;;  %v12983_v44 = vld [vmem:[#allocation108_spill] sm:$0xff] }
 0x36e   : > { %v3426_v48 = vadd.f32 %v12951_v31, %v12978_v42  ;;  %v12981_v24 = vmax.f32 %v10007_v63, 0.0  ;;  %v3428_v54 = vadd.f32 %v12948_v46, %v12982_v35  ;;  %v3432_v39 = vadd.f32 %v12948_v46, %v12983_v44  ;;  %v12987_v49 = vld [vmem:[#allocation83_spill] sm:$0xff] }
 0x36f   : > { %4327 = vmatmul.mubr.bf16.gmra.mxu1 %v3649_v0  ;;  %v12984_v33 = vmax.f32 %v10011_v53, 0.0  ;;  %v12985_v42 = vmax.f32 %v10019_v9, 0.0  ;;  %v12986_v0 = vld [vmem:[#allocation35_spill] sm:$0xff]  ;;  %v3434_v63 = vadd.f32 %v12951_v31, %v12987_v49  ;;  %v3546_v47 = vmax.f32 %v3418_v56, 0.0 }
 0x370   : > { %4336 = vmatprep.mubr.bf16.mxu1 %v3654_v43  ;;  %v12988_v35 = vmax.f32 %v10015_v2, 0.0  ;;  %v12989_v44 = vmax.f32 %v10023_v38, 0.0  ;;  %v3548_v19 = vmax.f32 %v3420_v52, 0.0  ;;  %v3552_v58 = vmax.f32 %v3424_v26, 0.0  ;;  %v12992_v56 = vld [vmem:[#allocation39_spill] sm:$0xff]  ;;  %v12993_v38 = vld [vmem:[#allocation84_spill] sm:$0xff] }
 0x371   : > { %v3655_v40 = vpack.c.bf16 %v12985_v42, %v12984_v33  ;;  %v3550_v53 = vmax.f32 %v3422_v7, 0.0  ;;  %v3554_v51 = vmax.f32 %v3426_v48, 0.0  ;;  %v3556_v9 = vmax.f32 %v3428_v54, 0.0  ;;  %v12990_v42 = vld [vmem:[#allocation63_spill] sm:$0xff] }
 0x372   : > { %v3657_v43 = vpack.c.bf16 %v12989_v44, %v12988_v35  ;;  %v3560_v33 = vmax.f32 %v3432_v39, 0.0  ;;  %v3440_v49 = vadd.f32 %v12948_v46, %v12991_v30  ;;  %v10206_v2 = vadd.f32 %v12951_v31, %v12992_v56 }
 0x373   : > { %4134 = vmatmul.mubr.bf16.gmra.mxu0 %v3647_v20  ;;  %v3653_v20 = vpack.c.bf16 %v12981_v24, %v12980_v62  ;;  %v3544_v62 = vmax.f32 %v3416_v17, 0.0  ;;  %v3542_v24 = vmax.f32 %v3414_v37, 0.0  ;;  %v3562_v37 = vmax.f32 %v3434_v63, 0.0 }
 0x374   : > { %4143 = vmatprep.mubr.bf16.mxu0 %v3652_v27  ;;  %v3430_v27 = vadd.f32 %v12951_v31, %v12986_v0  ;;  %v3436_v0 = vadd.f32 %v12948_v46, %v12990_v42  ;;  %v10210_v52 = vadd.f32 %v12951_v31, %v12993_v38  ;;  %v12994_v48 = vmax.f32 %v10027_v21, 0.0  ;;  %v13007_v38 = vld [vmem:[#allocation73_spill] sm:$0xff] }
 0x375   : > { %v3656_v26 = vpack.c.bf16 %v3544_v62, %v3540_v45  ;;  %v3658_v7 = vpack.c.bf16 %v3546_v47, %v3542_v24  ;;  %v12995_v54 = vmax.f32 %v10035_v11, 0.0  ;;  %v12996_v30 = vmax.f32 %v10031_v5, 0.0  ;;  %v13001_v11 = vld [vmem:[#allocation78_spill] sm:$0xff] }
 0x376   : > { %v3558_v17 = vmax.f32 %v3430_v27, 0.0  ;;  %v12997_v27 = vmax.f32 %v10039_v1, 0.0  ;;  %v3660_v35 = vpack.c.bf16 %v3552_v58, %v3548_v19  ;;  %v3662_v44 = vpack.c.bf16 %v3554_v51, %v3550_v53  ;;  %v13003_v58 = vld [vmem:[#allocation71_spill] sm:$0xff]  ;;  %v13005_v19 = vld [vmem:[#allocation94_spill] sm:$0xff] }
 0x377   : > { %v10216_v39 = vpack.c.bf16 %v12995_v54, %v12994_v48  ;;  %v12998_v42 = vmax.f32 %v10043_v25, 0.0  ;;  %v12999_v45 = vmax.f32 %v10051_v6, 0.0  ;;  %v13000_v21 = vmax.f32 %v10047_v4, 0.0  ;;  %4337 = vmatmul.mubr.bf16.gmra.mxu1 %v3653_v20  ;;  %v13026_v4 = vld [vmem:[#allocation50_spill] sm:$0xff] }
 0x378   : > { %v10222_v63 = vpack.c.bf16 %v12997_v27, %v12996_v30  ;;  %v13002_v62 = vmax.f32 %v13001_v11, 0.0  ;;  %v10236_v5 = vpack.c.bf16 %v3560_v33, %v3556_v9  ;;  %v3564_v1 = vmax.f32 %v3436_v0, 0.0  ;;  %4346 = vmatprep.mubr.bf16.mxu1 %v3658_v7  ;;  %v13008_v9 = vld [vmem:[#allocation43_spill] sm:$0xff]  ;;  %v13009_v0 = vld [vmem:[#allocation68_spill] sm:$0xff]  ;;  %v13014_v7 = vld [vmem:[#allocation86_spill] sm:$0xff] }
 0x379   : > { %v10228_v47 = vpack.c.bf16 %v12999_v45, %v12998_v42  ;;  %v13004_v51 = vmax.f32 %v13003_v58, 0.0  ;;  %v13006_v25 = vmax.f32 %v13005_v19, 0.0  ;;  %v10244_v6 = vpack.c.bf16 %v3562_v37, %v3558_v17  ;;  %v13013_v17 = vld [vmem:[#allocation85_spill] sm:$0xff]  ;;  %v13015_v27 = vld [vmem:[#allocation42_spill] sm:$0xff]  ;;  %v13017_v11 = vld [vmem:[#allocation48_spill] sm:$0xff] }
 0x37a   : > { %v10234_v24 = vpack.c.bf16 %v13002_v62, %v13000_v21  ;;  %v10250_v20 = vadd.f32 %v12948_v46, %v13007_v38  ;;  %v10254_v33 = vadd.f32 %v12948_v46, %v13008_v9  ;;  %v3460_v37 = vadd.f32 %v12948_v46, %v13013_v17  ;;  %v13016_v45 = vld [vmem:[#allocation46_spill] sm:$0xff]  ;;  %v13024_v17 = vld [vmem:[#allocation111_spill] sm:$0xff] }
 0x37b   : > { %4144 = vmatmul.mubr.bf16.gmra.mxu0 %v3651_v60  ;;  %v3568_v60 = vmax.f32 %v3440_v49, 0.0  ;;  %v10242_v53 = vpack.c.bf16 %v13006_v25, %v13004_v51  ;;  %v13010_v49 = vmax.f32 %v13009_v0, 0.0  ;;  %v3464_v30 = vadd.f32 %v12948_v46, %v13014_v7  ;;  %v13018_v58 = vld [vmem:[#allocation74_spill] sm:$0xff] }
 0x37c   : > { %4153 = vmatprep.mubr.bf16.mxu0 %v3656_v26  ;;  %v13011_v26 = vld [vmem:[#allocation95_spill] sm:$0xff]  ;;  %v10268_v42 = vadd.f32 %v12951_v31, %v13015_v27  ;;  %v3462_v21 = vadd.f32 %v12951_v31, %v13016_v45  ;;  %v3466_v62 = vadd.f32 %v12951_v31, %v13017_v11  ;;  %v13019_v51 = vmax.f32 %v13018_v58, 0.0  ;;  %v13020_v19 = vld [vmem:[#allocation110_spill] sm:$0xff]  ;;  %v13027_v58 = vld [vmem:[#allocation52_spill] sm:$0xff] }
 0x37d   : > { %v13012_v48 = vmax.f32 %v13011_v26, 0.0  ;;  %v13021_v25 = vmax.f32 %v13020_v19, 0.0  ;;  %v10280_v9 = vpack.c.bf16 %v3568_v60, %v3564_v1  ;;  %v3588_v0 = vmax.f32 %v3460_v37, 0.0  ;;  %v13022_v26 = vld [vmem:[#allocation75_spill] sm:$0xff]  ;;  %v13029_v37 = vld [vmem:[#allocation53_spill] sm:$0xff] }
 0x37e   : > { %v13025_v7 = vmax.f32 %v13024_v17, 0.0  ;;  %v3590_v45 = vmax.f32 %v3462_v21, 0.0  ;;  %v3594_v56 = vmax.f32 %v3466_v62, 0.0  ;;  %v3468_v11 = vadd.f32 %v12948_v46, %v13026_v4  ;;  %v13028_v1 = vld [vmem:[#allocation51_spill] sm:$0xff] }
 0x37f   : > { %v10260_v54 = vpack.c.bf16 %v13012_v48, %v13010_v49  ;;  %v10278_v38 = vpack.c.bf16 %v13021_v25, %v13019_v51  ;;  %v3592_v49 = vmax.f32 %v3464_v30, 0.0  ;;  %v13023_v48 = vmax.f32 %v13022_v26, 0.0  ;;  %v13030_v25 = vld [vmem:[#allocation76_spill] sm:$0xff]  ;;  %4347 = vmatmul.mubr.bf16.gmra.mxu1 %v3657_v43 }
 0x380   : > { %v3472_v19 = vadd.f32 %v12948_v46, %v13027_v58  ;;  %v3470_v60 = vadd.f32 %v12951_v31, %v13028_v1  ;;  %v3474_v30 = vadd.f32 %v12951_v31, %v13029_v37  ;;  %v13031_v26 = vmax.f32 %v13030_v25, 0.0  ;;  %v13036_v25 = vld [vmem:[#allocation88_spill] sm:$0xff]  ;;  %4356 = vmatprep.mubr.bf16.mxu1 %v3662_v44 }
 0x381   : > { %v10286_v27 = vpack.c.bf16 %v13025_v7, %v13023_v48  ;;  %v10292_v51 = vpack.c.bf16 %v3592_v49, %v3588_v0  ;;  %v13032_v48 = vmax.f32 %v9886_v12, 0.0  ;;  %v10304_v62 = vpack.c.bf16 %v3594_v56, %v3590_v45  ;;  %v13033_v7 = vld [vmem:[#allocation77_spill] sm:$0xff]  ;;  %v13038_v45 = vld [vmem:[#allocation54_spill] sm:$0xff] }
 0x382   : > { %v3596_v4 = vmax.f32 %v3468_v11, 0.0  ;;  %v3600_v17 = vmax.f32 %v3472_v19, 0.0  ;;  %v13034_v0 = vmax.f32 %v13033_v7, 0.0  ;;  %v13035_v49 = vmax.f32 %v9889_v14, 0.0  ;;  %v13039_v19 = vld [vmem:[#allocation56_spill] sm:$0xff] }
 0x383   : > { %v10302_v21 = vpack.c.bf16 %v13032_v48, %v13031_v26  ;;  %4154 = vmatmul.mubr.bf16.gmra.mxu0 %v3655_v40  ;;  %v3598_v1 = vmax.f32 %v3470_v60, 0.0  ;;  %v3602_v37 = vmax.f32 %v3474_v30, 0.0  ;;  %v3476_v12 = vadd.f32 %v12948_v46, %v13036_v25  ;;  %v13037_v26 = vld [vmem:[#allocation55_spill] sm:$0xff]  ;;  %v13044_v25 = vld [vmem:[#allocation57_spill] sm:$0xff] }
 0x384   : > { %v10310_v58 = vpack.c.bf16 %v13035_v49, %v13034_v0  ;;  %4163 = vmatprep.mubr.bf16.mxu0 %v3660_v35  ;;  %v3480_v40 = vadd.f32 %v12948_v46, %v13037_v26  ;;  %v10316_v56 = vpack.c.bf16 %v3600_v17, %v3596_v4  ;;  %v3478_v11 = vadd.f32 %v12951_v31, %v13038_v45 }
 0x385   : > { %v3482_v14 = vadd.f32 %v12951_v31, %v13039_v19  ;;  %v13040_v43 = vmax.f32 %v9892_v18, 0.0  ;;  %v13041_v35 = vmax.f32 %v9898_v57, 0.0  ;;  %v10328_v30 = vpack.c.bf16 %v3602_v37, %v3598_v1  ;;  %v13045_v18 = vld [vmem:[#allocation60_spill] sm:$0xff]  ;;  %v13046_v1 = vld [vmem:[#allocation59_spill] sm:$0xff] }
 0x386   : > { %v3604_v48 = vmax.f32 %v3476_v12, 0.0  ;;  %v3608_v7 = vmax.f32 %v3480_v40, 0.0  ;;  %v13042_v44 = vmax.f32 %v9895_v13, 0.0  ;;  %v13043_v4 = vmax.f32 %v9901_v22, 0.0  ;;  %v13047_v12 = vld [vmem:[#allocation61_spill] sm:$0xff] }
 0x387   : > { %v10326_v60 = vpack.c.bf16 %v13041_v35, %v13040_v43  ;;  %v3606_v0 = vmax.f32 %v3478_v11, 0.0  ;;  %v3610_v49 = vmax.f32 %v3482_v14, 0.0  ;;  %v3484_v26 = vadd.f32 %v12948_v46, %v13044_v25  ;;  %v13052_v25 = vld [vmem:[#allocation58_spill] sm:$0xff]  ;;  %4357 = vmatmul.mubr.bf16.gmra.mxu1 %v10222_v63 }
 0x388   : > { %v10334_v17 = vpack.c.bf16 %v13043_v4, %v13042_v44  ;;  %v3488_v57 = vadd.f32 %v12948_v46, %v13045_v18  ;;  %v10340_v45 = vpack.c.bf16 %v3608_v7, %v3604_v48  ;;  %v3486_v37 = vadd.f32 %v12951_v31, %v13046_v1  ;;  %4366 = vmatprep.mubr.bf16.mxu1 %v10244_v6  ;;  %v13061_v63 = vld [vmem:[#allocation70_spill] sm:$0xff] }
 0x389   : > { %v3490_v13 = vadd.f32 %v12951_v31, %v13047_v12  ;;  %v13048_v22 = vmax.f32 %v9904_v10, 0.0  ;;  %v13049_v40 = vmax.f32 %v9910_v16, 0.0  ;;  %v10352_v19 = vpack.c.bf16 %v3610_v49, %v3606_v0  ;;  %v13053_v10 = vld [vmem:[#allocation65_spill] sm:$0xff]  ;;  %v13054_v49 = vld [vmem:[#allocation64_spill] sm:$0xff] }
 0x38a   : > { %v3612_v14 = vmax.f32 %v3484_v26, 0.0  ;;  %v3616_v43 = vmax.f32 %v3488_v57, 0.0  ;;  %v13050_v35 = vmax.f32 %v9907_v41, 0.0  ;;  %v13051_v48 = vmax.f32 %v9913_v3, 0.0  ;;  %v13055_v41 = vld [vmem:[#allocation66_spill] sm:$0xff] }
 0x38b   : > { %v10350_v11 = vpack.c.bf16 %v13049_v40, %v13048_v22  ;;  %v3614_v44 = vmax.f32 %v3486_v37, 0.0  ;;  %v3618_v4 = vmax.f32 %v3490_v13, 0.0  ;;  %v3492_v18 = vadd.f32 %v12948_v46, %v13052_v25  ;;  %4164 = vmatmul.mubr.bf16.gmra.mxu0 %v10216_v39 }
 0x38c   : > { %v10358_v7 = vpack.c.bf16 %v13051_v48, %v13050_v35  ;;  %v3496_v16 = vadd.f32 %v12948_v46, %v13053_v10  ;;  %v10365_v0 = vpack.c.bf16 %v3616_v43, %v3612_v14  ;;  %v3494_v26 = vadd.f32 %v12951_v31, %v13054_v49  ;;  %4173 = vmatprep.mubr.bf16.mxu0 %v10236_v5  ;;  %v13060_v43 = vld [vmem:[#allocation62_spill] sm:$0xff] }
 0x38d   : > { %v3498_v3 = vadd.f32 %v12951_v31, %v13055_v41  ;;  %v13056_v57 = vmax.f32 %v9916_v34, 0.0  ;;  %v13057_v1 = vmax.f32 %v9922_v36, 0.0  ;;  %v10379_v12 = vpack.c.bf16 %v3618_v4, %v3614_v44  ;;  %v13062_v44 = vld [vmem:[#allocation69_spill] sm:$0xff] }
 0x38e   : > { %v3620_v39 = vmax.f32 %v3492_v18, 0.0  ;;  %v3624_v13 = vmax.f32 %v3496_v16, 0.0  ;;  %v13058_v22 = vmax.f32 %v9919_v8, 0.0  ;;  %v13059_v40 = vmax.f32 %v9925_v59, 0.0  ;;  %v13063_v8 = vld [vmem:[#allocation93_spill] sm:$0xff] }
 0x38f   : > { %v10375_v37 = vpack.c.bf16 %v13057_v1, %v13056_v57  ;;  %v3622_v34 = vmax.f32 %v3494_v26, 0.0  ;;  %v3626_v36 = vmax.f32 %v3498_v3, 0.0  ;;  %v3500_v35 = vadd.f32 %v12948_v46, %v13060_v43  ;;  %4367 = vmatmul.mubr.bf16.gmra.mxu1 %v10234_v24 }
 0x390   : > { %v10385_v14 = vpack.c.bf16 %v13059_v40, %v13058_v22  ;;  %v3504_v5 = vadd.f32 %v12948_v46, %v13061_v63  ;;  %v10392_v48 = vpack.c.bf16 %v3624_v13, %v3620_v39  ;;  %v3502_v4 = vadd.f32 %v12951_v31, %v13062_v44  ;;  %v13068_v39 = vld [vmem:[#allocation79_spill] sm:$0xff]  ;;  %v13070_v40 = vld [vmem:[#allocation80_spill] sm:$0xff] }
 0x391   : > { %v3506_v59 = vadd.f32 %v12951_v31, %v13063_v8  ;;  %v13064_v25 = vmax.f32 %v9928_v32, 0.0  ;;  %v13065_v6 = vmax.f32 %v9934_v55, 0.0  ;;  %v10404_v10 = vpack.c.bf16 %v3626_v36, %v3622_v34  ;;  %v13069_v32 = vld [vmem:[#allocation115_spill] sm:$0xff] }
 0x392   : > { %v3628_v16 = vmax.f32 %v3500_v35, 0.0  ;;  %v3632_v49 = vmax.f32 %v3504_v5, 0.0  ;;  %v13066_v26 = vmax.f32 %v9931_v29, 0.0  ;;  %v13067_v41 = vmax.f32 %v12961_v50, 0.0  ;;  %v13071_v36 = vld [vmem:[#allocation119_spill] sm:$0xff] }
 0x393   : > { %v10402_v18 = vpack.c.bf16 %v13065_v6, %v13064_v25  ;;  %v3630_v57 = vmax.f32 %v3502_v4, 0.0  ;;  %v3634_v1 = vmax.f32 %v3506_v59, 0.0  ;;  %v3508_v13 = vadd.f32 %v12948_v46, %v13068_v39  ;;  %4174 = vmatmul.mubr.bf16.gmra.mxu0 %v10228_v47  ;;  %v13082_v39 = vld [vmem:[#allocation19_spill] sm:$0xff] }
 0x394   : > { %v10410_v3 = vpack.c.bf16 %v13067_v41, %v13066_v26  ;;  %v3512_v55 = vadd.f32 %v12948_v46, %v13069_v32  ;;  %v10416_v22 = vpack.c.bf16 %v3632_v49, %v3628_v16  ;;  %v3510_v34 = vadd.f32 %v12951_v31, %v13070_v40  ;;  %v13079_v41 = vld [vmem:[#allocation45_spill] sm:$0xff]  ;;  %4183 = vmatprep.mubr.bf16.mxu0 %v10280_v9 }
 0x395   : > { %v3514_v29 = vadd.f32 %v12951_v31, %v13071_v36  ;;  %v13072_v50 = vmax.f32 %v12962_v28, 0.0  ;;  %v13073_v43 = vmax.f32 %v12964_v23, 0.0  ;;  %v10428_v63 = vpack.c.bf16 %v3634_v1, %v3630_v57  ;;  %v13078_v23 = vld [vmem:[#allocation44_spill] sm:$0xff]  ;;  %v13080_v57 = vld [vmem:[#allocation117_spill] sm:$0xff] }
 0x396   : > { %v3636_v5 = vmax.f32 %v3508_v13, 0.0  ;;  %v3640_v44 = vmax.f32 %v3512_v55, 0.0  ;;  %v13074_v4 = vmax.f32 %v12963_v15, 0.0  ;;  %v13075_v8 = vmax.f32 %v12979_v61, 0.0  ;;  %v13081_v15 = vld [vmem:[#allocation89_spill] sm:$0xff]  ;;  %v13084_v13 = vld [vmem:[#allocation31_spill] sm:$0xff] }
 0x397   : > { %v10426_v35 = vpack.c.bf16 %v13073_v43, %v13072_v50  ;;  %v13076_v25 = vmax.f32 %v10206_v2, 0.0  ;;  %v13077_v28 = vmax.f32 %v10210_v52, 0.0  ;;  %v3450_v16 = vadd.f32 %v12951_v31, %v13078_v23  ;;  %v13083_v2 = vld [vmem:[#allocation47_spill] sm:$0xff]  ;;  %v13085_v55 = vld [vmem:[#allocation34_spill] sm:$0xff]  ;;  %v13086_v36 = vld [vmem:[#allocation105_spill] sm:$0xff] }
 0x398   : > { %v10434_v59 = vpack.c.bf16 %v13075_v8, %v13074_v4  ;;  %v3638_v49 = vmax.f32 %v3510_v34, 0.0  ;;  %v3642_v26 = vmax.f32 %v3514_v29, 0.0  ;;  %v3294_v1 = vmul.f32 %v13080_v57, %v13079_v41  ;;  %v13087_v50 = vld [vmem:[#allocation107_spill] sm:$0xff]  ;;  %v13089_v4 = vld [vmem:[#allocation49_spill] sm:$0xff]  ;;  %v13090_v8 = vld [vmem:[#allocation118_spill] sm:$0xff] }
 0x399   : > { %v3670_v6 = vpack.c.bf16 %v13077_v28, %v13076_v25  ;;  %v3296_v61 = vmul.f32 %v13082_v39, %v13081_v15  ;;  %v10449_v47 = vpack.c.bf16 %v3640_v44, %v3636_v5  ;;  %v3298_v52 = vmul.f32 %v13080_v57, %v13083_v2  ;;  %v13088_v5 = vld [vmem:[#allocation90_spill] sm:$0xff]  ;;  %v13093_v41 = vld [vmem:[#allocation87_spill] sm:$0xff]  ;;  %v13094_v15 = vld [vmem:[#allocation92_spill] sm:$0xff] }
 0x39a   : > { %v3563_v32 = vmax.f32 %v13084_v13, 0.0  ;;  %v3567_v40 = vmax.f32 %v13085_v55, 0.0  ;;  %v10455_v34 = vpack.c.bf16 %v3642_v26, %v3638_v49  ;;  %v3565_v29 = vmax.f32 %v13086_v36, 0.0  ;;  %v13092_v49 = vld [vmem:[#allocation17_spill] sm:$0xff]  ;;  %v13096_v13 = vld [vmem:[#allocation103_spill] sm:$0xff] }
 0x39b   : > { %4376 = vmatprep.mubr.bf16.mxu1 %v3670_v6  ;;  %v3569_v43 = vmax.f32 %v13087_v50, 0.0  ;;  %v3572_v24 = vmax.f32 %v10250_v20, 0.0  ;;  %v3576_v9 = vmax.f32 %v10254_v33, 0.0  ;;  %v3300_v44 = vmul.f32 %v13082_v39, %v13088_v5  ;;  %v13091_v6 = vld [vmem:[#allocation91_spill] sm:$0xff]  ;;  %v13095_v2 = vld [vmem:[#allocation101_spill] sm:$0xff] }
 0x39c   : > { %v3303_v25 = vmul.f32 %v13090_v8, %v13089_v4  ;;  %v3574_v28 = vmax.f32 %v10268_v42, 0.0  ;;  %v3578_v23 = vmax.f32 %v3450_v16, 0.0  ;;  %v3305_v26 = vmul.f32 %v13092_v49, %v13091_v6 }
 0x39d   : > { %v3307_v57 = vmul.f32 %v13090_v8, %v13093_v41  ;;  %v3309_v20 = vmul.f32 %v13092_v49, %v13094_v15  ;;  %v3443_v33 = vadd.f32 %v13095_v2, %v3294_v1  ;;  %v3445_v55 = vadd.f32 %v13096_v13, %v3296_v61 }
 0x39e   : > { %v3447_v39 = vadd.f32 %v13095_v2, %v3298_v52  ;;  %v3449_v36 = vadd.f32 %v13096_v13, %v3300_v44  ;;  %v3667_v50 = vpack.c.bf16 %v3567_v40, %v3563_v32  ;;  %v3669_v42 = vpack.c.bf16 %v3569_v43, %v3565_v29 }
 0x39f   : > { %v3672_v16 = vpack.c.bf16 %v3576_v9, %v3572_v24  ;;  %v3452_v5 = vadd.f32 %v12948_v46, %v3303_v25  ;;  %v3456_v4 = vadd.f32 %v12948_v46, %v3307_v57  ;;  %v3674_v8 = vpack.c.bf16 %v3578_v23, %v3574_v28 }
 0x3a0   : > { %4184 = vmatmul.mubr.bf16.gmra.mxu0 %v3667_v50  ;;  %v3454_v6 = vadd.f32 %v12951_v31, %v3305_v26  ;;  %v3458_v49 = vadd.f32 %v12951_v31, %v3309_v20  ;;  %4377 = vmatmul.mubr.bf16.gmra.mxu1 %v3669_v42  ;;  %v3571_v1 = vmax.f32 %v3443_v33, 0.0  ;;  %v3575_v61 = vmax.f32 %v3447_v39, 0.0  ;;  %v7446_v31 = vld [vmem:[%s12294_s4 + $0x70] ss:$8 sps:$4 sm:$0xff]  }
 0x3a1   : > { %4193 = vmatprep.mubr.bf16.mxu0 %v3672_v16  ;;  %4386 = vmatprep.mubr.bf16.mxu1 %v3674_v8  ;;  %v3573_v52 = vmax.f32 %v3445_v55, 0.0  ;;  %v3577_v44 = vmax.f32 %v3449_v36, 0.0  ;;  %v3580_v32 = vmax.f32 %v3452_v5, 0.0  ;;  %v3584_v40 = vmax.f32 %v3456_v4, 0.0 }
 0x3a2   : > { %v3582_v29 = vmax.f32 %v3454_v6, 0.0  ;;  %v3586_v43 = vmax.f32 %v3458_v49, 0.0  ;;  %v3671_v24 = vpack.c.bf16 %v3575_v61, %v3571_v1 }
 0x3a3   : > { %v3673_v9 = vpack.c.bf16 %v3577_v44, %v3573_v52  ;;  %v3676_v46 = vpack.c.bf16 %v3584_v40, %v3580_v32 }
 0x3a4   : > { %v3678_v25 = vpack.c.bf16 %v3586_v43, %v3582_v29 }
 0x3a8   : > { %4194 = vmatmul.mubr.bf16.gmra.mxu0 %v3671_v24  ;;  %4387 = vmatmul.mubr.bf16.gmra.mxu1 %v3673_v9 }
 0x3a9   : > { %4203 = vmatprep.mubr.bf16.mxu0 %v3676_v46  ;;  %4396 = vmatprep.mubr.bf16.mxu1 %v3678_v25 }
 0x3b0   : > { %4204 = vmatmul.mubr.bf16.gmra.mxu0 %v10242_v53  ;;  %4397 = vmatmul.mubr.bf16.gmra.mxu1 %v10260_v54  ;;  %v7448_v53 = vld [vmem:[%s12294_s4 + $0x74] ss:$8 sps:$4 sm:$0xff]   ;;  %v7449_v54 = vld [vmem:[%s12294_s4 + $0x60] ss:$8 sps:$4 sm:$0xff]  }
 0x3b1   : > { %4213 = vmatprep.mubr.bf16.mxu0 %v10292_v51  ;;  %4406 = vmatprep.mubr.bf16.mxu1 %v10304_v62  ;;  %v7454_v51 = vld [vmem:[%s12294_s4 + $0x54] ss:$8 sps:$4 sm:$0xff]   ;;  %v7457_v62 = vld [vmem:[%s12294_s4 + $0x44] ss:$8 sps:$4 sm:$0xff]  }
 0x3b2   : > { %5181 = vmatprep.subr.bf16.mxu0 %v7448_v53 }
 0x3b3   : > { %5182 = vmatpush1.bf16.msra.mxu0 %v7446_v31 }
 0x3b8   : > { %4214 = vmatmul.mubr.bf16.gmra.mxu0 %v10278_v38  ;;  %4407 = vmatmul.mubr.bf16.gmra.mxu1 %v10286_v27  ;;  %v7451_v38 = vld [vmem:[%s12294_s4 + $0x64] ss:$8 sps:$4 sm:$0xff]   ;;  %v7452_v27 = vld [vmem:[%s12294_s4 + $0x50] ss:$8 sps:$4 sm:$0xff]  }
 0x3b9   : > { %4223 = vmatprep.mubr.bf16.mxu0 %v10316_v56  ;;  %4416 = vmatprep.mubr.bf16.mxu1 %v10328_v30  ;;  %v7460_v56 = vld [vmem:[%s12294_s4 + $0x34] ss:$8 sps:$4 sm:$0xff]   ;;  %v7463_v30 = vld [vmem:[%s12294_s4 + $0x24] ss:$8 sps:$4 sm:$0xff]  }
 0x3ba   : > { %5183 = vmatprep.subr.bf16.mxu0 %v7451_v38 }
 0x3bb   : > { %5184 = vmatpush1.bf16.msra.mxu0 %v7449_v54 }
 0x3bc   : > { %5185 = vmatprep.subr.bf16.mxu0 %v7454_v51 }
 0x3bf   : > { %5186 = vmatpush1.bf16.msra.mxu0 %v7452_v27 }
 0x3c0   : > { %4224 = vmatmul.mubr.bf16.gmra.mxu0 %v10302_v21  ;;  %4417 = vmatmul.mubr.bf16.gmra.mxu1 %v10310_v58  ;;  %v7455_v21 = vld [vmem:[%s12294_s4 + $0x40] ss:$8 sps:$4 sm:$0xff]   ;;  %v7458_v58 = vld [vmem:[%s12294_s4 + $0x30] ss:$8 sps:$4 sm:$0xff]  }
 0x3c1   : > { %4233 = vmatprep.mubr.bf16.mxu0 %v10340_v45  ;;  %4426 = vmatprep.mubr.bf16.mxu1 %v10352_v19  ;;  %v7466_v45 = vld [vmem:[%s12294_s4 + $0x14] ss:$8 sps:$4 sm:$0xff]   ;;  %v7467_v19 = vld [vmem:[%s12294_s4] ss:$8 sps:$4 sm:$0xff]  }
 0x3c2   : > { %5187 = vmatprep.subr.bf16.mxu0 %v7457_v62 }
 0x3c3   : > { %5188 = vmatpush1.bf16.msra.mxu0 %v7455_v21 }
 0x3c4   : > { %5189 = vmatprep.subr.bf16.mxu0 %v7460_v56 }
 0x3c7   : > { %5190 = vmatpush1.bf16.msra.mxu0 %v7458_v58 }
 0x3c8   : > { %4234 = vmatmul.mubr.bf16.gmra.mxu0 %v10326_v60  ;;  %4427 = vmatmul.mubr.bf16.gmra.mxu1 %v10334_v17  ;;  %v7461_v60 = vld [vmem:[%s12294_s4 + $0x20] ss:$8 sps:$4 sm:$0xff]   ;;  %v7464_v17 = vld [vmem:[%s12294_s4 + $0x10] ss:$8 sps:$4 sm:$0xff]  }
 0x3c9   : > { %4243 = vmatprep.mubr.bf16.mxu0 %v10365_v0  ;;  %4436 = vmatprep.mubr.bf16.mxu1 %v10379_v12 }
 0x3ca   : > { %5191 = vmatprep.subr.bf16.mxu0 %v7463_v30 }
 0x3cb   : > { %5192 = vmatpush1.bf16.msra.mxu0 %v7461_v60 }
 0x3cc   : > { %5193 = vmatprep.subr.bf16.mxu0 %v7466_v45 }
 0x3cf   : > { %5194 = vmatpush1.bf16.msra.mxu0 %v7464_v17 }
 0x3d0   : > { %4244 = vmatmul.mubr.bf16.gmra.mxu0 %v10350_v11  ;;  %4437 = vmatmul.mubr.bf16.gmra.mxu1 %v10358_v7  ;;  %v7469_v7 = vld [vmem:[%s12294_s4 + $0x4] ss:$8 sps:$4 sm:$0xff]  }
 0x3d1   : > { %4253 = vmatprep.mubr.bf16.mxu0 %v10392_v48  ;;  %4446 = vmatprep.mubr.bf16.mxu1 %v10404_v10 }
 0x3d2   : > { %5195 = vmatprep.subr.bf16.mxu0 %v7469_v7 }
 0x3d3   : > { %5196 = vmatpush1.bf16.msra.mxu0 %v7467_v19 }
 0x3d8   : > { %4254 = vmatmul.mubr.bf16.gmra.mxu0 %v10375_v37  ;;  %4447 = vmatmul.mubr.bf16.gmra.mxu1 %v10385_v14 }
 0x3d9   : > { %4263 = vmatprep.mubr.bf16.mxu0 %v10416_v22  ;;  %4456 = vmatprep.mubr.bf16.mxu1 %v10428_v63 }
 0x3e0   : > { %4264 = vmatmul.mubr.bf16.gmra.mxu0 %v10402_v18  ;;  %4457 = vmatmul.mubr.bf16.gmra.mxu1 %v10410_v3 }
 0x3e1   : > { %4273 = vmatprep.mubr.bf16.mxu0 %v10449_v47  ;;  %4466 = vmatprep.mubr.bf16.mxu1 %v10455_v34 }
 0x3e8   : > { %4274 = vmatmul.mubr.bf16.gmra.mxu0 %v10426_v35  ;;  %4467 = vmatmul.mubr.bf16.gmra.mxu1 %v10434_v59 }
 0x427   : > { %v4318_v0 = vpop.f32.mrf.mxu1 }
 0x429   : > { %v4320_v14 = vpop.f32.mrf.mxu1 }
 0x42b   : > { %v4125_v11 = vpop.f32.mrf.mxu0  ;;  %v4322_v10 = vpop.f32.mrf.mxu1 }
 0x42c   : > { %v10558_v37 = vadd.f32 %v4318_v0, %v4125_v11 }
 0x42d   : > { %v4127_v12 = vpop.f32.mrf.mxu0  ;;  %v4324_v22 = vpop.f32.mrf.mxu1 }
 0x42e   : > { %13097 = vst [vmem:[#allocation36_spill] sm:$0xff] %v10558_v37  ;;  %v10560_v48 = vadd.f32 %v4320_v14, %v4127_v12 }
 0x42f   : > { %v4129_v18 = vpop.f32.mrf.mxu0  ;;  %v4328_v63 = vpop.f32.mrf.mxu1 }
 0x430   : > { %v10644_v11 = vadd.f32 %v4322_v10, %v4129_v18 }
 0x431   : > { %v4131_v3 = vpop.f32.mrf.mxu0  ;;  %v4330_v47 = vpop.f32.mrf.mxu1 }
 0x432   : > { %13102 = vst [vmem:[#allocation40_spill] sm:$0xff] %v10644_v11  ;;  %v10648_v7 = vadd.f32 %v4324_v22, %v4131_v3 }
 0x433   : > { %v4135_v35 = vpop.f32.mrf.mxu0  ;;  %v4332_v28 = vpop.f32.mrf.mxu1 }
 0x434   : > { %13103 = vst [vmem:[#allocation20_spill] sm:$0xff] %v10648_v7  ;;  %v10652_v12 = vadd.f32 %v4328_v63, %v4135_v35  ;;  %v4556_v10 = vmul.f32 %v10648_v7, %v10648_v7  ;;  %v4553_v35 = vmul.f32 %v10558_v37, %v10558_v37 }
 0x435   : > { %v4137_v59 = vpop.f32.mrf.mxu0  ;;  %v4334_v26 = vpop.f32.mrf.mxu1 }
 0x436   : > { %v4557_v63 = vmul.f32 %v10652_v12, %v10652_v12 }
 0x437   : > { %v4139_v34 = vpop.f32.mrf.mxu0  ;;  %v4338_v57 = vpop.f32.mrf.mxu1 }
 0x439   : > { %v4141_v23 = vpop.f32.mrf.mxu0  ;;  %v4340_v20 = vpop.f32.mrf.mxu1 }
 0x43a   : > { %v10668_v3 = vadd.f32 %v4334_v26, %v4141_v23 }
 0x43b   : > { %v4145_v41 = vpop.f32.mrf.mxu0  ;;  %v10566_v33 = vpop.f32.mrf.mxu1 }
 0x43d   : > { %v10562_v15 = vpop.f32.mrf.mxu0  ;;  %v10570_v55 = vpop.f32.mrf.mxu1 }
 0x43e   : > { %v10687_v26 = vadd.f32 %v4340_v20, %v10562_v15  ;;  %v4560_v15 = vmul.f32 %v10668_v3, %v10668_v3 }
 0x43f   : > { %v10564_v2 = vpop.f32.mrf.mxu0  ;;  %v10574_v36 = vpop.f32.mrf.mxu1 }
 0x441   : > { %v10568_v13 = vpop.f32.mrf.mxu0  ;;  %v10578_v42 = vpop.f32.mrf.mxu1 }
 0x442   : > { %v10706_v20 = vadd.f32 %v10570_v55, %v10568_v13  ;;  %v4562_v13 = vmul.f32 %v10687_v26, %v10687_v26 }
 0x443   : > { %v10572_v39 = vpop.f32.mrf.mxu0  ;;  %v10582_v5 = vpop.f32.mrf.mxu1 }
 0x445   : > { %v10576_v50 = vpop.f32.mrf.mxu0  ;;  %v10586_v8 = vpop.f32.mrf.mxu1 }
 0x446   : > { %v10724_v55 = vadd.f32 %v10578_v42, %v10576_v50  ;;  %v4564_v50 = vmul.f32 %v10706_v20, %v10706_v20 }
 0x447   : > { %v10580_v16 = vpop.f32.mrf.mxu0  ;;  %v10590_v49 = vpop.f32.mrf.mxu1 }
 0x449   : > { %v10584_v4 = vpop.f32.mrf.mxu0  ;;  %v10594_v61 = vpop.f32.mrf.mxu1 }
 0x44a   : > { %v10742_v42 = vadd.f32 %v10586_v8, %v10584_v4  ;;  %v4566_v4 = vmul.f32 %v10724_v55, %v10724_v55 }
 0x44b   : > { %v10588_v6 = vpop.f32.mrf.mxu0  ;;  %v10598_v44 = vpop.f32.mrf.mxu1 }
 0x44c   : > { %13108 = vst [vmem:[#allocation22_spill] sm:$0xff] %v10742_v42 }
 0x44d   : > { %v10592_v1 = vpop.f32.mrf.mxu0  ;;  %v10602_v40 = vpop.f32.mrf.mxu1 }
 0x44e   : > { %v10760_v8 = vadd.f32 %v10594_v61, %v10592_v1  ;;  %v4568_v1 = vmul.f32 %v10742_v42, %v10742_v42 }
 0x44f   : > { %v10596_v52 = vpop.f32.mrf.mxu0  ;;  %v10606_v43 = vpop.f32.mrf.mxu1 }
 0x451   : > { %v10600_v32 = vpop.f32.mrf.mxu0  ;;  %v10610_v9 = vpop.f32.mrf.mxu1 }
 0x452   : > { %v10778_v61 = vadd.f32 %v10602_v40, %v10600_v32  ;;  %v4570_v32 = vmul.f32 %v10760_v8, %v10760_v8 }
 0x453   : > { %v10604_v29 = vpop.f32.mrf.mxu0  ;;  %v10614_v25 = vpop.f32.mrf.mxu1 }
 0x454   : > { %13111 = vst [vmem:[#allocation96_spill] sm:$0xff] %v10778_v61 }
 0x455   : > { %v10608_v24 = vpop.f32.mrf.mxu0  ;;  %v10618_v53 = vpop.f32.mrf.mxu1 }
 0x456   : > { %v10796_v40 = vadd.f32 %v10610_v9, %v10608_v24  ;;  %v7470_v24 = vld [vmem:[%s12294_s4 + $0xf0] ss:$8 sps:$4 sm:$0xff]  }
 0x457   : > { %v10612_v46 = vpop.f32.mrf.mxu0 }
 0x458   : > { %13113 = vst [vmem:[#allocation24_spill] sm:$0xff] %v10796_v40 }
 0x459   : > { %v10616_v31 = vpop.f32.mrf.mxu0 }
 0x460   : > { %v10620_v54 = vpop.f32.mrf.mxu0  ;;  %v10622_v38 = vpop.f32.mrf.mxu1 }
 0x462   : > { %v10624_v27 = vpop.f32.mrf.mxu0  ;;  %v10626_v51 = vpop.f32.mrf.mxu1 }
 0x464   : > { %v10628_v21 = vpop.f32.mrf.mxu0  ;;  %v10630_v62 = vpop.f32.mrf.mxu1 }
 0x466   : > { %v10632_v58 = vpop.f32.mrf.mxu0  ;;  %v10634_v56 = vpop.f32.mrf.mxu1 }
 0x467   : > { %13098 = vst [vmem:[#allocation37_spill] sm:$0xff] %v10634_v56  ;;  %v10656_v56 = vadd.f32 %v4330_v47, %v4137_v59  ;;  %v10676_v59 = vadd.f32 %v4338_v57, %v4145_v41  ;;  %v4514_v41 = vadd.f32 %v10648_v7, %v10560_v48 }
 0x468   : > { %v10636_v60 = vpop.f32.mrf.mxu0  ;;  %v10638_v30 = vpop.f32.mrf.mxu1 }
 0x469   : > { %13099 = vst [vmem:[#allocation109_spill] sm:$0xff] %v10636_v60  ;;  %v4558_v23 = vmul.f32 %v10656_v56, %v10656_v56  ;;  %v4515_v7 = vadd.f32 %v4514_v41, %v10656_v56 }
 0x46a   : > { %v10640_v17 = vpop.f32.mrf.mxu0  ;;  %v10642_v45 = vpop.f32.mrf.mxu1 }
 0x46b   : > { %13100 = vst [vmem:[#allocation38_spill] sm:$0xff] %v10640_v17  ;;  %13101 = vst [vmem:[#allocation67_spill] sm:$0xff] %v10642_v45  ;;  %v4555_v17 = vmul.f32 %v10644_v11, %v10644_v11  ;;  %v10662_v45 = vadd.f32 %v4332_v28, %v4139_v34  ;;  %v4554_v34 = vmul.f32 %v10560_v48, %v10560_v48 }
 0x46c   : > { %v10646_v19 = vpop.f32.mrf.mxu0  ;;  %v10650_v0 = vpop.f32.mrf.mxu1  ;;  %v4477_v28 = vadd.f32 %v10644_v11, %v10558_v37  ;;  %v4516_v41 = vadd.f32 %v4515_v7, %v10668_v3 }
 0x46d   : > { %v4559_v57 = vmul.f32 %v10662_v45, %v10662_v45  ;;  %v4654_v37 = vadd.f32 %v4556_v10, %v4554_v34 }
 0x46e   : > { %v10654_v14 = vpop.f32.mrf.mxu0  ;;  %v10658_v60 = vpop.f32.mrf.mxu1 }
 0x46f   : > { %13104 = vst [vmem:[#allocation30_spill] sm:$0xff] %v10658_v60  ;;  %v4478_v60 = vadd.f32 %v4477_v28, %v10652_v12  ;;  %v4655_v34 = vadd.f32 %v4654_v37, %v4558_v23  ;;  %v10733_v37 = vadd.f32 %v10582_v5, %v10580_v16  ;;  %v10751_v5 = vadd.f32 %v10590_v49, %v10588_v6 }
 0x470   : > { %v10664_v18 = vpop.f32.mrf.mxu0  ;;  %v10670_v22 = vpop.f32.mrf.mxu1  ;;  %v10769_v49 = vadd.f32 %v10598_v44, %v10596_v52  ;;  %v10787_v44 = vadd.f32 %v10606_v43, %v10604_v29 }
 0x471   : > { %13105 = vst [vmem:[#allocation82_spill] sm:$0xff] %v10664_v18  ;;  %13106 = vst [vmem:[#allocation21_spill] sm:$0xff] %v10670_v22  ;;  %v4617_v18 = vadd.f32 %v4555_v17, %v4553_v35  ;;  %v4479_v28 = vadd.f32 %v4478_v60, %v10662_v45  ;;  %v4656_v60 = vadd.f32 %v4655_v34, %v4560_v15 }
 0x472   : > { %v10678_v47 = vpop.f32.mrf.mxu0  ;;  %v10689_v22 = vpop.f32.mrf.mxu1  ;;  %13109 = vst [vmem:[#allocation41_spill] sm:$0xff] %v10751_v5  ;;  %v4567_v6 = vmul.f32 %v10733_v37, %v10733_v37  ;;  %13110 = vst [vmem:[#allocation97_spill] sm:$0xff] %v10769_v49  ;;  %v4569_v52 = vmul.f32 %v10751_v5, %v10751_v5 }
 0x473   : > { %13107 = vst [vmem:[#allocation104_spill] sm:$0xff] %v10678_v47  ;;  %v10697_v47 = vadd.f32 %v10566_v33, %v10564_v2  ;;  %v4618_v35 = vadd.f32 %v4617_v18, %v4557_v63  ;;  %v4561_v2 = vmul.f32 %v10676_v59, %v10676_v59  ;;  %v10715_v33 = vadd.f32 %v10574_v36, %v10572_v39 }
 0x474   : > { %v10699_v11 = vpop.f32.mrf.mxu0  ;;  %v10708_v17 = vpop.f32.mrf.mxu1  ;;  %v4480_v23 = vadd.f32 %v4479_v28, %v10676_v59  ;;  %v4657_v34 = vadd.f32 %v4656_v60, %v4562_v13  ;;  %13112 = vst [vmem:[#allocation23_spill] sm:$0xff] %v10787_v44 }
 0x475   : > { %v4619_v63 = vadd.f32 %v4618_v35, %v4559_v57  ;;  %v4563_v39 = vmul.f32 %v10697_v47, %v10697_v47  ;;  %v4517_v35 = vadd.f32 %v4516_v41, %v10687_v26  ;;  %v4565_v16 = vmul.f32 %v10715_v33, %v10715_v33 }
 0x476   : > { %v10717_v10 = vpop.f32.mrf.mxu0  ;;  %v10726_v18 = vpop.f32.mrf.mxu1  ;;  %v4481_v28 = vadd.f32 %v4480_v23, %v10697_v47  ;;  %v4658_v60 = vadd.f32 %v4657_v34, %v4564_v50 }
 0x477   : > { %v4620_v57 = vadd.f32 %v4619_v63, %v4561_v2  ;;  %v4518_v41 = vadd.f32 %v4517_v35, %v10706_v20 }
 0x478   : > { %v10735_v36 = vpop.f32.mrf.mxu0  ;;  %v10744_v7 = vpop.f32.mrf.mxu1  ;;  %v4482_v23 = vadd.f32 %v4481_v28, %v10715_v33  ;;  %v4659_v34 = vadd.f32 %v4658_v60, %v4566_v4  ;;  %v4571_v4 = vmul.f32 %v10769_v49, %v10769_v49 }
 0x479   : > { %v4621_v63 = vadd.f32 %v4620_v57, %v4563_v39  ;;  %v4519_v35 = vadd.f32 %v4518_v41, %v10724_v55  ;;  %v10808_v41 = vadd.f32 %v10614_v25, %v10612_v46 }
 0x47a   : > { %v10753_v15 = vpop.f32.mrf.mxu0  ;;  %v10762_v2 = vpop.f32.mrf.mxu1  ;;  %v4483_v28 = vadd.f32 %v4482_v23, %v10733_v37  ;;  %v4660_v9 = vadd.f32 %v4659_v34, %v4568_v1  ;;  %v10829_v1 = vadd.f32 %v10622_v38, %v10620_v54  ;;  %v7475_v54 = vld [vmem:[%s12294_s4 + $0xe4] ss:$8 sps:$4 sm:$0xff]  }
 0x47b   : > { %v4622_v57 = vadd.f32 %v4621_v63, %v4565_v16  ;;  %v7472_v63 = vld [vmem:[%s12294_s4 + $0xf4] ss:$8 sps:$4 sm:$0xff]   ;;  %v4520_v43 = vadd.f32 %v4519_v35, %v10742_v42  ;;  %13114 = vst [vmem:[#allocation25_spill] sm:$0xff] %v10808_v41  ;;  %v4573_v42 = vmul.f32 %v10787_v44, %v10787_v44 }
 0x47c   : > { %v10771_v13 = vpop.f32.mrf.mxu0  ;;  %v10780_v39 = vpop.f32.mrf.mxu1  ;;  %v4484_v23 = vadd.f32 %v4483_v28, %v10751_v5  ;;  %5197 = vmatprep.subr.bf16.mxu0 %v7472_v63  ;;  %13116 = vst [vmem:[#allocation26_spill] sm:$0xff] %v10829_v1  ;;  %v4661_v28 = vadd.f32 %v4660_v9, %v4570_v32  ;;  %v4575_v32 = vmul.f32 %v10808_v41, %v10808_v41 }
 0x47d   : > { %v4623_v29 = vadd.f32 %v4622_v57, %v4567_v6  ;;  %v4572_v6 = vmul.f32 %v10778_v61, %v10778_v61  ;;  %v10820_v57 = vadd.f32 %v10618_v53, %v10616_v31  ;;  %v4521_v25 = vadd.f32 %v4520_v43, %v10760_v8  ;;  %5198 = vmatpush2.bf16.msra.mxu0 %v7470_v24 }
 0x47e   : > { %v10789_v50 = vpop.f32.mrf.mxu0  ;;  %v10798_v16 = vpop.f32.mrf.mxu1  ;;  %v4485_v31 = vadd.f32 %v4484_v23, %v10769_v49  ;;  %v4574_v53 = vmul.f32 %v10796_v40, %v10796_v40  ;;  %v10850_v43 = vadd.f32 %v10630_v62, %v10628_v21  ;;  %5199 = vmatprep.subr.bf16.mxu0 %v7475_v54  ;;  %v4577_v5 = vmul.f32 %v10829_v1, %v10829_v1 }
 0x47f   : > { %13115 = vst [vmem:[#allocation98_spill] sm:$0xff] %v10820_v57  ;;  %v4624_v46 = vadd.f32 %v4623_v29, %v4569_v52  ;;  %v10838_v52 = vadd.f32 %v10626_v51, %v10624_v27  ;;  %v4522_v29 = vadd.f32 %v4521_v25, %v10778_v61  ;;  %v7473_v27 = vld [vmem:[%s12294_s4 + $0xe0] ss:$8 sps:$4 sm:$0xff]   ;;  %v7478_v51 = vld [vmem:[%s12294_s4 + $0xd4] ss:$8 sps:$4 sm:$0xff]   ;;  %v4576_v23 = vmul.f32 %v10820_v57, %v10820_v57 }
 0x480   : > { %v10810_v60 = vpop.f32.mrf.mxu0  ;;  %v10822_v35 = vpop.f32.mrf.mxu1  ;;  %13118 = vst [vmem:[#allocation113_spill] sm:$0xff] %v10850_v43  ;;  %v4486_v9 = vadd.f32 %v4485_v31, %v10787_v44  ;;  %v13121_v61 = vld [vmem:[#allocation109_spill] sm:$0xff] }
 0x481   : > { %13117 = vst [vmem:[#allocation112_spill] sm:$0xff] %v10838_v52  ;;  %v4625_v38 = vadd.f32 %v4624_v46, %v4571_v4  ;;  %v4662_v4 = vadd.f32 %v4661_v28, %v4572_v6  ;;  %v13119_v46 = vld [vmem:[#allocation37_spill] sm:$0xff]  ;;  %v4523_v49 = vadd.f32 %v4522_v29, %v10796_v40  ;;  %v10874_v6 = vadd.f32 %v10638_v30, %v13121_v61  ;;  %v13124_v29 = vld [vmem:[#allocation67_spill] sm:$0xff] }
 0x482   : > { %v10831_v34 = vpop.f32.mrf.mxu0  ;;  %v10840_v63 = vpop.f32.mrf.mxu1  ;;  %v10865_v21 = vadd.f32 %v13119_v46, %v10632_v58  ;;  %5200 = vmatpush2.bf16.msra.mxu0 %v7473_v27  ;;  %v7476_v58 = vld [vmem:[%s12294_s4 + $0xd0] ss:$8 sps:$4 sm:$0xff]   ;;  %v4487_v54 = vadd.f32 %v4486_v9, %v10808_v41  ;;  %v7481_v30 = vld [vmem:[%s12294_s4 + $0xc4] ss:$8 sps:$4 sm:$0xff]  }
 0x483   : > { %v4626_v25 = vadd.f32 %v4625_v38, %v4573_v42  ;;  %13122 = vst [vmem:[#allocation81_spill] sm:$0xff] %v10874_v6  ;;  %v4663_v31 = vadd.f32 %v4662_v4, %v4574_v53  ;;  %v4578_v42 = vmul.f32 %v10838_v52, %v10838_v52  ;;  %v13123_v38 = vld [vmem:[#allocation38_spill] sm:$0xff]  ;;  %5201 = vmatprep.subr.bf16.mxu0 %v7478_v51  ;;  %v13130_v40 = vld [vmem:[#allocation21_spill] sm:$0xff] }
 0x484   : > { %v10852_v24 = vpop.f32.mrf.mxu0  ;;  %13120 = vst [vmem:[#allocation114_spill] sm:$0xff] %v10865_v21  ;;  %v10867_v62 = vpop.f32.mrf.mxu1  ;;  %v10886_v46 = vadd.f32 %v13124_v29, %v13123_v38  ;;  %v4524_v27 = vadd.f32 %v4523_v49, %v10820_v57  ;;  %v4579_v53 = vmul.f32 %v10850_v43, %v10850_v43  ;;  %v10898_v4 = vadd.f32 %v10650_v0, %v10646_v19  ;;  %v13127_v41 = vld [vmem:[#allocation30_spill] sm:$0xff] }
 0x485   : > { %v4627_v61 = vadd.f32 %v4626_v25, %v4575_v32  ;;  %v4664_v38 = vadd.f32 %v4663_v31, %v4576_v23  ;;  %v4488_v29 = vadd.f32 %v4487_v54, %v10829_v1  ;;  %v4580_v51 = vmul.f32 %v10865_v21, %v10865_v21  ;;  %v13129_v0 = vld [vmem:[#allocation82_spill] sm:$0xff] }
 0x486   : > { %v10876_v28 = vpop.f32.mrf.mxu0  ;;  %13125 = vst [vmem:[#allocation99_spill] sm:$0xff] %v10886_v46  ;;  %v10888_v44 = vpop.f32.mrf.mxu1  ;;  %13126 = vst [vmem:[#allocation27_spill] sm:$0xff] %v10898_v4  ;;  %v10907_v32 = vadd.f32 %v13127_v41, %v10654_v14  ;;  %v4525_v57 = vadd.f32 %v4524_v27, %v10838_v52  ;;  %v4581_v19 = vmul.f32 %v10874_v6, %v10874_v6  ;;  %5202 = vmatpush2.bf16.msra.mxu0 %v7476_v58  ;;  %v7479_v14 = vld [vmem:[%s12294_s4 + $0xc0] ss:$8 sps:$4 sm:$0xff]  }
 0x487   : > { %v4628_v25 = vadd.f32 %v4627_v61, %v4577_v5  ;;  %v10916_v23 = vadd.f32 %v13130_v40, %v13129_v0  ;;  %v4665_v41 = vadd.f32 %v4664_v38, %v4578_v42  ;;  %v4489_v54 = vadd.f32 %v4488_v29, %v10850_v43  ;;  %v13131_v61 = vld [vmem:[#allocation104_spill] sm:$0xff]  ;;  %5203 = vmatprep.subr.bf16.mxu0 %v7481_v30  ;;  %v7484_v40 = vld [vmem:[%s12294_s4 + $0xb4] ss:$8 sps:$4 sm:$0xff]  }
 0x488   : > { %v10900_v9 = vpop.f32.mrf.mxu0  ;;  %13128 = vst [vmem:[#allocation100_spill] sm:$0xff] %v10907_v32  ;;  %v10909_v49 = vpop.f32.mrf.mxu1  ;;  %v4582_v5 = vmul.f32 %v10886_v46, %v10886_v46  ;;  %v10928_v27 = vadd.f32 %v10689_v22, %v13131_v61  ;;  %v4526_v0 = vadd.f32 %v4525_v57, %v10865_v21  ;;  %v4583_v42 = vmul.f32 %v10898_v4, %v10898_v4 }
 0x489   : > { %v4629_v58 = vadd.f32 %v4628_v25, %v4579_v53  ;;  %v10940_v38 = vadd.f32 %v10708_v17, %v10699_v11  ;;  %v4666_v22 = vadd.f32 %v4665_v41, %v4580_v51  ;;  %v4490_v61 = vadd.f32 %v4489_v54, %v10874_v6 }
 0x48a   : > { %v10918_v31 = vpop.f32.mrf.mxu0  ;;  %13132 = vst [vmem:[#allocation28_spill] sm:$0xff] %v10928_v27  ;;  %v10930_v1 = vpop.f32.mrf.mxu1  ;;  %v4584_v30 = vmul.f32 %v10907_v32, %v10907_v32  ;;  %v10949_v53 = vadd.f32 %v10726_v18, %v10717_v10  ;;  %v4527_v43 = vadd.f32 %v4526_v0, %v10886_v46  ;;  %v4585_v11 = vmul.f32 %v10916_v23, %v10916_v23  ;;  %v7482_v10 = vld [vmem:[%s12294_s4 + $0xb0] ss:$8 sps:$4 sm:$0xff]  }
 0x48b   : > { %v4630_v25 = vadd.f32 %v4629_v58, %v4581_v19  ;;  %v10958_v17 = vadd.f32 %v10744_v7, %v10735_v36  ;;  %5204 = vmatpush2.bf16.msra.mxu0 %v7479_v14  ;;  %v4667_v18 = vadd.f32 %v4666_v22, %v4582_v5  ;;  %v4491_v41 = vadd.f32 %v4490_v61, %v10898_v4  ;;  %v7487_v36 = vld [vmem:[%s12294_s4 + $0xa4] ss:$8 sps:$4 sm:$0xff]  }
 0x48c   : > { %v10942_v29 = vpop.f32.mrf.mxu0  ;;  %13133 = vst [vmem:[#allocation102_spill] sm:$0xff] %v10949_v53  ;;  %v10951_v57 = vpop.f32.mrf.mxu1  ;;  %v4586_v19 = vmul.f32 %v10928_v27, %v10928_v27  ;;  %v10970_v54 = vadd.f32 %v10762_v2, %v10753_v15  ;;  %5205 = vmatprep.subr.bf16.mxu0 %v7484_v40  ;;  %v4528_v14 = vadd.f32 %v4527_v43, %v10907_v32 }
 0x48d   : > { %v4631_v7 = vadd.f32 %v4630_v25, %v4583_v42  ;;  %v4587_v5 = vmul.f32 %v10940_v38, %v10940_v38  ;;  %v10980_v0 = vadd.f32 %v10780_v39, %v10771_v13  ;;  %v4668_v61 = vadd.f32 %v4667_v18, %v4584_v30  ;;  %v7485_v30 = vld [vmem:[%s12294_s4 + $0xa0] ss:$8 sps:$4 sm:$0xff]  }
 0x48e   : > { %v10960_v51 = vpop.f32.mrf.mxu0  ;;  %v4434_v58 = vpop.f32.mrf.mxu1  ;;  %v4492_v15 = vadd.f32 %v4491_v41, %v10916_v23  ;;  %v4588_v2 = vmul.f32 %v10949_v53, %v10949_v53  ;;  %v10987_v40 = vadd.f32 %v10798_v16, %v10789_v50  ;;  %v4529_v25 = vadd.f32 %v4528_v14, %v10928_v27 }
 0x48f   : > { %v4632_v43 = vadd.f32 %v4631_v7, %v4585_v11  ;;  %v4589_v4 = vmul.f32 %v10958_v17, %v10958_v17  ;;  %v10994_v13 = vadd.f32 %v10822_v35, %v10810_v60  ;;  %5206 = vmatpush2.bf16.msra.mxu0 %v7482_v10  ;;  %v4669_v18 = vadd.f32 %v4668_v61, %v4586_v19  ;;  %v7490_v60 = vld [vmem:[%s12294_s4 + $0x94] ss:$8 sps:$4 sm:$0xff]  }
 0x490   : > { %v4245_v22 = vpop.f32.mrf.mxu0  ;;  %v4438_v42 = vpop.f32.mrf.mxu1  ;;  %v4493_v50 = vadd.f32 %v4492_v15, %v10940_v38  ;;  %v4590_v16 = vmul.f32 %v10970_v54, %v10970_v54  ;;  %v11004_v11 = vadd.f32 %v10840_v63, %v10831_v34  ;;  %5207 = vmatprep.subr.bf16.mxu0 %v7487_v36  ;;  %v4530_v10 = vadd.f32 %v4529_v25, %v10949_v53 }
 0x491   : > { %v4633_v35 = vadd.f32 %v4632_v43, %v4587_v5  ;;  %v4591_v19 = vmul.f32 %v10980_v0, %v10980_v0  ;;  %v11014_v7 = vadd.f32 %v10867_v62, %v10852_v24  ;;  %v4670_v61 = vadd.f32 %v4669_v18, %v4588_v2  ;;  %v7488_v2 = vld [vmem:[%s12294_s4 + $0x90] ss:$8 sps:$4 sm:$0xff]  }
 0x492   : > { %v4247_v39 = vpop.f32.mrf.mxu0  ;;  %v4440_v41 = vpop.f32.mrf.mxu1  ;;  %v4494_v34 = vadd.f32 %v4493_v50, %v10958_v17  ;;  %v4592_v63 = vmul.f32 %v10987_v40, %v10987_v40  ;;  %v11021_v36 = vadd.f32 %v10888_v44, %v10876_v28  ;;  %v4593_v43 = vmul.f32 %v10994_v13, %v10994_v13 }
 0x493   : > { %v4634_v15 = vadd.f32 %v4633_v35, %v4589_v4  ;;  %v11027_v24 = vadd.f32 %v10909_v49, %v10900_v9  ;;  %5208 = vmatpush2.bf16.msra.mxu0 %v7485_v30  ;;  %v4531_v25 = vadd.f32 %v4530_v10, %v10970_v54  ;;  %v4671_v18 = vadd.f32 %v4670_v61, %v4590_v16  ;;  %v7493_v9 = vld [vmem:[%s12294_s4 + $0x84] ss:$8 sps:$4 sm:$0xff]  }
 0x494   : > { %v4249_v14 = vpop.f32.mrf.mxu0  ;;  %v4442_v5 = vpop.f32.mrf.mxu1  ;;  %v4495_v44 = vadd.f32 %v4494_v34, %v10980_v0  ;;  %v4594_v28 = vmul.f32 %v11004_v11, %v11004_v11  ;;  %5209 = vmatprep.subr.bf16.mxu0 %v7490_v60  ;;  %v4595_v30 = vmul.f32 %v11014_v7, %v11014_v7  ;;  %v11043_v50 = vadd.f32 %v10930_v1, %v10918_v31 }
 0x495   : > { %v4635_v49 = vadd.f32 %v4634_v15, %v4591_v19  ;;  %v11047_v16 = vadd.f32 %v10951_v57, %v10942_v29  ;;  %v4532_v10 = vadd.f32 %v4531_v25, %v10987_v40  ;;  %v4672_v60 = vadd.f32 %v4671_v18, %v4592_v63  ;;  %v7491_v57 = vld [vmem:[%s12294_s4 + $0x80] ss:$8 sps:$4 sm:$0xff]  }
 0x496   : > { %v4251_v62 = vpop.f32.mrf.mxu0  ;;  %v4444_v4 = vpop.f32.mrf.mxu1  ;;  %v4496_v61 = vadd.f32 %v4495_v44, %v10994_v13  ;;  %v4596_v19 = vmul.f32 %v11021_v36, %v11021_v36  ;;  %v4597_v53 = vmul.f32 %v11027_v24, %v11027_v24  ;;  %v11056_v1 = vadd.f32 %v4434_v58, %v10960_v51 }
 0x497   : > { %v4636_v15 = vadd.f32 %v4635_v49, %v4593_v43  ;;  %v11058_v31 = vadd.f32 %v4438_v42, %v4245_v22  ;;  %5210 = vmatpush2.bf16.msra.mxu0 %v7488_v2  ;;  %v4533_v63 = vadd.f32 %v4532_v10, %v11004_v11  ;;  %v4673_v25 = vadd.f32 %v4672_v60, %v4594_v28 }
 0x498   : > { %v4255_v35 = vpop.f32.mrf.mxu0  ;;  %v4448_v34 = vpop.f32.mrf.mxu1  ;;  %v4497_v18 = vadd.f32 %v4496_v61, %v11014_v7  ;;  %5211 = vmatprep.subr.bf16.mxu0 %v7493_v9  ;;  %v4598_v51 = vmul.f32 %v11043_v50, %v11043_v50  ;;  %v4599_v58 = vmul.f32 %v11047_v16, %v11047_v16  ;;  %v11069_v22 = vadd.f32 %v4440_v41, %v4247_v39 }
 0x499   : > { %v4637_v44 = vadd.f32 %v4636_v15, %v4595_v30  ;;  %v4534_v2 = vadd.f32 %v4533_v63, %v11021_v36  ;;  %v4674_v49 = vadd.f32 %v4673_v25, %v4596_v19  ;;  %v11072_v27 = vadd.f32 %v4442_v5, %v4249_v14 }
 0x49a   : > { %v4257_v29 = vpop.f32.mrf.mxu0  ;;  %v4450_v43 = vpop.f32.mrf.mxu1  ;;  %v4498_v10 = vadd.f32 %v4497_v18, %v11027_v24  ;;  %v4600_v9 = vmul.f32 %v11056_v1, %v11056_v1  ;;  %v4601_v30 = vmul.f32 %v11058_v31, %v11058_v31  ;;  %v11080_v41 = vadd.f32 %v4444_v4, %v4251_v62 }
 0x49b   : > { %v4638_v60 = vadd.f32 %v4637_v44, %v4597_v53  ;;  %5212 = vmatpush2.bf16.msra.mxu0 %v7491_v57  ;;  %v4535_v39 = vadd.f32 %v4534_v2, %v11043_v50  ;;  %v11082_v15 = vadd.f32 %v4448_v34, %v4255_v35  ;;  %v4675_v5 = vadd.f32 %v4674_v49, %v4598_v51 }
 0x49c   : > { %v4259_v42 = vpop.f32.mrf.mxu0  ;;  %v4452_v28 = vpop.f32.mrf.mxu1  ;;  %13134 = vst [vmem:[#allocation32_spill] sm:$0xff] %v11080_v41  ;;  %v4499_v19 = vadd.f32 %v4498_v10, %v11047_v16  ;;  %v4602_v53 = vmul.f32 %v11069_v22, %v11069_v22  ;;  %v4603_v18 = vmul.f32 %v11072_v27, %v11072_v27  ;;  %v11089_v44 = vadd.f32 %v4450_v43, %v4257_v29 }
 0x49d   : > { %v4639_v63 = vadd.f32 %v4638_v60, %v4599_v58  ;;  %v11091_v57 = vadd.f32 %v4452_v28, %v4259_v42  ;;  %v4536_v4 = vadd.f32 %v4535_v39, %v11056_v1  ;;  %v4676_v35 = vadd.f32 %v4675_v5, %v4600_v9 }
 0x49e   : > { %v4261_v61 = vpop.f32.mrf.mxu0  ;;  %v4454_v14 = vpop.f32.mrf.mxu1  ;;  %13135 = vst [vmem:[#allocation29_spill] sm:$0xff] %v11089_v44  ;;  %v4500_v34 = vadd.f32 %v4499_v19, %v11058_v31  ;;  %v4604_v58 = vmul.f32 %v11080_v41, %v11080_v41  ;;  %v4605_v49 = vmul.f32 %v11082_v15, %v11082_v15 }
 0x49f   : > { %v4640_v51 = vadd.f32 %v4639_v63, %v4601_v30  ;;  %v11099_v10 = vadd.f32 %v4454_v14, %v4261_v61  ;;  %v4537_v42 = vadd.f32 %v4536_v4, %v11069_v22  ;;  %v4677_v28 = vadd.f32 %v4676_v35, %v4602_v53 }
 0x4a0   : > { %v4265_v25 = vpop.f32.mrf.mxu0  ;;  %v4458_v62 = vpop.f32.mrf.mxu1  ;;  %v4501_v60 = vadd.f32 %v4500_v34, %v11072_v27  ;;  %v4606_v30 = vmul.f32 %v11089_v44, %v11089_v44  ;;  %v4607_v5 = vmul.f32 %v11091_v57, %v11091_v57 }
 0x4a1   : > { %13136 = vst [vmem:[#allocation33_spill] sm:$0xff] %v11099_v10  ;;  %v11101_v29 = vadd.f32 %v4458_v62, %v4265_v25  ;;  %v4641_v39 = vadd.f32 %v4640_v51, %v4603_v18  ;;  %v4538_v14 = vadd.f32 %v4537_v42, %v11080_v41  ;;  %v4678_v62 = vadd.f32 %v4677_v28, %v4604_v58 }
 0x4a2   : > { %v4267_v2 = vpop.f32.mrf.mxu0  ;;  %v4460_v43 = vpop.f32.mrf.mxu1  ;;  %v4502_v63 = vadd.f32 %v4501_v60, %v11082_v15  ;;  %v4608_v18 = vmul.f32 %v11099_v10, %v11099_v10 }
 0x4a3   : > { %v11109_v19 = vadd.f32 %v4460_v43, %v4267_v2  ;;  %v4642_v4 = vadd.f32 %v4641_v39, %v4605_v49  ;;  %v4609_v35 = vmul.f32 %v11101_v29, %v11101_v29  ;;  %v4539_v51 = vadd.f32 %v4538_v14, %v11089_v44 }
 0x4a4   : > { %v4269_v9 = vpop.f32.mrf.mxu0  ;;  %v4462_v61 = vpop.f32.mrf.mxu1  ;;  %v4503_v2 = vadd.f32 %v4502_v63, %v11091_v57  ;;  %v4679_v60 = vadd.f32 %v4678_v62, %v4606_v30 }
 0x4a5   : > { %13137 = vst [vmem:[#allocation116_spill] sm:$0xff] %v11109_v19  ;;  %v11113_v25 = vadd.f32 %v4462_v61, %v4269_v9  ;;  %v4643_v9 = vadd.f32 %v4642_v4, %v4607_v5  ;;  %v4610_v58 = vmul.f32 %v11109_v19, %v11109_v19  ;;  %v4540_v39 = vadd.f32 %v4539_v51, %v11099_v10 }
 0x4a6   : > { %v4271_v53 = vpop.f32.mrf.mxu0  ;;  %v4464_v34 = vpop.f32.mrf.mxu1  ;;  %v4504_v61 = vadd.f32 %v4503_v2, %v11101_v29  ;;  %v4680_v63 = vadd.f32 %v4679_v60, %v4608_v18 }
 0x4a7   : > { %v11121_v43 = vadd.f32 %v4464_v34, %v4271_v53  ;;  %v4611_v49 = vmul.f32 %v11113_v25, %v11113_v25  ;;  %v4644_v53 = vadd.f32 %v4643_v9, %v4609_v35  ;;  %v4541_v62 = vadd.f32 %v4540_v39, %v11109_v19 }
 0x4a8   : > { %v4275_v42 = vpop.f32.mrf.mxu0  ;;  %v4468_v28 = vpop.f32.mrf.mxu1  ;;  %v4505_v4 = vadd.f32 %v4504_v61, %v11113_v25  ;;  %v4681_v2 = vadd.f32 %v4680_v63, %v4610_v58 }
 0x4a9   : > { %13138 = vst [vmem:[#allocation106_spill] sm:$0xff] %v11121_v43  ;;  %v11129_v6 = vadd.f32 %v4468_v28, %v4275_v42  ;;  %v4612_v30 = vmul.f32 %v11121_v43, %v11121_v43  ;;  %v4645_v42 = vadd.f32 %v4644_v53, %v4611_v49  ;;  %v4542_v18 = vadd.f32 %v4541_v62, %v11121_v43 }
 0x4aa   : > { %v4277_v14 = vpop.f32.mrf.mxu0  ;;  %v4470_v5 = vpop.f32.mrf.mxu1 }
 0x4ab   : > { %v4613_v34 = vmul.f32 %v11129_v6, %v11129_v6  ;;  %v11137_v32 = vadd.f32 %v4470_v5, %v4277_v14  ;;  %v4506_v35 = vadd.f32 %v4505_v4, %v11129_v6  ;;  %v4682_v61 = vadd.f32 %v4681_v2, %v4612_v30 }
 0x4ac   : > { %v4279_v51 = vpop.f32.mrf.mxu0  ;;  %v4472_v28 = vpop.f32.mrf.mxu1 }
 0x4ad   : > { %13139 = vst [vmem:[#allocation108_spill] sm:$0xff] %v11137_v32  ;;  %v4614_v60 = vmul.f32 %v11137_v32, %v11137_v32  ;;  %v11143_v9 = vadd.f32 %v4472_v28, %v4279_v51  ;;  %v4646_v46 = vadd.f32 %v4645_v42, %v4613_v34  ;;  %v4543_v14 = vadd.f32 %v4542_v18, %v11137_v32 }
 0x4ae   : > { %v4281_v39 = vpop.f32.mrf.mxu0  ;;  %v4474_v21 = vpop.f32.mrf.mxu1 }
 0x4af   : > { %v4507_v5 = vadd.f32 %v4506_v35, %v11143_v9  ;;  %v4615_v58 = vmul.f32 %v11143_v9, %v11143_v9  ;;  %v4475_v49 = vadd.f32 %v4474_v21, %v4281_v39  ;;  %v4683_v63 = vadd.f32 %v4682_v61, %v4614_v60 }
 0x4b1   : > { %v4508_v53 = vrot.slane %v4507_v5, 4  ;;  %v4647_v62 = vadd.f32 %v4646_v46, %v4615_v58  ;;  %v4544_v4 = vadd.f32 %v4543_v14, %v4475_v49  ;;  %v4616_v52 = vmul.f32 %v4475_v49, %v4475_v49 }
 0x4b3   : > { %v4509_v43 = vadd.f32 %v4508_v53, %v4507_v5  ;;  %v4648_v51 = vrot.slane %v4647_v62, 4  ;;  %v4545_v28 = vrot.slane %v4544_v4, 4  ;;  %v4684_v19 = vadd.f32 %v4683_v63, %v4616_v52 }
 0x4b5   : > { %v4510_v30 = vrot.slane %v4509_v43, 2  ;;  %v4649_v34 = vadd.f32 %v4648_v51, %v4647_v62  ;;  %v4546_v2 = vadd.f32 %v4545_v28, %v4544_v4  ;;  %v4685_v42 = vrot.slane %v4684_v19, 4 }
 0x4b7   : > { %v4511_v18 = vadd.f32 %v4510_v30, %v4509_v43  ;;  %v4650_v32 = vrot.slane %v4649_v34, 2  ;;  %v4547_v35 = vrot.slane %v4546_v2, 2  ;;  %v4686_v10 = vadd.f32 %v4685_v42, %v4684_v19 }
 0x4b9   : > { %v4512_v44 = vrot.slane %v4511_v18, 1  ;;  %v4651_v41 = vadd.f32 %v4650_v32, %v4649_v34  ;;  %v4548_v21 = vadd.f32 %v4547_v35, %v4546_v2  ;;  %v4687_v60 = vrot.slane %v4686_v10, 2 }
 0x4bb   : > { %v4513_v39 = vadd.f32 %v4512_v44, %v4511_v18  ;;  %v4652_v46 = vrot.slane %v4651_v41, 1  ;;  %v4549_v61 = vrot.slane %v4548_v21, 1  ;;  %v4688_v14 = vadd.f32 %v4687_v60, %v4686_v10 }
 0x4bd   : > { %v4551_v5 = vmul.f32 0.00390625, %v4513_v39  ;;  %v4653_v58 = vadd.f32 %v4652_v46, %v4651_v41  ;;  %v4550_v53 = vadd.f32 %v4549_v61, %v4548_v21  ;;  %v4689_v52 = vrot.slane %v4688_v14, 1  ;;  %v13140_v41 = vld [vmem:[#allocation15_spill] sm:$0xff]  ;;  %v13141_v46 = vld [vmem:[#allocation18_spill] sm:$0xff] }
 0x4be   : > { %v344_v21 = vld [vmem:[#allocation8 + $0x3] ss:$8 sm:$0x3] }
 0x4bf   : > { %v4691_v63 = vmul.f32 0.00390625, %v4653_v58  ;;  %v4693_v62 = vmul.f32 %v4551_v5, %v4551_v5  ;;  %v4552_v4 = vmul.f32 0.00390625, %v4550_v53  ;;  %v4690_v51 = vadd.f32 %v4689_v52, %v4688_v14  ;;  %v13142_v14 = vld [vmem:[#allocation16_spill] sm:$0xff] }
 0x4c1   : > { %v4695_v43 = vsub.f32 %v4691_v63, %v4693_v62  ;;  %v4692_v28 = vmul.f32 0.00390625, %v4690_v51  ;;  %v4694_v30 = vmul.f32 %v4552_v4, %v4552_v4 }
 0x4c3   : > { %v4697_v19 = vmax.f32 %v4695_v43, 0.0  ;;  %v4696_v42 = vsub.f32 %v4692_v28, %v4694_v30  ;;  %v346_v28 = vld [vmem:[#allocation8 + $0x4] ss:$8 sm:$0x3] }
 0x4c5   : > { %v4699_v32 = vadd.f32 1e-05, %v4697_v19  ;;  %v4698_v34 = vmax.f32 %v4696_v42, 0.0  ;;  %v13143_v19 = vld [vmem:[#allocation36_spill] sm:$0xff] }
 0x4c7   : > { %v4700_v2 = vadd.f32 1e-05, %v4698_v34  ;;  %7518 = vrsqrt.f32 %v4699_v32 }
 0x4c9   : > { %7520 = vrsqrt.f32 %v4700_v2 }
 0x4d4   : > { %v7519_v44 = vpop.eup %7518 }
 0x4d6   : > { %v7521_v10 = vpop.eup %7520 }
 0x4d7   : > { %v4705_v18 = vcombine.low %v7519_v44, %v7521_v10 }
 0x4d9   : > { %v4712_v35 = vrot.slane %v4705_v18, %v13140_v41 }
 0x4db   : > { %v4719_v60 = vrot.slane %v4712_v35, %v13140_v41 }
 0x4dd   : > { %v4721_v39 = vmul.f32 %v4719_v60, %v344_v21 }
 0x4df   : > { %v11152_v61 = vrot.slane %v4721_v39, %v13141_v46  ;;  %v11155_v58 = vrot.slane %v4721_v39, %v13142_v14 }
 0x4e1   : > { %v4733_v53 = vmul.f32 %v11152_v61, %v4551_v5  ;;  %v4734_v52 = vmul.f32 %v11155_v58, %v4552_v4  ;;  %v11160_v63 = vmul.f32 %v11155_v58, %v4475_v49  ;;  %v4754_v42 = vmul.f32 %v11152_v61, %v13143_v19 }
 0x4e2   : > { %v4786_v32 = vmul.f32 %v11152_v61, %v10916_v23  ;;  %v4788_v49 = vmul.f32 %v11152_v61, %v10940_v38  ;;  %v4790_v4 = vmul.f32 %v11152_v61, %v10958_v17  ;;  %v4792_v34 = vmul.f32 %v11152_v61, %v10980_v0 }
 0x4e3   : > { %v4737_v62 = vcombine.low %v4733_v53, %v4734_v52  ;;  %v4794_v2 = vmul.f32 %v11152_v61, %v10994_v13  ;;  %v4796_v44 = vmul.f32 %v11152_v61, %v11014_v7  ;;  %v4798_v23 = vmul.f32 %v11152_v61, %v11027_v24 }
 0x4e4   : > { %v4800_v10 = vmul.f32 %v11152_v61, %v11047_v16  ;;  %v4802_v38 = vmul.f32 %v11152_v61, %v11058_v31  ;;  %v4804_v17 = vmul.f32 %v11152_v61, %v11072_v27  ;;  %v4806_v0 = vmul.f32 %v11152_v61, %v11082_v15 }
 0x4e5   : > { %v4744_v51 = vrot.slane %v4737_v62, %v13140_v41  ;;  %v4808_v13 = vmul.f32 %v11152_v61, %v11091_v57  ;;  %v4810_v7 = vmul.f32 %v11152_v61, %v11101_v29  ;;  %v4812_v24 = vmul.f32 %v11152_v61, %v11113_v25 }
 0x4e6   : > { %v4814_v16 = vmul.f32 %v11152_v61, %v11129_v6  ;;  %v4816_v31 = vmul.f32 %v11152_v61, %v11143_v9 }
 0x4e7   : > { %v4751_v43 = vrot.slane %v4744_v51, %v13140_v41 }
 0x4e9   : > { %v4753_v30 = vsub.f32 %v346_v28, %v4751_v43  ;;  %v4755_v43 = vmul.f32 %v11155_v58, %v10560_v48  ;;  %v13144_v28 = vld [vmem:[#allocation40_spill] sm:$0xff]  ;;  %v4762_v48 = vmul.f32 %v11152_v61, %v10676_v59 }
 0x4ea   : > { %v4756_v19 = vmul.f32 %v11152_v61, %v13144_v28 }
 0x4eb   : > { %v11169_v5 = vrot.slane %v4753_v30, %v13141_v46 }
 0x4ed   : > { %v11202_v27 = vadd.f32 %v11169_v5, %v4786_v32  ;;  %v11205_v15 = vadd.f32 %v11169_v5, %v4788_v49  ;;  %v11208_v57 = vadd.f32 %v11169_v5, %v4790_v4  ;;  %v11211_v29 = vadd.f32 %v11169_v5, %v4792_v34  ;;  %v13145_v32 = vld [vmem:[#allocation20_spill] sm:$0xff] }
 0x4ee   : > { %v11214_v25 = vadd.f32 %v11169_v5, %v4794_v2  ;;  %v11217_v6 = vadd.f32 %v11169_v5, %v4796_v44  ;;  %v11220_v9 = vadd.f32 %v11169_v5, %v4798_v23  ;;  %v11223_v18 = vadd.f32 %v11169_v5, %v4800_v10 }
 0x4ef   : > { %v11226_v35 = vadd.f32 %v11169_v5, %v4802_v38  ;;  %v11229_v21 = vadd.f32 %v11169_v5, %v4804_v17  ;;  %v11232_v60 = vadd.f32 %v11169_v5, %v4806_v0  ;;  %v11235_v39 = vadd.f32 %v11169_v5, %v4808_v13  ;;  %v13148_v13 = vld [vmem:[#allocation32_spill] sm:$0xff] }
 0x4f0   : > { %v11238_v53 = vadd.f32 %v11169_v5, %v4810_v7  ;;  %v11241_v52 = vadd.f32 %v11169_v5, %v4812_v24  ;;  %v11244_v62 = vadd.f32 %v11169_v5, %v4814_v16  ;;  %v11247_v51 = vadd.f32 %v11169_v5, %v4816_v31  ;;  %v13149_v7 = vld [vmem:[#allocation29_spill] sm:$0xff] }
 0x4f1   : > { %v4757_v49 = vmul.f32 %v11155_v58, %v13145_v32  ;;  %v4758_v4 = vmul.f32 %v11152_v61, %v10652_v12  ;;  %v4759_v34 = vmul.f32 %v11155_v58, %v10656_v56  ;;  %v4760_v2 = vmul.f32 %v11152_v61, %v10662_v45  ;;  %v13150_v24 = vld [vmem:[#allocation33_spill] sm:$0xff] }
 0x4f2   : > { %v4761_v44 = vmul.f32 %v11155_v58, %v10668_v3  ;;  %v4763_v23 = vmul.f32 %v11155_v58, %v10687_v26  ;;  %v4764_v10 = vmul.f32 %v11152_v61, %v10697_v47  ;;  %v4765_v12 = vmul.f32 %v11155_v58, %v10706_v20  ;;  %v13146_v47 = vld [vmem:[#allocation22_spill] sm:$0xff] }
 0x4f3   : > { %v4766_v56 = vmul.f32 %v11152_v61, %v10715_v33  ;;  %v4767_v45 = vmul.f32 %v11155_v58, %v10724_v55  ;;  %v4768_v3 = vmul.f32 %v11152_v61, %v10733_v37  ;;  %v4829_v59 = vadd.f32 %v11169_v5, %v4754_v42  ;;  %v13147_v33 = vld [vmem:[#allocation96_spill] sm:$0xff] }
 0x4f4   : > { %v4831_v38 = vadd.f32 %v11169_v5, %v4756_v19  ;;  %v11280_v26 = vrot.slane %v4753_v30, %v13142_v14  ;;  %v11284_v17 = vmul.f32 %v11155_v58, %v13146_v47  ;;  %v11288_v20 = vmul.f32 %v11155_v58, %v10760_v8  ;;  %v13152_v14 = vld [vmem:[#allocation106_spill] sm:$0xff] }
 0x4f5   : > { %v11292_v55 = vmul.f32 %v11155_v58, %v13147_v33  ;;  %v11296_v37 = vmul.f32 %v11155_v58, %v10970_v54  ;;  %v11300_v30 = vmul.f32 %v11155_v58, %v10987_v40  ;;  %v11304_v42 = vmul.f32 %v11155_v58, %v11004_v11 }
 0x4f6   : > { %v11308_v8 = vmul.f32 %v11155_v58, %v11021_v36  ;;  %v11312_v0 = vmul.f32 %v11155_v58, %v11043_v50  ;;  %v11316_v54 = vmul.f32 %v11155_v58, %v11056_v1  ;;  %v11320_v40 = vmul.f32 %v11155_v58, %v11069_v22  ;;  %v13151_v1 = vld [vmem:[#allocation116_spill] sm:$0xff] }
 0x4f7   : > { %v11324_v11 = vmul.f32 %v11155_v58, %v13148_v13  ;;  %v11328_v36 = vmul.f32 %v11155_v58, %v13149_v7  ;;  %v11332_v50 = vmul.f32 %v11155_v58, %v13150_v24  ;;  %v4893_v16 = vmax.f32 %v4829_v59, 0.0 }
 0x4f8   : > { %v4895_v31 = vmax.f32 %v4831_v38, 0.0  ;;  %v11336_v28 = vmul.f32 %v11155_v58, %v13151_v1  ;;  %v4830_v22 = vadd.f32 %v11280_v26, %v4755_v43  ;;  %v4832_v19 = vadd.f32 %v11280_v26, %v4757_v49  ;;  %v13153_v49 = vld [vmem:[#allocation108_spill] sm:$0xff] }
 0x4f9   : > { %v4834_v32 = vadd.f32 %v11280_v26, %v4759_v34  ;;  %v4833_v47 = vadd.f32 %v11169_v5, %v4758_v4  ;;  %v4835_v33 = vadd.f32 %v11169_v5, %v4760_v2  ;;  %v4837_v13 = vadd.f32 %v11169_v5, %v4762_v48 }
 0x4fa   : > { %v4836_v7 = vadd.f32 %v11280_v26, %v4761_v44  ;;  %v4839_v59 = vadd.f32 %v11169_v5, %v4764_v10  ;;  %v4894_v38 = vmax.f32 %v4830_v22, 0.0  ;;  %v4896_v24 = vmax.f32 %v4832_v19, 0.0 }
 0x4fb   : > { %v4898_v1 = vmax.f32 %v4834_v32, 0.0  ;;  %v11348_v43 = vmul.f32 %v11155_v58, %v13152_v14  ;;  %v11352_v34 = vmul.f32 %v11155_v58, %v13153_v49  ;;  %v4957_v4 = vpack.c.bf16 %v4895_v31, %v4893_v16 }
 0x4fc   : > { %v4900_v46 = vmax.f32 %v4836_v7, 0.0  ;;  %v11355_v2 = vadd.f32 %v11169_v5, %v4766_v56  ;;  %v4958_v48 = vpack.c.bf16 %v4896_v24, %v4894_v38  ;;  %v4838_v44 = vadd.f32 %v11280_v26, %v4763_v23 }
 0x4fd   : > { %v4840_v10 = vadd.f32 %v11280_v26, %v4765_v12  ;;  %v11360_v22 = vadd.f32 %v11169_v5, %v4768_v3  ;;  %v4897_v19 = vmax.f32 %v4833_v47, 0.0  ;;  %v4899_v14 = vmax.f32 %v4835_v33, 0.0 }
 0x4fe   : > { %v4901_v32 = vmax.f32 %v4837_v13, 0.0  ;;  %v4903_v41 = vmax.f32 %v4839_v59, 0.0  ;;  %v4925_v49 = vmax.f32 %v11202_v27, 0.0  ;;  %v4927_v16 = vmax.f32 %v11205_v15, 0.0  ;;  %5213 = vmatprep.mubr.bf16.mxu0 %v4958_v48 }
 0x4ff   : > { %v4960_v31 = vpack.c.bf16 %v4900_v46, %v4898_v1  ;;  %v4929_v56 = vmax.f32 %v11208_v57, 0.0  ;;  %v4931_v7 = vmax.f32 %v11211_v29, 0.0  ;;  %v4933_v23 = vmax.f32 %v11214_v25, 0.0  ;;  %5214 = vmatmul.mubr.bf16.vlgmr.msra.gmra.mxu0 %v4957_v4 }
 0x500   : > { %v4935_v12 = vmax.f32 %v11217_v6, 0.0  ;;  %v4937_v3 = vmax.f32 %v11220_v9, 0.0  ;;  %v4939_v47 = vmax.f32 %v11223_v18, 0.0  ;;  %v4902_v33 = vmax.f32 %v4838_v44, 0.0 }
 0x501   : > { %5223 = vmatprep.mubr.bf16.mxu0 %v4960_v31  ;;  %v4904_v27 = vmax.f32 %v4840_v10, 0.0  ;;  %v4941_v15 = vmax.f32 %v11226_v35, 0.0  ;;  %v4943_v46 = vmax.f32 %v11229_v21, 0.0  ;;  %v4945_v57 = vmax.f32 %v11232_v60, 0.0 }
 0x502   : > { %v4842_v29 = vadd.f32 %v11280_v26, %v4767_v45  ;;  %v4947_v25 = vmax.f32 %v11235_v39, 0.0  ;;  %v4949_v6 = vmax.f32 %v11238_v53, 0.0  ;;  %v4951_v13 = vmax.f32 %v11241_v52, 0.0 }
 0x503   : > { %v4953_v9 = vmax.f32 %v11244_v62, 0.0  ;;  %v4955_v18 = vmax.f32 %v11247_v51, 0.0  ;;  %v4959_v59 = vpack.c.bf16 %v4899_v14, %v4897_v19  ;;  %v4844_v35 = vadd.f32 %v11280_v26, %v11284_v17 }
 0x504   : > { %v11381_v38 = vpack.c.bf16 %v4927_v16, %v4925_v49  ;;  %v4962_v21 = vpack.c.bf16 %v4904_v27, %v4902_v33  ;;  %v4961_v60 = vpack.c.bf16 %v4903_v41, %v4901_v32  ;;  %v11385_v45 = vadd.f32 %v11280_v26, %v11288_v20 }
 0x505   : > { %v4866_v39 = vadd.f32 %v11280_v26, %v11296_v37  ;;  %v4906_v53 = vmax.f32 %v4842_v29, 0.0  ;;  %v4868_v52 = vadd.f32 %v11280_v26, %v11300_v30  ;;  %v11391_v62 = vpack.c.bf16 %v4931_v7, %v4929_v56 }
 0x506   : > { %v4870_v51 = vadd.f32 %v11280_v26, %v11304_v42  ;;  %v4848_v17 = vadd.f32 %v11280_v26, %v11292_v55  ;;  %v4872_v20 = vadd.f32 %v11280_v26, %v11308_v8  ;;  %v11399_v24 = vpack.c.bf16 %v4935_v12, %v4933_v23 }
 0x507   : > { %v4930_v41 = vmax.f32 %v4866_v39, 0.0  ;;  %5224 = vmatmul.mubr.bf16.gmra.mxu0 %v4959_v59  ;;  %v4908_v37 = vmax.f32 %v4844_v35, 0.0  ;;  %v4932_v1 = vmax.f32 %v4868_v52, 0.0  ;;  %v4874_v30 = vadd.f32 %v11280_v26, %v11312_v0  ;;  %v13157_v39 = vld [vmem:[#allocation98_spill] sm:$0xff] }
 0x508   : > { %v4934_v4 = vmax.f32 %v4870_v51, 0.0  ;;  %5233 = vmatprep.mubr.bf16.mxu0 %v4962_v21  ;;  %v4936_v48 = vmax.f32 %v4872_v20, 0.0  ;;  %v4876_v42 = vadd.f32 %v11280_v26, %v11316_v54  ;;  %v11405_v44 = vpack.c.bf16 %v4939_v47, %v4937_v3  ;;  %v13156_v21 = vld [vmem:[#allocation24_spill] sm:$0xff] }
 0x509   : > { %v4878_v55 = vadd.f32 %v11280_v26, %v11320_v40  ;;  %v11409_v8 = vpack.c.bf16 %v4932_v1, %v4930_v41  ;;  %v4938_v10 = vmax.f32 %v4874_v30, 0.0  ;;  %v4880_v19 = vadd.f32 %v11280_v26, %v11324_v11 }
 0x50a   : > { %v11413_v14 = vpack.c.bf16 %v4943_v46, %v4941_v15  ;;  %v11415_v32 = vpack.c.bf16 %v4936_v48, %v4934_v4  ;;  %v4940_v0 = vmax.f32 %v4876_v42, 0.0  ;;  %v4882_v54 = vadd.f32 %v11280_v26, %v11328_v36  ;;  %v13158_v4 = vld [vmem:[#allocation23_spill] sm:$0xff]  ;;  %v13159_v48 = vld [vmem:[#allocation25_spill] sm:$0xff] }
 0x50b   : > { %v4942_v49 = vmax.f32 %v4878_v55, 0.0  ;;  %v4944_v16 = vmax.f32 %v4880_v19, 0.0  ;;  %v4884_v31 = vadd.f32 %v11280_v26, %v11332_v50  ;;  %v11421_v40 = vpack.c.bf16 %v4947_v25, %v4945_v57  ;;  %v13160_v55 = vld [vmem:[#allocation112_spill] sm:$0xff]  ;;  %v13161_v19 = vld [vmem:[#allocation114_spill] sm:$0xff] }
 0x50c   : > { %v4886_v56 = vadd.f32 %v11280_v26, %v11336_v28  ;;  %v11425_v7 = vpack.c.bf16 %v4940_v0, %v4938_v10  ;;  %v4946_v11 = vmax.f32 %v4882_v54, 0.0  ;;  %v4888_v23 = vadd.f32 %v11280_v26, %v11348_v43 }
 0x50d   : > { %v11429_v12 = vpack.c.bf16 %v4951_v13, %v4949_v6  ;;  %v11431_v3 = vpack.c.bf16 %v4944_v16, %v4942_v49  ;;  %v4948_v36 = vmax.f32 %v4884_v31, 0.0  ;;  %v4890_v50 = vadd.f32 %v11280_v26, %v11352_v34 }
 0x50e   : > { %v4950_v47 = vmax.f32 %v4886_v56, 0.0  ;;  %v4964_v33 = vpack.c.bf16 %v4908_v37, %v4906_v53  ;;  %v4952_v27 = vmax.f32 %v4888_v23, 0.0  ;;  %v4892_v28 = vadd.f32 %v11280_v26, %v11160_v63  ;;  %v13154_v63 = vld [vmem:[#allocation41_spill] sm:$0xff] }
 0x50f   : > { %v11437_v15 = vpack.c.bf16 %v4955_v18, %v4953_v9  ;;  %5234 = vmatmul.mubr.bf16.gmra.mxu0 %v4961_v60  ;;  %v11439_v46 = vpack.c.bf16 %v4948_v36, %v4946_v11  ;;  %v4954_v43 = vmax.f32 %v4890_v50, 0.0  ;;  %v4905_v25 = vmax.f32 %v11355_v2, 0.0  ;;  %v13155_v18 = vld [vmem:[#allocation97_spill] sm:$0xff] }
 0x510   : > { %5243 = vmatprep.mubr.bf16.mxu0 %v4964_v33  ;;  %v11441_v57 = vpack.c.bf16 %v4952_v27, %v4950_v47  ;;  %v4956_v29 = vmax.f32 %v4892_v28, 0.0  ;;  %v4907_v6 = vmax.f32 %v11360_v22, 0.0  ;;  %v4910_v34 = vmax.f32 %v11385_v45, 0.0  ;;  %v13162_v33 = vld [vmem:[#allocation26_spill] sm:$0xff]  ;;  %v13163_v28 = vld [vmem:[#allocation113_spill] sm:$0xff] }
 0x511   : > { %v4912_v13 = vmax.f32 %v4848_v17, 0.0  ;;  %v4770_v9 = vmul.f32 %v11152_v61, %v13154_v63  ;;  %v4772_v35 = vmul.f32 %v11152_v61, %v13155_v18  ;;  %v4775_v60 = vmul.f32 %v11155_v58, %v13156_v21 }
 0x512   : > { %v11446_v59 = vpack.c.bf16 %v4956_v29, %v4954_v43  ;;  %v4777_v53 = vmul.f32 %v11155_v58, %v13157_v39  ;;  %v4963_v45 = vpack.c.bf16 %v4907_v6, %v4905_v25  ;;  %v4774_v30 = vmul.f32 %v11152_v61, %v13158_v4  ;;  %v13164_v29 = vld [vmem:[#allocation99_spill] sm:$0xff]  ;;  %v13165_v6 = vld [vmem:[#allocation100_spill] sm:$0xff] }
 0x513   : > { %v4845_v2 = vadd.f32 %v11169_v5, %v4770_v9  ;;  %v4847_v22 = vadd.f32 %v11169_v5, %v4772_v35  ;;  %v4966_v52 = vpack.c.bf16 %v4912_v13, %v4910_v34  ;;  %v4850_v51 = vadd.f32 %v11280_v26, %v4775_v60 }
 0x514   : > { %v4852_v17 = vadd.f32 %v11280_v26, %v4777_v53  ;;  %v4776_v42 = vmul.f32 %v11152_v61, %v13159_v48  ;;  %v4779_v10 = vmul.f32 %v11155_v58, %v13160_v55  ;;  %v4781_v0 = vmul.f32 %v11155_v58, %v13161_v19 }
 0x515   : > { %v4909_v41 = vmax.f32 %v4845_v2, 0.0  ;;  %v4911_v20 = vmax.f32 %v4847_v22, 0.0  ;;  %v4914_v37 = vmax.f32 %v4850_v51, 0.0  ;;  %v4849_v49 = vadd.f32 %v11169_v5, %v4774_v30  ;;  %v13166_v22 = vld [vmem:[#allocation81_spill] sm:$0xff] }
 0x516   : > { %v4916_v1 = vmax.f32 %v4852_v17, 0.0  ;;  %v4851_v54 = vadd.f32 %v11169_v5, %v4776_v42  ;;  %v4854_v56 = vadd.f32 %v11280_v26, %v4779_v10  ;;  %v4856_v11 = vadd.f32 %v11280_v26, %v4781_v0  ;;  %v13168_v17 = vld [vmem:[#allocation28_spill] sm:$0xff] }
 0x517   : > { %5244 = vmatmul.mubr.bf16.gmra.mxu0 %v4963_v45  ;;  %v4965_v16 = vpack.c.bf16 %v4911_v20, %v4909_v41  ;;  %v4913_v23 = vmax.f32 %v4849_v49, 0.0  ;;  %v4778_v27 = vmul.f32 %v11152_v61, %v13162_v33  ;;  %v4780_v43 = vmul.f32 %v11152_v61, %v13163_v28  ;;  %v13169_v20 = vld [vmem:[#allocation102_spill] sm:$0xff] }
 0x518   : > { %5253 = vmatprep.mubr.bf16.mxu0 %v4966_v52  ;;  %v4968_v31 = vpack.c.bf16 %v4916_v1, %v4914_v37  ;;  %v4915_v36 = vmax.f32 %v4851_v54, 0.0  ;;  %v4918_v47 = vmax.f32 %v4854_v56, 0.0  ;;  %v4920_v50 = vmax.f32 %v4856_v11, 0.0  ;;  %v13167_v52 = vld [vmem:[#allocation27_spill] sm:$0xff] }
 0x519   : > { %v4783_v25 = vmul.f32 %v11155_v58, %v13164_v29  ;;  %v4785_v34 = vmul.f32 %v11155_v58, %v13165_v6  ;;  %v4853_v13 = vadd.f32 %v11169_v5, %v4778_v27  ;;  %v4855_v63 = vadd.f32 %v11169_v5, %v4780_v43 }
 0x51a   : > { %v4967_v9 = vpack.c.bf16 %v4915_v36, %v4913_v23  ;;  %v4970_v18 = vpack.c.bf16 %v4920_v50, %v4918_v47  ;;  %v4782_v45 = vmul.f32 %v11152_v61, %v13166_v22  ;;  %v4784_v51 = vmul.f32 %v11152_v61, %v13167_v52 }
 0x51b   : > { %v4858_v35 = vadd.f32 %v11280_v26, %v4783_v25  ;;  %v4860_v21 = vadd.f32 %v11280_v26, %v4785_v34  ;;  %v4917_v60 = vmax.f32 %v4853_v13, 0.0  ;;  %v4919_v39 = vmax.f32 %v4855_v63, 0.0 }
 0x51c   : > { %v4787_v41 = vmul.f32 %v11155_v58, %v13168_v17  ;;  %v4789_v37 = vmul.f32 %v11155_v58, %v13169_v20  ;;  %v4857_v1 = vadd.f32 %v11169_v5, %v4782_v45  ;;  %v4859_v4 = vadd.f32 %v11169_v5, %v4784_v51  ;;  %v7494_v58 = vld [vmem:[#allocation7 + $0x78] sm:$0xff]  }
 0x51d   : > { %v4922_v53 = vmax.f32 %v4858_v35, 0.0  ;;  %v4924_v2 = vmax.f32 %v4860_v21, 0.0  ;;  %v4969_v30 = vpack.c.bf16 %v4919_v39, %v4917_v60  ;;  %6928 = vmatprep.subr.bf16.mxu1 %v7494_v58  ;;  %v7495_v5 = vld [vmem:[#allocation7 + $0x38] sm:$0xff]  }
 0x51e   : > { %v4862_v42 = vadd.f32 %v11280_v26, %v4787_v41  ;;  %v4864_v55 = vadd.f32 %v11280_v26, %v4789_v37  ;;  %v4921_v10 = vmax.f32 %v4857_v1, 0.0  ;;  %v4923_v61 = vmax.f32 %v4859_v4, 0.0  ;;  %6929 = vmatpush3.bf16.msra.mxu1 %v7495_v5  ;;  %v7496_v26 = vld [vmem:[#allocation7 + $0x70] sm:$0xff]  }
 0x51f   : > { %5254 = vmatmul.mubr.bf16.gmra.mxu0 %v4965_v16  ;;  %v4972_v48 = vpack.c.bf16 %v4924_v2, %v4922_v53  ;;  %6930 = vmatprep.subr.bf16.mxu1 %v7496_v26 }
 0x520   : > { %5263 = vmatprep.mubr.bf16.mxu0 %v4968_v31  ;;  %v4926_v19 = vmax.f32 %v4862_v42, 0.0  ;;  %v4928_v0 = vmax.f32 %v4864_v55, 0.0  ;;  %v4971_v49 = vpack.c.bf16 %v4923_v61, %v4921_v10 }
 0x522   : > { %v4974_v54 = vpack.c.bf16 %v4928_v0, %v4926_v19 }
 0x527   : > { %5264 = vmatmul.mubr.bf16.gmra.mxu0 %v4967_v9 }
 0x528   : > { %5273 = vmatprep.mubr.bf16.mxu0 %v4970_v18 }
 0x52f   : > { %5274 = vmatmul.mubr.bf16.gmra.mxu0 %v4969_v30 }
 0x530   : > { %5283 = vmatprep.mubr.bf16.mxu0 %v4972_v48 }
 0x537   : > { %5284 = vmatmul.mubr.bf16.gmra.mxu0 %v4971_v49 }
 0x538   : > { %5293 = vmatprep.mubr.bf16.mxu0 %v4974_v54 }
 0x53f   : > { %5294 = vmatmul.mubr.bf16.gmra.mxu0 %v11381_v38  ;;  %v7497_v38 = vld [vmem:[#allocation7 + $0x30] sm:$0xff]  }
 0x540   : > { %5303 = vmatprep.mubr.bf16.mxu0 %v11409_v8  ;;  %6931 = vmatpush3.bf16.msra.mxu1 %v7497_v38  ;;  %v7501_v8 = vld [vmem:[#allocation7 + $0x20] sm:$0xff]  }
 0x547   : > { %5304 = vmatmul.mubr.bf16.gmra.mxu0 %v11391_v62  ;;  %v7498_v62 = vld [vmem:[#allocation7 + $0x68] sm:$0xff]  }
 0x548   : > { %5313 = vmatprep.mubr.bf16.mxu0 %v11415_v32  ;;  %6932 = vmatprep.subr.bf16.mxu1 %v7498_v62 }
 0x54f   : > { %5314 = vmatmul.mubr.bf16.gmra.mxu0 %v11399_v24  ;;  %v7499_v24 = vld [vmem:[#allocation7 + $0x28] sm:$0xff]  }
 0x550   : > { %5323 = vmatprep.mubr.bf16.mxu0 %v11425_v7  ;;  %6933 = vmatpush3.bf16.msra.mxu1 %v7499_v24 }
 0x557   : > { %5324 = vmatmul.mubr.bf16.gmra.mxu0 %v11405_v44  ;;  %v7500_v44 = vld [vmem:[#allocation7 + $0x60] sm:$0xff]  }
 0x558   : > { %5333 = vmatprep.mubr.bf16.mxu0 %v11431_v3  ;;  %6934 = vmatprep.subr.bf16.mxu1 %v7500_v44 }
 0x559   : > { %6935 = vmatpush3.bf16.msra.mxu1 %v7501_v8 }
 0x55f   : > { %5334 = vmatmul.mubr.bf16.gmra.mxu0 %v11413_v14 }
 0x560   : > { %5343 = vmatprep.mubr.bf16.mxu0 %v11439_v46 }
 0x567   : > { %5344 = vmatmul.mubr.bf16.gmra.mxu0 %v11421_v40 }
 0x568   : > { %5353 = vmatprep.mubr.bf16.mxu0 %v11441_v57 }
 0x56f   : > { %5354 = vmatmul.mubr.bf16.gmra.mxu0 %v11429_v12 }
 0x570   : > { %5363 = vmatprep.mubr.bf16.mxu0 %v11446_v59 }
 0x577   : > { %5364 = vmatmul.mubr.bf16.gmra.mxu0 %v11437_v15 }
 0x5bf   : > { %v11511_v14 = vpop.f32.mrf.mxu0 }
 0x5c0   : > { %v5450_v2 = vmul.f32 %v11511_v14, %v11511_v14 }
 0x5c1   : > { %v11513_v32 = vpop.f32.mrf.mxu0 }
 0x5c2   : > { %v5451_v52 = vmul.f32 %v11513_v32, %v11513_v32 }
 0x5c3   : > { %v11515_v40 = vpop.f32.mrf.mxu0 }
 0x5c4   : > { %v5452_v60 = vmul.f32 %v11515_v40, %v11515_v40  ;;  %v5374_v22 = vadd.f32 %v11515_v40, %v11511_v14 }
 0x5c5   : > { %v11517_v7 = vpop.f32.mrf.mxu0 }
 0x5c6   : > { %v5453_v39 = vmul.f32 %v11517_v7, %v11517_v7  ;;  %v5514_v41 = vadd.f32 %v5452_v60, %v5450_v2  ;;  %v5411_v20 = vadd.f32 %v11517_v7, %v11513_v32 }
 0x5c7   : > { %v11519_v12 = vpop.f32.mrf.mxu0 }
 0x5c8   : > { %v5454_v45 = vmul.f32 %v11519_v12, %v11519_v12  ;;  %v5375_v37 = vadd.f32 %v5374_v22, %v11519_v12  ;;  %v5551_v4 = vadd.f32 %v5453_v39, %v5451_v52 }
 0x5c9   : > { %v11521_v3 = vpop.f32.mrf.mxu0 }
 0x5ca   : > { %v5455_v51 = vmul.f32 %v11521_v3, %v11521_v3  ;;  %v5515_v42 = vadd.f32 %v5514_v41, %v5454_v45  ;;  %v5412_v55 = vadd.f32 %v5411_v20, %v11521_v3 }
 0x5cb   : > { %v11523_v15 = vpop.f32.mrf.mxu0 }
 0x5cc   : > { %13170 = vst [vmem:[#allocation35_spill] sm:$0xff] %v11523_v15  ;;  %v5456_v1 = vmul.f32 %v11523_v15, %v11523_v15  ;;  %v5376_v10 = vadd.f32 %v5375_v37, %v11523_v15  ;;  %v5552_v19 = vadd.f32 %v5551_v4, %v5455_v51 }
 0x5cd   : > { %v11525_v46 = vpop.f32.mrf.mxu0 }
 0x5ce   : > { %v5457_v30 = vmul.f32 %v11525_v46, %v11525_v46  ;;  %v5516_v54 = vadd.f32 %v5515_v42, %v5456_v1  ;;  %v5413_v58 = vadd.f32 %v5412_v55, %v11525_v46 }
 0x5cf   : > { %v11527_v57 = vpop.f32.mrf.mxu0 }
 0x5d0   : > { %13171 = vst [vmem:[#allocation83_spill] sm:$0xff] %v11527_v57  ;;  %v5458_v61 = vmul.f32 %v11527_v57, %v11527_v57  ;;  %v5377_v5 = vadd.f32 %v5376_v10, %v11527_v57  ;;  %v5553_v38 = vadd.f32 %v5552_v19, %v5457_v30  ;;  %v7502_v30 = vld [vmem:[#allocation7 + $0x58] sm:$0xff]  }
 0x5d1   : > { %v11529_v59 = vpop.f32.mrf.mxu0  ;;  %v7503_v19 = vld [vmem:[#allocation7 + $0x18] sm:$0xff]   ;;  %6936 = vmatprep.subr.bf16.mxu1 %v7502_v30 }
 0x5d2   : > { %13172 = vst [vmem:[#allocation63_spill] sm:$0xff] %v11529_v59  ;;  %v5459_v0 = vmul.f32 %v11529_v59, %v11529_v59  ;;  %v5517_v44 = vadd.f32 %v5516_v54, %v5458_v61  ;;  %v5414_v8 = vadd.f32 %v5413_v58, %v11529_v59  ;;  %6937 = vmatpush3.bf16.msra.mxu1 %v7503_v19 }
 0x5d3   : > { %v11531_v16 = vpop.f32.mrf.mxu0 }
 0x5d4   : > { %13173 = vst [vmem:[#allocation72_spill] sm:$0xff] %v11531_v16  ;;  %v5460_v26 = vmul.f32 %v11531_v16, %v11531_v16  ;;  %v5378_v60 = vadd.f32 %v5377_v5, %v11531_v16  ;;  %v5554_v2 = vadd.f32 %v5553_v38, %v5459_v0 }
 0x5d5   : > { %v11533_v31 = vpop.f32.mrf.mxu0 }
 0x5d6   : > { %13174 = vst [vmem:[#allocation39_spill] sm:$0xff] %v11533_v31  ;;  %v5461_v62 = vmul.f32 %v11533_v31, %v11533_v31  ;;  %v5518_v52 = vadd.f32 %v5517_v44, %v5460_v26  ;;  %v5415_v51 = vadd.f32 %v5414_v8, %v11533_v31 }
 0x5d7   : > { %v11535_v56 = vpop.f32.mrf.mxu0 }
 0x5d8   : > { %13175 = vst [vmem:[#allocation84_spill] sm:$0xff] %v11535_v56  ;;  %v5462_v39 = vmul.f32 %v11535_v56, %v11535_v56  ;;  %v5379_v41 = vadd.f32 %v5378_v60, %v11535_v56  ;;  %v5555_v37 = vadd.f32 %v5554_v2, %v5461_v62 }
 0x5d9   : > { %v11537_v11 = vpop.f32.mrf.mxu0 }
 0x5da   : > { %13176 = vst [vmem:[#allocation78_spill] sm:$0xff] %v11537_v11  ;;  %v5463_v22 = vmul.f32 %v11537_v11, %v11537_v11  ;;  %v5519_v42 = vadd.f32 %v5518_v52, %v5462_v39  ;;  %v5416_v55 = vadd.f32 %v5415_v51, %v11537_v11  ;;  %v7504_v39 = vld [vmem:[#allocation7 + $0x50] sm:$0xff]  }
 0x5db   : > { %v11539_v23 = vpop.f32.mrf.mxu0  ;;  %6938 = vmatprep.subr.bf16.mxu1 %v7504_v39 }
 0x5dc   : > { %13177 = vst [vmem:[#allocation71_spill] sm:$0xff] %v11539_v23  ;;  %v5464_v20 = vmul.f32 %v11539_v23, %v11539_v23  ;;  %v5380_v10 = vadd.f32 %v5379_v41, %v11539_v23  ;;  %v5556_v0 = vadd.f32 %v5555_v37, %v5463_v22  ;;  %v7505_v41 = vld [vmem:[#allocation7 + $0x10] sm:$0xff]  }
 0x5dd   : > { %v11541_v36 = vpop.f32.mrf.mxu0  ;;  %6939 = vmatpush3.bf16.msra.mxu1 %v7505_v41 }
 0x5de   : > { %13178 = vst [vmem:[#allocation94_spill] sm:$0xff] %v11541_v36  ;;  %v5465_v1 = vmul.f32 %v11541_v36, %v11541_v36  ;;  %v5520_v5 = vadd.f32 %v5519_v42, %v5464_v20  ;;  %v5417_v26 = vadd.f32 %v5416_v55, %v11541_v36 }
 0x5df   : > { %v11543_v47 = vpop.f32.mrf.mxu0 }
 0x5e0   : > { %13179 = vst [vmem:[#allocation73_spill] sm:$0xff] %v11543_v47  ;;  %v5466_v61 = vmul.f32 %v11543_v47, %v11543_v47  ;;  %v5381_v38 = vadd.f32 %v5380_v10, %v11543_v47  ;;  %v5557_v44 = vadd.f32 %v5556_v0, %v5465_v1 }
 0x5e1   : > { %v11545_v50 = vpop.f32.mrf.mxu0 }
 0x5e2   : > { %13180 = vst [vmem:[#allocation43_spill] sm:$0xff] %v11545_v50  ;;  %v5467_v54 = vmul.f32 %v11545_v50, %v11545_v50  ;;  %v5521_v2 = vadd.f32 %v5520_v5, %v5466_v61  ;;  %v5418_v22 = vadd.f32 %v5417_v26, %v11545_v50 }
 0x5e3   : > { %v11547_v33 = vpop.f32.mrf.mxu0 }
 0x5e4   : > { %13181 = vst [vmem:[#allocation68_spill] sm:$0xff] %v11547_v33  ;;  %v5468_v62 = vmul.f32 %v11547_v33, %v11547_v33  ;;  %v5382_v52 = vadd.f32 %v5381_v38, %v11547_v33  ;;  %v5558_v20 = vadd.f32 %v5557_v44, %v5467_v54  ;;  %v7506_v54 = vld [vmem:[#allocation7 + $0x48] sm:$0xff]  }
 0x5e5   : > { %v11549_v27 = vpop.f32.mrf.mxu0  ;;  %v7507_v44 = vld [vmem:[#allocation7 + $0x8] sm:$0xff]   ;;  %6940 = vmatprep.subr.bf16.mxu1 %v7506_v54 }
 0x5e6   : > { %13182 = vst [vmem:[#allocation95_spill] sm:$0xff] %v11549_v27  ;;  %v5469_v8 = vmul.f32 %v11549_v27, %v11549_v27  ;;  %v5522_v30 = vadd.f32 %v5521_v2, %v5468_v62  ;;  %v5419_v42 = vadd.f32 %v5418_v22, %v11549_v27  ;;  %6941 = vmatpush3.bf16.msra.mxu1 %v7507_v44 }
 0x5e7   : > { %v11551_v28 = vpop.f32.mrf.mxu0 }
 0x5e8   : > { %13183 = vst [vmem:[#allocation85_spill] sm:$0xff] %v11551_v28  ;;  %v5470_v51 = vmul.f32 %v11551_v28, %v11551_v28  ;;  %v5383_v55 = vadd.f32 %v5382_v52, %v11551_v28  ;;  %v5559_v61 = vadd.f32 %v5558_v20, %v5469_v8 }
 0x5e9   : > { %v11553_v43 = vpop.f32.mrf.mxu0 }
 0x5ea   : > { %13184 = vst [vmem:[#allocation86_spill] sm:$0xff] %v11553_v43  ;;  %v5471_v37 = vmul.f32 %v11553_v43, %v11553_v43  ;;  %v5523_v5 = vadd.f32 %v5522_v30, %v5470_v51  ;;  %v5420_v26 = vadd.f32 %v5419_v42, %v11553_v43  ;;  %v7508_v42 = vld [vmem:[#allocation7 + $0x40] sm:$0xff]  }
 0x5eb   : > { %v11555_v29 = vpop.f32.mrf.mxu0  ;;  %6942 = vmatprep.subr.bf16.mxu1 %v7508_v42 }
 0x5ec   : > { %13185 = vst [vmem:[#allocation42_spill] sm:$0xff] %v11555_v29  ;;  %v5472_v10 = vmul.f32 %v11555_v29, %v11555_v29  ;;  %v5384_v38 = vadd.f32 %v5383_v55, %v11555_v29  ;;  %v5560_v39 = vadd.f32 %v5559_v61, %v5471_v37 }
 0x5ed   : > { %v11557_v25 = vpop.f32.mrf.mxu0 }
 0x5ee   : > { %13186 = vst [vmem:[#allocation46_spill] sm:$0xff] %v11557_v25  ;;  %v5473_v19 = vmul.f32 %v11557_v25, %v11557_v25  ;;  %v5524_v22 = vadd.f32 %v5523_v5, %v5472_v10  ;;  %v5421_v52 = vadd.f32 %v5420_v26, %v11557_v25  ;;  %v7509_v5 = vld [vmem:[#allocation7] sm:$0xff]  }
 0x5ef   : > { %v11559_v6 = vpop.f32.mrf.mxu0  ;;  %6943 = vmatpush3.bf16.msra.mxu1 %v7509_v5 }
 0x5f0   : > { %13187 = vst [vmem:[#allocation48_spill] sm:$0xff] %v11559_v6  ;;  %v5474_v62 = vmul.f32 %v11559_v6, %v11559_v6  ;;  %v5385_v51 = vadd.f32 %v5384_v38, %v11559_v6  ;;  %v5561_v20 = vadd.f32 %v5560_v39, %v5473_v19 }
 0x5f1   : > { %v11561_v34 = vpop.f32.mrf.mxu0 }
 0x5f2   : > { %13188 = vst [vmem:[#allocation74_spill] sm:$0xff] %v11561_v34  ;;  %v5475_v2 = vmul.f32 %v11561_v34, %v11561_v34  ;;  %v5525_v55 = vadd.f32 %v5524_v22, %v5474_v62  ;;  %v5422_v61 = vadd.f32 %v5421_v52, %v11561_v34 }
 0x5f3   : > { %v11563_v13 = vpop.f32.mrf.mxu0 }
 0x5f4   : > { %13189 = vst [vmem:[#allocation110_spill] sm:$0xff] %v11563_v13  ;;  %v5476_v41 = vmul.f32 %v11563_v13, %v11563_v13  ;;  %v5386_v10 = vadd.f32 %v5385_v51, %v11563_v13  ;;  %v5562_v26 = vadd.f32 %v5561_v20, %v5475_v2 }
 0x5f5   : > { %v11565_v63 = vpop.f32.mrf.mxu0 }
 0x5f6   : > { %13190 = vst [vmem:[#allocation75_spill] sm:$0xff] %v11565_v63  ;;  %v5477_v30 = vmul.f32 %v11565_v63, %v11565_v63  ;;  %v5526_v44 = vadd.f32 %v5525_v55, %v5476_v41  ;;  %v5423_v39 = vadd.f32 %v5422_v61, %v11565_v63 }
 0x5f7   : > { %v11567_v9 = vpop.f32.mrf.mxu0 }
 0x5f8   : > { %13191 = vst [vmem:[#allocation111_spill] sm:$0xff] %v11567_v9  ;;  %v5478_v54 = vmul.f32 %v11567_v9, %v11567_v9  ;;  %v5387_v62 = vadd.f32 %v5386_v10, %v11567_v9  ;;  %v5563_v52 = vadd.f32 %v5562_v26, %v5477_v30 }
 0x5f9   : > { %v11569_v18 = vpop.f32.mrf.mxu0 }
 0x5fa   : > { %13192 = vst [vmem:[#allocation50_spill] sm:$0xff] %v11569_v18  ;;  %v5479_v38 = vmul.f32 %v11569_v18, %v11569_v18  ;;  %v5527_v20 = vadd.f32 %v5526_v44, %v5478_v54  ;;  %v5424_v13 = vadd.f32 %v5423_v39, %v11569_v18 }
 0x5fb   : > { %v11571_v35 = vpop.f32.mrf.mxu0 }
 0x5fc   : > { %13193 = vst [vmem:[#allocation52_spill] sm:$0xff] %v11571_v35  ;;  %v5480_v22 = vmul.f32 %v11571_v35, %v11571_v35  ;;  %v5388_v42 = vadd.f32 %v5387_v62, %v11571_v35  ;;  %v5564_v55 = vadd.f32 %v5563_v52, %v5479_v38 }
 0x5fd   : > { %v11573_v21 = vpop.f32.mrf.mxu0 }
 0x5fe   : > { %13194 = vst [vmem:[#allocation51_spill] sm:$0xff] %v11573_v21  ;;  %v5481_v51 = vmul.f32 %v11573_v21, %v11573_v21  ;;  %v5528_v30 = vadd.f32 %v5527_v20, %v5480_v22  ;;  %v5425_v5 = vadd.f32 %v5424_v13, %v11573_v21 }
 0x5ff   : > { %v11579_v53 = vpop.f32.mrf.mxu0 }
 0x600   : > { %v5482_v41 = vmul.f32 %v11579_v53, %v11579_v53  ;;  %v5389_v26 = vadd.f32 %v5388_v42, %v11579_v53  ;;  %v5565_v44 = vadd.f32 %v5564_v55, %v5481_v51 }
 0x601   : > { %v11591_v17 = vpop.f32.mrf.mxu0 }
 0x602   : > { %13195 = vst [vmem:[#allocation53_spill] sm:$0xff] %v11591_v17  ;;  %v5483_v61 = vmul.f32 %v11591_v17, %v11591_v17  ;;  %v5529_v38 = vadd.f32 %v5528_v30, %v5482_v41  ;;  %v5426_v52 = vadd.f32 %v5425_v5, %v11591_v17 }
 0x603   : > { %v11600_v48 = vpop.f32.mrf.mxu0 }
 0x604   : > { %v5484_v54 = vmul.f32 %v11600_v48, %v11600_v48  ;;  %v5390_v35 = vadd.f32 %v5389_v26, %v11600_v48  ;;  %v5566_v13 = vadd.f32 %v5565_v44, %v5483_v61 }
 0x605   : > { %v11608_v49 = vpop.f32.mrf.mxu0 }
 0x606   : > { %13196 = vst [vmem:[#allocation76_spill] sm:$0xff] %v11608_v49  ;;  %v5485_v39 = vmul.f32 %v11608_v49, %v11608_v49  ;;  %v5530_v51 = vadd.f32 %v5529_v38, %v5484_v54  ;;  %v5427_v55 = vadd.f32 %v5426_v52, %v11608_v49 }
 0x607   : > { %v11616_v24 = vpop.f32.mrf.mxu0 }
 0x608   : > { %v5486_v22 = vmul.f32 %v11616_v24, %v11616_v24  ;;  %v5391_v9 = vadd.f32 %v5390_v35, %v11616_v24  ;;  %v5567_v30 = vadd.f32 %v5566_v13, %v5485_v39 }
 0x609   : > { %v11624_v45 = vpop.f32.mrf.mxu0 }
 0x60a   : > { %v5487_v20 = vmul.f32 %v11624_v45, %v11624_v45  ;;  %v5531_v61 = vadd.f32 %v5530_v51, %v5486_v22  ;;  %v5428_v44 = vadd.f32 %v5427_v55, %v11624_v45 }
 0x60b   : > { %v11632_v4 = vpop.f32.mrf.mxu0 }
 0x60c   : > { %v5488_v41 = vmul.f32 %v11632_v4, %v11632_v4  ;;  %v5392_v17 = vadd.f32 %v5391_v9, %v11632_v4  ;;  %v5568_v38 = vadd.f32 %v5567_v30, %v5487_v20 }
 0x60d   : > { %v11640_v58 = vpop.f32.mrf.mxu0 }
 0x60e   : > { %v5489_v5 = vmul.f32 %v11640_v58, %v11640_v58  ;;  %v5532_v39 = vadd.f32 %v5531_v61, %v5488_v41  ;;  %v5429_v13 = vadd.f32 %v5428_v44, %v11640_v58 }
 0x60f   : > { %v11648_v60 = vpop.f32.mrf.mxu0 }
 0x610   : > { %v5490_v54 = vmul.f32 %v11648_v60, %v11648_v60  ;;  %v5393_v49 = vadd.f32 %v5392_v17, %v11648_v60  ;;  %v5569_v51 = vadd.f32 %v5568_v38, %v5489_v5 }
 0x611   : > { %v11656_v1 = vpop.f32.mrf.mxu0 }
 0x612   : > { %v5491_v35 = vmul.f32 %v11656_v1, %v11656_v1  ;;  %v5533_v20 = vadd.f32 %v5532_v39, %v5490_v54  ;;  %v5430_v30 = vadd.f32 %v5429_v13, %v11656_v1 }
 0x613   : > { %v11664_v0 = vpop.f32.mrf.mxu0 }
 0x614   : > { %v5492_v22 = vmul.f32 %v11664_v0, %v11664_v0  ;;  %v5394_v21 = vadd.f32 %v5393_v49, %v11664_v0  ;;  %v5570_v61 = vadd.f32 %v5569_v51, %v5491_v35 }
 0x615   : > { %v11672_v8 = vpop.f32.mrf.mxu0 }
 0x616   : > { %v5493_v9 = vmul.f32 %v11672_v8, %v11672_v8  ;;  %v5534_v5 = vadd.f32 %v5533_v20, %v5492_v22  ;;  %v5431_v38 = vadd.f32 %v5430_v30, %v11672_v8 }
 0x617   : > { %v11680_v37 = vpop.f32.mrf.mxu0 }
 0x618   : > { %v5494_v41 = vmul.f32 %v11680_v37, %v11680_v37  ;;  %v5395_v18 = vadd.f32 %v5394_v21, %v11680_v37  ;;  %v5571_v39 = vadd.f32 %v5570_v61, %v5493_v9 }
 0x619   : > { %v11688_v19 = vpop.f32.mrf.mxu0 }
 0x61a   : > { %v5495_v17 = vmul.f32 %v11688_v19, %v11688_v19  ;;  %v5535_v35 = vadd.f32 %v5534_v5, %v5494_v41  ;;  %v5432_v51 = vadd.f32 %v5431_v38, %v11688_v19 }
 0x61b   : > { %v11696_v2 = vpop.f32.mrf.mxu0 }
 0x61c   : > { %v5496_v54 = vmul.f32 %v11696_v2, %v11696_v2  ;;  %v5396_v6 = vadd.f32 %v5395_v18, %v11696_v2  ;;  %v5572_v20 = vadd.f32 %v5571_v39, %v5495_v17 }
 0x61d   : > { %v11704_v10 = vpop.f32.mrf.mxu0 }
 0x61e   : > { %v5497_v49 = vmul.f32 %v11704_v10, %v11704_v10  ;;  %v5536_v9 = vadd.f32 %v5535_v35, %v5496_v54  ;;  %v5433_v61 = vadd.f32 %v5432_v51, %v11704_v10 }
 0x61f   : > { %v11712_v62 = vpop.f32.mrf.mxu0 }
 0x620   : > { %v5498_v22 = vmul.f32 %v11712_v62, %v11712_v62  ;;  %v5397_v63 = vadd.f32 %v5396_v6, %v11712_v62  ;;  %v5573_v5 = vadd.f32 %v5572_v20, %v5497_v49 }
 0x621   : > { %v11720_v42 = vpop.f32.mrf.mxu0 }
 0x622   : > { %v5499_v21 = vmul.f32 %v11720_v42, %v11720_v42  ;;  %v5537_v17 = vadd.f32 %v5536_v9, %v5498_v22  ;;  %v5434_v39 = vadd.f32 %v5433_v61, %v11720_v42 }
 0x623   : > { %v11728_v26 = vpop.f32.mrf.mxu0 }
 0x624   : > { %v5500_v41 = vmul.f32 %v11728_v26, %v11728_v26  ;;  %v5398_v34 = vadd.f32 %v5397_v63, %v11728_v26  ;;  %v5574_v35 = vadd.f32 %v5573_v5, %v5499_v21 }
 0x625   : > { %v11736_v52 = vpop.f32.mrf.mxu0 }
 0x626   : > { %v5501_v18 = vmul.f32 %v11736_v52, %v11736_v52  ;;  %v5538_v49 = vadd.f32 %v5537_v17, %v5500_v41  ;;  %v5435_v20 = vadd.f32 %v5434_v39, %v11736_v52 }
 0x627   : > { %v11744_v55 = vpop.f32.mrf.mxu0 }
 0x628   : > { %v5502_v54 = vmul.f32 %v11744_v55, %v11744_v55  ;;  %v5399_v29 = vadd.f32 %v5398_v34, %v11744_v55  ;;  %v5575_v9 = vadd.f32 %v5574_v35, %v5501_v18 }
 0x629   : > { %v11752_v44 = vpop.f32.mrf.mxu0 }
 0x62a   : > { %v5503_v6 = vmul.f32 %v11752_v44, %v11752_v44  ;;  %v5539_v21 = vadd.f32 %v5538_v49, %v5502_v54  ;;  %v5436_v5 = vadd.f32 %v5435_v20, %v11752_v44 }
 0x62b   : > { %v11760_v13 = vpop.f32.mrf.mxu0 }
 0x62c   : > { %v5504_v22 = vmul.f32 %v11760_v13, %v11760_v13  ;;  %v5400_v28 = vadd.f32 %v5399_v29, %v11760_v13  ;;  %v5576_v17 = vadd.f32 %v5575_v9, %v5503_v6 }
 0x62d   : > { %v11768_v30 = vpop.f32.mrf.mxu0 }
 0x62e   : > { %v5505_v63 = vmul.f32 %v11768_v30, %v11768_v30  ;;  %v5540_v18 = vadd.f32 %v5539_v21, %v5504_v22  ;;  %v5437_v35 = vadd.f32 %v5436_v5, %v11768_v30 }
 0x62f   : > { %v11776_v38 = vpop.f32.mrf.mxu0 }
 0x630   : > { %v5506_v41 = vmul.f32 %v11776_v38, %v11776_v38  ;;  %v5401_v25 = vadd.f32 %v5400_v28, %v11776_v38  ;;  %v5577_v49 = vadd.f32 %v5576_v17, %v5505_v63 }
 0x631   : > { %v11784_v51 = vpop.f32.mrf.mxu0 }
 0x632   : > { %v5507_v34 = vmul.f32 %v11784_v51, %v11784_v51  ;;  %v5541_v6 = vadd.f32 %v5540_v18, %v5506_v41  ;;  %v5438_v9 = vadd.f32 %v5437_v35, %v11784_v51 }
 0x633   : > { %v11792_v61 = vpop.f32.mrf.mxu0 }
 0x634   : > { %v5508_v54 = vmul.f32 %v11792_v61, %v11792_v61  ;;  %v5402_v43 = vadd.f32 %v5401_v25, %v11792_v61  ;;  %v5578_v21 = vadd.f32 %v5577_v49, %v5507_v34 }
 0x635   : > { %v11800_v39 = vpop.f32.mrf.mxu0 }
 0x636   : > { %v5509_v29 = vmul.f32 %v11800_v39, %v11800_v39  ;;  %v5542_v28 = vadd.f32 %v5541_v6, %v5508_v54  ;;  %v5439_v33 = vadd.f32 %v5438_v9, %v11800_v39 }
 0x637   : > { %v11808_v20 = vpop.f32.mrf.mxu0 }
 0x638   : > { %v5510_v22 = vmul.f32 %v11808_v20, %v11808_v20  ;;  %v5403_v63 = vadd.f32 %v5402_v43, %v11808_v20  ;;  %v5579_v47 = vadd.f32 %v5578_v21, %v5509_v29 }
 0x639   : > { %v11814_v5 = vpop.f32.mrf.mxu0 }
 0x63a   : > { %v5511_v17 = vmul.f32 %v11814_v5, %v11814_v5  ;;  %v5543_v18 = vadd.f32 %v5542_v28, %v5510_v22  ;;  %v5440_v25 = vadd.f32 %v5439_v33, %v11814_v5 }
 0x63b   : > { %v11820_v41 = vpop.f32.mrf.mxu0 }
 0x63c   : > { %v5404_v35 = vadd.f32 %v5403_v63, %v11820_v41  ;;  %v5512_v34 = vmul.f32 %v11820_v41, %v11820_v41  ;;  %v5580_v49 = vadd.f32 %v5579_v47, %v5511_v17 }
 0x63d   : > { %v5371_v54 = vpop.f32.mrf.mxu0 }
 0x63e   : > { %v5405_v6 = vrot.slane %v5404_v35, 4  ;;  %v5544_v9 = vadd.f32 %v5543_v18, %v5512_v34  ;;  %v5441_v27 = vadd.f32 %v5440_v25, %v5371_v54  ;;  %v5513_v43 = vmul.f32 %v5371_v54, %v5371_v54 }
 0x640   : > { %v5406_v50 = vadd.f32 %v5405_v6, %v5404_v35  ;;  %v5545_v23 = vrot.slane %v5544_v9, 4  ;;  %v5442_v56 = vrot.slane %v5441_v27, 4  ;;  %v5581_v29 = vadd.f32 %v5580_v49, %v5513_v43 }
 0x642   : > { %v5407_v21 = vrot.slane %v5406_v50, 2  ;;  %v5546_v36 = vadd.f32 %v5545_v23, %v5544_v9  ;;  %v5443_v22 = vadd.f32 %v5442_v56, %v5441_v27  ;;  %v5582_v28 = vrot.slane %v5581_v29, 4 }
 0x644   : > { %v5408_v33 = vadd.f32 %v5407_v21, %v5406_v50  ;;  %v5547_v11 = vrot.slane %v5546_v36, 2  ;;  %v5444_v63 = vrot.slane %v5443_v22, 2  ;;  %v5583_v31 = vadd.f32 %v5582_v28, %v5581_v29 }
 0x646   : > { %v5409_v16 = vrot.slane %v5408_v33, 1  ;;  %v5548_v59 = vadd.f32 %v5547_v11, %v5546_v36  ;;  %v5445_v47 = vadd.f32 %v5444_v63, %v5443_v22  ;;  %v5584_v17 = vrot.slane %v5583_v31, 2  ;;  %v348_v63 = vld [vmem:[#allocation8 + $0x5] ss:$8 sm:$0x3] }
 0x648   : > { %v5410_v57 = vadd.f32 %v5409_v16, %v5408_v33  ;;  %v5549_v18 = vrot.slane %v5548_v59, 1  ;;  %v5446_v25 = vrot.slane %v5445_v47, 1  ;;  %v5585_v34 = vadd.f32 %v5584_v17, %v5583_v31  ;;  %v13198_v17 = vld [vmem:[#allocation18_spill] sm:$0xff] }
 0x64a   : > { %v5448_v35 = vmul.f32 0.00390625, %v5410_v57  ;;  %v5550_v6 = vadd.f32 %v5549_v18, %v5548_v59  ;;  %v5447_v15 = vadd.f32 %v5446_v25, %v5445_v47  ;;  %v5586_v49 = vrot.slane %v5585_v34, 1  ;;  %v13197_v59 = vld [vmem:[#allocation15_spill] sm:$0xff]  ;;  %v13199_v25 = vld [vmem:[#allocation16_spill] sm:$0xff] }
 0x64c   : > { %v5588_v43 = vmul.f32 0.00390625, %v5550_v6  ;;  %v5590_v23 = vmul.f32 %v5448_v35, %v5448_v35  ;;  %v5449_v56 = vmul.f32 0.00390625, %v5447_v15  ;;  %v5587_v27 = vadd.f32 %v5586_v49, %v5585_v34 }
 0x64e   : > { %v5592_v50 = vsub.f32 %v5588_v43, %v5590_v23  ;;  %v5589_v9 = vmul.f32 0.00390625, %v5587_v27  ;;  %v5591_v21 = vmul.f32 %v5449_v56, %v5449_v56 }
 0x650   : > { %v5594_v29 = vmax.f32 %v5592_v50, 0.0  ;;  %v5593_v28 = vsub.f32 %v5589_v9, %v5591_v21  ;;  %v350_v50 = vld [vmem:[#allocation8 + $0x6] ss:$8 sm:$0x3] }
 0x652   : > { %v5596_v11 = vadd.f32 1e-05, %v5594_v29  ;;  %v5595_v36 = vmax.f32 %v5593_v28, 0.0 }
 0x654   : > { %v5597_v22 = vadd.f32 1e-05, %v5595_v36  ;;  %7522 = vrsqrt.f32 %v5596_v11 }
 0x656   : > { %7524 = vrsqrt.f32 %v5597_v22 }
 0x661   : > { %v7523_v16 = vpop.eup %7522 }
 0x663   : > { %v7525_v31 = vpop.eup %7524 }
 0x664   : > { %v5602_v57 = vcombine.low %v7523_v16, %v7525_v31 }
 0x666   : > { %v5609_v33 = vrot.slane %v5602_v57, %v13197_v59 }
 0x668   : > { %v5616_v47 = vrot.slane %v5609_v33, %v13197_v59 }
 0x66a   : > { %v5618_v15 = vmul.f32 %v5616_v47, %v348_v63 }
 0x66c   : > { %v11829_v18 = vrot.slane %v5618_v15, %v13198_v17  ;;  %v11832_v34 = vrot.slane %v5618_v15, %v13199_v25 }
 0x66e   : > { %v5630_v6 = vmul.f32 %v11829_v18, %v5448_v35  ;;  %v5631_v49 = vmul.f32 %v11832_v34, %v5449_v56  ;;  %v5714_v43 = vmul.f32 %v11832_v34, %v5371_v54  ;;  %v5651_v35 = vmul.f32 %v11829_v18, %v11511_v14 }
 0x66f   : > { %v5653_v54 = vmul.f32 %v11829_v18, %v11515_v40  ;;  %v5683_v56 = vmul.f32 %v11829_v18, %v11579_v53  ;;  %v5685_v36 = vmul.f32 %v11829_v18, %v11600_v48  ;;  %v5687_v22 = vmul.f32 %v11829_v18, %v11616_v24 }
 0x670   : > { %v5634_v23 = vcombine.low %v5630_v6, %v5631_v49  ;;  %v5688_v16 = vmul.f32 %v11832_v34, %v11624_v45  ;;  %v5689_v31 = vmul.f32 %v11829_v18, %v11632_v4  ;;  %v5690_v14 = vmul.f32 %v11832_v34, %v11640_v58 }
 0x671   : > { %v5691_v40 = vmul.f32 %v11829_v18, %v11648_v60  ;;  %v5692_v53 = vmul.f32 %v11832_v34, %v11656_v1  ;;  %v5693_v48 = vmul.f32 %v11829_v18, %v11664_v0  ;;  %v5694_v24 = vmul.f32 %v11832_v34, %v11672_v8 }
 0x672   : > { %v5641_v27 = vrot.slane %v5634_v23, %v13197_v59  ;;  %v5695_v45 = vmul.f32 %v11829_v18, %v11680_v37  ;;  %v5696_v4 = vmul.f32 %v11832_v34, %v11688_v19  ;;  %v5697_v58 = vmul.f32 %v11829_v18, %v11696_v2 }
 0x673   : > { %v5698_v60 = vmul.f32 %v11832_v34, %v11704_v10  ;;  %v5699_v1 = vmul.f32 %v11829_v18, %v11712_v62  ;;  %v5700_v0 = vmul.f32 %v11832_v34, %v11720_v42  ;;  %v5701_v8 = vmul.f32 %v11829_v18, %v11728_v26 }
 0x674   : > { %v5648_v9 = vrot.slane %v5641_v27, %v13197_v59  ;;  %v5702_v37 = vmul.f32 %v11832_v34, %v11736_v52  ;;  %v5703_v19 = vmul.f32 %v11829_v18, %v11744_v55  ;;  %v5704_v2 = vmul.f32 %v11832_v34, %v11752_v44 }
 0x675   : > { %v5705_v10 = vmul.f32 %v11829_v18, %v11760_v13  ;;  %v5706_v62 = vmul.f32 %v11832_v34, %v11768_v30  ;;  %v5707_v42 = vmul.f32 %v11829_v18, %v11776_v38  ;;  %v5708_v26 = vmul.f32 %v11832_v34, %v11784_v51 }
 0x676   : > { %v5650_v21 = vsub.f32 %v350_v50, %v5648_v9  ;;  %v5709_v52 = vmul.f32 %v11829_v18, %v11792_v61  ;;  %v5710_v55 = vmul.f32 %v11832_v34, %v11800_v39  ;;  %v5711_v44 = vmul.f32 %v11829_v18, %v11808_v20 }
 0x677   : > { %v5712_v13 = vmul.f32 %v11832_v34, %v11814_v5  ;;  %v5713_v38 = vmul.f32 %v11829_v18, %v11820_v41 }
 0x678   : > { %v11840_v29 = vrot.slane %v5650_v21, %v13199_v25  ;;  %v11846_v11 = vrot.slane %v5650_v21, %v13198_v17 }
 0x67a   : > { %v11843_v28 = vadd.f32 %v11840_v29, %v5714_v43  ;;  %v11909_v30 = vadd.f32 %v11846_v11, %v5683_v56  ;;  %v11914_v51 = vadd.f32 %v11846_v11, %v5685_v36  ;;  %v11917_v61 = vadd.f32 %v11846_v11, %v5687_v22 }
 0x67b   : > { %v11920_v39 = vadd.f32 %v11840_v29, %v5688_v16  ;;  %v11923_v20 = vadd.f32 %v11846_v11, %v5689_v31  ;;  %v11926_v5 = vadd.f32 %v11840_v29, %v5690_v14  ;;  %v11929_v57 = vadd.f32 %v11846_v11, %v5691_v40 }
 0x67c   : > { %v11932_v41 = vadd.f32 %v11840_v29, %v5692_v53  ;;  %v11935_v59 = vadd.f32 %v11846_v11, %v5693_v48  ;;  %v11938_v33 = vadd.f32 %v11840_v29, %v5694_v24  ;;  %v11941_v63 = vadd.f32 %v11846_v11, %v5695_v45 }
 0x67d   : > { %v11944_v47 = vadd.f32 %v11840_v29, %v5696_v4  ;;  %v11947_v15 = vadd.f32 %v11846_v11, %v5697_v58  ;;  %v11950_v17 = vadd.f32 %v11840_v29, %v5698_v60  ;;  %v11953_v25 = vadd.f32 %v11846_v11, %v5699_v1  ;;  %v13200_v60 = vld [vmem:[#allocation35_spill] sm:$0xff] }
 0x67e   : > { %v11956_v6 = vadd.f32 %v11840_v29, %v5700_v0  ;;  %v11959_v49 = vadd.f32 %v11846_v11, %v5701_v8  ;;  %v11962_v43 = vadd.f32 %v11840_v29, %v5702_v37  ;;  %v11965_v23 = vadd.f32 %v11846_v11, %v5703_v19 }
 0x67f   : > { %v11968_v27 = vadd.f32 %v11840_v29, %v5704_v2  ;;  %v11971_v50 = vadd.f32 %v11846_v11, %v5705_v10  ;;  %v11974_v9 = vadd.f32 %v11840_v29, %v5706_v62  ;;  %v11977_v21 = vadd.f32 %v11846_v11, %v5707_v42  ;;  %v13204_v10 = vld [vmem:[#allocation39_spill] sm:$0xff]  ;;  %v13205_v42 = vld [vmem:[#allocation78_spill] sm:$0xff] }
 0x680   : > { %v11980_v56 = vadd.f32 %v11840_v29, %v5708_v26  ;;  %v11983_v36 = vadd.f32 %v11846_v11, %v5709_v52  ;;  %v11986_v22 = vadd.f32 %v11840_v29, %v5710_v55  ;;  %v11989_v16 = vadd.f32 %v11846_v11, %v5711_v44  ;;  %v13206_v52 = vld [vmem:[#allocation94_spill] sm:$0xff] }
 0x681   : > { %v11992_v31 = vadd.f32 %v11840_v29, %v5712_v13  ;;  %v11995_v14 = vadd.f32 %v11846_v11, %v5713_v38  ;;  %v5726_v40 = vadd.f32 %v11846_v11, %v5651_v35  ;;  %v5728_v53 = vadd.f32 %v11846_v11, %v5653_v54 }
 0x682   : > { %v5652_v48 = vmul.f32 %v11832_v34, %v11513_v32  ;;  %v5654_v24 = vmul.f32 %v11832_v34, %v11517_v7  ;;  %v5656_v45 = vmul.f32 %v11832_v34, %v11521_v3  ;;  %v5658_v4 = vmul.f32 %v11832_v34, %v11525_v46  ;;  %v13201_v3 = vld [vmem:[#allocation83_spill] sm:$0xff] }
 0x683   : > { %v5655_v58 = vmul.f32 %v11829_v18, %v11519_v12  ;;  %v5657_v35 = vmul.f32 %v11829_v18, %v13200_v60  ;;  %v5790_v0 = vmax.f32 %v5726_v40, 0.0  ;;  %v5792_v8 = vmax.f32 %v5728_v53, 0.0  ;;  %v13202_v46 = vld [vmem:[#allocation63_spill] sm:$0xff]  ;;  %v13203_v12 = vld [vmem:[#allocation72_spill] sm:$0xff] }
 0x684   : > { %v5727_v54 = vadd.f32 %v11840_v29, %v5652_v48  ;;  %v5729_v1 = vadd.f32 %v11840_v29, %v5654_v24  ;;  %v5731_v32 = vadd.f32 %v11840_v29, %v5656_v45  ;;  %v5733_v7 = vadd.f32 %v11840_v29, %v5658_v4 }
 0x685   : > { %v5659_v37 = vmul.f32 %v11829_v18, %v13201_v3  ;;  %v5660_v19 = vmul.f32 %v11832_v34, %v13202_v46  ;;  %v5661_v2 = vmul.f32 %v11829_v18, %v13203_v12  ;;  %v5662_v62 = vmul.f32 %v11832_v34, %v13204_v10 }
 0x686   : > { %v5664_v26 = vmul.f32 %v11832_v34, %v13205_v42  ;;  %v5666_v55 = vmul.f32 %v11832_v34, %v13206_v52  ;;  %v5730_v44 = vadd.f32 %v11846_v11, %v5655_v58  ;;  %v5732_v13 = vadd.f32 %v11846_v11, %v5657_v35 }
 0x687   : > { %v5853_v38 = vmax.f32 %v11843_v28, 0.0  ;;  %v12031_v40 = vadd.f32 %v11846_v11, %v5659_v37  ;;  %v5791_v53 = vmax.f32 %v5727_v54, 0.0  ;;  %v5793_v48 = vmax.f32 %v5729_v1, 0.0 }
 0x688   : > { %v5735_v24 = vadd.f32 %v11840_v29, %v5660_v19  ;;  %v5854_v45 = vpack.c.bf16 %v5792_v8, %v5790_v0  ;;  %v5795_v4 = vmax.f32 %v5731_v32, 0.0  ;;  %v5797_v60 = vmax.f32 %v5733_v7, 0.0 }
 0x689   : > { %v12035_v3 = vadd.f32 %v11846_v11, %v5661_v2  ;;  %v5737_v46 = vadd.f32 %v11840_v29, %v5662_v62  ;;  %v12039_v58 = vadd.f32 %v11840_v29, %v5664_v26  ;;  %v5855_v35 = vpack.c.bf16 %v5793_v48, %v5791_v53 }
 0x68a   : > { %v12042_v12 = vadd.f32 %v11840_v29, %v5666_v55  ;;  %v5794_v37 = vmax.f32 %v5730_v44, 0.0  ;;  %v5796_v54 = vmax.f32 %v5732_v13, 0.0  ;;  %v5822_v1 = vmax.f32 %v11909_v30, 0.0 }
 0x68b   : > { %v5824_v0 = vmax.f32 %v11914_v51, 0.0  ;;  %v5826_v32 = vmax.f32 %v11917_v61, 0.0  ;;  %v5828_v7 = vmax.f32 %v11923_v20, 0.0  ;;  %6046 = vmatprep.mubr.bf16.mxu1 %v5855_v35  ;;  %v5857_v8 = vpack.c.bf16 %v5797_v60, %v5795_v4 }
 0x68c   : > { %v5830_v19 = vmax.f32 %v11929_v57, 0.0  ;;  %v5832_v2 = vmax.f32 %v11935_v59, 0.0  ;;  %v5834_v10 = vmax.f32 %v11941_v63, 0.0  ;;  %v5836_v62 = vmax.f32 %v11947_v15, 0.0  ;;  %6047 = vmatmul.mubr.bf16.vlgmr.msra.gmra.mxu1 %v5854_v45 }
 0x68d   : > { %v5838_v42 = vmax.f32 %v11953_v25, 0.0  ;;  %v5840_v30 = vmax.f32 %v11959_v49, 0.0  ;;  %6054 = vmatprep.mubr.bf16.mxu1 %v5857_v8  ;;  %v5799_v51 = vmax.f32 %v5735_v24, 0.0  ;;  %v5801_v61 = vmax.f32 %v5737_v46, 0.0 }
 0x68e   : > { %v5842_v20 = vmax.f32 %v11965_v23, 0.0  ;;  %v5844_v26 = vmax.f32 %v11971_v50, 0.0  ;;  %v5846_v57 = vmax.f32 %v11977_v21, 0.0  ;;  %v5848_v59 = vmax.f32 %v11983_v36, 0.0 }
 0x68f   : > { %v5850_v63 = vmax.f32 %v11989_v16, 0.0  ;;  %v5852_v15 = vmax.f32 %v11995_v14, 0.0  ;;  %v12060_v52 = vpack.c.bf16 %v5824_v0, %v5822_v1  ;;  %v5827_v25 = vmax.f32 %v11920_v39, 0.0  ;;  %v13207_v1 = vld [vmem:[#allocation84_spill] sm:$0xff]  ;;  %v13209_v0 = vld [vmem:[#allocation43_spill] sm:$0xff] }
 0x690   : > { %v5856_v49 = vpack.c.bf16 %v5796_v54, %v5794_v37  ;;  %v5829_v55 = vmax.f32 %v11926_v5, 0.0  ;;  %v12064_v44 = vpack.c.bf16 %v5828_v7, %v5826_v32  ;;  %v5831_v23 = vmax.f32 %v11932_v41, 0.0  ;;  %v13210_v7 = vld [vmem:[#allocation95_spill] sm:$0xff] }
 0x691   : > { %v5859_v50 = vpack.c.bf16 %v5801_v61, %v5799_v51  ;;  %v5833_v21 = vmax.f32 %v11938_v33, 0.0  ;;  %v12068_v13 = vpack.c.bf16 %v5832_v2, %v5830_v19  ;;  %v5835_v36 = vmax.f32 %v11944_v47, 0.0  ;;  %v13211_v51 = vld [vmem:[#allocation73_spill] sm:$0xff] }
 0x692   : > { %v12071_v16 = vpack.c.bf16 %v5829_v55, %v5827_v25  ;;  %v5837_v14 = vmax.f32 %v11950_v17, 0.0  ;;  %v12074_v53 = vpack.c.bf16 %v5836_v62, %v5834_v10  ;;  %v5839_v39 = vmax.f32 %v11956_v6, 0.0 }
 0x693   : > { %v12077_v5 = vpack.c.bf16 %v5833_v21, %v5831_v23  ;;  %v5841_v48 = vmax.f32 %v11962_v43, 0.0  ;;  %v12080_v41 = vpack.c.bf16 %v5840_v30, %v5838_v42  ;;  %v5843_v33 = vmax.f32 %v11968_v27, 0.0 }
 0x694   : > { %6055 = vmatmul.mubr.bf16.gmra.mxu1 %v5856_v49  ;;  %v12083_v24 = vpack.c.bf16 %v5837_v14, %v5835_v36  ;;  %v5845_v47 = vmax.f32 %v11974_v9, 0.0  ;;  %v12086_v45 = vpack.c.bf16 %v5844_v26, %v5842_v20  ;;  %v5847_v17 = vmax.f32 %v11980_v56, 0.0  ;;  %v13212_v20 = vld [vmem:[#allocation68_spill] sm:$0xff] }
 0x695   : > { %6062 = vmatprep.mubr.bf16.mxu1 %v5859_v50  ;;  %v12089_v4 = vpack.c.bf16 %v5841_v48, %v5839_v39  ;;  %v5849_v6 = vmax.f32 %v11986_v22, 0.0  ;;  %v12092_v60 = vpack.c.bf16 %v5848_v59, %v5846_v57  ;;  %v5851_v43 = vmax.f32 %v11992_v31, 0.0  ;;  %v13213_v57 = vld [vmem:[#allocation86_spill] sm:$0xff] }
 0x696   : > { %v5798_v27 = vmax.f32 %v12031_v40, 0.0  ;;  %v5800_v46 = vmax.f32 %v12035_v3, 0.0  ;;  %v12097_v35 = vpack.c.bf16 %v5845_v47, %v5843_v33  ;;  %v12099_v9 = vpack.c.bf16 %v5852_v15, %v5850_v63  ;;  %v13208_v40 = vld [vmem:[#allocation71_spill] sm:$0xff]  ;;  %v13214_v63 = vld [vmem:[#allocation46_spill] sm:$0xff]  ;;  %v13215_v33 = vld [vmem:[#allocation85_spill] sm:$0xff] }
 0x697   : > { %v5803_v37 = vmax.f32 %v12039_v58, 0.0  ;;  %v5805_v56 = vmax.f32 %v12042_v12, 0.0  ;;  %v12103_v54 = vpack.c.bf16 %v5849_v6, %v5847_v17  ;;  %v12107_v22 = vpack.c.bf16 %v5853_v38, %v5851_v43  ;;  %v13216_v17 = vld [vmem:[#allocation42_spill] sm:$0xff] }
 0x698   : > { %v5663_v31 = vmul.f32 %v11829_v18, %v13207_v1  ;;  %v5665_v3 = vmul.f32 %v11829_v18, %v13208_v40  ;;  %v5668_v32 = vmul.f32 %v11832_v34, %v13209_v0  ;;  %v5670_v58 = vmul.f32 %v11832_v34, %v13210_v7  ;;  %v13217_v43 = vld [vmem:[#allocation74_spill] sm:$0xff] }
 0x699   : > { %v5858_v19 = vpack.c.bf16 %v5800_v46, %v5798_v27  ;;  %v5861_v2 = vpack.c.bf16 %v5805_v56, %v5803_v37  ;;  %v5667_v61 = vmul.f32 %v11829_v18, %v13211_v51  ;;  %v5669_v26 = vmul.f32 %v11829_v18, %v13212_v20  ;;  %v13218_v46 = vld [vmem:[#allocation75_spill] sm:$0xff] }
 0x69a   : > { %v5738_v12 = vadd.f32 %v11846_v11, %v5663_v31  ;;  %v5740_v8 = vadd.f32 %v11846_v11, %v5665_v3  ;;  %v5743_v28 = vadd.f32 %v11840_v29, %v5668_v32  ;;  %v5745_v38 = vadd.f32 %v11840_v29, %v5670_v58 }
 0x69b   : > { %v5672_v59 = vmul.f32 %v11832_v34, %v13213_v57  ;;  %v5674_v15 = vmul.f32 %v11832_v34, %v13214_v63  ;;  %v5742_v25 = vadd.f32 %v11846_v11, %v5667_v61  ;;  %v5744_v49 = vadd.f32 %v11846_v11, %v5669_v26 }
 0x69c   : > { %6063 = vmatmul.mubr.bf16.gmra.mxu1 %v5858_v19  ;;  %v5802_v10 = vmax.f32 %v5738_v12, 0.0  ;;  %v5804_v62 = vmax.f32 %v5740_v8, 0.0  ;;  %v5807_v42 = vmax.f32 %v5743_v28, 0.0  ;;  %v5809_v30 = vmax.f32 %v5745_v38, 0.0  ;;  %v13219_v8 = vld [vmem:[#allocation48_spill] sm:$0xff]  ;;  %v13220_v28 = vld [vmem:[#allocation110_spill] sm:$0xff] }
 0x69d   : > { %6070 = vmatprep.mubr.bf16.mxu1 %v5861_v2  ;;  %v5747_v23 = vadd.f32 %v11840_v29, %v5672_v59  ;;  %v5749_v50 = vadd.f32 %v11840_v29, %v5674_v15  ;;  %v5806_v36 = vmax.f32 %v5742_v25, 0.0  ;;  %v5808_v14 = vmax.f32 %v5744_v49, 0.0  ;;  %v13221_v2 = vld [vmem:[#allocation50_spill] sm:$0xff]  ;;  %v13223_v49 = vld [vmem:[#allocation111_spill] sm:$0xff] }
 0x69e   : > { %v5860_v55 = vpack.c.bf16 %v5804_v62, %v5802_v10  ;;  %v5863_v21 = vpack.c.bf16 %v5809_v30, %v5807_v42  ;;  %v5671_v47 = vmul.f32 %v11829_v18, %v13215_v33  ;;  %v5673_v6 = vmul.f32 %v11829_v18, %v13216_v17  ;;  %v13222_v62 = vld [vmem:[#allocation51_spill] sm:$0xff] }
 0x69f   : > { %v5811_v39 = vmax.f32 %v5747_v23, 0.0  ;;  %v5813_v48 = vmax.f32 %v5749_v50, 0.0  ;;  %v5676_v27 = vmul.f32 %v11832_v34, %v13217_v43  ;;  %v5678_v37 = vmul.f32 %v11832_v34, %v13218_v46  ;;  %v13224_v23 = vld [vmem:[#allocation52_spill] sm:$0xff] }
 0x6a0   : > { %v5746_v56 = vadd.f32 %v11846_v11, %v5671_v47  ;;  %v5748_v1 = vadd.f32 %v11846_v11, %v5673_v6  ;;  %v5862_v31 = vpack.c.bf16 %v5808_v14, %v5806_v36  ;;  %v5675_v19 = vmul.f32 %v11829_v18, %v13219_v8  ;;  %v13226_v14 = vld [vmem:[#allocation76_spill] sm:$0xff] }
 0x6a1   : > { %v5751_v40 = vadd.f32 %v11840_v29, %v5676_v27  ;;  %v5753_v3 = vadd.f32 %v11840_v29, %v5678_v37  ;;  %v5865_v0 = vpack.c.bf16 %v5813_v48, %v5811_v39  ;;  %v5677_v38 = vmul.f32 %v11829_v18, %v13220_v28 }
 0x6a2   : > { %v5810_v32 = vmax.f32 %v5746_v56, 0.0  ;;  %v5812_v7 = vmax.f32 %v5748_v1, 0.0  ;;  %v5680_v10 = vmul.f32 %v11832_v34, %v13221_v2  ;;  %v5682_v42 = vmul.f32 %v11832_v34, %v13222_v62 }
 0x6a3   : > { %v5815_v58 = vmax.f32 %v5751_v40, 0.0  ;;  %v5817_v12 = vmax.f32 %v5753_v3, 0.0  ;;  %v5750_v30 = vadd.f32 %v11846_v11, %v5675_v19  ;;  %v5752_v51 = vadd.f32 %v11846_v11, %v5677_v38 }
 0x6a4   : > { %6071 = vmatmul.mubr.bf16.gmra.mxu1 %v5860_v55  ;;  %v5864_v61 = vpack.c.bf16 %v5812_v7, %v5810_v32  ;;  %v5755_v20 = vadd.f32 %v11840_v29, %v5680_v10  ;;  %v5757_v26 = vadd.f32 %v11840_v29, %v5682_v42  ;;  %v5679_v55 = vmul.f32 %v11829_v18, %v13223_v49 }
 0x6a5   : > { %6078 = vmatprep.mubr.bf16.mxu1 %v5863_v21  ;;  %v5867_v57 = vpack.c.bf16 %v5817_v12, %v5815_v58  ;;  %v5814_v59 = vmax.f32 %v5750_v30, 0.0  ;;  %v5816_v63 = vmax.f32 %v5752_v51, 0.0  ;;  %v5681_v50 = vmul.f32 %v11829_v18, %v13224_v23  ;;  %v13225_v21 = vld [vmem:[#allocation53_spill] sm:$0xff] }
 0x6a6   : > { %v5819_v15 = vmax.f32 %v5755_v20, 0.0  ;;  %v5821_v25 = vmax.f32 %v5757_v26, 0.0  ;;  %v5684_v36 = vmul.f32 %v11832_v34, %v13225_v21  ;;  %v5686_v39 = vmul.f32 %v11832_v34, %v13226_v14 }
 0x6a7   : > { %v5754_v48 = vadd.f32 %v11846_v11, %v5679_v55  ;;  %v5756_v33 = vadd.f32 %v11846_v11, %v5681_v50  ;;  %v5866_v47 = vpack.c.bf16 %v5816_v63, %v5814_v59 }
 0x6a8   : > { %v5759_v17 = vadd.f32 %v11840_v29, %v5684_v36  ;;  %v5761_v6 = vadd.f32 %v11840_v29, %v5686_v39  ;;  %v5869_v43 = vpack.c.bf16 %v5821_v25, %v5819_v15 }
 0x6a9   : > { %v5818_v27 = vmax.f32 %v5754_v48, 0.0  ;;  %v5820_v18 = vmax.f32 %v5756_v33, 0.0 }
 0x6aa   : > { %v5823_v46 = vmax.f32 %v5759_v17, 0.0  ;;  %v5825_v37 = vmax.f32 %v5761_v6, 0.0 }
 0x6ab   : > { %v5868_v56 = vpack.c.bf16 %v5820_v18, %v5818_v27 }
 0x6ac   : > { %6079 = vmatmul.mubr.bf16.gmra.mxu1 %v5862_v31  ;;  %v5871_v1 = vpack.c.bf16 %v5825_v37, %v5823_v46 }
 0x6ad   : > { %6086 = vmatprep.mubr.bf16.mxu1 %v5865_v0 }
 0x6b4   : > { %6087 = vmatmul.mubr.bf16.gmra.mxu1 %v5864_v61 }
 0x6b5   : > { %6094 = vmatprep.mubr.bf16.mxu1 %v5867_v57 }
 0x6bc   : > { %6095 = vmatmul.mubr.bf16.gmra.mxu1 %v5866_v47 }
 0x6bd   : > { %6102 = vmatprep.mubr.bf16.mxu1 %v5869_v43 }
 0x6c4   : > { %6103 = vmatmul.mubr.bf16.gmra.mxu1 %v5868_v56 }
 0x6c5   : > { %6110 = vmatprep.mubr.bf16.mxu1 %v5871_v1 }
 0x6cc   : > { %6111 = vmatmul.mubr.bf16.gmra.mxu1 %v12060_v52 }
 0x6cd   : > { %6118 = vmatprep.mubr.bf16.mxu1 %v12071_v16 }
 0x6d4   : > { %6119 = vmatmul.mubr.bf16.gmra.mxu1 %v12064_v44  ;;  %v12185_v44 = vld [vmem:[#allocation8 + $0x7] ss:$0 sm:$0xff] }
 0x6d5   : > { %6126 = vmatprep.mubr.bf16.mxu1 %v12077_v5 }
 0x6dc   : > { %6127 = vmatmul.mubr.bf16.gmra.mxu1 %v12068_v13 }
 0x6dd   : > { %6134 = vmatprep.mubr.bf16.mxu1 %v12083_v24 }
 0x6e4   : > { %6135 = vmatmul.mubr.bf16.gmra.mxu1 %v12074_v53 }
 0x6e5   : > { %6142 = vmatprep.mubr.bf16.mxu1 %v12089_v4 }
 0x6ec   : > { %6143 = vmatmul.mubr.bf16.gmra.mxu1 %v12080_v41 }
 0x6ed   : > { %6150 = vmatprep.mubr.bf16.mxu1 %v12097_v35 }
 0x6f4   : > { %6151 = vmatmul.mubr.bf16.gmra.mxu1 %v12086_v45 }
 0x6f5   : > { %6158 = vmatprep.mubr.bf16.mxu1 %v12103_v54 }
 0x6fc   : > { %6159 = vmatmul.mubr.bf16.gmra.mxu1 %v12092_v60 }
 0x6fd   : > { %6166 = vmatprep.mubr.bf16.mxu1 %v12107_v22 }
 0x704   : > { %6167 = vmatmul.mubr.bf16.gmra.mxu1 %v12099_v9 }
 0x74c   : > { %v6944_v34 = vpop.f32.mrf.mxu1 }
 0x74e   : > { %v6945_v29 = vpop.f32.mrf.mxu1 }
 0x74f   : > { %v6946_v52 = vadd.f32 %v6945_v29, %v6944_v34 }
 0x750   : > { %v6947_v11 = vpop.f32.mrf.mxu1 }
 0x751   : > { %v6049_v5 = vadd.f32 %v6946_v52, %v12185_v44 }
 0x752   : > { %v6948_v13 = vpop.f32.mrf.mxu1 }
 0x753   : > { %v6949_v16 = vadd.f32 %v6948_v13, %v6947_v11 }
 0x754   : > { %v6950_v53 = vpop.f32.mrf.mxu1 }
 0x755   : > { %v6052_v41 = vadd.f32 %v6949_v16, %v12185_v44 }
 0x756   : > { %v6951_v24 = vpop.f32.mrf.mxu1 }
 0x757   : > { %v6836_v45 = vpack.c.bf16 %v6052_v41, %v6049_v5  ;;  %v6952_v60 = vadd.f32 %v6951_v24, %v6950_v53 }
 0x758   : > { %v6953_v4 = vpop.f32.mrf.mxu1 }
 0x759   : > { %6837 = vst [vmem:[%s12191_s19] sm:$0xff] %v6836_v45   ;;  %v6057_v22 = vadd.f32 %v6952_v60, %v12185_v44 }
 0x75a   : > { %v6954_v35 = vpop.f32.mrf.mxu1 }
 0x75b   : > { %v6955_v9 = vadd.f32 %v6954_v35, %v6953_v4 }
 0x75c   : > { %v6956_v54 = vpop.f32.mrf.mxu1 }
 0x75d   : > { %v6060_v31 = vadd.f32 %v6955_v9, %v12185_v44 }
 0x75e   : > { %v6957_v40 = vpop.f32.mrf.mxu1 }
 0x75f   : > { %v6841_v3 = vpack.c.bf16 %v6060_v31, %v6057_v22  ;;  %v6958_v32 = vadd.f32 %v6957_v40, %v6956_v54 }
 0x760   : > { %v6959_v0 = vpop.f32.mrf.mxu1 }
 0x761   : > { %6913 = vst [vmem:[%s12191_s19 + $0x8] sm:$0xff] %v6841_v3   ;;  %v6065_v8 = vadd.f32 %v6958_v32, %v12185_v44 }
 0x762   : > { %v6960_v7 = vpop.f32.mrf.mxu1 }
 0x763   : > { %v6961_v58 = vadd.f32 %v6960_v7, %v6959_v0 }
 0x764   : > { %v6962_v12 = vpop.f32.mrf.mxu1 }
 0x765   : > { %v6068_v19 = vadd.f32 %v6961_v58, %v12185_v44 }
 0x766   : > { %v6963_v28 = vpop.f32.mrf.mxu1 }
 0x767   : > { %v6846_v38 = vpack.c.bf16 %v6068_v19, %v6065_v8  ;;  %v6964_v10 = vadd.f32 %v6963_v28, %v6962_v12 }
 0x768   : > { %v6965_v2 = vpop.f32.mrf.mxu1 }
 0x769   : > { %6914 = vst [vmem:[%s12191_s19 + $0x10] sm:$0xff] %v6846_v38   ;;  %v6073_v51 = vadd.f32 %v6964_v10, %v12185_v44 }
 0x76a   : > { %v6966_v62 = vpop.f32.mrf.mxu1 }
 0x76b   : > { %v6967_v42 = vadd.f32 %v6966_v62, %v6965_v2 }
 0x76c   : > { %v6968_v30 = vpop.f32.mrf.mxu1 }
 0x76d   : > { %v6076_v61 = vadd.f32 %v6967_v42, %v12185_v44 }
 0x76e   : > { %v6969_v20 = vpop.f32.mrf.mxu1 }
 0x76f   : > { %v6851_v26 = vpack.c.bf16 %v6076_v61, %v6073_v51  ;;  %v6970_v59 = vadd.f32 %v6969_v20, %v6968_v30 }
 0x770   : > { %v6971_v57 = vpop.f32.mrf.mxu1 }
 0x771   : > { %6915 = vst [vmem:[%s12191_s19 + $0x18] sm:$0xff] %v6851_v26   ;;  %v6081_v49 = vadd.f32 %v6970_v59, %v12185_v44 }
 0x772   : > { %v6972_v63 = vpop.f32.mrf.mxu1 }
 0x773   : > { %v6973_v15 = vadd.f32 %v6972_v63, %v6971_v57 }
 0x774   : > { %v6974_v25 = vpop.f32.mrf.mxu1 }
 0x775   : > { %v6084_v55 = vadd.f32 %v6973_v15, %v12185_v44 }
 0x776   : > { %v6975_v23 = vpop.f32.mrf.mxu1 }
 0x777   : > { %v6856_v50 = vpack.c.bf16 %v6084_v55, %v6081_v49  ;;  %v6976_v36 = vadd.f32 %v6975_v23, %v6974_v25 }
 0x778   : > { %v6977_v21 = vpop.f32.mrf.mxu1 }
 0x779   : > { %6916 = vst [vmem:[%s12191_s19 + $0x20] sm:$0xff] %v6856_v50   ;;  %v6089_v33 = vadd.f32 %v6976_v36, %v12185_v44 }
 0x77a   : > { %v6978_v14 = vpop.f32.mrf.mxu1 }
 0x77b   : > { %v6979_v39 = vadd.f32 %v6978_v14, %v6977_v21 }
 0x77c   : > { %v6980_v48 = vpop.f32.mrf.mxu1 }
 0x77d   : > { %v6092_v47 = vadd.f32 %v6979_v39, %v12185_v44 }
 0x77e   : > { %v6981_v17 = vpop.f32.mrf.mxu1 }
 0x77f   : > { %v6861_v6 = vpack.c.bf16 %v6092_v47, %v6089_v33  ;;  %v6982_v27 = vadd.f32 %v6981_v17, %v6980_v48 }
 0x780   : > { %v6983_v43 = vpop.f32.mrf.mxu1 }
 0x781   : > { %6917 = vst [vmem:[%s12191_s19 + $0x28] sm:$0xff] %v6861_v6   ;;  %v6097_v56 = vadd.f32 %v6982_v27, %v12185_v44 }
 0x782   : > { %v6984_v18 = vpop.f32.mrf.mxu1 }
 0x783   : > { %v6985_v46 = vadd.f32 %v6984_v18, %v6983_v43 }
 0x784   : > { %v6986_v37 = vpop.f32.mrf.mxu1 }
 0x785   : > { %v6100_v1 = vadd.f32 %v6985_v46, %v12185_v44 }
 0x786   : > { %v6987_v34 = vpop.f32.mrf.mxu1 }
 0x787   : > { %v6866_v29 = vpack.c.bf16 %v6100_v1, %v6097_v56  ;;  %v6988_v52 = vadd.f32 %v6987_v34, %v6986_v37 }
 0x788   : > { %v6989_v11 = vpop.f32.mrf.mxu1 }
 0x789   : > { %6918 = vst [vmem:[%s12191_s19 + $0x30] sm:$0xff] %v6866_v29   ;;  %v6105_v5 = vadd.f32 %v6988_v52, %v12185_v44 }
 0x78a   : > { %v6990_v13 = vpop.f32.mrf.mxu1 }
 0x78b   : > { %v6991_v16 = vadd.f32 %v6990_v13, %v6989_v11 }
 0x78c   : > { %v6992_v53 = vpop.f32.mrf.mxu1 }
 0x78d   : > { %v6108_v41 = vadd.f32 %v6991_v16, %v12185_v44 }
 0x78e   : > { %v6993_v24 = vpop.f32.mrf.mxu1 }
 0x78f   : > { %v6871_v45 = vpack.c.bf16 %v6108_v41, %v6105_v5  ;;  %v6994_v60 = vadd.f32 %v6993_v24, %v6992_v53 }
 0x790   : > { %v6995_v4 = vpop.f32.mrf.mxu1 }
 0x791   : > { %6919 = vst [vmem:[%s12191_s19 + $0x38] sm:$0xff] %v6871_v45   ;;  %v6113_v22 = vadd.f32 %v6994_v60, %v12185_v44 }
 0x792   : > { %v6996_v35 = vpop.f32.mrf.mxu1 }
 0x793   : > { %v6997_v9 = vadd.f32 %v6996_v35, %v6995_v4 }
 0x794   : > { %v6998_v54 = vpop.f32.mrf.mxu1 }
 0x795   : > { %v6116_v31 = vadd.f32 %v6997_v9, %v12185_v44 }
 0x796   : > { %v6999_v40 = vpop.f32.mrf.mxu1 }
 0x797   : > { %v6876_v3 = vpack.c.bf16 %v6116_v31, %v6113_v22  ;;  %v7000_v32 = vadd.f32 %v6999_v40, %v6998_v54 }
 0x798   : > { %v7001_v0 = vpop.f32.mrf.mxu1 }
 0x799   : > { %6920 = vst [vmem:[%s12191_s19 + $0x40] sm:$0xff] %v6876_v3   ;;  %v6121_v8 = vadd.f32 %v7000_v32, %v12185_v44 }
 0x79a   : > { %v7002_v7 = vpop.f32.mrf.mxu1 }
 0x79b   : > { %v7003_v58 = vadd.f32 %v7002_v7, %v7001_v0 }
 0x79c   : > { %v7004_v12 = vpop.f32.mrf.mxu1 }
 0x79d   : > { %v6124_v19 = vadd.f32 %v7003_v58, %v12185_v44 }
 0x79e   : > { %v7005_v28 = vpop.f32.mrf.mxu1 }
 0x79f   : > { %v6881_v38 = vpack.c.bf16 %v6124_v19, %v6121_v8  ;;  %v7006_v10 = vadd.f32 %v7005_v28, %v7004_v12 }
 0x7a0   : > { %v7007_v2 = vpop.f32.mrf.mxu1 }
 0x7a1   : > { %6921 = vst [vmem:[%s12191_s19 + $0x48] sm:$0xff] %v6881_v38   ;;  %v6129_v51 = vadd.f32 %v7006_v10, %v12185_v44 }
 0x7a2   : > { %v7008_v62 = vpop.f32.mrf.mxu1 }
 0x7a3   : > { %v7009_v42 = vadd.f32 %v7008_v62, %v7007_v2 }
 0x7a4   : > { %v7010_v30 = vpop.f32.mrf.mxu1 }
 0x7a5   : > { %v6132_v61 = vadd.f32 %v7009_v42, %v12185_v44 }
 0x7a6   : > { %v7011_v20 = vpop.f32.mrf.mxu1 }
 0x7a7   : > { %v6886_v26 = vpack.c.bf16 %v6132_v61, %v6129_v51  ;;  %v7012_v59 = vadd.f32 %v7011_v20, %v7010_v30 }
 0x7a8   : > { %v7013_v57 = vpop.f32.mrf.mxu1 }
 0x7a9   : > { %6922 = vst [vmem:[%s12191_s19 + $0x50] sm:$0xff] %v6886_v26   ;;  %v6137_v49 = vadd.f32 %v7012_v59, %v12185_v44 }
 0x7aa   : > { %v7014_v63 = vpop.f32.mrf.mxu1 }
 0x7ab   : > { %v7015_v15 = vadd.f32 %v7014_v63, %v7013_v57 }
 0x7ac   : > { %v7016_v25 = vpop.f32.mrf.mxu1 }
 0x7ad   : > { %v6140_v55 = vadd.f32 %v7015_v15, %v12185_v44 }
 0x7ae   : > { %v7017_v23 = vpop.f32.mrf.mxu1 }
 0x7af   : > { %v6891_v50 = vpack.c.bf16 %v6140_v55, %v6137_v49  ;;  %v7018_v36 = vadd.f32 %v7017_v23, %v7016_v25 }
 0x7b0   : > { %v7019_v21 = vpop.f32.mrf.mxu1 }
 0x7b1   : > { %6923 = vst [vmem:[%s12191_s19 + $0x58] sm:$0xff] %v6891_v50   ;;  %v6145_v33 = vadd.f32 %v7018_v36, %v12185_v44 }
 0x7b2   : > { %v7020_v14 = vpop.f32.mrf.mxu1 }
 0x7b3   : > { %v7021_v39 = vadd.f32 %v7020_v14, %v7019_v21 }
 0x7b4   : > { %v7022_v48 = vpop.f32.mrf.mxu1 }
 0x7b5   : > { %v6148_v47 = vadd.f32 %v7021_v39, %v12185_v44 }
 0x7b6   : > { %v7023_v17 = vpop.f32.mrf.mxu1 }
 0x7b7   : > { %v6896_v6 = vpack.c.bf16 %v6148_v47, %v6145_v33  ;;  %v7024_v27 = vadd.f32 %v7023_v17, %v7022_v48 }
 0x7b8   : > { %v7025_v43 = vpop.f32.mrf.mxu1 }
 0x7b9   : > { %6924 = vst [vmem:[%s12191_s19 + $0x60] sm:$0xff] %v6896_v6   ;;  %v6153_v56 = vadd.f32 %v7024_v27, %v12185_v44 }
 0x7ba   : > { %v7026_v18 = vpop.f32.mrf.mxu1 }
 0x7bb   : > { %v7027_v46 = vadd.f32 %v7026_v18, %v7025_v43 }
 0x7bc   : > { %v7028_v37 = vpop.f32.mrf.mxu1 }
 0x7bd   : > { %v6156_v1 = vadd.f32 %v7027_v46, %v12185_v44 }
 0x7be   : > { %v7029_v34 = vpop.f32.mrf.mxu1 }
 0x7bf   : > { %v6901_v29 = vpack.c.bf16 %v6156_v1, %v6153_v56  ;;  %v7030_v52 = vadd.f32 %v7029_v34, %v7028_v37 }
 0x7c0   : > { %v7031_v11 = vpop.f32.mrf.mxu1 }
 0x7c1   : > { %6925 = vst [vmem:[%s12191_s19 + $0x68] sm:$0xff] %v6901_v29   ;;  %v6161_v5 = vadd.f32 %v7030_v52, %v12185_v44 }
 0x7c2   : > { %v7032_v13 = vpop.f32.mrf.mxu1 }
 0x7c3   : > { %v7033_v16 = vadd.f32 %v7032_v13, %v7031_v11 }
 0x7c4   : > { %v7034_v53 = vpop.f32.mrf.mxu1 }
 0x7c5   : > { %v6164_v41 = vadd.f32 %v7033_v16, %v12185_v44 }
 0x7c6   : > { %v7035_v24 = vpop.f32.mrf.mxu1 }
 0x7c7   : > { %v6906_v45 = vpack.c.bf16 %v6164_v41, %v6161_v5  ;;  %v7036_v60 = vadd.f32 %v7035_v24, %v7034_v53 }
 0x7c8   : > { %v7037_v4 = vpop.f32.mrf.mxu1 }
 0x7c9   : > { %6926 = vst [vmem:[%s12191_s19 + $0x70] sm:$0xff] %v6906_v45   ;;  %v6169_v54 = vadd.f32 %v7036_v60, %v12185_v44 }
 0x7ca   : > { %v7038_v35 = vpop.f32.mrf.mxu1 }
 0x7cb   : > { %v7039_v9 = vadd.f32 %v7038_v35, %v7037_v4 }
 0x7cd   : > { %v6172_v22 = vadd.f32 %v7039_v9, %v12185_v44 }
 0x7cf   : > { %v6911_v31 = vpack.c.bf16 %v6172_v22, %v6169_v54 }
 0x7d1   : > { %6927 = vst [vmem:[%s12191_s19 + $0x78] sm:$0xff] %v6911_v31  }
 0x7d2   : > { %7643 = shalt.err (!%p7640_p8)
}
 0x7d3   : > { %s7644_s17 = scalar_lea.hbm %s12243_s23, 2048  ;;  %s7648_s15 = scalar_lea.hbm %s12297_s7, 4096 }
 0x7d4   : > { %p7645_p13 = scmp.ne.s32.totalorder %s12243_s23, %s7644_s17  ;;  %p7649_p1 = scmp.lt.s32.totalorder %s12243_s23, %s12297_s7 }
 0x7d5   : > { %p7650_p12 = scmp.lt.s32.totalorder %s7648_s15, %s7644_s17 }
 0x7d6   : > { %p7646_p11 = pnand %p7645_p13, %p7797_p5 }
 0x7d7   : > { %p7651_p10 = por %p7650_p12, %p7649_p1 }
 0x7d8   : > { %p7647_p0 = pneg %p7646_p11 }
 0x7da   : > { %p7652_p3 = pnand %p7651_p10, %p7647_p0 }
 0x7dc   : > { %7655 = shalt.err (!%p7652_p3)
}
 0x7dd   : > { %s7717_s18 = smov 64   ;;  %s7718_s21 = smov 4  }
 0x7de   : > { %7056 = dma.vmem_to_hbm [thread:$0]  (%p7797_p5), %s12245_s22, 2048, %s12243_s23, %s12250_s29, %s7717_s18, %s7717_s18, %s7718_s21  }
 0x7df PF: > { %p7083_p2 = scmp.ge.s32.totalorder %s7702_s27, 2  ;;  %s6364_s28 = sand.u32 1, %s7690_s24  }
 0x7e0   : > { %p13227_p4 = scmp.ne.s32.totalorder %s12533_s12, 0  ;;  %s6365_s8 = scalar_lea.sflag [#allocation4], %s6364_s28 }
 0x7e2   : > { %p7072_p7 = pnand %p7083_p2, %p13227_p4 }
 0x7e4   : > { %p7073_p6 = pneg %p7072_p7 }
 0x7e6   : > { %7685 = dma.done.wait (%p7073_p6), %s6365_s8, 2048  }
 0x7e7   : > { %7687 = vsyncadd (%p7073_p6), %s6365_s8, 4294965248  ;;  %p20_p9 = scmp.ge.s32.totalorder %s7784_s30, 4   ;;  %s13228_s24 = smov %s7694_s25 }
 0x7e8   : > { %s13229_s25 = smov %s7698_s26  ;;  %s13230_s26 = smov %s7795_s10 }
 0x7e9   : > { %s13231_s27 = smov %s7784_s30  ;;  %22 = sbr.rel (!%p20_p9) target bundleno = 6 (0x6), region = 106 }
 0x7ee   :  { %6370 = vsyncpa [#allocation3], 1 }
 0x7ef   :  { %6372 = vsyncpa [#allocation3 + $0x1], 1 }
 0x7f0   :  { %6373 = vsyncpa [#allocation6], 1 }
 0x7f1   :  { %6374 = vsyncpa [#allocation9], 1 }
 0x7f2   :  { %6375 = vsyncpa [#allocation4], 1 }
 0x7f3   :  { %6377 = vsyncpa [#allocation4 + $0x1], 1 }

</bundles_post_ra>
